<compile_context>
chip_gen: v7x
topology: tpu7x:2x2x1
jax: 0.10.0
libtpu: 0.0.40
codegen_flags: <defaults>
</compile_context>

<pallas_src>
import functools

import jax
import jax.numpy as jnp
from jax.experimental import pallas as pl
from jax.experimental.pallas import tpu as pltpu

ALPHA = 0.3     # membrane decay (soma_params='all_share' -> shared scalar)
THETA = 0.5     # firing threshold
V_RESET = 0.0   # reset potential

_DEFAULT_SCOPED_VMEM = 32 << 20


def _compiler_params(semantics, vmem_need):
    kwargs = {"dimension_semantics": semantics}
    if vmem_need > _DEFAULT_SCOPED_VMEM:
        # TODO(synk): for very large B*H*W on v7x (64 MiB VMEM) add an inner
        # row-tile grid axis instead of only raising the scoped limit.
        kwargs["vmem_limit_bytes"] = min(int(vmem_need), 100 << 20)
    return pltpu.CompilerParams(**kwargs)


# ---------------------------------------------------------------------------
# Fused conv(3x3 as im2col matmul) + LIF soma + 2x2 max-pool, grid = (G, T).
# The caller's im2col groups rows as (p, n, i, j), p = position in the 2x2
# pool window, so pooling is a logical_or over four aligned sublane slices.
# Membrane potential lives in VMEM scratch across the T (arbitrary) axis.
# ---------------------------------------------------------------------------
def conv_lif_pool_kernel(xcol_ref, w_ref, b_ref, o_ref, v_ref):
    cur = (jnp.dot(xcol_ref[...].astype(w_ref.dtype), w_ref[...],
                   preferred_element_type=jnp.float32) + b_ref[...])

    @pl.when(pl.program_id(1) == 0)
    def _():                                  # clif.reset() at t == 0
        v_ref[...] = jnp.zeros_like(v_ref)

    v = v_ref[...] * ALPHA + cur              # decay + integrate (f32)
    fired = v >= THETA                        # bool mask (cmode='spike')
    v_ref[...] = jnp.where(fired, V_RESET, v)           # hard reset

    q = o_ref.shape[0]                        # rows per pool-position group
    pooled = jnp.logical_or(jnp.logical_or(fired[0:q], fired[q:2 * q]),
                            jnp.logical_or(fired[2 * q:3 * q], fired[3 * q:]))
    o_ref[...] = pooled.astype(o_ref.dtype)   # single store (0/1 spikes)


def conv_lif_pool(xcol, wgt, bias, g, t, out_dtype):
    m_total, k = xcol.shape
    cout = wgt.shape[1]
    nb = g * t
    m_blk = m_total // nb
    q = m_blk // 4

    vmem_need = int(1.3 * (
        2 * m_blk * k * xcol.dtype.itemsize          # double-buffered xcol
        + 2 * wgt.size * wgt.dtype.itemsize
        + 2 * bias.size * 4
        + 2 * q * cout * jnp.dtype(out_dtype).itemsize
        + 2 * m_blk * cout * 4))                     # membrane scratch + cur

    return pl.pallas_call(
        conv_lif_pool_kernel,
        out_shape=jax.ShapeDtypeStruct((nb * q, cout), out_dtype),
        grid=(g, t),
        in_specs=[pl.BlockSpec((m_blk, k), lambda gi, ti: (gi * t + ti, 0)),
                  pl.BlockSpec(wgt.shape, lambda gi, ti: (0, 0)),
                  pl.BlockSpec(bias.shape, lambda gi, ti: (0, 0))],
        out_specs=pl.BlockSpec((q, cout), lambda gi, ti: (gi * t + ti, 0)),
        scratch_shapes=[pltpu.VMEM((m_blk, cout), jnp.float32)],
        compiler_params=_compiler_params(("parallel", "arbitrary"), vmem_need),
    )(xcol, wgt, bias)


# ---------------------------------------------------------------------------
# Head: Linear(F,512) -> ReLU -> Linear(512,128) -> ReLU -> Linear(128,128pad)
# Tiled over rows; weights stay resident; output is 128-lane dense (w3/b3 are
# pre-padded at init), sliced back to nclass in the wrapper.
# ---------------------------------------------------------------------------
def head_kernel(x_ref, w1_ref, b1_ref, w2_ref, b2_ref, w3_ref, b3_ref, o_ref):
    h1 = jnp.maximum(
        jnp.dot(x_ref[...], w1_ref[...], preferred_element_type=jnp.float32)
        + b1_ref[...], 0.0)
    h2 = jnp.maximum(
        jnp.dot(h1.astype(w2_ref.dtype), w2_ref[...],
                preferred_element_type=jnp.float32) + b2_ref[...], 0.0)
    o_ref[...] = (jnp.dot(h2.astype(w3_ref.dtype), w3_ref[...],
                          preferred_element_type=jnp.float32) + b3_ref[...])


def head(x, head_params, nclass):
    w1, b1, w2, b2, w3, b3 = head_params      # w3/b3 already lane-padded
    m, feat = x.shape
    npad = w3.shape[1]
    m_tile = 128 if m % 128 == 0 else m

    vmem_need = int(1.3 * (
        2 * m_tile * feat * x.dtype.itemsize
        + 2 * sum(w.size * w.dtype.itemsize for w in (w1, w2, w3))
        + 2 * sum(bb.size * 4 for bb in (b1, b2, b3))
        + 2 * m_tile * npad * 4
        + m_tile * (512 + 128) * 4))

    out = pl.pallas_call(
        head_kernel,
        out_shape=jax.ShapeDtypeStruct((m, npad), jnp.float32),
        grid=(m // m_tile,),
        in_specs=[pl.BlockSpec((m_tile, feat), lambda i: (i, 0)),
                  pl.BlockSpec(w1.shape, lambda i: (0, 0)),
                  pl.BlockSpec(b1.shape, lambda i: (0, 0)),
                  pl.BlockSpec(w2.shape, lambda i: (0, 0)),
                  pl.BlockSpec(b2.shape, lambda i: (0, 0)),
                  pl.BlockSpec(w3.shape, lambda i: (0, 0)),
                  pl.BlockSpec(b3.shape, lambda i: (0, 0))],
        out_specs=pl.BlockSpec((m_tile, npad), lambda i: (i, 0)),
        compiler_params=_compiler_params(("parallel",), vmem_need),
    )(x, w1, b1, w2, b2, w3, b3)
    return out[:, :nclass]


# ---------------------------------------------------------------------------
# Glue (plain JAX, fused by XLA): pool-grouped im2col, batch/time relayout.
# ---------------------------------------------------------------------------
def im2col_3x3_poolgrouped(x, nb):
    """3x3 / pad=1 / stride=1 im2col with rows grouped for in-kernel pooling.

    x: (nb*N, H, W, C) images ordered block-major (block = (g, t) grid step)
    -> (nb * 4*N*(H//2)*(W//2), 9*C).  Row order is (block, p, n, i, j) with
    output pixel (y, x) = (2i+a, 2j+b) and p = 2a+b, so the kernel pools its
    spike map with four aligned sublane slices and the pooled rows land back
    in plain (block, n, i, j) order for the next layer.  Dtype is preserved
    (int8 spikes stay int8 -> half the xcol HBM bytes).
    """
    total, h, w, c = x.shape
    n = total // nb
    xp = jnp.pad(x, ((0, 0), (1, 1), (1, 1), (0, 0)))
    cols = [xp[:, kh:kh + h, kw:kw + w, :]
            for kh in range(3) for kw in range(3)]
    a = jnp.concatenate(cols, axis=-1)                    # (nb*N, H, W, 9*C)
    a = a.reshape(nb, n, h // 2, 2, w // 2, 2, 9 * c)
    a = jnp.transpose(a, (0, 3, 5, 1, 2, 4, 6))           # (nb,2,2,N,H/2,W/2,K)
    return a.reshape(nb * 4 * n * (h // 2) * (w // 2), 9 * c)


def _choose_split(b, h, w):
    """Pick the batch split G for the leading 'parallel' grid axis (v7x TCs).

    Keeps every per-step block sublane-aligned: int8 spike blocks need row
    counts that are multiples of 32, the bf16 layer-3 output multiples of 16.
    """
    for g in (2, 1):
        if b % g:
            continue
        n_loc = b // g
        q1 = n_loc * (h // 2) * (w // 2)
        q2 = n_loc * (h // 4) * (w // 4)
        q3 = n_loc * (h // 8) * (w // 8)
        if q1 % 32 == 0 and q2 % 32 == 0 and q3 % 16 == 0:
            return g
    return 1


def forward(params, xis, nclass, timestep=None):
    # xis: (B, T, Cin, H, W)  -- PyTorch NCHW-per-timestep convention.
    (cw1, cb1), (cw2, cb2), (cw3, cb3), head_params = params
    b, t, cin, h, w = xis.shape
    c1, c2, c3 = cw1.shape[1], cw2.shape[1], cw3.shape[1]
    if timestep is None:
        timestep = t                       # PyTorch default divides by self.timestep

    g = _choose_split(b, h, w)
    n_loc = b // g
    nb = g * t

    # (g, t, n_local)-major NHWC so each (g, t) grid step's rows are contiguous.
    x0 = xis.reshape(g, n_loc, t, cin, h, w)
    x0 = jnp.transpose(x0, (0, 2, 1, 4, 5, 3)).reshape(nb * n_loc, h, w, cin)

    # --- layer 1: conv + LIF + pool fused (f32 input current, int8 spikes) ---
    xcol1 = im2col_3x3_poolgrouped(x0, nb)                # f32, K = 9*Cin
    x1 = conv_lif_pool(xcol1, cw1, cb1, g, t, out_dtype=jnp.int8)
    h1s, w1s = h // 2, w // 2
    x1 = x1.reshape(nb * n_loc, h1s, w1s, c1)

    # --- layer 2 ---
    xcol2 = im2col_3x3_poolgrouped(x1, nb)                # int8
    x2 = conv_lif_pool(xcol2, cw2, cb2, g, t, out_dtype=jnp.int8)
    h2s, w2s = h1s // 2, w1s // 2
    x2 = x2.reshape(nb * n_loc, h2s, w2s, c2)

    # --- layer 3 (bf16 spikes feed the head directly) ---
    xcol3 = im2col_3x3_poolgrouped(x2, nb)                # int8
    x3 = conv_lif_pool(xcol3, cw3, cb3, g, t, out_dtype=jnp.bfloat16)
    h3s, w3s = h2s // 2, w2s // 2

    # NHWC flatten is folded into w1's row order -> plain reshape, no transpose.
    x4 = x3.reshape(nb * n_loc, h3s * w3s * c3)
    logits = head(x4, head_params, nclass)                # (G*T*n_loc, nclass)
    logits = logits.reshape(g, t, n_loc, nclass)
    return jnp.sum(logits, axis=1).reshape(b, nclass) / timestep


def init_params(key, input_channels=1, h=16, w=16, nclass=2):
    ks = jax.random.split(key, 6)

    def conv_p(k, cin, cout, dtype):
        wgt = jax.random.normal(k, (3, 3, cin, cout), jnp.float32)
        wgt = wgt * (1.0 / jnp.sqrt(9.0 * cin))
        # TODO(synk): PyTorch OIHW weights -> permute to (kh,kw,Cin,Cout) first.
        return (wgt.reshape(9 * cin, cout).astype(dtype),
                jnp.zeros((1, cout), jnp.float32))

    def lin_p(k, fin, fout):
        wgt = jax.random.normal(k, (fin, fout), jnp.float32)
        wgt = wgt * (1.0 / jnp.sqrt(float(fin)))
        return wgt.astype(jnp.bfloat16), jnp.zeros((1, fout), jnp.float32)

    c1 = conv_p(ks[0], input_channels, 32, jnp.float32)   # layer-1 stays f32
    c2 = conv_p(ks[1], 32, 64, jnp.bfloat16)
    c3 = conv_p(ks[2], 64, 128, jnp.bfloat16)

    feat = (h // 8) * (w // 8) * 128
    # w1 rows are in NHWC flatten order (h, w, c); a PyTorch head.0 import must
    # permute its rows from the NCHW (c, h, w) flatten order.
    w1, b1 = lin_p(ks[3], feat, 512)
    w2, b2 = lin_p(ks[4], 512, 128)
    w3r, b3r = lin_p(ks[5], 128, nclass)
    npad = pl.cdiv(nclass, 128) * 128                     # lane-dense head store
    w3 = jnp.zeros((128, npad), jnp.bfloat16).at[:, :nclass].set(w3r)
    b3 = jnp.zeros((1, npad), jnp.float32).at[:, :nclass].set(b3r)
    return c1, c2, c3, (w1, b1, w2, b2, w3, b3)


if __name__ == "__main__":
    B, T, CIN, H, W = 8, 4, 1, 16, 16   # small; H, W divisible by 8, B even
    NCLASS = 2
    TIMESTEP = 4

    key = jax.random.PRNGKey(0)
    kx, kp = jax.random.split(key)
    xis = jax.random.normal(kx, (B, T, CIN, H, W), dtype=jnp.float32)
    params = init_params(kp, CIN, H, W, NCLASS)

    fwd = jax.jit(functools.partial(forward, nclass=NCLASS, timestep=TIMESTEP))
    out = jax.block_until_ready(fwd(params, xis))
    assert out.shape == (B, NCLASS)
    print("KERNEL_OK")
</pallas_src>

<mosaic_0001>
module attributes {stable_mosaic.version = 11 : i64} {
  func.func @conv_lif_pool_kernel(%arg0: i32, %arg1: i32, %arg2: memref<1024x9xf32, #tpu.memory_space<vmem>>, %arg3: memref<9x32xf32, #tpu.memory_space<vmem>>, %arg4: memref<1x32xf32, #tpu.memory_space<vmem>>, %arg5: memref<256x32xi8, #tpu.memory_space<vmem>>, %arg6: memref<1024x32xf32, #tpu.memory_space<vmem>>) attributes {dimension_semantics = [#tpu.dimension_semantics<parallel>, #tpu.dimension_semantics<arbitrary>], iteration_bounds = array<i64: 2, 4>, scalar_prefetch = 0 : i64, scratch_operands = 1 : i64, tpu.core_type = #tpu.core_type<tc>, window_params = [{transform_indices = @transform_0, window_bounds = array<i64: 1024, 9>}, {pipeline_mode = #tpu.pipeline_mode<synchronous>, transform_indices = @transform_1, window_bounds = array<i64: 9, 32>}, {pipeline_mode = #tpu.pipeline_mode<synchronous>, transform_indices = @transform_2, window_bounds = array<i64: 1, 32>}, {transform_indices = @transform_3, window_bounds = array<i64: 256, 32>}]} {
    %c0 = arith.constant 0 : index
    %c0_0 = arith.constant 0 : index
    %0 = vector.load %arg2[%c0, %c0_0] : memref<1024x9xf32, #tpu.memory_space<vmem>>, vector<1024x9xf32>
    %c0_1 = arith.constant 0 : index
    %c0_2 = arith.constant 0 : index
    %1 = vector.load %arg3[%c0_1, %c0_2] : memref<9x32xf32, #tpu.memory_space<vmem>>, vector<9x32xf32>
    %cst = arith.constant dense<0.000000e+00> : vector<1024x32xf32>
    %2 = tpu.matmul %0, %1, %cst {dimension_numbers = #tpu.dot_dimension_numbers<[1], [0], [0], [1], [0, 0, 1, 1], [], []>} : vector<1024x9xf32>, vector<9x32xf32>, vector<1024x32xf32> -> vector<1024x32xf32>
    %c0_3 = arith.constant 0 : index
    %c0_4 = arith.constant 0 : index
    %3 = vector.load %arg4[%c0_3, %c0_4] : memref<1x32xf32, #tpu.memory_space<vmem>>, vector<1x32xf32>
    %4 = vector.broadcast %3 : vector<1x32xf32> to vector<1024x32xf32>
    %5 = arith.addf %2, %4 : vector<1024x32xf32>
    %c0_i32 = arith.constant 0 : i32
    %6 = arith.cmpi eq, %arg1, %c0_i32 : i32
    %7 = arith.extui %6 : i1 to i32
    %c0_i32_5 = arith.constant 0 : i32
    %8 = arith.cmpi ne, %7, %c0_i32_5 : i32
    scf.if %8 {
      %cst_15 = arith.constant 0.000000e+00 : f32
      %27 = vector.broadcast %cst_15 : f32 to vector<1024x32xf32>
      %c0_16 = arith.constant 0 : index
      %c0_17 = arith.constant 0 : index
      %28 = vector.load %arg6[%c0_16, %c0_17] : memref<1024x32xf32, #tpu.memory_space<vmem>>, vector<1024x32xf32>
      tpu.vector_store %arg6[%c0_16, %c0_17], %27 {strides = array<i32>} : memref<1024x32xf32, #tpu.memory_space<vmem>>, vector<1024x32xf32>,
    } else {
    }
    %c0_6 = arith.constant 0 : index
    %c0_7 = arith.constant 0 : index
    %9 = vector.load %arg6[%c0_6, %c0_7] : memref<1024x32xf32, #tpu.memory_space<vmem>>, vector<1024x32xf32>
    %cst_8 = arith.constant 3.000000e-01 : f32
    %10 = vector.broadcast %cst_8 : f32 to vector<1024x32xf32>
    %11 = arith.mulf %9, %10 : vector<1024x32xf32>
    %12 = arith.addf %11, %5 : vector<1024x32xf32>
    %cst_9 = arith.constant 5.000000e-01 : f32
    %13 = vector.broadcast %cst_9 : f32 to vector<1024x32xf32>
    %14 = arith.cmpf oge, %12, %13 : vector<1024x32xf32>
    %cst_10 = arith.constant 0.000000e+00 : f32
    %15 = vector.broadcast %cst_10 : f32 to vector<1024x32xf32>
    %16 = arith.select %14, %15, %12 : vector<1024x32xi1>, vector<1024x32xf32>
    %c0_11 = arith.constant 0 : index
    %c0_12 = arith.constant 0 : index
    %17 = vector.load %arg6[%c0_11, %c0_12] : memref<1024x32xf32, #tpu.memory_space<vmem>>, vector<1024x32xf32>
    tpu.vector_store %arg6[%c0_11, %c0_12], %16 {strides = array<i32>} : memref<1024x32xf32, #tpu.memory_space<vmem>>, vector<1024x32xf32>,
    %18 = vector.extract_strided_slice %14 {offsets = [0, 0], sizes = [256, 32], strides = [1, 1]} : vector<1024x32xi1> to vector<256x32xi1>
    %19 = vector.extract_strided_slice %14 {offsets = [256, 0], sizes = [256, 32], strides = [1, 1]} : vector<1024x32xi1> to vector<256x32xi1>
    %20 = arith.ori %18, %19 : vector<256x32xi1>
    %21 = vector.extract_strided_slice %14 {offsets = [512, 0], sizes = [256, 32], strides = [1, 1]} : vector<1024x32xi1> to vector<256x32xi1>
    %22 = vector.extract_strided_slice %14 {offsets = [768, 0], sizes = [256, 32], strides = [1, 1]} : vector<1024x32xi1> to vector<256x32xi1>
    %23 = arith.ori %21, %22 : vector<256x32xi1>
    %24 = arith.ori %20, %23 : vector<256x32xi1>
    %25 = arith.extui %24 : vector<256x32xi1> to vector<256x32xi8>
    %c0_13 = arith.constant 0 : index
    %c0_14 = arith.constant 0 : index
    %26 = vector.load %arg5[%c0_13, %c0_14] : memref<256x32xi8, #tpu.memory_space<vmem>>, vector<256x32xi8>
    tpu.vector_store %arg5[%c0_13, %c0_14], %25 {strides = array<i32>} : memref<256x32xi8, #tpu.memory_space<vmem>>, vector<256x32xi8>,
    return
  }
  func.func @transform_0(%arg0: i32, %arg1: i32) -> (i32, i32) {
    %c4_i32 = arith.constant 4 : i32
    %0 = arith.muli %arg0, %c4_i32 : i32
    %1 = arith.addi %0, %arg1 : i32
    %c0_i32 = arith.constant 0 : i32
    %c0_i32_0 = arith.constant 0 : i32
    return %1, %c0_i32 : i32, i32
  }
  func.func @transform_1(%arg0: i32, %arg1: i32) -> (i32, i32) {
    %c0_i32 = arith.constant 0 : i32
    %c0_i32_0 = arith.constant 0 : i32
    %c0_i32_1 = arith.constant 0 : i32
    return %c0_i32, %c0_i32_0 : i32, i32
  }
  func.func @transform_2(%arg0: i32, %arg1: i32) -> (i32, i32) {
    %c0_i32 = arith.constant 0 : i32
    %c0_i32_0 = arith.constant 0 : i32
    %c0_i32_1 = arith.constant 0 : i32
    return %c0_i32, %c0_i32_0 : i32, i32
  }
  func.func @transform_3(%arg0: i32, %arg1: i32) -> (i32, i32) {
    %c4_i32 = arith.constant 4 : i32
    %0 = arith.muli %arg0, %c4_i32 : i32
    %1 = arith.addi %0, %arg1 : i32
    %c0_i32 = arith.constant 0 : i32
    %c0_i32_0 = arith.constant 0 : i32
    return %1, %c0_i32 : i32, i32
  }
}

module attributes {stable_mosaic.version = 11 : i64} {
  func.func @conv_lif_pool_kernel(%arg0: i32, %arg1: i32, %arg2: memref<256x288xi8, #tpu.memory_space<vmem>>, %arg3: memref<288x64xbf16, #tpu.memory_space<vmem>>, %arg4: memref<1x64xf32, #tpu.memory_space<vmem>>, %arg5: memref<64x64xi8, #tpu.memory_space<vmem>>, %arg6: memref<256x64xf32, #tpu.memory_space<vmem>>) attributes {dimension_semantics = [#tpu.dimension_semantics<parallel>, #tpu.dimension_semantics<arbitrary>], iteration_bounds = array<i64: 2, 4>, scalar_prefetch = 0 : i64, scratch_operands = 1 : i64, tpu.core_type = #tpu.core_type<tc>, window_params = [{transform_indices = @transform_0, window_bounds = array<i64: 256, 288>}, {pipeline_mode = #tpu.pipeline_mode<synchronous>, transform_indices = @transform_1, window_bounds = array<i64: 288, 64>}, {pipeline_mode = #tpu.pipeline_mode<synchronous>, transform_indices = @transform_2, window_bounds = array<i64: 1, 64>}, {transform_indices = @transform_3, window_bounds = array<i64: 64, 64>}]} {
    %c0 = arith.constant 0 : index
    %c0_0 = arith.constant 0 : index
    %0 = vector.load %arg2[%c0, %c0_0] : memref<256x288xi8, #tpu.memory_space<vmem>>, vector<256x288xi8>
    %1 = arith.sitofp %0 : vector<256x288xi8> to vector<256x288xbf16>
    %c0_1 = arith.constant 0 : index
    %c0_2 = arith.constant 0 : index
    %2 = vector.load %arg3[%c0_1, %c0_2] : memref<288x64xbf16, #tpu.memory_space<vmem>>, vector<288x64xbf16>
    %cst = arith.constant dense<0.000000e+00> : vector<256x64xf32>
    %3 = tpu.matmul %1, %2, %cst {dimension_numbers = #tpu.dot_dimension_numbers<[1], [0], [0], [1], [0, 0, 1, 1], [], []>} : vector<256x288xbf16>, vector<288x64xbf16>, vector<256x64xf32> -> vector<256x64xf32>
    %c0_3 = arith.constant 0 : index
    %c0_4 = arith.constant 0 : index
    %4 = vector.load %arg4[%c0_3, %c0_4] : memref<1x64xf32, #tpu.memory_space<vmem>>, vector<1x64xf32>
    %5 = vector.broadcast %4 : vector<1x64xf32> to vector<256x64xf32>
    %6 = arith.addf %3, %5 : vector<256x64xf32>
    %c0_i32 = arith.constant 0 : i32
    %7 = arith.cmpi eq, %arg1, %c0_i32 : i32
    %8 = arith.extui %7 : i1 to i32
    %c0_i32_5 = arith.constant 0 : i32
    %9 = arith.cmpi ne, %8, %c0_i32_5 : i32
    scf.if %9 {
      %cst_15 = arith.constant 0.000000e+00 : f32
      %28 = vector.broadcast %cst_15 : f32 to vector<256x64xf32>
      %c0_16 = arith.constant 0 : index
      %c0_17 = arith.constant 0 : index
      %29 = vector.load %arg6[%c0_16, %c0_17] : memref<256x64xf32, #tpu.memory_space<vmem>>, vector<256x64xf32>
      tpu.vector_store %arg6[%c0_16, %c0_17], %28 {strides = array<i32>} : memref<256x64xf32, #tpu.memory_space<vmem>>, vector<256x64xf32>,
    } else {
    }
    %c0_6 = arith.constant 0 : index
    %c0_7 = arith.constant 0 : index
    %10 = vector.load %arg6[%c0_6, %c0_7] : memref<256x64xf32, #tpu.memory_space<vmem>>, vector<256x64xf32>
    %cst_8 = arith.constant 3.000000e-01 : f32
    %11 = vector.broadcast %cst_8 : f32 to vector<256x64xf32>
    %12 = arith.mulf %10, %11 : vector<256x64xf32>
    %13 = arith.addf %12, %6 : vector<256x64xf32>
    %cst_9 = arith.constant 5.000000e-01 : f32
    %14 = vector.broadcast %cst_9 : f32 to vector<256x64xf32>
    %15 = arith.cmpf oge, %13, %14 : vector<256x64xf32>
    %cst_10 = arith.constant 0.000000e+00 : f32
    %16 = vector.broadcast %cst_10 : f32 to vector<256x64xf32>
    %17 = arith.select %15, %16, %13 : vector<256x64xi1>, vector<256x64xf32>
    %c0_11 = arith.constant 0 : index
    %c0_12 = arith.constant 0 : index
    %18 = vector.load %arg6[%c0_11, %c0_12] : memref<256x64xf32, #tpu.memory_space<vmem>>, vector<256x64xf32>
    tpu.vector_store %arg6[%c0_11, %c0_12], %17 {strides = array<i32>} : memref<256x64xf32, #tpu.memory_space<vmem>>, vector<256x64xf32>,
    %19 = vector.extract_strided_slice %15 {offsets = [0, 0], sizes = [64, 64], strides = [1, 1]} : vector<256x64xi1> to vector<64x64xi1>
    %20 = vector.extract_strided_slice %15 {offsets = [64, 0], sizes = [64, 64], strides = [1, 1]} : vector<256x64xi1> to vector<64x64xi1>
    %21 = arith.ori %19, %20 : vector<64x64xi1>
    %22 = vector.extract_strided_slice %15 {offsets = [128, 0], sizes = [64, 64], strides = [1, 1]} : vector<256x64xi1> to vector<64x64xi1>
    %23 = vector.extract_strided_slice %15 {offsets = [192, 0], sizes = [64, 64], strides = [1, 1]} : vector<256x64xi1> to vector<64x64xi1>
    %24 = arith.ori %22, %23 : vector<64x64xi1>
    %25 = arith.ori %21, %24 : vector<64x64xi1>
    %26 = arith.extui %25 : vector<64x64xi1> to vector<64x64xi8>
    %c0_13 = arith.constant 0 : index
    %c0_14 = arith.constant 0 : index
    %27 = vector.load %arg5[%c0_13, %c0_14] : memref<64x64xi8, #tpu.memory_space<vmem>>, vector<64x64xi8>
    tpu.vector_store %arg5[%c0_13, %c0_14], %26 {strides = array<i32>} : memref<64x64xi8, #tpu.memory_space<vmem>>, vector<64x64xi8>,
    return
  }
  func.func @transform_0(%arg0: i32, %arg1: i32) -> (i32, i32) {
    %c4_i32 = arith.constant 4 : i32
    %0 = arith.muli %arg0, %c4_i32 : i32
    %1 = arith.addi %0, %arg1 : i32
    %c0_i32 = arith.constant 0 : i32
    %c0_i32_0 = arith.constant 0 : i32
    return %1, %c0_i32 : i32, i32
  }
  func.func @transform_1(%arg0: i32, %arg1: i32) -> (i32, i32) {
    %c0_i32 = arith.constant 0 : i32
    %c0_i32_0 = arith.constant 0 : i32
    %c0_i32_1 = arith.constant 0 : i32
    return %c0_i32, %c0_i32_0 : i32, i32
  }
  func.func @transform_2(%arg0: i32, %arg1: i32) -> (i32, i32) {
    %c0_i32 = arith.constant 0 : i32
    %c0_i32_0 = arith.constant 0 : i32
    %c0_i32_1 = arith.constant 0 : i32
    return %c0_i32, %c0_i32_0 : i32, i32
  }
  func.func @transform_3(%arg0: i32, %arg1: i32) -> (i32, i32) {
    %c4_i32 = arith.constant 4 : i32
    %0 = arith.muli %arg0, %c4_i32 : i32
    %1 = arith.addi %0, %arg1 : i32
    %c0_i32 = arith.constant 0 : i32
    %c0_i32_0 = arith.constant 0 : i32
    return %1, %c0_i32 : i32, i32
  }
}

module attributes {stable_mosaic.version = 11 : i64} {
  func.func @conv_lif_pool_kernel(%arg0: i32, %arg1: i32, %arg2: memref<64x576xi8, #tpu.memory_space<vmem>>, %arg3: memref<576x128xbf16, #tpu.memory_space<vmem>>, %arg4: memref<1x128xf32, #tpu.memory_space<vmem>>, %arg5: memref<16x128xbf16, #tpu.memory_space<vmem>>, %arg6: memref<64x128xf32, #tpu.memory_space<vmem>>) attributes {dimension_semantics = [#tpu.dimension_semantics<parallel>, #tpu.dimension_semantics<arbitrary>], iteration_bounds = array<i64: 2, 4>, scalar_prefetch = 0 : i64, scratch_operands = 1 : i64, tpu.core_type = #tpu.core_type<tc>, window_params = [{transform_indices = @transform_0, window_bounds = array<i64: 64, 576>}, {pipeline_mode = #tpu.pipeline_mode<synchronous>, transform_indices = @transform_1, window_bounds = array<i64: 576, 128>}, {pipeline_mode = #tpu.pipeline_mode<synchronous>, transform_indices = @transform_2, window_bounds = array<i64: 1, 128>}, {transform_indices = @transform_3, window_bounds = array<i64: 16, 128>}]} {
    %c0 = arith.constant 0 : index
    %c0_0 = arith.constant 0 : index
    %0 = vector.load %arg2[%c0, %c0_0] : memref<64x576xi8, #tpu.memory_space<vmem>>, vector<64x576xi8>
    %1 = arith.sitofp %0 : vector<64x576xi8> to vector<64x576xbf16>
    %c0_1 = arith.constant 0 : index
    %c0_2 = arith.constant 0 : index
    %2 = vector.load %arg3[%c0_1, %c0_2] : memref<576x128xbf16, #tpu.memory_space<vmem>>, vector<576x128xbf16>
    %cst = arith.constant dense<0.000000e+00> : vector<64x128xf32>
    %3 = tpu.matmul %1, %2, %cst {dimension_numbers = #tpu.dot_dimension_numbers<[1], [0], [0], [1], [0, 0, 1, 1], [], []>} : vector<64x576xbf16>, vector<576x128xbf16>, vector<64x128xf32> -> vector<64x128xf32>
    %c0_3 = arith.constant 0 : index
    %c0_4 = arith.constant 0 : index
    %4 = vector.load %arg4[%c0_3, %c0_4] : memref<1x128xf32, #tpu.memory_space<vmem>>, vector<1x128xf32>
    %5 = vector.broadcast %4 : vector<1x128xf32> to vector<64x128xf32>
    %6 = arith.addf %3, %5 : vector<64x128xf32>
    %c0_i32 = arith.constant 0 : i32
    %7 = arith.cmpi eq, %arg1, %c0_i32 : i32
    %8 = arith.extui %7 : i1 to i32
    %c0_i32_5 = arith.constant 0 : i32
    %9 = arith.cmpi ne, %8, %c0_i32_5 : i32
    scf.if %9 {
      %cst_15 = arith.constant 0.000000e+00 : f32
      %30 = vector.broadcast %cst_15 : f32 to vector<64x128xf32>
      %c0_16 = arith.constant 0 : index
      %c0_17 = arith.constant 0 : index
      %31 = vector.load %arg6[%c0_16, %c0_17] : memref<64x128xf32, #tpu.memory_space<vmem>>, vector<64x128xf32>
      tpu.vector_store %arg6[%c0_16, %c0_17], %30 {strides = array<i32>} : memref<64x128xf32, #tpu.memory_space<vmem>>, vector<64x128xf32>,
    } else {
    }
    %c0_6 = arith.constant 0 : index
    %c0_7 = arith.constant 0 : index
    %10 = vector.load %arg6[%c0_6, %c0_7] : memref<64x128xf32, #tpu.memory_space<vmem>>, vector<64x128xf32>
    %cst_8 = arith.constant 3.000000e-01 : f32
    %11 = vector.broadcast %cst_8 : f32 to vector<64x128xf32>
    %12 = arith.mulf %10, %11 : vector<64x128xf32>
    %13 = arith.addf %12, %6 : vector<64x128xf32>
    %cst_9 = arith.constant 5.000000e-01 : f32
    %14 = vector.broadcast %cst_9 : f32 to vector<64x128xf32>
    %15 = arith.cmpf oge, %13, %14 : vector<64x128xf32>
    %cst_10 = arith.constant 0.000000e+00 : f32
    %16 = vector.broadcast %cst_10 : f32 to vector<64x128xf32>
    %17 = arith.select %15, %16, %13 : vector<64x128xi1>, vector<64x128xf32>
    %c0_11 = arith.constant 0 : index
    %c0_12 = arith.constant 0 : index
    %18 = vector.load %arg6[%c0_11, %c0_12] : memref<64x128xf32, #tpu.memory_space<vmem>>, vector<64x128xf32>
    tpu.vector_store %arg6[%c0_11, %c0_12], %17 {strides = array<i32>} : memref<64x128xf32, #tpu.memory_space<vmem>>, vector<64x128xf32>,
    %19 = vector.extract_strided_slice %15 {offsets = [0, 0], sizes = [16, 128], strides = [1, 1]} : vector<64x128xi1> to vector<16x128xi1>
    %20 = vector.extract_strided_slice %15 {offsets = [16, 0], sizes = [16, 128], strides = [1, 1]} : vector<64x128xi1> to vector<16x128xi1>
    %21 = arith.ori %19, %20 : vector<16x128xi1>
    %22 = vector.extract_strided_slice %15 {offsets = [32, 0], sizes = [16, 128], strides = [1, 1]} : vector<64x128xi1> to vector<16x128xi1>
    %23 = vector.extract_strided_slice %15 {offsets = [48, 0], sizes = [16, 128], strides = [1, 1]} : vector<64x128xi1> to vector<16x128xi1>
    %24 = arith.ori %22, %23 : vector<16x128xi1>
    %25 = arith.ori %21, %24 : vector<16x128xi1>
    %26 = arith.extui %25 : vector<16x128xi1> to vector<16x128xi32>
    %27 = arith.sitofp %26 : vector<16x128xi32> to vector<16x128xf32>
    %28 = arith.truncf %27 : vector<16x128xf32> to vector<16x128xbf16>
    %c0_13 = arith.constant 0 : index
    %c0_14 = arith.constant 0 : index
    %29 = vector.load %arg5[%c0_13, %c0_14] : memref<16x128xbf16, #tpu.memory_space<vmem>>, vector<16x128xbf16>
    tpu.vector_store %arg5[%c0_13, %c0_14], %28 {strides = array<i32>} : memref<16x128xbf16, #tpu.memory_space<vmem>>, vector<16x128xbf16>,
    return
  }
  func.func @transform_0(%arg0: i32, %arg1: i32) -> (i32, i32) {
    %c4_i32 = arith.constant 4 : i32
    %0 = arith.muli %arg0, %c4_i32 : i32
    %1 = arith.addi %0, %arg1 : i32
    %c0_i32 = arith.constant 0 : i32
    %c0_i32_0 = arith.constant 0 : i32
    return %1, %c0_i32 : i32, i32
  }
  func.func @transform_1(%arg0: i32, %arg1: i32) -> (i32, i32) {
    %c0_i32 = arith.constant 0 : i32
    %c0_i32_0 = arith.constant 0 : i32
    %c0_i32_1 = arith.constant 0 : i32
    return %c0_i32, %c0_i32_0 : i32, i32
  }
  func.func @transform_2(%arg0: i32, %arg1: i32) -> (i32, i32) {
    %c0_i32 = arith.constant 0 : i32
    %c0_i32_0 = arith.constant 0 : i32
    %c0_i32_1 = arith.constant 0 : i32
    return %c0_i32, %c0_i32_0 : i32, i32
  }
  func.func @transform_3(%arg0: i32, %arg1: i32) -> (i32, i32) {
    %c4_i32 = arith.constant 4 : i32
    %0 = arith.muli %arg0, %c4_i32 : i32
    %1 = arith.addi %0, %arg1 : i32
    %c0_i32 = arith.constant 0 : i32
    %c0_i32_0 = arith.constant 0 : i32
    return %1, %c0_i32 : i32, i32
  }
}

module attributes {stable_mosaic.version = 11 : i64} {
  func.func @head_kernel(%arg0: i32, %arg1: memref<32x512xbf16, #tpu.memory_space<vmem>>, %arg2: memref<512x512xbf16, #tpu.memory_space<vmem>>, %arg3: memref<1x512xf32, #tpu.memory_space<vmem>>, %arg4: memref<512x128xbf16, #tpu.memory_space<vmem>>, %arg5: memref<1x128xf32, #tpu.memory_space<vmem>>, %arg6: memref<128x128xbf16, #tpu.memory_space<vmem>>, %arg7: memref<1x128xf32, #tpu.memory_space<vmem>>, %arg8: memref<32x128xf32, #tpu.memory_space<vmem>>) attributes {dimension_semantics = [#tpu.dimension_semantics<parallel>], iteration_bounds = array<i64: 1>, scalar_prefetch = 0 : i64, scratch_operands = 0 : i64, tpu.core_type = #tpu.core_type<tc>, window_params = [{transform_indices = @transform_0, window_bounds = array<i64: 32, 512>}, {pipeline_mode = #tpu.pipeline_mode<synchronous>, transform_indices = @transform_1, window_bounds = array<i64: 512, 512>}, {pipeline_mode = #tpu.pipeline_mode<synchronous>, transform_indices = @transform_2, window_bounds = array<i64: 1, 512>}, {pipeline_mode = #tpu.pipeline_mode<synchronous>, transform_indices = @transform_3, window_bounds = array<i64: 512, 128>}, {pipeline_mode = #tpu.pipeline_mode<synchronous>, transform_indices = @transform_4, window_bounds = array<i64: 1, 128>}, {pipeline_mode = #tpu.pipeline_mode<synchronous>, transform_indices = @transform_5, window_bounds = array<i64: 128, 128>}, {pipeline_mode = #tpu.pipeline_mode<synchronous>, transform_indices = @transform_6, window_bounds = array<i64: 1, 128>}, {transform_indices = @transform_7, window_bounds = array<i64: 32, 128>}]} {
    %c0 = arith.constant 0 : index
    %c0_0 = arith.constant 0 : index
    %0 = vector.load %arg1[%c0, %c0_0] : memref<32x512xbf16, #tpu.memory_space<vmem>>, vector<32x512xbf16>
    %c0_1 = arith.constant 0 : index
    %c0_2 = arith.constant 0 : index
    %1 = vector.load %arg2[%c0_1, %c0_2] : memref<512x512xbf16, #tpu.memory_space<vmem>>, vector<512x512xbf16>
    %cst = arith.constant dense<0.000000e+00> : vector<32x512xf32>
    %2 = tpu.matmul %0, %1, %cst {dimension_numbers = #tpu.dot_dimension_numbers<[1], [0], [0], [1], [0, 0, 1, 1], [], []>} : vector<32x512xbf16>, vector<512x512xbf16>, vector<32x512xf32> -> vector<32x512xf32>
    %c0_3 = arith.constant 0 : index
    %c0_4 = arith.constant 0 : index
    %3 = vector.load %arg3[%c0_3, %c0_4] : memref<1x512xf32, #tpu.memory_space<vmem>>, vector<1x512xf32>
    %4 = vector.broadcast %3 : vector<1x512xf32> to vector<32x512xf32>
    %5 = arith.addf %2, %4 : vector<32x512xf32>
    %cst_5 = arith.constant 0.000000e+00 : f32
    %6 = vector.broadcast %cst_5 : f32 to vector<32x512xf32>
    %7 = arith.maximumf %5, %6 : vector<32x512xf32>
    %8 = arith.truncf %7 : vector<32x512xf32> to vector<32x512xbf16>
    %c0_6 = arith.constant 0 : index
    %c0_7 = arith.constant 0 : index
    %9 = vector.load %arg4[%c0_6, %c0_7] : memref<512x128xbf16, #tpu.memory_space<vmem>>, vector<512x128xbf16>
    %cst_8 = arith.constant dense<0.000000e+00> : vector<32x128xf32>
    %10 = tpu.matmul %8, %9, %cst_8 {dimension_numbers = #tpu.dot_dimension_numbers<[1], [0], [0], [1], [0, 0, 1, 1], [], []>} : vector<32x512xbf16>, vector<512x128xbf16>, vector<32x128xf32> -> vector<32x128xf32>
    %c0_9 = arith.constant 0 : index
    %c0_10 = arith.constant 0 : index
    %11 = vector.load %arg5[%c0_9, %c0_10] : memref<1x128xf32, #tpu.memory_space<vmem>>, vector<1x128xf32>
    %12 = vector.broadcast %11 : vector<1x128xf32> to vector<32x128xf32>
    %13 = arith.addf %10, %12 : vector<32x128xf32>
    %cst_11 = arith.constant 0.000000e+00 : f32
    %14 = vector.broadcast %cst_11 : f32 to vector<32x128xf32>
    %15 = arith.maximumf %13, %14 : vector<32x128xf32>
    %16 = arith.truncf %15 : vector<32x128xf32> to vector<32x128xbf16>
    %c0_12 = arith.constant 0 : index
    %c0_13 = arith.constant 0 : index
    %17 = vector.load %arg6[%c0_12, %c0_13] : memref<128x128xbf16, #tpu.memory_space<vmem>>, vector<128x128xbf16>
    %cst_14 = arith.constant dense<0.000000e+00> : vector<32x128xf32>
    %18 = tpu.matmul %16, %17, %cst_14 {dimension_numbers = #tpu.dot_dimension_numbers<[1], [0], [0], [1], [0, 0, 1, 1], [], []>} : vector<32x128xbf16>, vector<128x128xbf16>, vector<32x128xf32> -> vector<32x128xf32>
    %c0_15 = arith.constant 0 : index
    %c0_16 = arith.constant 0 : index
    %19 = vector.load %arg7[%c0_15, %c0_16] : memref<1x128xf32, #tpu.memory_space<vmem>>, vector<1x128xf32>
    %20 = vector.broadcast %19 : vector<1x128xf32> to vector<32x128xf32>
    %21 = arith.addf %18, %20 : vector<32x128xf32>
    %c0_17 = arith.constant 0 : index
    %c0_18 = arith.constant 0 : index
    %22 = vector.load %arg8[%c0_17, %c0_18] : memref<32x128xf32, #tpu.memory_space<vmem>>, vector<32x128xf32>
    tpu.vector_store %arg8[%c0_17, %c0_18], %21 {strides = array<i32>} : memref<32x128xf32, #tpu.memory_space<vmem>>, vector<32x128xf32>,
    return
  }
  func.func @transform_0(%arg0: i32) -> (i32, i32) {
    %c0_i32 = arith.constant 0 : i32
    %c0_i32_0 = arith.constant 0 : i32
    return %arg0, %c0_i32 : i32, i32
  }
  func.func @transform_1(%arg0: i32) -> (i32, i32) {
    %c0_i32 = arith.constant 0 : i32
    %c0_i32_0 = arith.constant 0 : i32
    %c0_i32_1 = arith.constant 0 : i32
    return %c0_i32, %c0_i32_0 : i32, i32
  }
  func.func @transform_2(%arg0: i32) -> (i32, i32) {
    %c0_i32 = arith.constant 0 : i32
    %c0_i32_0 = arith.constant 0 : i32
    %c0_i32_1 = arith.constant 0 : i32
    return %c0_i32, %c0_i32_0 : i32, i32
  }
  func.func @transform_3(%arg0: i32) -> (i32, i32) {
    %c0_i32 = arith.constant 0 : i32
    %c0_i32_0 = arith.constant 0 : i32
    %c0_i32_1 = arith.constant 0 : i32
    return %c0_i32, %c0_i32_0 : i32, i32
  }
  func.func @transform_4(%arg0: i32) -> (i32, i32) {
    %c0_i32 = arith.constant 0 : i32
    %c0_i32_0 = arith.constant 0 : i32
    %c0_i32_1 = arith.constant 0 : i32
    return %c0_i32, %c0_i32_0 : i32, i32
  }
  func.func @transform_5(%arg0: i32) -> (i32, i32) {
    %c0_i32 = arith.constant 0 : i32
    %c0_i32_0 = arith.constant 0 : i32
    %c0_i32_1 = arith.constant 0 : i32
    return %c0_i32, %c0_i32_0 : i32, i32
  }
  func.func @transform_6(%arg0: i32) -> (i32, i32) {
    %c0_i32 = arith.constant 0 : i32
    %c0_i32_0 = arith.constant 0 : i32
    %c0_i32_1 = arith.constant 0 : i32
    return %c0_i32, %c0_i32_0 : i32, i32
  }
  func.func @transform_7(%arg0: i32) -> (i32, i32) {
    %c0_i32 = arith.constant 0 : i32
    %c0_i32_0 = arith.constant 0 : i32
    return %arg0, %c0_i32 : i32, i32
  }
}

</mosaic_0001>

<bundles_post_ra>
// kernel: forward.4
= control target key start
LH: loop header
LB: loop body
LE: loop exit
PB: predicated region body
PF: predicated region fallthrough
CT: control target
= control target key end

     0   :  { %s3264_s12 = smov 0   ;;  %s3266_s13 = smov 0   ;;  %s5678_s0 = inlined_call_operand.vmem [shape: f32[8192,9], index: 0, kind: input, shape index: {}]   ;;  %s5679_s1 = inlined_call_operand.vmem [shape: f32[9,32], index: 1, kind: input, shape index: {}]   ;;  %s5680_s2 = inlined_call_operand.vmem [shape: f32[1,32], index: 2, kind: input, shape index: {}]   ;;  %s5681_s3 = inlined_call_operand.vmem [shape: s8[2048,32], index: 3, kind: output, shape index: {}]  }
   0x1   :  { %s3268_s14 = smov 0   ;;  %s3270_s15 = smov 0  }
   0x2   :  { %s3272_s16 = smov 0  }
   0x3 LB: > { %s22_s17 = sadd.s32 1, %s3231_s14  ;;  %s25_s18 = sadd.s32 1, %s3235_s15  ;;  %s3239_s16 = sphi %s3272_s16, %s13_s16   ;;  %s3235_s15 = sphi %s3270_s15, %s6285_s15   ;;  %s3231_s14 = sphi %s3268_s14, %s6284_s14   ;;  %s3227_s13 = sphi %s3266_s13, %s6283_s13   ;;  %s3223_s12 = sphi %s3264_s12, %s6282_s12  }
   0x4   : > { %p23_p0 = scmp.ge.s32.totalorder %s22_s17, 4  ;;  %p2684_p1 = scmp.ge.s32.totalorder %s3239_s16, 1 }
   0x5   : > { %p162_p2 = scmp.lt.s32.totalorder %s3239_s16, 9 }
   0x6   : > { %s6287_s17 = smov (%p23_p0, %s22_s17), 0  ;;  %s6289_s18 = smov (!%p23_p0, %s25_s18), %s3235_s15 }
   0x7   : > { %p163_p3 = pnand %p2684_p1, %p162_p2  ;;  %p27_p4 = scmp.ge.s32.totalorder %s6289_s18, 2 }
   0x9   : > { %s6291_s18 = smov (%p27_p4, %s6289_s18), 0  ;;  %166 = sbr.rel (%p163_p3) target bundleno = 693 (0x2b5), region = 32 }
  0x10   : > { %v340_v0 = vld [vmem:[%s5679_s1] sm:$0xff]  ;;  %v341_v1 = vld [vmem:[%s5679_s1 + $0x8] sm:$0x1]  ;;  %vm734_vm0 = vcmask 1040384   ;;  %s2685_s23 = sshll.u32 %s3227_s13, 2  ;;  %vm3241_vm1 = vmmov 1  }
  0x11   : > { %v3150_v2 = vpack.c.bf16 %v341_v1, %v340_v0  ;;  %vm3151_vm2 = vmpackc.low %vm734_vm0, %vm3241_vm1  ;;  %s191_s24 = sadd.s32 %s3223_s12, %s2685_s23  ;;  %vm349_vm3 = vcmask 72704   ;;  %p2821_p7 = scmp.ne.s32.totalorder %s3223_s12, 0 }
  0x12   : > { %s2686_s25 = sshll.u32 %s191_s24, 7  ;;  %s2689_s26 = sshll.u32 %s191_s24, 5  ;;  %vm1447_vm4 = vcmask (!%p2821_p7), 261120  }
  0x13   : > { %3152 = vmatprep.subr.msk.bf16.mxu0 %vm3151_vm2, %v3150_v2  ;;  %3156 = vmatprep.subr.msk.bf16.mxu1 %vm3151_vm2, %v3150_v2  ;;  %p193_p5 = scmp.lt.s32.totalorder %s2686_s25, 1023  ;;  %p203_p6 = scmp.lt.s32.totalorder %s2689_s26, 255 }
  0x14   : > { %3155 = vmatpush3.bf16.msk.msra.mxu0 %vm3151_vm2, %v3150_v2  ;;  %3157 = vmatpush3.bf16.msk.msra.mxu1 %vm3151_vm2, %v3150_v2 }
  0x15   : > { %s6293_s25 = smov (!%p193_p5, %s2686_s25), 1023  ;;  %s6295_s26 = smov (!%p203_p6, %s2689_s26), 255 }
  0x16   : > { %s2687_s27 = sshll.u32 %s6293_s25, 3  ;;  %s2690_s4 = sshll.u32 %s6295_s26, 1 }
  0x17   : > { %s3306_s30 = scalar_lea.vmem %s5678_s0, %s2687_s27  ;;  %s3311_s7 = scalar_lea.vmem %s5681_s3, %s2690_s4 }
  0x18   : > { %v212_v3 = vld [vmem:[%s3306_s30] sm:$0xff]  ;;  %v213_v5 = vld [vmem:[%s3306_s30 + $0x8] sm:$0xff]  ;;  %v214_v7 = vld [vmem:[%s3306_s30 + $0x10] sm:$0xff] }
  0x19   : > { %v276_v4 = vld [vmem:[%s3306_s30 + $0x200] sm:$0xff]  ;;  %2958 = vmatprep.mubr.msk.f32.mxu0 %vm349_vm3, %v212_v3  ;;  %v277_v6 = vld [vmem:[%s3306_s30 + $0x208] sm:$0xff]  ;;  %v278_v8 = vld [vmem:[%s3306_s30 + $0x210] sm:$0xff] }
  0x1a   : > { %3054 = vmatprep.mubr.msk.f32.mxu1 %vm349_vm3, %v276_v4  ;;  %2959 = vmatmul.mubr.msk.f32.vlgmr.msra.gmra.mrb[0].mxu0 %vm349_vm3, %v213_v5  ;;  %v215_v9 = vld [vmem:[%s3306_s30 + $0x18] sm:$0xff]  ;;  %v216_v11 = vld [vmem:[%s3306_s30 + $0x20] sm:$0xff]  ;;  %v217_v13 = vld [vmem:[%s3306_s30 + $0x28] sm:$0xff] }
  0x1b   : > { %3055 = vmatmul.mubr.msk.f32.vlgmr.msra.gmra.mrb[0].mxu1 %vm349_vm3, %v277_v6  ;;  %2961 = vmatprep.mubr.msk.f32.mxu0 %vm349_vm3, %v214_v7  ;;  %v279_v10 = vld [vmem:[%s3306_s30 + $0x218] sm:$0xff]  ;;  %v280_v12 = vld [vmem:[%s3306_s30 + $0x220] sm:$0xff]  ;;  %v281_v14 = vld [vmem:[%s3306_s30 + $0x228] sm:$0xff] }
  0x1c   : > { %3057 = vmatprep.mubr.msk.f32.mxu1 %vm349_vm3, %v278_v8  ;;  %v218_v15 = vld [vmem:[%s3306_s30 + $0x30] sm:$0xff]  ;;  %v219_v17 = vld [vmem:[%s3306_s30 + $0x38] sm:$0xff]  ;;  %v220_v19 = vld [vmem:[%s3306_s30 + $0x40] sm:$0xff] }
  0x1d   : > { %v282_v16 = vld [vmem:[%s3306_s30 + $0x230] sm:$0xff]  ;;  %v283_v18 = vld [vmem:[%s3306_s30 + $0x238] sm:$0xff]  ;;  %v284_v20 = vld [vmem:[%s3306_s30 + $0x240] sm:$0xff] }
  0x1e   : > { %2962 = vmatmul.mubr.msk.f32.gmra.mrb[2].mxu0 %vm349_vm3, %v215_v9  ;;  %v221_v21 = vld [vmem:[%s3306_s30 + $0x48] sm:$0xff]  ;;  %v222_v23 = vld [vmem:[%s3306_s30 + $0x50] sm:$0xff]  ;;  %v223_v25 = vld [vmem:[%s3306_s30 + $0x58] sm:$0xff] }
  0x1f   : > { %3058 = vmatmul.mubr.msk.f32.gmra.mrb[2].mxu1 %vm349_vm3, %v279_v10  ;;  %2964 = vmatprep.mubr.msk.f32.mxu0 %vm349_vm3, %v216_v11  ;;  %v285_v22 = vld [vmem:[%s3306_s30 + $0x248] sm:$0xff]  ;;  %v286_v24 = vld [vmem:[%s3306_s30 + $0x250] sm:$0xff]  ;;  %v287_v26 = vld [vmem:[%s3306_s30 + $0x258] sm:$0xff] }
  0x20   : > { %3060 = vmatprep.mubr.msk.f32.mxu1 %vm349_vm3, %v280_v12  ;;  %v224_v27 = vld [vmem:[%s3306_s30 + $0x60] sm:$0xff]  ;;  %v225_v29 = vld [vmem:[%s3306_s30 + $0x68] sm:$0xff]  ;;  %v226_v31 = vld [vmem:[%s3306_s30 + $0x70] sm:$0xff] }
  0x21   : > { %v288_v28 = vld [vmem:[%s3306_s30 + $0x260] sm:$0xff]  ;;  %v289_v30 = vld [vmem:[%s3306_s30 + $0x268] sm:$0xff]  ;;  %v290_v32 = vld [vmem:[%s3306_s30 + $0x270] sm:$0xff] }
  0x22   : > { %2965 = vmatmul.mubr.msk.f32.gmra.mrb[4].mxu0 %vm349_vm3, %v217_v13  ;;  %v227_v33 = vld [vmem:[%s3306_s30 + $0x78] sm:$0xff]  ;;  %v228_v35 = vld [vmem:[%s3306_s30 + $0x80] sm:$0xff]  ;;  %v229_v37 = vld [vmem:[%s3306_s30 + $0x88] sm:$0xff] }
  0x23   : > { %3061 = vmatmul.mubr.msk.f32.gmra.mrb[4].mxu1 %vm349_vm3, %v281_v14  ;;  %2967 = vmatprep.mubr.msk.f32.mxu0 %vm349_vm3, %v218_v15  ;;  %v291_v34 = vld [vmem:[%s3306_s30 + $0x278] sm:$0xff]  ;;  %v292_v36 = vld [vmem:[%s3306_s30 + $0x280] sm:$0xff]  ;;  %v293_v38 = vld [vmem:[%s3306_s30 + $0x288] sm:$0xff] }
  0x24   : > { %3063 = vmatprep.mubr.msk.f32.mxu1 %vm349_vm3, %v282_v16  ;;  %v230_v39 = vld [vmem:[%s3306_s30 + $0x90] sm:$0xff]  ;;  %v231_v41 = vld [vmem:[%s3306_s30 + $0x98] sm:$0xff]  ;;  %v232_v43 = vld [vmem:[%s3306_s30 + $0xa0] sm:$0xff] }
  0x25   : > { %v294_v40 = vld [vmem:[%s3306_s30 + $0x290] sm:$0xff]  ;;  %v295_v42 = vld [vmem:[%s3306_s30 + $0x298] sm:$0xff]  ;;  %v296_v44 = vld [vmem:[%s3306_s30 + $0x2a0] sm:$0xff] }
  0x26   : > { %2968 = vmatmul.mubr.msk.f32.gmra.mrb[6].mxu0 %vm349_vm3, %v219_v17  ;;  %v233_v45 = vld [vmem:[%s3306_s30 + $0xa8] sm:$0xff]  ;;  %v234_v47 = vld [vmem:[%s3306_s30 + $0xb0] sm:$0xff]  ;;  %v235_v49 = vld [vmem:[%s3306_s30 + $0xb8] sm:$0xff] }
  0x27   : > { %3064 = vmatmul.mubr.msk.f32.gmra.mrb[6].mxu1 %vm349_vm3, %v283_v18  ;;  %2970 = vmatprep.mubr.msk.f32.mxu0 %vm349_vm3, %v220_v19  ;;  %v297_v46 = vld [vmem:[%s3306_s30 + $0x2a8] sm:$0xff]  ;;  %v298_v48 = vld [vmem:[%s3306_s30 + $0x2b0] sm:$0xff]  ;;  %v299_v50 = vld [vmem:[%s3306_s30 + $0x2b8] sm:$0xff] }
  0x28   : > { %3066 = vmatprep.mubr.msk.f32.mxu1 %vm349_vm3, %v284_v20  ;;  %v236_v51 = vld [vmem:[%s3306_s30 + $0xc0] sm:$0xff]  ;;  %v237_v53 = vld [vmem:[%s3306_s30 + $0xc8] sm:$0xff]  ;;  %v238_v55 = vld [vmem:[%s3306_s30 + $0xd0] sm:$0xff] }
  0x29   : > { %v300_v52 = vld [vmem:[%s3306_s30 + $0x2c0] sm:$0xff]  ;;  %v301_v54 = vld [vmem:[%s3306_s30 + $0x2c8] sm:$0xff]  ;;  %v302_v56 = vld [vmem:[%s3306_s30 + $0x2d0] sm:$0xff] }
  0x2a   : > { %2971 = vmatmul.mubr.msk.f32.gmra.mrb[8].mxu0 %vm349_vm3, %v221_v21  ;;  %v239_v57 = vld [vmem:[%s3306_s30 + $0xd8] sm:$0xff]  ;;  %v240_v59 = vld [vmem:[%s3306_s30 + $0xe0] sm:$0xff]  ;;  %v241_v61 = vld [vmem:[%s3306_s30 + $0xe8] sm:$0xff] }
  0x2b   : > { %3067 = vmatmul.mubr.msk.f32.gmra.mrb[8].mxu1 %vm349_vm3, %v285_v22  ;;  %2973 = vmatprep.mubr.msk.f32.mxu0 %vm349_vm3, %v222_v23  ;;  %v303_v58 = vld [vmem:[%s3306_s30 + $0x2d8] sm:$0xff]  ;;  %v304_v60 = vld [vmem:[%s3306_s30 + $0x2e0] sm:$0xff]  ;;  %v305_v62 = vld [vmem:[%s3306_s30 + $0x2e8] sm:$0xff] }
  0x2c   : > { %3069 = vmatprep.mubr.msk.f32.mxu1 %vm349_vm3, %v286_v24  ;;  %v242_v63 = vld [vmem:[%s3306_s30 + $0xf0] sm:$0xff]  ;;  %v243_v1 = vld [vmem:[%s3306_s30 + $0xf8] sm:$0xff]  ;;  %v244_v3 = vld [vmem:[%s3306_s30 + $0x100] sm:$0xff] }
  0x2d   : > { %v306_v0 = vld [vmem:[%s3306_s30 + $0x2f0] sm:$0xff]  ;;  %v307_v2 = vld [vmem:[%s3306_s30 + $0x2f8] sm:$0xff]  ;;  %v308_v4 = vld [vmem:[%s3306_s30 + $0x300] sm:$0xff] }
  0x2e   : > { %2974 = vmatmul.mubr.msk.f32.gmra.mrb[10].mxu0 %vm349_vm3, %v223_v25  ;;  %v245_v5 = vld [vmem:[%s3306_s30 + $0x108] sm:$0xff]  ;;  %v246_v7 = vld [vmem:[%s3306_s30 + $0x110] sm:$0xff]  ;;  %v247_v9 = vld [vmem:[%s3306_s30 + $0x118] sm:$0xff] }
  0x2f   : > { %3070 = vmatmul.mubr.msk.f32.gmra.mrb[10].mxu1 %vm349_vm3, %v287_v26  ;;  %2976 = vmatprep.mubr.msk.f32.mxu0 %vm349_vm3, %v224_v27  ;;  %v309_v6 = vld [vmem:[%s3306_s30 + $0x308] sm:$0xff]  ;;  %v310_v8 = vld [vmem:[%s3306_s30 + $0x310] sm:$0xff]  ;;  %v311_v10 = vld [vmem:[%s3306_s30 + $0x318] sm:$0xff] }
  0x30   : > { %3072 = vmatprep.mubr.msk.f32.mxu1 %vm349_vm3, %v288_v28  ;;  %v248_v11 = vld [vmem:[%s3306_s30 + $0x120] sm:$0xff]  ;;  %v249_v13 = vld [vmem:[%s3306_s30 + $0x128] sm:$0xff]  ;;  %v250_v15 = vld [vmem:[%s3306_s30 + $0x130] sm:$0xff] }
  0x31   : > { %v312_v12 = vld [vmem:[%s3306_s30 + $0x320] sm:$0xff]  ;;  %v313_v14 = vld [vmem:[%s3306_s30 + $0x328] sm:$0xff]  ;;  %v314_v16 = vld [vmem:[%s3306_s30 + $0x330] sm:$0xff] }
  0x32   : > { %2977 = vmatmul.mubr.msk.f32.gmra.mrb[12].mxu0 %vm349_vm3, %v225_v29  ;;  %v251_v17 = vld [vmem:[%s3306_s30 + $0x138] sm:$0xff]  ;;  %v252_v19 = vld [vmem:[%s3306_s30 + $0x140] sm:$0xff]  ;;  %v253_v21 = vld [vmem:[%s3306_s30 + $0x148] sm:$0xff] }
  0x33   : > { %3073 = vmatmul.mubr.msk.f32.gmra.mrb[12].mxu1 %vm349_vm3, %v289_v30  ;;  %2979 = vmatprep.mubr.msk.f32.mxu0 %vm349_vm3, %v226_v31  ;;  %v315_v18 = vld [vmem:[%s3306_s30 + $0x338] sm:$0xff]  ;;  %v316_v20 = vld [vmem:[%s3306_s30 + $0x340] sm:$0xff]  ;;  %v317_v22 = vld [vmem:[%s3306_s30 + $0x348] sm:$0xff] }
  0x34   : > { %3075 = vmatprep.mubr.msk.f32.mxu1 %vm349_vm3, %v290_v32  ;;  %v254_v23 = vld [vmem:[%s3306_s30 + $0x150] sm:$0xff]  ;;  %v255_v25 = vld [vmem:[%s3306_s30 + $0x158] sm:$0xff]  ;;  %v256_v27 = vld [vmem:[%s3306_s30 + $0x160] sm:$0xff] }
  0x35   : > { %v318_v24 = vld [vmem:[%s3306_s30 + $0x350] sm:$0xff]  ;;  %v319_v26 = vld [vmem:[%s3306_s30 + $0x358] sm:$0xff]  ;;  %v320_v28 = vld [vmem:[%s3306_s30 + $0x360] sm:$0xff] }
  0x36   : > { %2980 = vmatmul.mubr.msk.f32.gmra.mrb[14].mxu0 %vm349_vm3, %v227_v33  ;;  %v257_v29 = vld [vmem:[%s3306_s30 + $0x168] sm:$0xff]  ;;  %v258_v31 = vld [vmem:[%s3306_s30 + $0x170] sm:$0xff]  ;;  %v259_v33 = vld [vmem:[%s3306_s30 + $0x178] sm:$0xff] }
  0x37   : > { %3076 = vmatmul.mubr.msk.f32.gmra.mrb[14].mxu1 %vm349_vm3, %v291_v34  ;;  %2982 = vmatprep.mubr.msk.f32.mxu0 %vm349_vm3, %v228_v35  ;;  %v321_v30 = vld [vmem:[%s3306_s30 + $0x368] sm:$0xff]  ;;  %v322_v32 = vld [vmem:[%s3306_s30 + $0x370] sm:$0xff]  ;;  %v323_v34 = vld [vmem:[%s3306_s30 + $0x378] sm:$0xff] }
  0x38   : > { %3078 = vmatprep.mubr.msk.f32.mxu1 %vm349_vm3, %v292_v36  ;;  %v260_v35 = vld [vmem:[%s3306_s30 + $0x180] sm:$0xff] }
  0x39   : > { %v324_v36 = vld [vmem:[%s3306_s30 + $0x380] sm:$0xff] }
  0x3a   : > { %2983 = vmatmul.mubr.msk.f32.gmra.mrb[16].mxu0 %vm349_vm3, %v229_v37  ;;  %v261_v37 = vld [vmem:[%s3306_s30 + $0x188] sm:$0xff] }
  0x3b   : > { %3079 = vmatmul.mubr.msk.f32.gmra.mrb[16].mxu1 %vm349_vm3, %v293_v38  ;;  %2985 = vmatprep.mubr.msk.f32.mxu0 %vm349_vm3, %v230_v39  ;;  %v325_v38 = vld [vmem:[%s3306_s30 + $0x388] sm:$0xff]  ;;  %v262_v39 = vld [vmem:[%s3306_s30 + $0x190] sm:$0xff] }
  0x3c   : > { %3081 = vmatprep.mubr.msk.f32.mxu1 %vm349_vm3, %v294_v40  ;;  %v326_v40 = vld [vmem:[%s3306_s30 + $0x390] sm:$0xff] }
  0x3e   : > { %2986 = vmatmul.mubr.msk.f32.gmra.mrb[18].mxu0 %vm349_vm3, %v231_v41  ;;  %v263_v41 = vld [vmem:[%s3306_s30 + $0x198] sm:$0xff] }
  0x3f   : > { %3082 = vmatmul.mubr.msk.f32.gmra.mrb[18].mxu1 %vm349_vm3, %v295_v42  ;;  %2988 = vmatprep.mubr.msk.f32.mxu0 %vm349_vm3, %v232_v43  ;;  %v327_v42 = vld [vmem:[%s3306_s30 + $0x398] sm:$0xff]  ;;  %v264_v43 = vld [vmem:[%s3306_s30 + $0x1a0] sm:$0xff] }
  0x40   : > { %3084 = vmatprep.mubr.msk.f32.mxu1 %vm349_vm3, %v296_v44  ;;  %v328_v44 = vld [vmem:[%s3306_s30 + $0x3a0] sm:$0xff] }
  0x42   : > { %2989 = vmatmul.mubr.msk.f32.gmra.mrb[20].mxu0 %vm349_vm3, %v233_v45  ;;  %v265_v45 = vld [vmem:[%s3306_s30 + $0x1a8] sm:$0xff] }
  0x43   : > { %3085 = vmatmul.mubr.msk.f32.gmra.mrb[20].mxu1 %vm349_vm3, %v297_v46  ;;  %2991 = vmatprep.mubr.msk.f32.mxu0 %vm349_vm3, %v234_v47  ;;  %v329_v46 = vld [vmem:[%s3306_s30 + $0x3a8] sm:$0xff]  ;;  %v266_v47 = vld [vmem:[%s3306_s30 + $0x1b0] sm:$0xff] }
  0x44   : > { %3087 = vmatprep.mubr.msk.f32.mxu1 %vm349_vm3, %v298_v48  ;;  %v330_v48 = vld [vmem:[%s3306_s30 + $0x3b0] sm:$0xff] }
  0x46   : > { %2992 = vmatmul.mubr.msk.f32.gmra.mrb[22].mxu0 %vm349_vm3, %v235_v49  ;;  %v267_v49 = vld [vmem:[%s3306_s30 + $0x1b8] sm:$0xff] }
  0x47   : > { %3088 = vmatmul.mubr.msk.f32.gmra.mrb[22].mxu1 %vm349_vm3, %v299_v50  ;;  %2994 = vmatprep.mubr.msk.f32.mxu0 %vm349_vm3, %v236_v51  ;;  %v331_v50 = vld [vmem:[%s3306_s30 + $0x3b8] sm:$0xff]  ;;  %v268_v51 = vld [vmem:[%s3306_s30 + $0x1c0] sm:$0xff] }
  0x48   : > { %3090 = vmatprep.mubr.msk.f32.mxu1 %vm349_vm3, %v300_v52  ;;  %v332_v52 = vld [vmem:[%s3306_s30 + $0x3c0] sm:$0xff] }
  0x4a   : > { %2995 = vmatmul.mubr.msk.f32.gmra.mrb[24].mxu0 %vm349_vm3, %v237_v53  ;;  %v269_v53 = vld [vmem:[%s3306_s30 + $0x1c8] sm:$0xff] }
  0x4b   : > { %3091 = vmatmul.mubr.msk.f32.gmra.mrb[24].mxu1 %vm349_vm3, %v301_v54  ;;  %2997 = vmatprep.mubr.msk.f32.mxu0 %vm349_vm3, %v238_v55  ;;  %v333_v54 = vld [vmem:[%s3306_s30 + $0x3c8] sm:$0xff]  ;;  %v270_v55 = vld [vmem:[%s3306_s30 + $0x1d0] sm:$0xff] }
  0x4c   : > { %3093 = vmatprep.mubr.msk.f32.mxu1 %vm349_vm3, %v302_v56  ;;  %v334_v56 = vld [vmem:[%s3306_s30 + $0x3d0] sm:$0xff] }
  0x4e   : > { %2998 = vmatmul.mubr.msk.f32.gmra.mrb[26].mxu0 %vm349_vm3, %v239_v57  ;;  %v271_v57 = vld [vmem:[%s3306_s30 + $0x1d8] sm:$0xff] }
  0x4f   : > { %3094 = vmatmul.mubr.msk.f32.gmra.mrb[26].mxu1 %vm349_vm3, %v303_v58  ;;  %3000 = vmatprep.mubr.msk.f32.mxu0 %vm349_vm3, %v240_v59  ;;  %v335_v58 = vld [vmem:[%s3306_s30 + $0x3d8] sm:$0xff]  ;;  %v272_v59 = vld [vmem:[%s3306_s30 + $0x1e0] sm:$0xff] }
  0x50   : > { %3096 = vmatprep.mubr.msk.f32.mxu1 %vm349_vm3, %v304_v60  ;;  %v336_v60 = vld [vmem:[%s3306_s30 + $0x3e0] sm:$0xff] }
  0x52   : > { %3001 = vmatmul.mubr.msk.f32.gmra.mrb[28].mxu0 %vm349_vm3, %v241_v61  ;;  %v273_v61 = vld [vmem:[%s3306_s30 + $0x1e8] sm:$0xff] }
  0x53   : > { %3097 = vmatmul.mubr.msk.f32.gmra.mrb[28].mxu1 %vm349_vm3, %v305_v62  ;;  %3003 = vmatprep.mubr.msk.f32.mxu0 %vm349_vm3, %v242_v63  ;;  %v337_v62 = vld [vmem:[%s3306_s30 + $0x3e8] sm:$0xff]  ;;  %v274_v63 = vld [vmem:[%s3306_s30 + $0x1f0] sm:$0xff] }
  0x54   : > { %3099 = vmatprep.mubr.msk.f32.mxu1 %vm349_vm3, %v306_v0  ;;  %v338_v0 = vld [vmem:[%s3306_s30 + $0x3f0] sm:$0xff] }
  0x56   : > { %3004 = vmatmul.mubr.msk.f32.gmra.mrb[30].mxu0 %vm349_vm3, %v243_v1  ;;  %v275_v1 = vld [vmem:[%s3306_s30 + $0x1f8] sm:$0xff] }
  0x57   : > { %3100 = vmatmul.mubr.msk.f32.gmra.mrb[30].mxu1 %vm349_vm3, %v307_v2  ;;  %3006 = vmatprep.mubr.msk.f32.mxu0 %vm349_vm3, %v244_v3  ;;  %v339_v2 = vld [vmem:[%s3306_s30 + $0x3f8] sm:$0xff]  ;;  %v3572_v3 = vld [vmem:[%s5680_s2] ss:$0 sm:$0xff] }
  0x58   : > { %3102 = vmatprep.mubr.msk.f32.mxu1 %vm349_vm3, %v308_v4 }
  0x5a   : > { %3007 = vmatmul.mubr.msk.f32.gmra.mrb[32].mxu0 %vm349_vm3, %v245_v5 }
  0x5b   : > { %3103 = vmatmul.mubr.msk.f32.gmra.mrb[32].mxu1 %vm349_vm3, %v309_v6  ;;  %3009 = vmatprep.mubr.msk.f32.mxu0 %vm349_vm3, %v246_v7 }
  0x5c   : > { %3105 = vmatprep.mubr.msk.f32.mxu1 %vm349_vm3, %v310_v8 }
  0x5e   : > { %3010 = vmatmul.mubr.msk.f32.gmra.mrb[34].mxu0 %vm349_vm3, %v247_v9 }
  0x5f   : > { %3106 = vmatmul.mubr.msk.f32.gmra.mrb[34].mxu1 %vm349_vm3, %v311_v10  ;;  %3012 = vmatprep.mubr.msk.f32.mxu0 %vm349_vm3, %v248_v11 }
  0x60   : > { %3108 = vmatprep.mubr.msk.f32.mxu1 %vm349_vm3, %v312_v12 }
  0x62   : > { %3013 = vmatmul.mubr.msk.f32.gmra.mrb[36].mxu0 %vm349_vm3, %v249_v13 }
  0x63   : > { %3109 = vmatmul.mubr.msk.f32.gmra.mrb[36].mxu1 %vm349_vm3, %v313_v14  ;;  %3015 = vmatprep.mubr.msk.f32.mxu0 %vm349_vm3, %v250_v15 }
  0x64   : > { %3111 = vmatprep.mubr.msk.f32.mxu1 %vm349_vm3, %v314_v16 }
  0x66   : > { %3016 = vmatmul.mubr.msk.f32.gmra.mrb[38].mxu0 %vm349_vm3, %v251_v17 }
  0x67   : > { %3112 = vmatmul.mubr.msk.f32.gmra.mrb[38].mxu1 %vm349_vm3, %v315_v18  ;;  %3018 = vmatprep.mubr.msk.f32.mxu0 %vm349_vm3, %v252_v19 }
  0x68   : > { %3114 = vmatprep.mubr.msk.f32.mxu1 %vm349_vm3, %v316_v20 }
  0x6a   : > { %3019 = vmatmul.mubr.msk.f32.gmra.mrb[40].mxu0 %vm349_vm3, %v253_v21 }
  0x6b   : > { %3115 = vmatmul.mubr.msk.f32.gmra.mrb[40].mxu1 %vm349_vm3, %v317_v22  ;;  %3021 = vmatprep.mubr.msk.f32.mxu0 %vm349_vm3, %v254_v23 }
  0x6c   : > { %3117 = vmatprep.mubr.msk.f32.mxu1 %vm349_vm3, %v318_v24 }
  0x6e   : > { %3022 = vmatmul.mubr.msk.f32.gmra.mrb[42].mxu0 %vm349_vm3, %v255_v25 }
  0x6f   : > { %3118 = vmatmul.mubr.msk.f32.gmra.mrb[42].mxu1 %vm349_vm3, %v319_v26  ;;  %3024 = vmatprep.mubr.msk.f32.mxu0 %vm349_vm3, %v256_v27 }
  0x70   : > { %3120 = vmatprep.mubr.msk.f32.mxu1 %vm349_vm3, %v320_v28 }
  0x72   : > { %3025 = vmatmul.mubr.msk.f32.gmra.mrb[44].mxu0 %vm349_vm3, %v257_v29 }
  0x73   : > { %3121 = vmatmul.mubr.msk.f32.gmra.mrb[44].mxu1 %vm349_vm3, %v321_v30  ;;  %3027 = vmatprep.mubr.msk.f32.mxu0 %vm349_vm3, %v258_v31 }
  0x74   : > { %3123 = vmatprep.mubr.msk.f32.mxu1 %vm349_vm3, %v322_v32 }
  0x76   : > { %3028 = vmatmul.mubr.msk.f32.gmra.mrb[46].mxu0 %vm349_vm3, %v259_v33 }
  0x77   : > { %3124 = vmatmul.mubr.msk.f32.gmra.mrb[46].mxu1 %vm349_vm3, %v323_v34  ;;  %3030 = vmatprep.mubr.msk.f32.mxu0 %vm349_vm3, %v260_v35 }
  0x78   : > { %3126 = vmatprep.mubr.msk.f32.mxu1 %vm349_vm3, %v324_v36 }
  0x7a   : > { %3031 = vmatmul.mubr.msk.f32.gmra.mrb[48].mxu0 %vm349_vm3, %v261_v37 }
  0x7b   : > { %3127 = vmatmul.mubr.msk.f32.gmra.mrb[48].mxu1 %vm349_vm3, %v325_v38  ;;  %3033 = vmatprep.mubr.msk.f32.mxu0 %vm349_vm3, %v262_v39 }
  0x7c   : > { %3129 = vmatprep.mubr.msk.f32.mxu1 %vm349_vm3, %v326_v40 }
  0x7e   : > { %3034 = vmatmul.mubr.msk.f32.gmra.mrb[50].mxu0 %vm349_vm3, %v263_v41 }
  0x7f   : > { %3130 = vmatmul.mubr.msk.f32.gmra.mrb[50].mxu1 %vm349_vm3, %v327_v42  ;;  %3036 = vmatprep.mubr.msk.f32.mxu0 %vm349_vm3, %v264_v43 }
  0x80   : > { %3132 = vmatprep.mubr.msk.f32.mxu1 %vm349_vm3, %v328_v44 }
  0x82   : > { %3037 = vmatmul.mubr.msk.f32.gmra.mrb[52].mxu0 %vm349_vm3, %v265_v45 }
  0x83   : > { %3133 = vmatmul.mubr.msk.f32.gmra.mrb[52].mxu1 %vm349_vm3, %v329_v46  ;;  %3039 = vmatprep.mubr.msk.f32.mxu0 %vm349_vm3, %v266_v47 }
  0x84   : > { %3135 = vmatprep.mubr.msk.f32.mxu1 %vm349_vm3, %v330_v48 }
  0x86   : > { %3040 = vmatmul.mubr.msk.f32.gmra.mrb[54].mxu0 %vm349_vm3, %v267_v49 }
  0x87   : > { %3136 = vmatmul.mubr.msk.f32.gmra.mrb[54].mxu1 %vm349_vm3, %v331_v50  ;;  %3042 = vmatprep.mubr.msk.f32.mxu0 %vm349_vm3, %v268_v51 }
  0x88   : > { %3138 = vmatprep.mubr.msk.f32.mxu1 %vm349_vm3, %v332_v52 }
  0x8a   : > { %3043 = vmatmul.mubr.msk.f32.gmra.mrb[56].mxu0 %vm349_vm3, %v269_v53 }
  0x8b   : > { %3139 = vmatmul.mubr.msk.f32.gmra.mrb[56].mxu1 %vm349_vm3, %v333_v54  ;;  %3045 = vmatprep.mubr.msk.f32.mxu0 %vm349_vm3, %v270_v55 }
  0x8c   : > { %3141 = vmatprep.mubr.msk.f32.mxu1 %vm349_vm3, %v334_v56 }
  0x8e   : > { %3046 = vmatmul.mubr.msk.f32.gmra.mrb[58].mxu0 %vm349_vm3, %v271_v57 }
  0x8f   : > { %3142 = vmatmul.mubr.msk.f32.gmra.mrb[58].mxu1 %vm349_vm3, %v335_v58  ;;  %3048 = vmatprep.mubr.msk.f32.mxu0 %vm349_vm3, %v272_v59 }
  0x90   : > { %3144 = vmatprep.mubr.msk.f32.mxu1 %vm349_vm3, %v336_v60 }
  0x92   : > { %3049 = vmatmul.mubr.msk.f32.gmra.mrb[60].mxu0 %vm349_vm3, %v273_v61 }
  0x93   : > { %3145 = vmatmul.mubr.msk.f32.gmra.mrb[60].mxu1 %vm349_vm3, %v337_v62  ;;  %3051 = vmatprep.mubr.msk.f32.mxu0 %vm349_vm3, %v274_v63 }
  0x94   : > { %3147 = vmatprep.mubr.msk.f32.mxu1 %vm349_vm3, %v338_v0 }
  0x96   : > { %3052 = vmatmul.mubr.msk.f32.gmra.mrb[62].mxu0 %vm349_vm3, %v275_v1 }
  0x97   : > { %3148 = vmatmul.mubr.msk.f32.gmra.mrb[62].mxu1 %vm349_vm3, %v339_v2 }
  0xed   : > { %v2960_v4 = vpop.f32.mrb[0].mxu0 }
  0xee   : > { %v3056_v5 = vpop.f32.mrb[0].mxu1  ;;  %v3575_v6 = vadd.f32 %v2960_v4, %v3572_v3  ;;  %v804_v8 = vpop.f32.mrb[1].mxu0 }
  0xef   : > { %v3578_v7 = vadd.f32 %v3056_v5, %v3572_v3  ;;  %v1124_v9 = vpop.f32.mrb[1].mxu1  ;;  %v3581_v10 = vadd.f32 %v3572_v3, %v804_v8 }
  0xf0   : > { %v3584_v11 = vadd.f32 %v3572_v3, %v1124_v9 }
  0xf1   : > { %5787 = vst [vmem:[#allocation3_spill] sm:$0xff] %v3578_v7  ;;  %v2963_v12 = vpop.f32.mrb[2].mxu0 }
  0xf2   : > { %5788 = vst [vmem:[#allocation4_spill] sm:$0xff] %v3584_v11  ;;  %v3059_v13 = vpop.f32.mrb[2].mxu1  ;;  %v3587_v14 = vadd.f32 %v2963_v12, %v3572_v3  ;;  %v814_v16 = vpop.f32.mrb[3].mxu0 }
  0xf3   : > { %v3590_v15 = vadd.f32 %v3059_v13, %v3572_v3  ;;  %v1134_v17 = vpop.f32.mrb[3].mxu1  ;;  %v3593_v18 = vadd.f32 %v3572_v3, %v814_v16 }
  0xf4   : > { %v3596_v19 = vadd.f32 %v3572_v3, %v1134_v17 }
  0xf5   : > { %5789 = vst [vmem:[#allocation5_spill] sm:$0xff] %v3590_v15  ;;  %v2966_v20 = vpop.f32.mrb[4].mxu0 }
  0xf6   : > { %5790 = vst [vmem:[#allocation6_spill] sm:$0xff] %v3596_v19  ;;  %v3062_v21 = vpop.f32.mrb[4].mxu1  ;;  %v3599_v22 = vadd.f32 %v2966_v20, %v3572_v3  ;;  %v824_v24 = vpop.f32.mrb[5].mxu0 }
  0xf7   : > { %v3602_v23 = vadd.f32 %v3062_v21, %v3572_v3  ;;  %v1144_v25 = vpop.f32.mrb[5].mxu1  ;;  %v3605_v26 = vadd.f32 %v3572_v3, %v824_v24 }
  0xf8   : > { %v3608_v27 = vadd.f32 %v3572_v3, %v1144_v25 }
  0xf9   : > { %5791 = vst [vmem:[#allocation7_spill] sm:$0xff] %v3602_v23  ;;  %v2969_v28 = vpop.f32.mrb[6].mxu0 }
  0xfa   : > { %5792 = vst [vmem:[#allocation8_spill] sm:$0xff] %v3608_v27  ;;  %v3065_v29 = vpop.f32.mrb[6].mxu1  ;;  %v3611_v30 = vadd.f32 %v2969_v28, %v3572_v3  ;;  %v834_v32 = vpop.f32.mrb[7].mxu0 }
  0xfb   : > { %v3614_v31 = vadd.f32 %v3065_v29, %v3572_v3  ;;  %v1154_v33 = vpop.f32.mrb[7].mxu1  ;;  %v3617_v34 = vadd.f32 %v3572_v3, %v834_v32 }
  0xfc   : > { %v3620_v35 = vadd.f32 %v3572_v3, %v1154_v33 }
  0xfd   : > { %5793 = vst [vmem:[#allocation9_spill] sm:$0xff] %v3614_v31  ;;  %v2972_v36 = vpop.f32.mrb[8].mxu0 }
  0xfe   : > { %5794 = vst [vmem:[#allocation10_spill] sm:$0xff] %v3620_v35  ;;  %v3068_v37 = vpop.f32.mrb[8].mxu1  ;;  %v3623_v38 = vadd.f32 %v2972_v36, %v3572_v3  ;;  %v844_v40 = vpop.f32.mrb[9].mxu0 }
  0xff   : > { %v3626_v39 = vadd.f32 %v3068_v37, %v3572_v3  ;;  %v1164_v41 = vpop.f32.mrb[9].mxu1  ;;  %v3629_v42 = vadd.f32 %v3572_v3, %v844_v40 }
 0x100   : > { %v3632_v43 = vadd.f32 %v3572_v3, %v1164_v41 }
 0x101   : > { %5795 = vst [vmem:[#allocation11_spill] sm:$0xff] %v3626_v39  ;;  %v2975_v44 = vpop.f32.mrb[10].mxu0 }
 0x102   : > { %5796 = vst [vmem:[#allocation12_spill] sm:$0xff] %v3632_v43  ;;  %v3071_v45 = vpop.f32.mrb[10].mxu1  ;;  %v3635_v46 = vadd.f32 %v2975_v44, %v3572_v3  ;;  %v854_v48 = vpop.f32.mrb[11].mxu0 }
 0x103   : > { %v3638_v47 = vadd.f32 %v3071_v45, %v3572_v3  ;;  %v1174_v49 = vpop.f32.mrb[11].mxu1  ;;  %v3641_v50 = vadd.f32 %v3572_v3, %v854_v48 }
 0x104   : > { %v3644_v51 = vadd.f32 %v3572_v3, %v1174_v49 }
 0x105   : > { %5797 = vst [vmem:[#allocation13_spill] sm:$0xff] %v3638_v47  ;;  %v2978_v52 = vpop.f32.mrb[12].mxu0 }
 0x106   : > { %5798 = vst [vmem:[#allocation14_spill] sm:$0xff] %v3644_v51  ;;  %v3074_v53 = vpop.f32.mrb[12].mxu1  ;;  %v3647_v54 = vadd.f32 %v2978_v52, %v3572_v3  ;;  %v864_v56 = vpop.f32.mrb[13].mxu0 }
 0x107   : > { %v3650_v55 = vadd.f32 %v3074_v53, %v3572_v3  ;;  %v1184_v57 = vpop.f32.mrb[13].mxu1  ;;  %v3653_v58 = vadd.f32 %v3572_v3, %v864_v56 }
 0x108   : > { %v3656_v59 = vadd.f32 %v3572_v3, %v1184_v57 }
 0x109   : > { %5799 = vst [vmem:[#allocation15_spill] sm:$0xff] %v3650_v55  ;;  %v2981_v60 = vpop.f32.mrb[14].mxu0 }
 0x10a   : > { %5800 = vst [vmem:[#allocation16_spill] sm:$0xff] %v3656_v59  ;;  %v3077_v61 = vpop.f32.mrb[14].mxu1  ;;  %v3659_v62 = vadd.f32 %v2981_v60, %v3572_v3  ;;  %v874_v0 = vpop.f32.mrb[15].mxu0 }
 0x10b   : > { %v3662_v63 = vadd.f32 %v3077_v61, %v3572_v3  ;;  %v1194_v1 = vpop.f32.mrb[15].mxu1  ;;  %v3665_v2 = vadd.f32 %v3572_v3, %v874_v0 }
 0x10c   : > { %v3668_v4 = vadd.f32 %v3572_v3, %v1194_v1 }
 0x10d   : > { %5801 = vst [vmem:[#allocation17_spill] sm:$0xff] %v3662_v63  ;;  %v2984_v5 = vpop.f32.mrb[16].mxu0 }
 0x10e   : > { %5802 = vst [vmem:[#allocation18_spill] sm:$0xff] %v3668_v4  ;;  %v3080_v8 = vpop.f32.mrb[16].mxu1  ;;  %v3671_v9 = vadd.f32 %v2984_v5, %v3572_v3  ;;  %v884_v13 = vpop.f32.mrb[17].mxu0 }
 0x10f   : > { %v3674_v12 = vadd.f32 %v3080_v8, %v3572_v3  ;;  %v1204_v16 = vpop.f32.mrb[17].mxu1  ;;  %v3677_v17 = vadd.f32 %v3572_v3, %v884_v13 }
 0x110   : > { %v3680_v20 = vadd.f32 %v3572_v3, %v1204_v16 }
 0x111   : > { %5803 = vst [vmem:[#allocation19_spill] sm:$0xff] %v3674_v12  ;;  %v2987_v21 = vpop.f32.mrb[18].mxu0 }
 0x112   : > { %5804 = vst [vmem:[#allocation20_spill] sm:$0xff] %v3680_v20  ;;  %v3083_v24 = vpop.f32.mrb[18].mxu1  ;;  %v3683_v25 = vadd.f32 %v2987_v21, %v3572_v3  ;;  %v894_v29 = vpop.f32.mrb[19].mxu0 }
 0x113   : > { %v3686_v28 = vadd.f32 %v3083_v24, %v3572_v3  ;;  %v1214_v32 = vpop.f32.mrb[19].mxu1  ;;  %v3689_v33 = vadd.f32 %v3572_v3, %v894_v29 }
 0x114   : > { %v3692_v36 = vadd.f32 %v3572_v3, %v1214_v32 }
 0x115   : > { %5805 = vst [vmem:[#allocation21_spill] sm:$0xff] %v3686_v28  ;;  %v2990_v37 = vpop.f32.mrb[20].mxu0 }
 0x116   : > { %5806 = vst [vmem:[#allocation22_spill] sm:$0xff] %v3692_v36  ;;  %v3086_v40 = vpop.f32.mrb[20].mxu1  ;;  %v3695_v41 = vadd.f32 %v2990_v37, %v3572_v3  ;;  %v904_v45 = vpop.f32.mrb[21].mxu0 }
 0x117   : > { %v3698_v44 = vadd.f32 %v3086_v40, %v3572_v3  ;;  %v1224_v48 = vpop.f32.mrb[21].mxu1  ;;  %v3701_v49 = vadd.f32 %v3572_v3, %v904_v45 }
 0x118   : > { %v3704_v52 = vadd.f32 %v3572_v3, %v1224_v48 }
 0x119   : > { %5807 = vst [vmem:[#allocation23_spill] sm:$0xff] %v3698_v44  ;;  %v2993_v53 = vpop.f32.mrb[22].mxu0 }
 0x11a   : > { %5808 = vst [vmem:[#allocation24_spill] sm:$0xff] %v3704_v52  ;;  %v3089_v56 = vpop.f32.mrb[22].mxu1  ;;  %v3707_v57 = vadd.f32 %v2993_v53, %v3572_v3  ;;  %v914_v61 = vpop.f32.mrb[23].mxu0 }
 0x11b   : > { %v3710_v60 = vadd.f32 %v3089_v56, %v3572_v3  ;;  %v1234_v0 = vpop.f32.mrb[23].mxu1  ;;  %v3713_v1 = vadd.f32 %v3572_v3, %v914_v61 }
 0x11c   : > { %v3716_v5 = vadd.f32 %v3572_v3, %v1234_v0 }
 0x11d   : > { %5809 = vst [vmem:[#allocation25_spill] sm:$0xff] %v3710_v60  ;;  %v2996_v8 = vpop.f32.mrb[24].mxu0 }
 0x11e   : > { %5810 = vst [vmem:[#allocation26_spill] sm:$0xff] %v3716_v5  ;;  %v3092_v13 = vpop.f32.mrb[24].mxu1  ;;  %v3719_v16 = vadd.f32 %v2996_v8, %v3572_v3  ;;  %v924_v24 = vpop.f32.mrb[25].mxu0 }
 0x11f   : > { %v3722_v21 = vadd.f32 %v3092_v13, %v3572_v3  ;;  %v1244_v29 = vpop.f32.mrb[25].mxu1  ;;  %v3725_v32 = vadd.f32 %v3572_v3, %v924_v24 }
 0x120   : > { %v3728_v37 = vadd.f32 %v3572_v3, %v1244_v29 }
 0x121   : > { %5811 = vst [vmem:[#allocation27_spill] sm:$0xff] %v3722_v21  ;;  %v2999_v40 = vpop.f32.mrb[26].mxu0 }
 0x122   : > { %5812 = vst [vmem:[#allocation28_spill] sm:$0xff] %v3728_v37  ;;  %v3095_v45 = vpop.f32.mrb[26].mxu1  ;;  %v3731_v48 = vadd.f32 %v2999_v40, %v3572_v3  ;;  %v934_v56 = vpop.f32.mrb[27].mxu0 }
 0x123   : > { %v3734_v53 = vadd.f32 %v3095_v45, %v3572_v3  ;;  %v1254_v61 = vpop.f32.mrb[27].mxu1  ;;  %v3737_v0 = vadd.f32 %v3572_v3, %v934_v56 }
 0x124   : > { %v3740_v8 = vadd.f32 %v3572_v3, %v1254_v61 }
 0x125   : > { %5813 = vst [vmem:[#allocation29_spill] sm:$0xff] %v3734_v53  ;;  %v3002_v13 = vpop.f32.mrb[28].mxu0 }
 0x126   : > { %5814 = vst [vmem:[#allocation30_spill] sm:$0xff] %v3740_v8  ;;  %v3098_v24 = vpop.f32.mrb[28].mxu1  ;;  %v3743_v29 = vadd.f32 %v3002_v13, %v3572_v3  ;;  %v944_v40 = vpop.f32.mrb[29].mxu0 }
 0x127   : > { %v3746_v21 = vadd.f32 %v3098_v24, %v3572_v3  ;;  %v1264_v37 = vpop.f32.mrb[29].mxu1  ;;  %v3749_v45 = vadd.f32 %v3572_v3, %v944_v40 }
 0x128   : > { %v3752_v53 = vadd.f32 %v3572_v3, %v1264_v37 }
 0x129   : > { %5815 = vst [vmem:[#allocation31_spill] sm:$0xff] %v3746_v21  ;;  %v3005_v56 = vpop.f32.mrb[30].mxu0 }
 0x12a   : > { %5816 = vst [vmem:[#allocation32_spill] sm:$0xff] %v3752_v53  ;;  %v3101_v60 = vpop.f32.mrb[30].mxu1  ;;  %v3755_v61 = vadd.f32 %v3005_v56, %v3572_v3  ;;  %v954_v13 = vpop.f32.mrb[31].mxu0 }
 0x12b   : > { %v3758_v8 = vadd.f32 %v3101_v60, %v3572_v3  ;;  %v1274_v5 = vpop.f32.mrb[31].mxu1  ;;  %v3761_v24 = vadd.f32 %v3572_v3, %v954_v13 }
 0x12c   : > { %v3764_v21 = vadd.f32 %v3572_v3, %v1274_v5 }
 0x12d   : > { %5817 = vst [vmem:[#allocation33_spill] sm:$0xff] %v3758_v8  ;;  %v3008_v40 = vpop.f32.mrb[32].mxu0 }
 0x12e   : > { %5818 = vst [vmem:[#allocation34_spill] sm:$0xff] %v3764_v21  ;;  %v3104_v44 = vpop.f32.mrb[32].mxu1  ;;  %v3767_v37 = vadd.f32 %v3008_v40, %v3572_v3  ;;  %v964_v56 = vpop.f32.mrb[33].mxu0 }
 0x12f   : > { %v3770_v53 = vadd.f32 %v3104_v44, %v3572_v3  ;;  %v1284_v52 = vpop.f32.mrb[33].mxu1  ;;  %v3773_v60 = vadd.f32 %v3572_v3, %v964_v56 }
 0x130   : > { %v3776_v8 = vadd.f32 %v3572_v3, %v1284_v52 }
 0x131   : > { %5819 = vst [vmem:[#allocation35_spill] sm:$0xff] %v3770_v53  ;;  %v3011_v13 = vpop.f32.mrb[34].mxu0 }
 0x132   : > { %5820 = vst [vmem:[#allocation36_spill] sm:$0xff] %v3776_v8  ;;  %v3107_v28 = vpop.f32.mrb[34].mxu1  ;;  %v3779_v5 = vadd.f32 %v3011_v13, %v3572_v3  ;;  %v974_v40 = vpop.f32.mrb[35].mxu0 }
 0x133   : > { %v3782_v21 = vadd.f32 %v3107_v28, %v3572_v3  ;;  %v1294_v36 = vpop.f32.mrb[35].mxu1  ;;  %v3785_v44 = vadd.f32 %v3572_v3, %v974_v40 }
 0x134   : > { %v3788_v53 = vadd.f32 %v3572_v3, %v1294_v36 }
 0x135   : > { %5821 = vst [vmem:[#allocation37_spill] sm:$0xff] %v3782_v21  ;;  %v3014_v56 = vpop.f32.mrb[36].mxu0 }
 0x136   : > { %5822 = vst [vmem:[#allocation38_spill] sm:$0xff] %v3788_v53  ;;  %v3110_v12 = vpop.f32.mrb[36].mxu1  ;;  %v3791_v52 = vadd.f32 %v3014_v56, %v3572_v3  ;;  %v984_v13 = vpop.f32.mrb[37].mxu0 }
 0x137   : > { %v3794_v8 = vadd.f32 %v3110_v12, %v3572_v3  ;;  %v1304_v20 = vpop.f32.mrb[37].mxu1  ;;  %v3797_v28 = vadd.f32 %v3572_v3, %v984_v13 }
 0x138   : > { %v3800_v21 = vadd.f32 %v3572_v3, %v1304_v20 }
 0x139   : > { %5823 = vst [vmem:[#allocation39_spill] sm:$0xff] %v3794_v8  ;;  %v3017_v40 = vpop.f32.mrb[38].mxu0 }
 0x13a   : > { %5824 = vst [vmem:[#allocation40_spill] sm:$0xff] %v3800_v21  ;;  %v3113_v63 = vpop.f32.mrb[38].mxu1  ;;  %v3803_v36 = vadd.f32 %v3017_v40, %v3572_v3  ;;  %v994_v56 = vpop.f32.mrb[39].mxu0 }
 0x13b   : > { %v3806_v53 = vadd.f32 %v3113_v63, %v3572_v3  ;;  %v1314_v4 = vpop.f32.mrb[39].mxu1  ;;  %v3809_v12 = vadd.f32 %v3572_v3, %v994_v56 }
 0x13c   : > { %v3812_v8 = vadd.f32 %v3572_v3, %v1314_v4 }
 0x13d   : > { %5825 = vst [vmem:[#allocation41_spill] sm:$0xff] %v3806_v53  ;;  %v3020_v13 = vpop.f32.mrb[40].mxu0 }
 0x13e   : > { %5826 = vst [vmem:[#allocation42_spill] sm:$0xff] %v3812_v8  ;;  %v3116_v55 = vpop.f32.mrb[40].mxu1  ;;  %v3815_v20 = vadd.f32 %v3020_v13, %v3572_v3  ;;  %v1004_v40 = vpop.f32.mrb[41].mxu0 }
 0x13f   : > { %v3818_v21 = vadd.f32 %v3116_v55, %v3572_v3  ;;  %v1324_v59 = vpop.f32.mrb[41].mxu1  ;;  %v3821_v63 = vadd.f32 %v3572_v3, %v1004_v40 }
 0x140   : > { %v3824_v53 = vadd.f32 %v3572_v3, %v1324_v59 }
 0x141   : > { %5827 = vst [vmem:[#allocation43_spill] sm:$0xff] %v3818_v21  ;;  %v3023_v56 = vpop.f32.mrb[42].mxu0 }
 0x142   : > { %5828 = vst [vmem:[#allocation44_spill] sm:$0xff] %v3824_v53  ;;  %v3119_v47 = vpop.f32.mrb[42].mxu1  ;;  %v3827_v4 = vadd.f32 %v3023_v56, %v3572_v3  ;;  %v1014_v13 = vpop.f32.mrb[43].mxu0 }
 0x143   : > { %v3830_v8 = vadd.f32 %v3119_v47, %v3572_v3  ;;  %v1334_v51 = vpop.f32.mrb[43].mxu1  ;;  %v3833_v55 = vadd.f32 %v3572_v3, %v1014_v13 }
 0x144   : > { %v3836_v21 = vadd.f32 %v3572_v3, %v1334_v51 }
 0x145   : > { %5829 = vst [vmem:[#allocation45_spill] sm:$0xff] %v3830_v8  ;;  %v3026_v40 = vpop.f32.mrb[44].mxu0 }
 0x146   : > { %5830 = vst [vmem:[#allocation46_spill] sm:$0xff] %v3836_v21  ;;  %v3122_v39 = vpop.f32.mrb[44].mxu1  ;;  %v3839_v59 = vadd.f32 %v3026_v40, %v3572_v3  ;;  %v1024_v56 = vpop.f32.mrb[45].mxu0 }
 0x147   : > { %v3842_v53 = vadd.f32 %v3122_v39, %v3572_v3  ;;  %v1344_v43 = vpop.f32.mrb[45].mxu1  ;;  %v3845_v47 = vadd.f32 %v3572_v3, %v1024_v56 }
 0x148   : > { %v3848_v8 = vadd.f32 %v3572_v3, %v1344_v43 }
 0x149   : > { %5831 = vst [vmem:[#allocation47_spill] sm:$0xff] %v3842_v53  ;;  %v3029_v13 = vpop.f32.mrb[46].mxu0 }
 0x14a   : > { %5832 = vst [vmem:[#allocation48_spill] sm:$0xff] %v3848_v8  ;;  %v3125_v31 = vpop.f32.mrb[46].mxu1  ;;  %v3851_v51 = vadd.f32 %v3029_v13, %v3572_v3  ;;  %v1034_v40 = vpop.f32.mrb[47].mxu0 }
 0x14b   : > { %v3854_v21 = vadd.f32 %v3125_v31, %v3572_v3  ;;  %v1354_v35 = vpop.f32.mrb[47].mxu1  ;;  %v3857_v39 = vadd.f32 %v3572_v3, %v1034_v40 }
 0x14c   : > { %5833 = vst [vmem:[#allocation49_spill] sm:$0xff] %v3851_v51  ;;  %v3860_v53 = vadd.f32 %v3572_v3, %v1354_v35 }
 0x14d   : > { %5834 = vst [vmem:[#allocation50_spill] sm:$0xff] %v3854_v21  ;;  %5835 = vst [vmem:[#allocation51_spill] sm:$0xff] %v3857_v39  ;;  %v3032_v56 = vpop.f32.mrb[48].mxu0 }
 0x14e   : > { %5836 = vst [vmem:[#allocation52_spill] sm:$0xff] %v3860_v53  ;;  %v3128_v23 = vpop.f32.mrb[48].mxu1  ;;  %v3863_v43 = vadd.f32 %v3032_v56, %v3572_v3  ;;  %v1044_v13 = vpop.f32.mrb[49].mxu0 }
 0x14f   : > { %v3866_v8 = vadd.f32 %v3128_v23, %v3572_v3  ;;  %v1364_v27 = vpop.f32.mrb[49].mxu1  ;;  %v3869_v31 = vadd.f32 %v3572_v3, %v1044_v13 }
 0x150   : > { %5837 = vst [vmem:[#allocation53_spill] sm:$0xff] %v3863_v43  ;;  %v3872_v21 = vadd.f32 %v3572_v3, %v1364_v27 }
 0x151   : > { %5838 = vst [vmem:[#allocation54_spill] sm:$0xff] %v3866_v8  ;;  %5839 = vst [vmem:[#allocation55_spill] sm:$0xff] %v3869_v31  ;;  %v3035_v40 = vpop.f32.mrb[50].mxu0 }
 0x152   : > { %5840 = vst [vmem:[#allocation56_spill] sm:$0xff] %v3872_v21  ;;  %v3131_v15 = vpop.f32.mrb[50].mxu1  ;;  %v3875_v35 = vadd.f32 %v3035_v40, %v3572_v3  ;;  %v1054_v56 = vpop.f32.mrb[51].mxu0 }
 0x153   : > { %v3878_v53 = vadd.f32 %v3131_v15, %v3572_v3  ;;  %v1374_v19 = vpop.f32.mrb[51].mxu1  ;;  %v3881_v23 = vadd.f32 %v3572_v3, %v1054_v56 }
 0x154   : > { %5841 = vst [vmem:[#allocation57_spill] sm:$0xff] %v3875_v35  ;;  %v3884_v8 = vadd.f32 %v3572_v3, %v1374_v19 }
 0x155   : > { %5842 = vst [vmem:[#allocation58_spill] sm:$0xff] %v3878_v53  ;;  %5843 = vst [vmem:[#allocation59_spill] sm:$0xff] %v3881_v23  ;;  %v3038_v13 = vpop.f32.mrb[52].mxu0 }
 0x156   : > { %5844 = vst [vmem:[#allocation60_spill] sm:$0xff] %v3884_v8  ;;  %v3134_v7 = vpop.f32.mrb[52].mxu1  ;;  %v3887_v27 = vadd.f32 %v3038_v13, %v3572_v3  ;;  %v1064_v40 = vpop.f32.mrb[53].mxu0 }
 0x157   : > { %v3890_v21 = vadd.f32 %v3134_v7, %v3572_v3  ;;  %v1384_v11 = vpop.f32.mrb[53].mxu1  ;;  %v3893_v15 = vadd.f32 %v3572_v3, %v1064_v40 }
 0x158   : > { %5845 = vst [vmem:[#allocation61_spill] sm:$0xff] %v3887_v27  ;;  %v3896_v53 = vadd.f32 %v3572_v3, %v1384_v11 }
 0x159   : > { %5846 = vst [vmem:[#allocation62_spill] sm:$0xff] %v3890_v21  ;;  %5847 = vst [vmem:[#allocation63_spill] sm:$0xff] %v3893_v15  ;;  %v3041_v56 = vpop.f32.mrb[54].mxu0 }
 0x15a   : > { %5848 = vst [vmem:[#allocation64_spill] sm:$0xff] %v3896_v53  ;;  %v3137_v35 = vpop.f32.mrb[54].mxu1  ;;  %v3899_v19 = vadd.f32 %v3041_v56, %v3572_v3  ;;  %v1074_v13 = vpop.f32.mrb[55].mxu0 }
 0x15b   : > { %v3902_v8 = vadd.f32 %v3137_v35, %v3572_v3  ;;  %v1394_v27 = vpop.f32.mrb[55].mxu1  ;;  %v3905_v7 = vadd.f32 %v3572_v3, %v1074_v13 }
 0x15c   : > { %5849 = vst [vmem:[#allocation65_spill] sm:$0xff] %v3899_v19  ;;  %v3908_v21 = vadd.f32 %v3572_v3, %v1394_v27 }
 0x15d   : > { %5850 = vst [vmem:[#allocation66_spill] sm:$0xff] %v3902_v8  ;;  %5851 = vst [vmem:[#allocation67_spill] sm:$0xff] %v3905_v7  ;;  %v3044_v40 = vpop.f32.mrb[56].mxu0 }
 0x15e   : > { %5852 = vst [vmem:[#allocation68_spill] sm:$0xff] %v3908_v21  ;;  %v3140_v15 = vpop.f32.mrb[56].mxu1  ;;  %v3911_v11 = vadd.f32 %v3044_v40, %v3572_v3  ;;  %v1084_v56 = vpop.f32.mrb[57].mxu0 }
 0x15f   : > { %v3914_v53 = vadd.f32 %v3140_v15, %v3572_v3  ;;  %v1404_v19 = vpop.f32.mrb[57].mxu1  ;;  %v3917_v35 = vadd.f32 %v3572_v3, %v1084_v56 }
 0x160   : > { %5853 = vst [vmem:[#allocation69_spill] sm:$0xff] %v3911_v11  ;;  %v3920_v8 = vadd.f32 %v3572_v3, %v1404_v19 }
 0x161   : > { %5854 = vst [vmem:[#allocation70_spill] sm:$0xff] %v3914_v53  ;;  %5855 = vst [vmem:[#allocation71_spill] sm:$0xff] %v3917_v35  ;;  %v3047_v13 = vpop.f32.mrb[58].mxu0 }
 0x162   : > { %5856 = vst [vmem:[#allocation72_spill] sm:$0xff] %v3920_v8  ;;  %v3143_v7 = vpop.f32.mrb[58].mxu1  ;;  %v3923_v27 = vadd.f32 %v3047_v13, %v3572_v3  ;;  %v1094_v40 = vpop.f32.mrb[59].mxu0 }
 0x163   : > { %v3926_v21 = vadd.f32 %v3143_v7, %v3572_v3  ;;  %v1414_v11 = vpop.f32.mrb[59].mxu1  ;;  %v3929_v15 = vadd.f32 %v3572_v3, %v1094_v40 }
 0x164   : > { %5857 = vst [vmem:[#allocation73_spill] sm:$0xff] %v3923_v27  ;;  %v3932_v53 = vadd.f32 %v3572_v3, %v1414_v11 }
 0x165   : > { %5858 = vst [vmem:[#allocation74_spill] sm:$0xff] %v3926_v21  ;;  %5859 = vst [vmem:[#allocation75_spill] sm:$0xff] %v3929_v15  ;;  %v3050_v56 = vpop.f32.mrb[60].mxu0 }
 0x166   : > { %5860 = vst [vmem:[#allocation76_spill] sm:$0xff] %v3932_v53  ;;  %v3146_v35 = vpop.f32.mrb[60].mxu1  ;;  %v3935_v19 = vadd.f32 %v3050_v56, %v3572_v3  ;;  %v1104_v13 = vpop.f32.mrb[61].mxu0 }
 0x167   : > { %v3938_v8 = vadd.f32 %v3146_v35, %v3572_v3  ;;  %v1424_v27 = vpop.f32.mrb[61].mxu1  ;;  %v3941_v7 = vadd.f32 %v3572_v3, %v1104_v13 }
 0x168   : > { %5861 = vst [vmem:[#allocation77_spill] sm:$0xff] %v3935_v19  ;;  %v3944_v21 = vadd.f32 %v3572_v3, %v1424_v27  ;;  %1446 = sbr.rel (%p2821_p7) target bundleno = 429 (0x1ad), region = 36  ;;  %v3242_v27 = vmov (!%p2821_p7), 0.0  }
 0x169   : > { %5862 = vst [vmem:[#allocation78_spill] sm:$0xff] %v3938_v8  ;;  %5863 = vst [vmem:[#allocation79_spill] sm:$0xff] %v3941_v7  ;;  %v3053_v40 = vpop.f32.mrb[62].mxu0 }
 0x16a   : > { %5864 = vst [vmem:[#allocation80_spill] sm:$0xff] %v3944_v21  ;;  %v3149_v15 = vpop.f32.mrb[62].mxu1  ;;  %v3947_v11 = vadd.f32 %v3053_v40, %v3572_v3  ;;  %v1114_v56 = vpop.f32.mrb[63].mxu0  ;;  %1448 = vst.msk [vmem:[#allocation2] sm:$0xff] (!%p2821_p7), %vm1447_vm4, %v3242_v27 }
 0x16b   : > { %v3950_v53 = vadd.f32 %v3149_v15, %v3572_v3  ;;  %v1434_v19 = vpop.f32.mrb[63].mxu1  ;;  %v3953_v35 = vadd.f32 %v3572_v3, %v1114_v56  ;;  %1449 = vst.msk [vmem:[#allocation2 + $0x8] sm:$0xff] (!%p2821_p7), %vm1447_vm4, %v3242_v27  ;;  %1450 = vst.msk [vmem:[#allocation2 + $0x10] sm:$0xff] (!%p2821_p7), %vm1447_vm4, %v3242_v27 }
 0x16c   : > { %5865 = vst [vmem:[#allocation81_spill] sm:$0xff] %v3947_v11  ;;  %v3956_v8 = vadd.f32 %v3572_v3, %v1434_v19  ;;  %1451 = vst.msk [vmem:[#allocation2 + $0x18] sm:$0xff] (!%p2821_p7), %vm1447_vm4, %v3242_v27 }
 0x16d   : > { %5866 = vst [vmem:[#allocation82_spill] sm:$0xff] %v3950_v53  ;;  %5867 = vst [vmem:[#allocation83_spill] sm:$0xff] %v3953_v35 }
 0x16e   : > { %5868 = vst [vmem:[#allocation84_spill] sm:$0xff] %v3956_v8  ;;  %1452 = vst.msk [vmem:[#allocation2 + $0x20] sm:$0xff] (!%p2821_p7), %vm1447_vm4, %v3242_v27 }
 0x16f   : > { %1453 = vst.msk [vmem:[#allocation2 + $0x28] sm:$0xff] %vm1447_vm4, %v3242_v27  ;;  %1454 = vst.msk [vmem:[#allocation2 + $0x30] sm:$0xff] %vm1447_vm4, %v3242_v27 }
 0x170   : > { %1455 = vst.msk [vmem:[#allocation2 + $0x38] sm:$0xff] %vm1447_vm4, %v3242_v27  ;;  %1456 = vst.msk [vmem:[#allocation2 + $0x40] sm:$0xff] %vm1447_vm4, %v3242_v27 }
 0x171   : > { %1457 = vst.msk [vmem:[#allocation2 + $0x48] sm:$0xff] %vm1447_vm4, %v3242_v27  ;;  %1458 = vst.msk [vmem:[#allocation2 + $0x50] sm:$0xff] %vm1447_vm4, %v3242_v27 }
 0x172   : > { %1459 = vst.msk [vmem:[#allocation2 + $0x58] sm:$0xff] %vm1447_vm4, %v3242_v27  ;;  %1460 = vst.msk [vmem:[#allocation2 + $0x60] sm:$0xff] %vm1447_vm4, %v3242_v27 }
 0x173   : > { %1461 = vst.msk [vmem:[#allocation2 + $0x68] sm:$0xff] %vm1447_vm4, %v3242_v27  ;;  %1462 = vst.msk [vmem:[#allocation2 + $0x70] sm:$0xff] %vm1447_vm4, %v3242_v27 }
 0x174   : > { %1463 = vst.msk [vmem:[#allocation2 + $0x78] sm:$0xff] %vm1447_vm4, %v3242_v27  ;;  %1464 = vst.msk [vmem:[#allocation2 + $0x80] sm:$0xff] %vm1447_vm4, %v3242_v27 }
 0x175   : > { %1465 = vst.msk [vmem:[#allocation2 + $0x88] sm:$0xff] %vm1447_vm4, %v3242_v27  ;;  %1466 = vst.msk [vmem:[#allocation2 + $0x90] sm:$0xff] %vm1447_vm4, %v3242_v27 }
 0x176   : > { %1467 = vst.msk [vmem:[#allocation2 + $0x98] sm:$0xff] %vm1447_vm4, %v3242_v27  ;;  %1468 = vst.msk [vmem:[#allocation2 + $0xa0] sm:$0xff] %vm1447_vm4, %v3242_v27 }
 0x177   : > { %1469 = vst.msk [vmem:[#allocation2 + $0xa8] sm:$0xff] %vm1447_vm4, %v3242_v27  ;;  %1470 = vst.msk [vmem:[#allocation2 + $0xb0] sm:$0xff] %vm1447_vm4, %v3242_v27 }
 0x178   : > { %1471 = vst.msk [vmem:[#allocation2 + $0xb8] sm:$0xff] %vm1447_vm4, %v3242_v27  ;;  %1472 = vst.msk [vmem:[#allocation2 + $0xc0] sm:$0xff] %vm1447_vm4, %v3242_v27 }
 0x179   : > { %1473 = vst.msk [vmem:[#allocation2 + $0xc8] sm:$0xff] %vm1447_vm4, %v3242_v27  ;;  %1474 = vst.msk [vmem:[#allocation2 + $0xd0] sm:$0xff] %vm1447_vm4, %v3242_v27 }
 0x17a   : > { %1475 = vst.msk [vmem:[#allocation2 + $0xd8] sm:$0xff] %vm1447_vm4, %v3242_v27  ;;  %1476 = vst.msk [vmem:[#allocation2 + $0xe0] sm:$0xff] %vm1447_vm4, %v3242_v27 }
 0x17b   : > { %1477 = vst.msk [vmem:[#allocation2 + $0xe8] sm:$0xff] %vm1447_vm4, %v3242_v27  ;;  %1478 = vst.msk [vmem:[#allocation2 + $0xf0] sm:$0xff] %vm1447_vm4, %v3242_v27 }
 0x17c   : > { %1479 = vst.msk [vmem:[#allocation2 + $0xf8] sm:$0xff] %vm1447_vm4, %v3242_v27  ;;  %1480 = vst.msk [vmem:[#allocation2 + $0x100] sm:$0xff] %vm1447_vm4, %v3242_v27 }
 0x17d   : > { %1481 = vst.msk [vmem:[#allocation2 + $0x108] sm:$0xff] %vm1447_vm4, %v3242_v27  ;;  %1482 = vst.msk [vmem:[#allocation2 + $0x110] sm:$0xff] %vm1447_vm4, %v3242_v27 }
 0x17e   : > { %1483 = vst.msk [vmem:[#allocation2 + $0x118] sm:$0xff] %vm1447_vm4, %v3242_v27  ;;  %1484 = vst.msk [vmem:[#allocation2 + $0x120] sm:$0xff] %vm1447_vm4, %v3242_v27 }
 0x17f   : > { %1485 = vst.msk [vmem:[#allocation2 + $0x128] sm:$0xff] %vm1447_vm4, %v3242_v27  ;;  %1486 = vst.msk [vmem:[#allocation2 + $0x130] sm:$0xff] %vm1447_vm4, %v3242_v27 }
 0x180   : > { %1487 = vst.msk [vmem:[#allocation2 + $0x138] sm:$0xff] %vm1447_vm4, %v3242_v27  ;;  %1488 = vst.msk [vmem:[#allocation2 + $0x140] sm:$0xff] %vm1447_vm4, %v3242_v27 }
 0x181   : > { %1489 = vst.msk [vmem:[#allocation2 + $0x148] sm:$0xff] %vm1447_vm4, %v3242_v27  ;;  %1490 = vst.msk [vmem:[#allocation2 + $0x150] sm:$0xff] %vm1447_vm4, %v3242_v27 }
 0x182   : > { %1491 = vst.msk [vmem:[#allocation2 + $0x158] sm:$0xff] %vm1447_vm4, %v3242_v27  ;;  %1492 = vst.msk [vmem:[#allocation2 + $0x160] sm:$0xff] %vm1447_vm4, %v3242_v27 }
 0x183   : > { %1493 = vst.msk [vmem:[#allocation2 + $0x168] sm:$0xff] %vm1447_vm4, %v3242_v27  ;;  %1494 = vst.msk [vmem:[#allocation2 + $0x170] sm:$0xff] %vm1447_vm4, %v3242_v27 }
 0x184   : > { %1495 = vst.msk [vmem:[#allocation2 + $0x178] sm:$0xff] %vm1447_vm4, %v3242_v27  ;;  %1496 = vst.msk [vmem:[#allocation2 + $0x180] sm:$0xff] %vm1447_vm4, %v3242_v27 }
 0x185   : > { %1497 = vst.msk [vmem:[#allocation2 + $0x188] sm:$0xff] %vm1447_vm4, %v3242_v27  ;;  %1498 = vst.msk [vmem:[#allocation2 + $0x190] sm:$0xff] %vm1447_vm4, %v3242_v27 }
 0x186   : > { %1499 = vst.msk [vmem:[#allocation2 + $0x198] sm:$0xff] %vm1447_vm4, %v3242_v27  ;;  %1500 = vst.msk [vmem:[#allocation2 + $0x1a0] sm:$0xff] %vm1447_vm4, %v3242_v27 }
 0x187   : > { %1501 = vst.msk [vmem:[#allocation2 + $0x1a8] sm:$0xff] %vm1447_vm4, %v3242_v27  ;;  %1502 = vst.msk [vmem:[#allocation2 + $0x1b0] sm:$0xff] %vm1447_vm4, %v3242_v27 }
 0x188   : > { %1503 = vst.msk [vmem:[#allocation2 + $0x1b8] sm:$0xff] %vm1447_vm4, %v3242_v27  ;;  %1504 = vst.msk [vmem:[#allocation2 + $0x1c0] sm:$0xff] %vm1447_vm4, %v3242_v27 }
 0x189   : > { %1505 = vst.msk [vmem:[#allocation2 + $0x1c8] sm:$0xff] %vm1447_vm4, %v3242_v27  ;;  %1506 = vst.msk [vmem:[#allocation2 + $0x1d0] sm:$0xff] %vm1447_vm4, %v3242_v27 }
 0x18a   : > { %1507 = vst.msk [vmem:[#allocation2 + $0x1d8] sm:$0xff] %vm1447_vm4, %v3242_v27  ;;  %1508 = vst.msk [vmem:[#allocation2 + $0x1e0] sm:$0xff] %vm1447_vm4, %v3242_v27 }
 0x18b   : > { %1509 = vst.msk [vmem:[#allocation2 + $0x1e8] sm:$0xff] %vm1447_vm4, %v3242_v27  ;;  %1510 = vst.msk [vmem:[#allocation2 + $0x1f0] sm:$0xff] %vm1447_vm4, %v3242_v27 }
 0x18c   : > { %1511 = vst.msk [vmem:[#allocation2 + $0x1f8] sm:$0xff] %vm1447_vm4, %v3242_v27  ;;  %1512 = vst.msk [vmem:[#allocation2 + $0x200] sm:$0xff] %vm1447_vm4, %v3242_v27 }
 0x18d   : > { %1513 = vst.msk [vmem:[#allocation2 + $0x208] sm:$0xff] %vm1447_vm4, %v3242_v27  ;;  %1514 = vst.msk [vmem:[#allocation2 + $0x210] sm:$0xff] %vm1447_vm4, %v3242_v27 }
 0x18e   : > { %1515 = vst.msk [vmem:[#allocation2 + $0x218] sm:$0xff] %vm1447_vm4, %v3242_v27  ;;  %1516 = vst.msk [vmem:[#allocation2 + $0x220] sm:$0xff] %vm1447_vm4, %v3242_v27 }
 0x18f   : > { %1517 = vst.msk [vmem:[#allocation2 + $0x228] sm:$0xff] %vm1447_vm4, %v3242_v27  ;;  %1518 = vst.msk [vmem:[#allocation2 + $0x230] sm:$0xff] %vm1447_vm4, %v3242_v27 }
 0x190   : > { %1519 = vst.msk [vmem:[#allocation2 + $0x238] sm:$0xff] %vm1447_vm4, %v3242_v27  ;;  %1520 = vst.msk [vmem:[#allocation2 + $0x240] sm:$0xff] %vm1447_vm4, %v3242_v27 }
 0x191   : > { %1521 = vst.msk [vmem:[#allocation2 + $0x248] sm:$0xff] %vm1447_vm4, %v3242_v27  ;;  %1522 = vst.msk [vmem:[#allocation2 + $0x250] sm:$0xff] %vm1447_vm4, %v3242_v27 }
 0x192   : > { %1523 = vst.msk [vmem:[#allocation2 + $0x258] sm:$0xff] %vm1447_vm4, %v3242_v27  ;;  %1524 = vst.msk [vmem:[#allocation2 + $0x260] sm:$0xff] %vm1447_vm4, %v3242_v27 }
 0x193   : > { %1525 = vst.msk [vmem:[#allocation2 + $0x268] sm:$0xff] %vm1447_vm4, %v3242_v27  ;;  %1526 = vst.msk [vmem:[#allocation2 + $0x270] sm:$0xff] %vm1447_vm4, %v3242_v27 }
 0x194   : > { %1527 = vst.msk [vmem:[#allocation2 + $0x278] sm:$0xff] %vm1447_vm4, %v3242_v27  ;;  %1528 = vst.msk [vmem:[#allocation2 + $0x280] sm:$0xff] %vm1447_vm4, %v3242_v27 }
 0x195   : > { %1529 = vst.msk [vmem:[#allocation2 + $0x288] sm:$0xff] %vm1447_vm4, %v3242_v27  ;;  %1530 = vst.msk [vmem:[#allocation2 + $0x290] sm:$0xff] %vm1447_vm4, %v3242_v27 }
 0x196   : > { %1531 = vst.msk [vmem:[#allocation2 + $0x298] sm:$0xff] %vm1447_vm4, %v3242_v27  ;;  %1532 = vst.msk [vmem:[#allocation2 + $0x2a0] sm:$0xff] %vm1447_vm4, %v3242_v27 }
 0x197   : > { %1533 = vst.msk [vmem:[#allocation2 + $0x2a8] sm:$0xff] %vm1447_vm4, %v3242_v27  ;;  %1534 = vst.msk [vmem:[#allocation2 + $0x2b0] sm:$0xff] %vm1447_vm4, %v3242_v27 }
 0x198   : > { %1535 = vst.msk [vmem:[#allocation2 + $0x2b8] sm:$0xff] %vm1447_vm4, %v3242_v27  ;;  %1536 = vst.msk [vmem:[#allocation2 + $0x2c0] sm:$0xff] %vm1447_vm4, %v3242_v27 }
 0x199   : > { %1537 = vst.msk [vmem:[#allocation2 + $0x2c8] sm:$0xff] %vm1447_vm4, %v3242_v27  ;;  %1538 = vst.msk [vmem:[#allocation2 + $0x2d0] sm:$0xff] %vm1447_vm4, %v3242_v27 }
 0x19a   : > { %1539 = vst.msk [vmem:[#allocation2 + $0x2d8] sm:$0xff] %vm1447_vm4, %v3242_v27  ;;  %1540 = vst.msk [vmem:[#allocation2 + $0x2e0] sm:$0xff] %vm1447_vm4, %v3242_v27 }
 0x19b   : > { %1541 = vst.msk [vmem:[#allocation2 + $0x2e8] sm:$0xff] %vm1447_vm4, %v3242_v27  ;;  %1542 = vst.msk [vmem:[#allocation2 + $0x2f0] sm:$0xff] %vm1447_vm4, %v3242_v27 }
 0x19c   : > { %1543 = vst.msk [vmem:[#allocation2 + $0x2f8] sm:$0xff] %vm1447_vm4, %v3242_v27  ;;  %1544 = vst.msk [vmem:[#allocation2 + $0x300] sm:$0xff] %vm1447_vm4, %v3242_v27 }
 0x19d   : > { %1545 = vst.msk [vmem:[#allocation2 + $0x308] sm:$0xff] %vm1447_vm4, %v3242_v27  ;;  %1546 = vst.msk [vmem:[#allocation2 + $0x310] sm:$0xff] %vm1447_vm4, %v3242_v27 }
 0x19e   : > { %1547 = vst.msk [vmem:[#allocation2 + $0x318] sm:$0xff] %vm1447_vm4, %v3242_v27  ;;  %1548 = vst.msk [vmem:[#allocation2 + $0x320] sm:$0xff] %vm1447_vm4, %v3242_v27 }
 0x19f   : > { %1549 = vst.msk [vmem:[#allocation2 + $0x328] sm:$0xff] %vm1447_vm4, %v3242_v27  ;;  %1550 = vst.msk [vmem:[#allocation2 + $0x330] sm:$0xff] %vm1447_vm4, %v3242_v27 }
 0x1a0   : > { %1551 = vst.msk [vmem:[#allocation2 + $0x338] sm:$0xff] %vm1447_vm4, %v3242_v27  ;;  %1552 = vst.msk [vmem:[#allocation2 + $0x340] sm:$0xff] %vm1447_vm4, %v3242_v27 }
 0x1a1   : > { %1553 = vst.msk [vmem:[#allocation2 + $0x348] sm:$0xff] %vm1447_vm4, %v3242_v27  ;;  %1554 = vst.msk [vmem:[#allocation2 + $0x350] sm:$0xff] %vm1447_vm4, %v3242_v27 }
 0x1a2   : > { %1555 = vst.msk [vmem:[#allocation2 + $0x358] sm:$0xff] %vm1447_vm4, %v3242_v27  ;;  %1556 = vst.msk [vmem:[#allocation2 + $0x360] sm:$0xff] %vm1447_vm4, %v3242_v27 }
 0x1a3   : > { %1557 = vst.msk [vmem:[#allocation2 + $0x368] sm:$0xff] %vm1447_vm4, %v3242_v27  ;;  %1558 = vst.msk [vmem:[#allocation2 + $0x370] sm:$0xff] %vm1447_vm4, %v3242_v27 }
 0x1a4   : > { %1559 = vst.msk [vmem:[#allocation2 + $0x378] sm:$0xff] %vm1447_vm4, %v3242_v27  ;;  %1560 = vst.msk [vmem:[#allocation2 + $0x380] sm:$0xff] %vm1447_vm4, %v3242_v27 }
 0x1a5   : > { %1561 = vst.msk [vmem:[#allocation2 + $0x388] sm:$0xff] %vm1447_vm4, %v3242_v27  ;;  %1562 = vst.msk [vmem:[#allocation2 + $0x390] sm:$0xff] %vm1447_vm4, %v3242_v27 }
 0x1a6   : > { %1563 = vst.msk [vmem:[#allocation2 + $0x398] sm:$0xff] %vm1447_vm4, %v3242_v27  ;;  %1564 = vst.msk [vmem:[#allocation2 + $0x3a0] sm:$0xff] %vm1447_vm4, %v3242_v27 }
 0x1a7   : > { %1565 = vst.msk [vmem:[#allocation2 + $0x3a8] sm:$0xff] %vm1447_vm4, %v3242_v27  ;;  %1566 = vst.msk [vmem:[#allocation2 + $0x3b0] sm:$0xff] %vm1447_vm4, %v3242_v27 }
 0x1a8   : > { %1567 = vst.msk [vmem:[#allocation2 + $0x3b8] sm:$0xff] %vm1447_vm4, %v3242_v27  ;;  %1568 = vst.msk [vmem:[#allocation2 + $0x3c0] sm:$0xff] %vm1447_vm4, %v3242_v27 }
 0x1a9   : > { %1569 = vst.msk [vmem:[#allocation2 + $0x3c8] sm:$0xff] %vm1447_vm4, %v3242_v27  ;;  %1570 = vst.msk [vmem:[#allocation2 + $0x3d0] sm:$0xff] %vm1447_vm4, %v3242_v27 }
 0x1aa   : > { %1571 = vst.msk [vmem:[#allocation2 + $0x3d8] sm:$0xff] %vm1447_vm4, %v3242_v27  ;;  %1572 = vst.msk [vmem:[#allocation2 + $0x3e0] sm:$0xff] %vm1447_vm4, %v3242_v27 }
 0x1ab   : > { %1573 = vst.msk [vmem:[#allocation2 + $0x3e8] sm:$0xff] %vm1447_vm4, %v3242_v27  ;;  %1574 = vst.msk [vmem:[#allocation2 + $0x3f0] sm:$0xff] %vm1447_vm4, %v3242_v27 }
 0x1ac   : > { %1575 = vst.msk [vmem:[#allocation2 + $0x3f8] sm:$0xff] %vm1447_vm4, %v3242_v27 }
 0x1ad PF: > { %vm5705_vm5 = vcmask 261120   ;;  %v1583_v43 = vld [vmem:[#allocation2 + $0x38] sm:$0xff] }
 0x1af   : > { %v1576_v3 = vld [vmem:[#allocation2] sm:$0xff] }
 0x1b0   : > { %v1577_v15 = vld [vmem:[#allocation2 + $0x8] sm:$0xff]  ;;  %v1578_v19 = vld [vmem:[#allocation2 + $0x10] sm:$0xff]  ;;  %v1704_v13 = vmul.f32 0.3, %v1576_v3 }
 0x1b1   : > { %v1705_v40 = vmul.f32 0.3, %v1577_v15  ;;  %v1706_v56 = vmul.f32 0.3, %v1578_v19  ;;  %v1579_v53 = vld [vmem:[#allocation2 + $0x18] sm:$0xff]  ;;  %v1585_v19 = vld [vmem:[#allocation2 + $0x48] sm:$0xff] }
 0x1b2   : > { %v4216_v11 = vadd.f32 %v1704_v13, %v3581_v10  ;;  %v1707_v27 = vmul.f32 0.3, %v1579_v53  ;;  %v1711_v13 = vmul.f32 0.3, %v1583_v43  ;;  %v1588_v43 = vld [vmem:[#allocation2 + $0x60] sm:$0xff] }
 0x1b3   : > { %v1580_v8 = vld [vmem:[#allocation2 + $0x20] sm:$0xff]  ;;  %v4219_v35 = vadd.f32 %v1705_v40, %v3575_v6  ;;  %v4222_v7 = vadd.f32 %v1706_v56, %v3593_v18  ;;  %v1586_v40 = vld [vmem:[#allocation2 + $0x50] sm:$0xff]  ;;  %v1587_v56 = vld [vmem:[#allocation2 + $0x58] sm:$0xff] }
 0x1b4   : > { %v1581_v21 = vld [vmem:[#allocation2 + $0x28] sm:$0xff]  ;;  %v1582_v23 = vld [vmem:[#allocation2 + $0x30] sm:$0xff]  ;;  %v1708_v31 = vmul.f32 0.3, %v1580_v8  ;;  %vm1960_vm6 = vcmp.ge.f32.partialorder %v4216_v11, 0.5  ;;  %v4228_v10 = vadd.f32 %v1707_v27, %v3587_v14  ;;  %v1584_v6 = vld [vmem:[#allocation2 + $0x40] sm:$0xff] }
 0x1b5   : > { %v1709_v3 = vmul.f32 0.3, %v1581_v21  ;;  %v1710_v15 = vmul.f32 0.3, %v1582_v23  ;;  %vm1961_vm7 = vcmp.ge.f32.partialorder %v4219_v35, 0.5  ;;  %vm1962_vm8 = vcmp.ge.f32.partialorder %v4222_v7, 0.5 }
 0x1b6   : > { %v2088_v18 = vsel %vm1960_vm6, 0.0, %v4216_v11  ;;  %v2089_v21 = vsel %vm1961_vm7, 0.0, %v4219_v35  ;;  %v2090_v53 = vsel %vm1962_vm8, 0.0, %v4222_v7  ;;  %v4240_v8 = vadd.f32 %v1708_v31, %v3605_v26 }
 0x1b7   : > { %2217 = vst.msk [vmem:[#allocation2] sm:$0xff] %vm5705_vm5, %v2088_v18  ;;  %2218 = vst.msk [vmem:[#allocation2 + $0x8] sm:$0xff] %vm5705_vm5, %v2089_v21  ;;  %vm1963_vm9 = vcmp.ge.f32.partialorder %v4228_v10, 0.5  ;;  %v4247_v14 = vadd.f32 %v1709_v3, %v3599_v22  ;;  %v4250_v23 = vadd.f32 %v1710_v15, %v3617_v34  ;;  %v1712_v31 = vmul.f32 0.3, %v1584_v6  ;;  %v1589_v18 = vld [vmem:[#allocation2 + $0x68] sm:$0xff] }
 0x1b8   : > { %2219 = vst.msk [vmem:[#allocation2 + $0x10] sm:$0xff] %vm5705_vm5, %v2090_v53  ;;  %v2091_v26 = vsel %vm1963_vm9, 0.0, %v4228_v10  ;;  %vm1964_vm10 = vcmp.ge.f32.partialorder %v4240_v8, 0.5  ;;  %v1713_v27 = vmul.f32 0.3, %v1585_v19  ;;  %v4263_v34 = vadd.f32 %v1711_v13, %v3611_v30  ;;  %v1590_v30 = vld [vmem:[#allocation2 + $0x70] sm:$0xff] }
 0x1b9   : > { %2220 = vst.msk [vmem:[#allocation2 + $0x18] sm:$0xff] %vm5705_vm5, %v2091_v26  ;;  %v2092_v22 = vsel %vm1964_vm10, 0.0, %v4240_v8  ;;  %vm1965_vm11 = vcmp.ge.f32.partialorder %v4247_v14, 0.5  ;;  %vm1966_vm12 = vcmp.ge.f32.partialorder %v4250_v23, 0.5  ;;  %v4273_v6 = vadd.f32 %v1712_v31, %v3629_v42  ;;  %v1591_v21 = vld [vmem:[#allocation2 + $0x78] sm:$0xff]  ;;  %v1592_v26 = vld [vmem:[#allocation2 + $0x80] sm:$0xff] }
 0x1ba   : > { %2221 = vst.msk [vmem:[#allocation2 + $0x20] sm:$0xff] %vm5705_vm5, %v2092_v22  ;;  %v2093_v3 = vsel %vm1965_vm11, 0.0, %v4247_v14  ;;  %v2094_v15 = vsel %vm1966_vm12, 0.0, %v4250_v23  ;;  %v4276_v19 = vadd.f32 %v1713_v27, %v3623_v38  ;;  %vm1967_vm13 = vcmp.ge.f32.partialorder %v4263_v34, 0.5  ;;  %v1593_v31 = vld [vmem:[#allocation2 + $0x88] sm:$0xff] }
 0x1bb   : > { %2222 = vst.msk [vmem:[#allocation2 + $0x28] sm:$0xff] %vm5705_vm5, %v2093_v3  ;;  %2223 = vst.msk [vmem:[#allocation2 + $0x30] sm:$0xff] %vm5705_vm5, %v2094_v15  ;;  %v1714_v53 = vmul.f32 0.3, %v1586_v40  ;;  %v1715_v13 = vmul.f32 0.3, %v1587_v56 }
 0x1bc   : > { %v2095_v42 = vsel %vm1967_vm13, 0.0, %v4263_v34  ;;  %vm1968_vm14 = vcmp.ge.f32.partialorder %v4273_v6, 0.5  ;;  %vm5704_vm15 = vcmp.ge.f32.partialorder %v4276_v19, 0.5  ;;  %v1716_v38 = vmul.f32 0.3, %v1588_v43  ;;  %v1594_v3 = vld [vmem:[#allocation2 + $0x90] sm:$0xff] }
 0x1bd   : > { %2224 = vst.msk [vmem:[#allocation2 + $0x38] sm:$0xff] %vm5705_vm5, %v2095_v42  ;;  %v2096_v27 = vsel %vm1968_vm14, 0.0, %v4273_v6  ;;  %v2097_v40 = vsel %vm5704_vm15, 0.0, %v4276_v19  ;;  %v4294_v56 = vadd.f32 %v1714_v53, %v3641_v50  ;;  %v4297_v22 = vadd.f32 %v1715_v13, %v3635_v46  ;;  %v1595_v15 = vld [vmem:[#allocation2 + $0x98] sm:$0xff] }
 0x1be   : > { %2225 = vst.msk [vmem:[#allocation2 + $0x40] sm:$0xff] %vm5705_vm5, %v2096_v27  ;;  %2226 = vst.msk [vmem:[#allocation2 + $0x48] sm:$0xff] %vm5705_vm5, %v2097_v40  ;;  %v4302_v43 = vadd.f32 %v1716_v38, %v3653_v58  ;;  %v1717_v42 = vmul.f32 0.3, %v1589_v18  ;;  %v1718_v51 = vmul.f32 0.3, %v1590_v30 }
 0x1bf   : > { %v1719_v39 = vmul.f32 0.3, %v1591_v21  ;;  %vm5703_vm0 = vcmp.ge.f32.partialorder %v4294_v56, 0.5  ;;  %vm5683_vm1 = vcmp.ge.f32.partialorder %v4297_v22, 0.5  ;;  %v1720_v50 = vmul.f32 0.3, %v1592_v26 }
 0x1c0   : > { %v1721_v53 = vmul.f32 0.3, %v1593_v31  ;;  %v2098_v46 = vsel %vm5703_vm0, 0.0, %v4294_v56  ;;  %v2099_v13 = vsel %vm5683_vm1, 0.0, %v4297_v22  ;;  %vm5682_vm2 = vcmp.ge.f32.partialorder %v4302_v43, 0.5  ;;  %v1596_v38 = vld [vmem:[#allocation2 + $0xa0] sm:$0xff] }
 0x1c1   : > { %v4314_v58 = vadd.f32 %v1717_v42, %v3647_v54  ;;  %2227 = vst.msk [vmem:[#allocation2 + $0x50] sm:$0xff] %vm5705_vm5, %v2098_v46  ;;  %2228 = vst.msk [vmem:[#allocation2 + $0x58] sm:$0xff] %vm5705_vm5, %v2099_v13  ;;  %v2100_v18 = vsel %vm5682_vm2, 0.0, %v4302_v43  ;;  %v4322_v30 = vadd.f32 %v1718_v51, %v3665_v2  ;;  %v4325_v21 = vadd.f32 %v1719_v39, %v3659_v62  ;;  %v1597_v40 = vld [vmem:[#allocation2 + $0xa8] sm:$0xff]  ;;  %v1598_v62 = vld [vmem:[#allocation2 + $0xb0] sm:$0xff] }
 0x1c2   : > { %v4328_v26 = vadd.f32 %v1720_v50, %v3677_v17  ;;  %2229 = vst.msk [vmem:[#allocation2 + $0x60] sm:$0xff] %vm5705_vm5, %v2100_v18  ;;  %v4333_v54 = vadd.f32 %v1721_v53, %v3671_v9  ;;  %v1722_v31 = vmul.f32 0.3, %v1594_v3  ;;  %v1723_v27 = vmul.f32 0.3, %v1595_v15  ;;  %v1599_v17 = vld [vmem:[#allocation2 + $0xb8] sm:$0xff] }
 0x1c3   : > { %vm5684_vm3 = vcmp.ge.f32.partialorder %v4314_v58, 0.5  ;;  %vm5690_vm4 = vcmp.ge.f32.partialorder %v4322_v30, 0.5  ;;  %vm5686_vm2 = vcmp.ge.f32.partialorder %v4325_v21, 0.5  ;;  %v1600_v3 = vld [vmem:[#allocation2 + $0xc0] sm:$0xff]  ;;  %v1724_v53 = vmul.f32 0.3, %v1596_v38 }
 0x1c4   : > { %v2101_v2 = vsel %vm5684_vm3, 0.0, %v4314_v58  ;;  %vm5685_vm1 = vcmp.ge.f32.partialorder %v4328_v26, 0.5  ;;  %v2102_v9 = vsel %vm5690_vm4, 0.0, %v4322_v30  ;;  %v2103_v51 = vsel %vm5686_vm2, 0.0, %v4325_v21  ;;  %v1601_v46 = vld [vmem:[#allocation2 + $0xc8] sm:$0xff]  ;;  %v1627_v6 = vld [vmem:[#allocation2 + $0x198] sm:$0xff] }
 0x1c5   : > { %2230 = vst.msk [vmem:[#allocation2 + $0x68] sm:$0xff] %vm5705_vm5, %v2101_v2  ;;  %v2104_v39 = vsel %vm5685_vm1, 0.0, %v4328_v26  ;;  %vm5687_vm3 = vcmp.ge.f32.partialorder %v4333_v54, 0.5  ;;  %2231 = vst.msk [vmem:[#allocation2 + $0x70] sm:$0xff] %vm5705_vm5, %v2102_v9  ;;  %v4359_v42 = vadd.f32 %v1722_v31, %v3689_v33  ;;  %v4362_v50 = vadd.f32 %v1723_v27, %v3683_v25  ;;  %v1602_v33 = vld [vmem:[#allocation2 + $0xd0] sm:$0xff] }
 0x1c6   : > { %2232 = vst.msk [vmem:[#allocation2 + $0x78] sm:$0xff] %vm5705_vm5, %v2103_v51  ;;  %2233 = vst.msk [vmem:[#allocation2 + $0x80] sm:$0xff] %vm5705_vm5, %v2104_v39  ;;  %v2105_v15 = vsel %vm5687_vm3, 0.0, %v4333_v54  ;;  %v1725_v13 = vmul.f32 0.3, %v1597_v40  ;;  %v4368_v9 = vadd.f32 %v1724_v53, %v3701_v49  ;;  %v1604_v39 = vld [vmem:[#allocation2 + $0xe0] sm:$0xff] }
 0x1c7   : > { %2234 = vst.msk [vmem:[#allocation2 + $0x88] sm:$0xff] %vm5705_vm5, %v2105_v15  ;;  %v1726_v18 = vmul.f32 0.3, %v1598_v62  ;;  %v1727_v2 = vmul.f32 0.3, %v1599_v17  ;;  %vm5689_vm1 = vcmp.ge.f32.partialorder %v4359_v42, 0.5 }
 0x1c8   : > { %vm5688_vm2 = vcmp.ge.f32.partialorder %v4362_v50, 0.5  ;;  %v1728_v51 = vmul.f32 0.3, %v1600_v3  ;;  %v2106_v25 = vsel %vm5689_vm1, 0.0, %v4359_v42  ;;  %v4377_v31 = vadd.f32 %v1725_v13, %v3695_v41  ;;  %v1603_v17 = vld [vmem:[#allocation2 + $0xd8] sm:$0xff]  ;;  %v1605_v3 = vld [vmem:[#allocation2 + $0xe8] sm:$0xff] }
 0x1c9   : > { %v2107_v38 = vsel %vm5688_vm2, 0.0, %v4362_v50  ;;  %v4380_v27 = vadd.f32 %v1726_v18, %v3713_v1  ;;  %2235 = vst.msk [vmem:[#allocation2 + $0x90] sm:$0xff] %vm5705_vm5, %v2106_v25  ;;  %vm5691_vm3 = vcmp.ge.f32.partialorder %v4368_v9, 0.5  ;;  %v4386_v49 = vadd.f32 %v1727_v2, %v3707_v57  ;;  %v1606_v15 = vld [vmem:[#allocation2 + $0xf0] sm:$0xff]  ;;  %v1607_v53 = vld [vmem:[#allocation2 + $0xf8] sm:$0xff] }
 0x1ca   : > { %2236 = vst.msk [vmem:[#allocation2 + $0x98] sm:$0xff] %vm5705_vm5, %v2107_v38  ;;  %v4389_v40 = vadd.f32 %v1728_v51, %v3725_v32  ;;  %v1729_v62 = vmul.f32 0.3, %v1601_v46  ;;  %v2108_v41 = vsel %vm5691_vm3, 0.0, %v4368_v9  ;;  %vm5697_vm2 = vcmp.ge.f32.partialorder %v4377_v31, 0.5  ;;  %v1608_v51 = vld [vmem:[#allocation2 + $0x100] sm:$0xff] }
 0x1cb   : > { %vm5696_vm1 = vcmp.ge.f32.partialorder %v4380_v27, 0.5  ;;  %v1730_v1 = vmul.f32 0.3, %v1602_v33  ;;  %2237 = vst.msk [vmem:[#allocation2 + $0xa0] sm:$0xff] %vm5705_vm5, %v2108_v41  ;;  %v2109_v57 = vsel %vm5697_vm2, 0.0, %v4377_v31  ;;  %vm5692_vm4 = vcmp.ge.f32.partialorder %v4386_v49, 0.5 }
 0x1cc   : > { %v2110_v32 = vsel %vm5696_vm1, 0.0, %v4380_v27  ;;  %vm5693_vm3 = vcmp.ge.f32.partialorder %v4389_v40, 0.5  ;;  %2238 = vst.msk [vmem:[#allocation2 + $0xa8] sm:$0xff] %vm5705_vm5, %v2109_v57  ;;  %v2111_v46 = vsel %vm5692_vm4, 0.0, %v4386_v49  ;;  %v4414_v18 = vadd.f32 %v1729_v62, %v3719_v16  ;;  %v1609_v33 = vld [vmem:[#allocation2 + $0x108] sm:$0xff]  ;;  %v1610_v25 = vld [vmem:[#allocation2 + $0x110] sm:$0xff] }
 0x1cd   : > { %2239 = vst.msk [vmem:[#allocation2 + $0xb0] sm:$0xff] %vm5705_vm5, %v2110_v32  ;;  %v2112_v13 = vsel %vm5693_vm3, 0.0, %v4389_v40  ;;  %v4417_v2 = vadd.f32 %v1730_v1, %v3737_v0  ;;  %2240 = vst.msk [vmem:[#allocation2 + $0xb8] sm:$0xff] %vm5705_vm5, %v2111_v46  ;;  %v1731_v38 = vmul.f32 0.3, %v1603_v17  ;;  %v1611_v46 = vld [vmem:[#allocation2 + $0x118] sm:$0xff] }
 0x1ce   : > { %2241 = vst.msk [vmem:[#allocation2 + $0xc0] sm:$0xff] %vm5705_vm5, %v2112_v13  ;;  %v1732_v41 = vmul.f32 0.3, %v1604_v39  ;;  %v1733_v57 = vmul.f32 0.3, %v1605_v3  ;;  %vm5695_vm4 = vcmp.ge.f32.partialorder %v4414_v18, 0.5 }
 0x1cf   : > { %vm5694_vm3 = vcmp.ge.f32.partialorder %v4417_v2, 0.5  ;;  %v1734_v32 = vmul.f32 0.3, %v1606_v15  ;;  %v1735_v16 = vmul.f32 0.3, %v1607_v53  ;;  %v2113_v0 = vsel %vm5695_vm4, 0.0, %v4414_v18 }
 0x1d0   : > { %v2114_v62 = vsel %vm5694_vm3, 0.0, %v4417_v2  ;;  %v4430_v1 = vadd.f32 %v1731_v38, %v3731_v48  ;;  %v4433_v17 = vadd.f32 %v1732_v41, %v3749_v45  ;;  %2242 = vst.msk [vmem:[#allocation2 + $0xc8] sm:$0xff] %vm5705_vm5, %v2113_v0  ;;  %v4438_v39 = vadd.f32 %v1733_v57, %v3743_v29 }
 0x1d1   : > { %2243 = vst.msk [vmem:[#allocation2 + $0xd0] sm:$0xff] %vm5705_vm5, %v2114_v62  ;;  %v4441_v3 = vadd.f32 %v1734_v32, %v3761_v24  ;;  %v4444_v15 = vadd.f32 %v1735_v16, %v3755_v61  ;;  %v1736_v53 = vmul.f32 0.3, %v1608_v51  ;;  %v1737_v48 = vmul.f32 0.3, %v1609_v33  ;;  %v1612_v61 = vld [vmem:[#allocation2 + $0x120] sm:$0xff] }
 0x1d2   : > { %vm5702_vm3 = vcmp.ge.f32.partialorder %v4430_v1, 0.5  ;;  %vm5698_vm4 = vcmp.ge.f32.partialorder %v4433_v17, 0.5  ;;  %v1738_v45 = vmul.f32 0.3, %v1610_v25  ;;  %vm5700_vm1 = vcmp.ge.f32.partialorder %v4438_v39, 0.5  ;;  %v1613_v24 = vld [vmem:[#allocation2 + $0x128] sm:$0xff] }
 0x1d3   : > { %v2115_v13 = vsel %vm5702_vm3, 0.0, %v4430_v1  ;;  %v2116_v29 = vsel %vm5698_vm4, 0.0, %v4433_v17  ;;  %vm5699_vm2 = vcmp.ge.f32.partialorder %v4441_v3, 0.5  ;;  %v2117_v51 = vsel %vm5700_vm1, 0.0, %v4438_v39  ;;  %v1614_v16 = vld [vmem:[#allocation2 + $0x130] sm:$0xff] }
 0x1d4   : > { %2244 = vst.msk [vmem:[#allocation2 + $0xd8] sm:$0xff] %vm5705_vm5, %v2115_v13  ;;  %2245 = vst.msk [vmem:[#allocation2 + $0xe0] sm:$0xff] %vm5705_vm5, %v2116_v29  ;;  %v2118_v33 = vsel %vm5699_vm2, 0.0, %v4441_v3  ;;  %vm5701_vm4 = vcmp.ge.f32.partialorder %v4444_v15, 0.5  ;;  %v1864_v25 = vadd.f32 %v1736_v53, %v3773_v60  ;;  %v1865_v41 = vadd.f32 %v1737_v48, %v3767_v37  ;;  %v1615_v60 = vld [vmem:[#allocation2 + $0x138] sm:$0xff]  ;;  %v6091_v13 = vld [vmem:[#allocation41_spill] sm:$0xff] }
 0x1d5   : > { %2246 = vst.msk [vmem:[#allocation2 + $0xe8] sm:$0xff] %vm5705_vm5, %v2117_v51  ;;  %2247 = vst.msk [vmem:[#allocation2 + $0xf0] sm:$0xff] %vm5705_vm5, %v2118_v33  ;;  %v2119_v38 = vsel %vm5701_vm4, 0.0, %v4444_v15  ;;  %v1866_v57 = vadd.f32 %v1738_v45, %v3785_v44  ;;  %v1739_v32 = vmul.f32 0.3, %v1611_v46  ;;  %v1616_v44 = vld [vmem:[#allocation2 + $0x140] sm:$0xff] }
 0x1d6   : > { %2248 = vst.msk [vmem:[#allocation2 + $0xf8] sm:$0xff] %vm5705_vm5, %v2119_v38  ;;  %vm1992_vm2 = vcmp.ge.f32.partialorder %v1864_v25, 0.5  ;;  %v1740_v0 = vmul.f32 0.3, %v1612_v61  ;;  %v1741_v62 = vmul.f32 0.3, %v1613_v24 }
 0x1d7   : > { %v2120_v53 = vsel %vm1992_vm2, 0.0, %v1864_v25  ;;  %vm4476_vm1 = vmor %vm1960_vm6, %vm1992_vm2  ;;  %vm1993_vm4 = vcmp.ge.f32.partialorder %v1865_v41, 0.5  ;;  %vm1994_vm3 = vcmp.ge.f32.partialorder %v1866_v57, 0.5  ;;  %v1867_v37 = vadd.f32 %v1739_v32, %v3779_v5  ;;  %v1617_v46 = vld [vmem:[#allocation2 + $0x148] sm:$0xff]  ;;  %v1618_v24 = vld [vmem:[#allocation2 + $0x150] sm:$0xff] }
 0x1d8   : > { %2249 = vst.msk [vmem:[#allocation2 + $0x100] sm:$0xff] %vm5705_vm5, %v2120_v53  ;;  %v2121_v48 = vsel %vm1993_vm4, 0.0, %v1865_v41  ;;  %vm4484_vm0 = vmor %vm1961_vm7, %vm1993_vm4  ;;  %v2122_v11 = vsel %vm1994_vm3, 0.0, %v1866_v57  ;;  %v1868_v29 = vadd.f32 %v1740_v0, %v3797_v28  ;;  %v1869_v61 = vadd.f32 %v1741_v62, %v3791_v52  ;;  %v1619_v51 = vld [vmem:[#allocation2 + $0x158] sm:$0xff]  ;;  %v1620_v25 = vld [vmem:[#allocation2 + $0x160] sm:$0xff] }
 0x1d9   : > { %2250 = vst.msk [vmem:[#allocation2 + $0x108] sm:$0xff] %vm5705_vm5, %v2121_v48  ;;  %2251 = vst.msk [vmem:[#allocation2 + $0x110] sm:$0xff] %vm5705_vm5, %v2122_v11  ;;  %vm1995_vm7 = vcmp.ge.f32.partialorder %v1867_v37, 0.5  ;;  %v1742_v35 = vmul.f32 0.3, %v1614_v16  ;;  %v1621_v41 = vld [vmem:[#allocation2 + $0x168] sm:$0xff] }
 0x1da   : > { %vm4494_vm6 = vmor %vm1962_vm8, %vm1994_vm3  ;;  %v1743_v33 = vmul.f32 0.3, %v1615_v60  ;;  %v2123_v38 = vsel %vm1995_vm7, 0.0, %v1867_v37  ;;  %vm1996_vm4 = vcmp.ge.f32.partialorder %v1868_v29, 0.5  ;;  %vm1997_vm15 = vcmp.ge.f32.partialorder %v1869_v61, 0.5  ;;  %v1622_v0 = vld [vmem:[#allocation2 + $0x170] sm:$0xff] }
 0x1db   : > { %vm4500_vm2 = vmor %vm1963_vm9, %vm1995_vm7  ;;  %v1744_v28 = vmul.f32 0.3, %v1616_v44  ;;  %2252 = vst.msk [vmem:[#allocation2 + $0x118] sm:$0xff] %vm5705_vm5, %v2123_v38  ;;  %v2124_v7 = vsel %vm1996_vm4, 0.0, %v1868_v29  ;;  %v2125_v32 = vsel %vm1997_vm15, 0.0, %v1869_v61  ;;  %v1870_v10 = vadd.f32 %v1742_v35, %v3809_v12  ;;  %v1623_v62 = vld [vmem:[#allocation2 + $0x178] sm:$0xff] }
 0x1dc   : > { %vm4507_vm8 = vmor %vm1964_vm10, %vm1996_vm4  ;;  %v1871_v16 = vadd.f32 %v1743_v33, %v3803_v36  ;;  %2253 = vst.msk [vmem:[#allocation2 + $0x120] sm:$0xff] %vm5705_vm5, %v2124_v7  ;;  %v5879_v60 = vmov 0  ;;  %v1745_v53 = vmul.f32 0.3, %v1617_v46  ;;  %v1746_v37 = vmul.f32 0.3, %v1618_v24 }
 0x1dd   : > { %2254 = vst.msk [vmem:[#allocation2 + $0x128] sm:$0xff] %vm5705_vm5, %v2125_v32  ;;  %vm4517_vm9 = vmor %vm1965_vm11, %vm1997_vm15  ;;  %v1872_v8 = vadd.f32 %v1744_v28, %v3821_v63  ;;  %v1747_v44 = vmul.f32 0.3, %v1619_v51  ;;  %vm1998_vm10 = vcmp.ge.f32.partialorder %v1870_v10, 0.5  ;;  %v1748_v36 = vmul.f32 0.3, %v1620_v25 }
 0x1de   : > { %v5880_v60 = vsel %vm4517_vm9, 4294967295, %v5879_v60  ;;  %vm1999_vm3 = vcmp.ge.f32.partialorder %v1871_v16, 0.5  ;;  %v1749_v12 = vmul.f32 0.3, %v1621_v41  ;;  %v2126_v48 = vsel %vm1998_vm10, 0.0, %v1870_v10  ;;  %vm4524_vm7 = vmor %vm1966_vm12, %vm1998_vm10  ;;  %v1624_v51 = vld [vmem:[#allocation2 + $0x180] sm:$0xff] }
 0x1df   : > { %v5881_v11 = vmov 0  ;;  %v2127_v14 = vsel %vm1999_vm3, 0.0, %v1871_v16  ;;  %vm2000_vm11 = vcmp.ge.f32.partialorder %v1872_v8, 0.5  ;;  %v1873_v29 = vadd.f32 %v1745_v53, %v3815_v20  ;;  %2255 = vst.msk [vmem:[#allocation2 + $0x130] sm:$0xff] %vm5705_vm5, %v2126_v48  ;;  %vm4533_vm15 = vmor %vm1967_vm13, %vm1999_vm3  ;;  %v1625_v25 = vld [vmem:[#allocation2 + $0x188] sm:$0xff]  ;;  %v1628_v41 = vld [vmem:[#allocation2 + $0x1a0] sm:$0xff] }
 0x1e0   : > { %v5882_v11 = vsel %vm4524_vm7, 4294967295, %v5881_v11  ;;  %2256 = vst.msk [vmem:[#allocation2 + $0x138] sm:$0xff] %vm5705_vm5, %v2127_v14  ;;  %v5883_v63 = vmov 0  ;;  %v2128_v46 = vsel %vm2000_vm11, 0.0, %v1872_v8  ;;  %v1874_v23 = vadd.f32 %v1746_v37, %v3833_v55  ;;  %vm4543_vm12 = vmor %vm1968_vm14, %vm2000_vm11  ;;  %v5900_v32 = vld [vmem:[#allocation51_spill] sm:$0xff]  ;;  %v5901_v16 = vld [vmem:[#allocation49_spill] sm:$0xff] }
 0x1e1   : > { %v5884_v63 = vsel %vm4533_vm15, 4294967295, %v5883_v63  ;;  %v1875_v61 = vadd.f32 %v1747_v44, %v3827_v4  ;;  %v1876_v24 = vadd.f32 %v1748_v36, %v3845_v47  ;;  %2257 = vst.msk [vmem:[#allocation2 + $0x140] sm:$0xff] %vm5705_vm5, %v2128_v46  ;;  %v5885_v20 = vmov 0  ;;  %v1626_v47 = vld [vmem:[#allocation2 + $0x190] sm:$0xff]  ;;  %v1629_v8 = vld [vmem:[#allocation2 + $0x1a8] sm:$0xff]  ;;  %v6178_v52 = vld [vmem:[#allocation78_spill] sm:$0xff] }
 0x1e2   : > { %v5886_v20 = vsel %vm4543_vm12, 4294967295, %v5885_v20  ;;  %vm2001_vm13 = vcmp.ge.f32.partialorder %v1873_v29, 0.5  ;;  %v1877_v34 = vadd.f32 %v1749_v12, %v3839_v59  ;;  %v1750_v35 = vmul.f32 0.3, %v1622_v0  ;;  %v5909_v12 = vld [vmem:[#allocation55_spill] sm:$0xff]  ;;  %v1630_v14 = vld [vmem:[#allocation2 + $0x1b0] sm:$0xff] }
 0x1e3   : > { %v1751_v33 = vmul.f32 0.3, %v1623_v62  ;;  %v2129_v55 = vsel %vm2001_vm13, 0.0, %v1873_v29  ;;  %vm5887_vm4 = vcmp.ge.f32.partialorder %v4276_v19, 0.5  ;;  %v5888_v4 = vmov 0 }
 0x1e4   : > { %vm4550_vm10 = vmor %vm5887_vm4, %vm2001_vm13  ;;  %vm2002_vm3 = vcmp.ge.f32.partialorder %v1874_v23, 0.5  ;;  %vm2003_vm5 = vcmp.ge.f32.partialorder %v1875_v61, 0.5  ;;  %vm2004_vm15 = vcmp.ge.f32.partialorder %v1876_v24, 0.5  ;;  %vm5890_vm14 = vcmask 261120  }
 0x1e5   : > { %v5889_v4 = vsel %vm4550_vm10, 4294967295, %v5888_v4  ;;  %2258 = vst.msk [vmem:[#allocation2 + $0x148] sm:$0xff] %vm5890_vm14, %v2129_v55  ;;  %v2130_v38 = vsel %vm2002_vm3, 0.0, %v1874_v23  ;;  %vm5891_vm11 = vcmp.ge.f32.partialorder %v4294_v56, 0.5  ;;  %v5892_v59 = vmov 0  ;;  %vm5894_vm4 = vmmov %vm5890_vm14 }
 0x1e6   : > { %vm4557_vm12 = vmor %vm5891_vm11, %vm2002_vm3  ;;  %v2131_v28 = vsel %vm2003_vm5, 0.0, %v1875_v61  ;;  %v2132_v19 = vsel %vm2004_vm15, 0.0, %v1876_v24  ;;  %vm2005_vm13 = vcmp.ge.f32.partialorder %v1877_v34, 0.5  ;;  %2259 = vst.msk [vmem:[#allocation2 + $0x150] sm:$0xff] %vm5894_vm4, %v2130_v38  ;;  %vm5896_vm7 = vcmp.ge.f32.partialorder %v4297_v22, 0.5  ;;  %v5913_v61 = vld [vmem:[#allocation53_spill] sm:$0xff] }
 0x1e7   : > { %v5893_v59 = vsel %vm4557_vm12, 4294967295, %v5892_v59  ;;  %vm5895_vm10 = vmmov %vm5894_vm4  ;;  %v5897_v7 = vmov 0  ;;  %v2133_v56 = vsel %vm2005_vm13, 0.0, %v1877_v34  ;;  %v1878_v10 = vadd.f32 %v1750_v35, %v5900_v32  ;;  %v5914_v24 = vld [vmem:[#allocation59_spill] sm:$0xff]  ;;  %v1631_v34 = vld [vmem:[#allocation2 + $0x1b8] sm:$0xff] }
 0x1e8   : > { %2260 = vst.msk [vmem:[#allocation2 + $0x158] sm:$0xff] %vm5895_vm10, %v2131_v28  ;;  %vm4566_vm9 = vmor %vm5896_vm7, %vm2003_vm5  ;;  %v1879_v0 = vadd.f32 %v1751_v33, %v5901_v16  ;;  %v1752_v62 = vmul.f32 0.3, %v1624_v51  ;;  %vm5902_vm3 = vcmp.ge.f32.partialorder %v4302_v43, 0.5  ;;  %v5903_v53 = vmov 0  ;;  %v1633_v38 = vld [vmem:[#allocation2 + $0x1c8] sm:$0xff] }
 0x1e9   : > { %v5898_v7 = vsel %vm4566_vm9, 4294967295, %v5897_v7  ;;  %vm5899_vm14 = vmmov %vm5894_vm4  ;;  %v1753_v22 = vmul.f32 0.3, %v1625_v25  ;;  %v1754_v37 = vmul.f32 0.3, %v1626_v47  ;;  %vm5906_vm7 = vcmp.ge.f32.partialorder %v4314_v58, 0.5 }
 0x1ea   : > { %2261 = vst.msk [vmem:[#allocation2 + $0x160] sm:$0xff] %vm5899_vm14, %v2132_v19  ;;  %vm4577_vm10 = vmor %vm5902_vm3, %vm2004_vm15  ;;  %v1755_v44 = vmul.f32 0.3, %v1627_v6  ;;  %v5907_v36 = vmov 0  ;;  %vm2007_vm14 = vcmp.ge.f32.partialorder %v1879_v0, 0.5  ;;  %v1880_v43 = vadd.f32 %v1752_v62, %v5909_v12  ;;  %v5920_v25 = vld [vmem:[#allocation63_spill] sm:$0xff] }
 0x1eb   : > { %v5904_v53 = vsel %vm4577_vm10, 4294967295, %v5903_v53  ;;  %vm5905_vm5 = vmmov %vm5894_vm4  ;;  %vm2006_vm4 = vcmp.ge.f32.partialorder %v1878_v10, 0.5  ;;  %v1756_v48 = vmul.f32 0.3, %v1628_v41  ;;  %vm5910_vm15 = vcmp.ge.f32.partialorder %v4322_v30, 0.5  ;;  %v5919_v30 = vld [vmem:[#allocation57_spill] sm:$0xff] }
 0x1ec   : > { %2262 = vst.msk [vmem:[#allocation2 + $0x168] sm:$0xff] %vm5905_vm5, %v2133_v56  ;;  %vm4585_vm11 = vmor %vm5906_vm7, %vm2005_vm13  ;;  %v2134_v29 = vsel %vm2006_vm4, 0.0, %v1878_v10  ;;  %v5911_v46 = vmov 0  ;;  %v2135_v23 = vsel %vm2007_vm14, 0.0, %v1879_v0  ;;  %v1881_v58 = vadd.f32 %v1753_v22, %v5913_v61  ;;  %v1632_v6 = vld [vmem:[#allocation2 + $0x1c0] sm:$0xff]  ;;  %v1634_v41 = vld [vmem:[#allocation2 + $0x1d0] sm:$0xff] }
 0x1ed   : > { %v5908_v36 = vsel %vm4585_vm11, 4294967295, %v5907_v36  ;;  %vm4592_vm3 = vmor %vm5910_vm15, %vm2006_vm4  ;;  %v1882_v51 = vadd.f32 %v1754_v37, %v5914_v24  ;;  %2264 = vst.msk [vmem:[#allocation2 + $0x178] sm:$0xff] %vm5905_vm5, %v2135_v23  ;;  %vm5916_vm7 = vcmp.ge.f32.partialorder %v4325_v21, 0.5  ;;  %v5917_v35 = vmov 0  ;;  %v1636_v16 = vld [vmem:[#allocation2 + $0x1e0] sm:$0xff]  ;;  %v1637_v12 = vld [vmem:[#allocation2 + $0x1e8] sm:$0xff] }
 0x1ee   : > { %v5912_v46 = vsel %vm4592_vm3, 4294967295, %v5911_v46  ;;  %vm5915_vm13 = vmmov %vm5905_vm5  ;;  %vm2008_vm4 = vcmp.ge.f32.partialorder %v1880_v43, 0.5  ;;  %v1883_v33 = vadd.f32 %v1755_v44, %v5919_v30  ;;  %v1884_v55 = vadd.f32 %v1756_v48, %v5920_v25  ;;  %v5934_v37 = vld [vmem:[#allocation67_spill] sm:$0xff] }
 0x1ef   : > { %2263 = vst.msk [vmem:[#allocation2 + $0x170] sm:$0xff] %vm5915_vm13, %v2134_v29  ;;  %vm4602_vm11 = vmor %vm5916_vm7, %vm2007_vm14  ;;  %v1757_v47 = vmul.f32 0.3, %v1629_v8  ;;  %v2136_v28 = vsel %vm2008_vm4, 0.0, %v1880_v43  ;;  %vm5921_vm15 = vcmp.ge.f32.partialorder %v4328_v26, 0.5  ;;  %v5922_v19 = vmov 0 }
 0x1f0   : > { %v5918_v35 = vsel %vm4602_vm11, 4294967295, %v5917_v35  ;;  %vm4610_vm13 = vmor %vm5921_vm15, %vm2008_vm4  ;;  %vm2009_vm5 = vcmp.ge.f32.partialorder %v1881_v58, 0.5  ;;  %vm2010_vm14 = vcmp.ge.f32.partialorder %v1882_v51, 0.5  ;;  %v1758_v21 = vmul.f32 0.3, %v1630_v14  ;;  %v1635_v26 = vld [vmem:[#allocation2 + $0x1d8] sm:$0xff] }
 0x1f1   : > { %v5923_v19 = vsel %vm4610_vm13, 4294967295, %v5922_v19  ;;  %vm5924_vm7 = vcmask 261120   ;;  %v2137_v56 = vsel %vm2009_vm5, 0.0, %v1881_v58  ;;  %vm5925_vm11 = vcmp.ge.f32.partialorder %v4333_v54, 0.5  ;;  %v5933_v8 = vld [vmem:[#allocation61_spill] sm:$0xff] }
 0x1f2   : > { %2265 = vst.msk [vmem:[#allocation2 + $0x180] sm:$0xff] %vm5924_vm7, %v2136_v28  ;;  %vm4617_vm3 = vmor %vm5925_vm11, %vm2009_vm5  ;;  %v5926_v32 = vmov 0  ;;  %v2138_v10 = vsel %vm2010_vm14, 0.0, %v1882_v51  ;;  %vm2011_vm10 = vcmp.ge.f32.partialorder %v1883_v33, 0.5  ;;  %vm2012_vm9 = vcmp.ge.f32.partialorder %v1884_v55, 0.5  ;;  %v1638_v43 = vld [vmem:[#allocation2 + $0x1f0] sm:$0xff] }
 0x1f3   : > { %v5927_v32 = vsel %vm4617_vm3, 4294967295, %v5926_v32  ;;  %vm5928_vm4 = vmmov %vm5924_vm7  ;;  %vm5930_vm13 = vcmp.ge.f32.partialorder %v4359_v42, 0.5  ;;  %v5931_v0 = vmov 0  ;;  %v2139_v54 = vsel %vm2011_vm10, 0.0, %v1883_v33  ;;  %v5948_v33 = vld [vmem:[#allocation71_spill] sm:$0xff] }
 0x1f4   : > { %2266 = vst.msk [vmem:[#allocation2 + $0x188] sm:$0xff] %vm5928_vm4, %v2137_v56  ;;  %vm5929_vm15 = vmmov %vm5928_vm4  ;;  %v2140_v62 = vsel %vm2012_vm9, 0.0, %v1884_v55  ;;  %v1885_v22 = vadd.f32 %v1757_v47, %v5933_v8  ;;  %v1886_v44 = vadd.f32 %v1758_v21, %v5934_v37  ;;  %vm5936_vm5 = vcmp.ge.f32.partialorder %v4362_v50, 0.5  ;;  %v5956_v47 = vld [vmem:[#allocation75_spill] sm:$0xff]  ;;  %v1641_v8 = vld [vmem:[#allocation2 + $0x208] sm:$0xff] }
 0x1f5   : > { %2267 = vst.msk [vmem:[#allocation2 + $0x190] sm:$0xff] %vm5929_vm15, %v2138_v10  ;;  %vm4625_vm12 = vmor %vm5930_vm13, %vm2010_vm14  ;;  %v5937_v48 = vmov 0  ;;  %v1759_v42 = vmul.f32 0.3, %v1631_v34  ;;  %v1760_v14 = vmul.f32 0.3, %v1632_v6 }
 0x1f6   : > { %v5932_v0 = vsel %vm4625_vm12, 4294967295, %v5931_v0  ;;  %vm5935_vm11 = vmmov %vm5928_vm4  ;;  %v1761_v29 = vmul.f32 0.3, %v1633_v38  ;;  %vm5940_vm14 = vcmp.ge.f32.partialorder %v4368_v9, 0.5  ;;  %v5941_v23 = vmov 0  ;;  %v5947_v34 = vld [vmem:[#allocation65_spill] sm:$0xff] }
 0x1f7   : > { %2268 = vst.msk [vmem:[#allocation2 + $0x198] sm:$0xff] %vm5935_vm11, %v2139_v54  ;;  %vm4635_vm7 = vmor %vm5936_vm5, %vm2011_vm10  ;;  %vm2013_vm15 = vcmp.ge.f32.partialorder %v1885_v22, 0.5  ;;  %vm2014_vm11 = vcmp.ge.f32.partialorder %v1886_v44, 0.5  ;;  %v1762_v61 = vmul.f32 0.3, %v1634_v41  ;;  %vm5943_vm10 = vcmp.ge.f32.partialorder %v4377_v31, 0.5 }
 0x1f8   : > { %v5938_v48 = vsel %vm4635_vm7, 4294967295, %v5937_v48  ;;  %vm5939_vm13 = vmmov %vm5928_vm4  ;;  %v1763_v50 = vmul.f32 0.3, %v1635_v26  ;;  %v2141_v58 = vsel %vm2013_vm15, 0.0, %v1885_v22  ;;  %v5944_v24 = vmov 0  ;;  %v5955_v31 = vld [vmem:[#allocation69_spill] sm:$0xff] }
 0x1f9   : > { %2269 = vst.msk [vmem:[#allocation2 + $0x1a0] sm:$0xff] %vm5939_vm13, %v2140_v62  ;;  %vm4643_vm4 = vmor %vm5940_vm14, %vm2012_vm9  ;;  %v2142_v51 = vsel %vm2014_vm11, 0.0, %v1886_v44  ;;  %v1887_v30 = vadd.f32 %v1759_v42, %v5947_v34  ;;  %v1888_v9 = vadd.f32 %v1760_v14, %v5948_v33  ;;  %vm5951_vm14 = vcmp.ge.f32.partialorder %v4380_v27, 0.5  ;;  %v5957_v38 = vld [vmem:[#allocation73_spill] sm:$0xff]  ;;  %v1639_v41 = vld [vmem:[#allocation2 + $0x1f8] sm:$0xff] }
 0x1fa   : > { %v5942_v23 = vsel %vm4643_vm4, 4294967295, %v5941_v23  ;;  %vm4649_vm5 = vmor %vm5943_vm10, %vm2013_vm15  ;;  %v5952_v25 = vmov 0  ;;  %v1889_v55 = vadd.f32 %v1761_v29, %v5955_v31  ;;  %v1890_v6 = vadd.f32 %v1762_v61, %v5956_v47  ;;  %v1640_v62 = vld [vmem:[#allocation2 + $0x200] sm:$0xff]  ;;  %v1643_v34 = vld [vmem:[#allocation2 + $0x218] sm:$0xff] }
 0x1fb   : > { %v5945_v24 = vsel %vm4649_vm5, 4294967295, %v5944_v24  ;;  %vm5949_vm9 = vmmov %vm5939_vm13  ;;  %v1891_v28 = vadd.f32 %v1763_v50, %v5957_v38  ;;  %v1764_v21 = vmul.f32 0.3, %v1636_v16  ;;  %vm2015_vm15 = vcmp.ge.f32.partialorder %v1887_v30, 0.5  ;;  %v5968_v37 = vld [vmem:[#allocation79_spill] sm:$0xff]  ;;  %v1642_v50 = vld [vmem:[#allocation2 + $0x210] sm:$0xff] }
 0x1fc   : > { %5946 = vst [vmem:[#allocation51_spill] sm:$0xff] %v5945_v24  ;;  %2270 = vst.msk [vmem:[#allocation2 + $0x1a8] sm:$0xff] %vm5949_vm9, %v2141_v58  ;;  %vm2016_vm10 = vcmp.ge.f32.partialorder %v1888_v9, 0.5  ;;  %v1765_v56 = vmul.f32 0.3, %v1637_v12  ;;  %v2143_v26 = vsel %vm2015_vm15, 0.0, %v1887_v30 }
 0x1fd   : > { %vm5950_vm13 = vmmov %vm5949_vm9  ;;  %v1766_v10 = vmul.f32 0.3, %v1638_v43  ;;  %vm5958_vm9 = vcmp.ge.f32.partialorder %v4386_v49, 0.5  ;;  %v5959_v27 = vmov 0  ;;  %v2144_v54 = vsel %vm2016_vm10, 0.0, %v1888_v9  ;;  %v5974_v43 = vld [vmem:[#allocation77_spill] sm:$0xff] }
 0x1fe   : > { %2271 = vst.msk [vmem:[#allocation2 + $0x1b0] sm:$0xff] %vm5950_vm13, %v2142_v51  ;;  %vm4659_vm4 = vmor %vm5951_vm14, %vm2014_vm11  ;;  %vm2017_vm11 = vcmp.ge.f32.partialorder %v1889_v55, 0.5  ;;  %vm2018_vm14 = vcmp.ge.f32.partialorder %v1890_v6, 0.5  ;;  %vm5964_vm7 = vcmp.ge.f32.partialorder %v4389_v40, 0.5  ;;  %v5965_v16 = vmov 0  ;;  %v5975_v14 = vld [vmem:[#allocation83_spill] sm:$0xff] }
 0x1ff   : > { %v5953_v25 = vsel %vm4659_vm4, 4294967295, %v5952_v25  ;;  %vm4668_vm13 = vmor %vm5958_vm9, %vm2015_vm15  ;;  %vm5962_vm4 = vcmask 261120   ;;  %v2145_v49 = vsel %vm2017_vm11, 0.0, %v1889_v55  ;;  %v2146_v22 = vsel %vm2018_vm14, 0.0, %v1890_v6  ;;  %v1644_v31 = vld [vmem:[#allocation2 + $0x220] sm:$0xff]  ;;  %v1645_v55 = vld [vmem:[#allocation2 + $0x228] sm:$0xff] }
 0x200   : > { %5954 = vst [vmem:[#allocation49_spill] sm:$0xff] %v5953_v25  ;;  %v5960_v27 = vsel %vm4668_vm13, 4294967295, %v5959_v27  ;;  %2272 = vst.msk [vmem:[#allocation2 + $0x1b8] sm:$0xff] %vm5962_vm4, %v2143_v26  ;;  %vm2019_vm15 = vcmp.ge.f32.partialorder %v1891_v28, 0.5  ;;  %v1892_v44 = vadd.f32 %v1764_v21, %v5968_v37  ;;  %vm5970_vm13 = vcmp.ge.f32.partialorder %v4414_v18, 0.5  ;;  %v5991_v38 = vld [vmem:[#allocation4_spill] sm:$0xff] }
 0x201   : > { %5961 = vst [vmem:[#allocation55_spill] sm:$0xff] %v5960_v27  ;;  %vm5963_vm5 = vmmov %vm5962_vm4  ;;  %v5971_v12 = vmov 0  ;;  %v2147_v40 = vsel %vm2019_vm15, 0.0, %v1891_v28  ;;  %v1893_v42 = vadd.f32 %v1765_v56, %v5974_v43  ;;  %v1894_v29 = vadd.f32 %v1766_v10, %v5975_v14  ;;  %v5992_v21 = vld [vmem:[#allocation3_spill] sm:$0xff]  ;;  %v1646_v56 = vld [vmem:[#allocation2 + $0x230] sm:$0xff] }
 0x202   : > { %2273 = vst.msk [vmem:[#allocation2 + $0x1c0] sm:$0xff] %vm5963_vm5, %v2144_v54  ;;  %vm4676_vm12 = vmor %vm5964_vm7, %vm2016_vm10  ;;  %v1767_v61 = vmul.f32 0.3, %v1639_v41  ;;  %vm5976_vm7 = vcmp.ge.f32.partialorder %v4417_v2, 0.5  ;;  %v5977_v58 = vmov 0  ;;  %v5982_v30 = vmov 0 }
 0x203   : > { %v5966_v16 = vsel %vm4676_vm12, 4294967295, %v5965_v16  ;;  %vm5969_vm9 = vmmov %vm5962_vm4  ;;  %2275 = vst.msk [vmem:[#allocation2 + $0x1d0] sm:$0xff] %vm5962_vm4, %v2146_v22  ;;  %v1768_v18 = vmul.f32 0.3, %v1640_v62  ;;  %v1769_v51 = vmul.f32 0.3, %v1641_v8 }
 0x204   : > { %5967 = vst [vmem:[#allocation53_spill] sm:$0xff] %v5966_v16  ;;  %2274 = vst.msk [vmem:[#allocation2 + $0x1c8] sm:$0xff] %vm5969_vm9, %v2145_v49  ;;  %v5985_v2 = vld [vmem:[#allocation81_spill] sm:$0xff]  ;;  %v5988_v47 = vmov 0  ;;  %v1647_v10 = vld [vmem:[#allocation2 + $0x238] sm:$0xff]  ;;  %v6000_v8 = vmov 0 }
 0x205   : > { %vm4685_vm3 = vmor %vm5970_vm13, %vm2017_vm11  ;;  %vm2020_vm13 = vcmp.ge.f32.partialorder %v1892_v44, 0.5  ;;  %vm5981_vm11 = vcmp.ge.f32.partialorder %v4430_v1, 0.5  ;;  %v1895_v9 = vadd.f32 %v1767_v61, %v5985_v2  ;;  %v4718_v28 = vadd.f32 %v1768_v18, %v5991_v38  ;;  %v1648_v62 = vld [vmem:[#allocation2 + $0x240] sm:$0xff]  ;;  %v1649_v22 = vld [vmem:[#allocation2 + $0x248] sm:$0xff] }
 0x206   : > { %v5972_v12 = vsel %vm4685_vm3, 4294967295, %v5971_v12  ;;  %vm4696_vm5 = vmor %vm5976_vm7, %vm2018_vm14  ;;  %v2148_v33 = vsel %vm2020_vm13, 0.0, %v1892_v44  ;;  %vm2022_vm3 = vcmp.ge.f32.partialorder %v1894_v29, 0.5  ;;  %vm5987_vm7 = vcmp.ge.f32.partialorder %v4433_v17, 0.5  ;;  %v6012_v61 = vld [vmem:[#allocation8_spill] sm:$0xff]  ;;  %v6015_v38 = vld [vmem:[#allocation10_spill] sm:$0xff] }
 0x207   : > { %5973 = vst [vmem:[#allocation59_spill] sm:$0xff] %v5972_v12  ;;  %v5978_v58 = vsel %vm4696_vm5, 4294967295, %v5977_v58  ;;  %vm5980_vm10 = vmmov %vm5962_vm4  ;;  %vm2021_vm4 = vcmp.ge.f32.partialorder %v1893_v42, 0.5  ;;  %v2150_v6 = vsel %vm2022_vm3, 0.0, %v1894_v29  ;;  %v4721_v41 = vadd.f32 %v1769_v51, %v5992_v21  ;;  %v1650_v29 = vld [vmem:[#allocation2 + $0x250] sm:$0xff]  ;;  %v1667_v27 = vld [vmem:[#allocation2 + $0x2d8] sm:$0xff] }
 0x208   : > { %5979 = vst [vmem:[#allocation57_spill] sm:$0xff] %v5978_v58  ;;  %2276 = vst.msk [vmem:[#allocation2 + $0x1d8] sm:$0xff] %vm5980_vm10, %v2147_v40  ;;  %v2149_v1 = vsel %vm2021_vm4, 0.0, %v1893_v42  ;;  %v5995_v17 = vmov 0  ;;  %v1770_v26 = vmul.f32 0.3, %v1642_v50 }
 0x209   : > { %vm4704_vm9 = vmor %vm5981_vm11, %vm2019_vm15  ;;  %vm5994_vm11 = vcmp.ge.f32.partialorder %v4438_v39, 0.5  ;;  %v1771_v54 = vmul.f32 0.3, %v1643_v34  ;;  %v1772_v39 = vmul.f32 0.3, %v1644_v31  ;;  %v6005_v37 = vmov 0 }
 0x20a   : > { %v5983_v30 = vsel %vm4704_vm9, 4294967295, %v5982_v30  ;;  %vm5986_vm14 = vmmov %vm5980_vm10  ;;  %v6008_v40 = vld [vmem:[#allocation6_spill] sm:$0xff]  ;;  %v6009_v42 = vld [vmem:[#allocation5_spill] sm:$0xff]  ;;  %v1773_v18 = vmul.f32 0.3, %v1645_v55  ;;  %vm6162_vm12 = vcmask 261120  }
 0x20b   : > { %5984 = vst [vmem:[#allocation63_spill] sm:$0xff] %v5983_v30  ;;  %2277 = vst.msk [vmem:[#allocation2 + $0x1e0] sm:$0xff] %vm5986_vm14, %v2148_v33  ;;  %v4754_v43 = vadd.f32 %v1770_v26, %v6008_v40  ;;  %v4757_v14 = vadd.f32 %v1771_v54, %v6009_v42  ;;  %v4762_v50 = vadd.f32 %v1772_v39, %v6012_v61  ;;  %v1774_v51 = vmul.f32 0.3, %v1646_v56  ;;  %v6016_v56 = vld [vmem:[#allocation9_spill] sm:$0xff]  ;;  %v6017_v26 = vld [vmem:[#allocation12_spill] sm:$0xff] }
 0x20c   : > { %vm4712_vm10 = vmor %vm5987_vm7, %vm2020_vm13  ;;  %vm2023_vm7 = vcmp.ge.f32.partialorder %v1895_v9, 0.5  ;;  %v1775_v34 = vmul.f32 0.3, %v1647_v10  ;;  %v1776_v33 = vmul.f32 0.3, %v1648_v62  ;;  %v1652_v62 = vld [vmem:[#allocation2 + $0x260] sm:$0xff] }
 0x20d   : > { %v5989_v47 = vsel %vm4712_vm10, 4294967295, %v5988_v47  ;;  %vm5993_vm15 = vmmov %vm5986_vm14  ;;  %vm5999_vm10 = vcmp.ge.f32.partialorder %v4441_v3, 0.5  ;;  %v2151_v49 = vsel %vm2023_vm7, 0.0, %v1895_v9  ;;  %v1777_v2 = vmul.f32 0.3, %v1649_v22  ;;  %v1654_v42 = vld [vmem:[#allocation2 + $0x270] sm:$0xff] }
 0x20e   : > { %5990 = vst [vmem:[#allocation61_spill] sm:$0xff] %v5989_v47  ;;  %2278 = vst.msk [vmem:[#allocation2 + $0x1e8] sm:$0xff] %vm5993_vm15, %v2149_v1  ;;  %v6013_v1 = vld [vmem:[#allocation7_spill] sm:$0xff]  ;;  %v4782_v21 = vadd.f32 %v1774_v51, %v6015_v38  ;;  %v4785_v10 = vadd.f32 %v1775_v34, %v6016_v56  ;;  %v4788_v54 = vadd.f32 %v1776_v33, %v6017_v26  ;;  %v1778_v22 = vmul.f32 0.3, %v1650_v29  ;;  %v1655_v61 = vld [vmem:[#allocation2 + $0x278] sm:$0xff] }
 0x20f   : > { %vm4726_vm14 = vmor %vm5994_vm11, %vm2021_vm4  ;;  %vm5714_vm4 = vcmp.ge.f32.partialorder %v4721_v41, 0.5  ;;  %v4774_v55 = vadd.f32 %v1773_v18, %v6013_v1  ;;  %v1656_v51 = vld [vmem:[#allocation2 + $0x280] sm:$0xff]  ;;  %v6023_v33 = vld [vmem:[#allocation14_spill] sm:$0xff]  ;;  %v1780_v1 = vmul.f32 0.3, %v1652_v62 }
 0x210   : > { %v5996_v17 = vsel %vm4726_vm14, 4294967295, %v5995_v17  ;;  %vm5998_vm13 = vmmov %vm5993_vm15  ;;  %vm5715_vm15 = vcmp.ge.f32.partialorder %v4718_v28, 0.5  ;;  %v2153_v44 = vsel %vm5714_vm4, 0.0, %v4721_v41  ;;  %v1782_v56 = vmul.f32 0.3, %v1654_v42  ;;  %v6044_v58 = vld [vmem:[#allocation25_spill] sm:$0xff] }
 0x211   : > { %5997 = vst [vmem:[#allocation67_spill] sm:$0xff] %v5996_v17  ;;  %2279 = vst.msk [vmem:[#allocation2 + $0x1f0] sm:$0xff] %vm5998_vm13, %v2150_v6  ;;  %v2152_v3 = vsel %vm5715_vm15, 0.0, %v4718_v28  ;;  %v1783_v26 = vmul.f32 0.3, %v1655_v61  ;;  %v6028_v61 = vld [vmem:[#allocation18_spill] sm:$0xff] }
 0x212   : > { %vm4734_vm9 = vmor %vm5999_vm10, %vm2022_vm3  ;;  %v1666_v17 = vld [vmem:[#allocation2 + $0x2d0] sm:$0xff]  ;;  %v1676_v25 = vld [vmem:[#allocation2 + $0x320] sm:$0xff] }
 0x213   : > { %v6001_v8 = vsel %vm4734_vm9, 4294967295, %v6000_v8  ;;  %vm6003_vm11 = vmmov %vm5998_vm13  ;;  %vm6004_vm13 = vcmp.ge.f32.partialorder %v4444_v15, 0.5  ;;  %v1651_v15 = vld [vmem:[#allocation2 + $0x258] sm:$0xff] }
 0x214   : > { %6002 = vst [vmem:[#allocation65_spill] sm:$0xff] %v6001_v8  ;;  %2280 = vst.msk [vmem:[#allocation2 + $0x1f8] sm:$0xff] %vm6003_vm11, %v2151_v49  ;;  %v6019_v49 = vld [vmem:[#allocation11_spill] sm:$0xff]  ;;  %v1665_v8 = vld [vmem:[#allocation2 + $0x2c8] sm:$0xff] }
 0x215   : > { %vm4743_vm14 = vmor %vm6004_vm13, %vm2023_vm7  ;;  %vm5712_vm7 = vcmp.ge.f32.partialorder %v4754_v43, 0.5  ;;  %vm5711_vm13 = vcmp.ge.f32.partialorder %v4762_v50, 0.5  ;;  %v4793_v39 = vadd.f32 %v1777_v2, %v6019_v49  ;;  %v4819_v2 = vadd.f32 %v1778_v22, %v6023_v33  ;;  %v6026_v49 = vld [vmem:[#allocation16_spill] sm:$0xff]  ;;  %v1658_v22 = vld [vmem:[#allocation2 + $0x290] sm:$0xff] }
 0x216   : > { %v6006_v37 = vsel %vm4743_vm14, 4294967295, %v6005_v37  ;;  %vm6010_vm3 = vmmov %vm6003_vm11  ;;  %vm5710_vm11 = vcmp.ge.f32.partialorder %v4757_v14, 0.5  ;;  %v2154_v9 = vsel %vm5712_vm7, 0.0, %v4754_v43  ;;  %v2156_v6 = vsel %vm5711_vm13, 0.0, %v4762_v50 }
 0x217   : > { %6007 = vst [vmem:[#allocation71_spill] sm:$0xff] %v6006_v37  ;;  %2281 = vst.msk [vmem:[#allocation2 + $0x200] sm:$0xff] %vm6010_vm3, %v2152_v3  ;;  %v2155_v31 = vsel %vm5710_vm11, 0.0, %v4757_v14  ;;  %v1779_v3 = vmul.f32 0.3, %v1651_v15  ;;  %vm5721_vm13 = vcmp.ge.f32.partialorder %v4785_v10, 0.5 }
 0x218   : > { %vm6011_vm10 = vmmov %vm6010_vm3  ;;  %2283 = vst.msk [vmem:[#allocation2 + $0x210] sm:$0xff] %vm6010_vm3, %v2154_v9  ;;  %vm5716_vm7 = vcmp.ge.f32.partialorder %v4788_v54, 0.5  ;;  %v2159_v15 = vsel %vm5721_vm13, 0.0, %v4785_v10  ;;  %v6024_v9 = vld [vmem:[#allocation13_spill] sm:$0xff]  ;;  %v1664_v37 = vld [vmem:[#allocation2 + $0x2c0] sm:$0xff] }
 0x219   : > { %2282 = vst.msk [vmem:[#allocation2 + $0x208] sm:$0xff] %vm6011_vm10, %v2153_v44  ;;  %vm6014_vm10 = vmmov %vm6010_vm3  ;;  %v1653_v44 = vld [vmem:[#allocation2 + $0x268] sm:$0xff]  ;;  %v2160_v18 = vsel %vm5716_vm7, 0.0, %v4788_v54  ;;  %v1792_v16 = vmul.f32 0.3, %v1664_v37 }
 0x21a   : > { %2284 = vst.msk [vmem:[#allocation2 + $0x218] sm:$0xff] %vm6014_vm10, %v2155_v31  ;;  %vm6018_vm11 = vmmov %vm6010_vm3  ;;  %vm5713_vm3 = vcmp.ge.f32.partialorder %v4774_v55, 0.5  ;;  %vm5722_vm10 = vcmp.ge.f32.partialorder %v4782_v21, 0.5  ;;  %v4822_v31 = vadd.f32 %v1779_v3, %v6024_v9  ;;  %v1781_v38 = vmul.f32 0.3, %v1653_v44  ;;  %v6027_v44 = vld [vmem:[#allocation15_spill] sm:$0xff] }
 0x21b   : > { %2285 = vst.msk [vmem:[#allocation2 + $0x220] sm:$0xff] %vm6018_vm11, %v2156_v6  ;;  %v2157_v40 = vsel %vm5713_vm3, 0.0, %v4774_v55  ;;  %v2158_v29 = vsel %vm5722_vm10, 0.0, %v4782_v21  ;;  %vm5717_vm3 = vcmp.ge.f32.partialorder %v4793_v39, 0.5  ;;  %vm6020_vm4 = vmmov %vm6018_vm11  ;;  %v1657_v6 = vld [vmem:[#allocation2 + $0x288] sm:$0xff] }
 0x21c   : > { %2286 = vst.msk [vmem:[#allocation2 + $0x228] sm:$0xff] %vm6018_vm11, %v2157_v40  ;;  %vm6021_vm15 = vmmov %vm6020_vm4  ;;  %v2161_v34 = vsel %vm5717_vm3, 0.0, %v4793_v39  ;;  %v4828_v40 = vadd.f32 %v1780_v1, %v6026_v49  ;;  %v4837_v42 = vadd.f32 %v1781_v38, %v6027_v44  ;;  %v1785_v9 = vmul.f32 0.3, %v1657_v6  ;;  %v1659_v1 = vld [vmem:[#allocation2 + $0x298] sm:$0xff]  ;;  %v1660_v49 = vld [vmem:[#allocation2 + $0x2a0] sm:$0xff] }
 0x21d   : > { %2287 = vst.msk [vmem:[#allocation2 + $0x230] sm:$0xff] %vm6020_vm4, %v2158_v29  ;;  %vm6022_vm11 = vmmov %vm6020_vm4  ;;  %v1784_v29 = vmul.f32 0.3, %v1656_v51  ;;  %v6048_v37 = vld [vmem:[#allocation28_spill] sm:$0xff] }
 0x21e   : > { %2288 = vst.msk [vmem:[#allocation2 + $0x238] sm:$0xff] %vm6021_vm15, %v2159_v15  ;;  %vm6025_vm7 = vmmov %vm6020_vm4  ;;  %vm5719_vm15 = vcmp.ge.f32.partialorder %v4819_v2, 0.5  ;;  %vm5718_vm4 = vcmp.ge.f32.partialorder %v4822_v31, 0.5  ;;  %v4840_v15 = vadd.f32 %v1782_v56, %v6028_v61  ;;  %vm5720_vm3 = vcmp.ge.f32.partialorder %v4828_v40, 0.5  ;;  %v6034_v61 = vld [vmem:[#allocation19_spill] sm:$0xff] }
 0x21f   : > { %2289 = vst.msk [vmem:[#allocation2 + $0x240] sm:$0xff] %vm6022_vm11, %v2160_v18  ;;  %v2162_v3 = vsel %vm5719_vm15, 0.0, %v4819_v2  ;;  %v2163_v62 = vsel %vm5718_vm4, 0.0, %v4822_v31  ;;  %vm6029_vm11 = vmmov %vm6025_vm7  ;;  %v6030_v18 = vld [vmem:[#allocation17_spill] sm:$0xff]  ;;  %v2164_v38 = vsel %vm5720_vm3, 0.0, %v4828_v40  ;;  %vm5739_vm4 = vcmp.ge.f32.partialorder %v4837_v42, 0.5 }
 0x220   : > { %2290 = vst.msk [vmem:[#allocation2 + $0x248] sm:$0xff] %vm6025_vm7, %v2161_v34  ;;  %2291 = vst.msk [vmem:[#allocation2 + $0x250] sm:$0xff] %vm6025_vm7, %v2162_v3  ;;  %v4846_v51 = vadd.f32 %v1783_v26, %v6030_v18  ;;  %v6031_v34 = vld [vmem:[#allocation20_spill] sm:$0xff]  ;;  %vm5736_vm7 = vcmp.ge.f32.partialorder %v4840_v15, 0.5  ;;  %v1786_v56 = vmul.f32 0.3, %v1658_v22  ;;  %v4874_v18 = vadd.f32 %v1785_v9, %v6034_v61 }
 0x221   : > { %2292 = vst.msk [vmem:[#allocation2 + $0x258] sm:$0xff] %vm6029_vm11, %v2163_v62  ;;  %v4849_v33 = vadd.f32 %v1784_v29, %v6031_v34  ;;  %v1661_v3 = vld [vmem:[#allocation2 + $0x2a8] sm:$0xff]  ;;  %2293 = vst.msk [vmem:[#allocation2 + $0x260] sm:$0xff] %vm6029_vm11, %v2164_v38  ;;  %v2165_v26 = vsel %vm5739_vm4, 0.0, %v4837_v42  ;;  %v2166_v6 = vsel %vm5736_vm7, 0.0, %v4840_v15  ;;  %v1662_v29 = vld [vmem:[#allocation2 + $0x2b0] sm:$0xff] }
 0x222   : > { %vm5735_vm15 = vcmp.ge.f32.partialorder %v4846_v51, 0.5  ;;  %v1663_v62 = vld [vmem:[#allocation2 + $0x2b8] sm:$0xff]  ;;  %vm6032_vm13 = vmmov %vm6029_vm11  ;;  %v1789_v47 = vmul.f32 0.3, %v1661_v3  ;;  %v1790_v30 = vmul.f32 0.3, %v1662_v29 }
 0x223   : > { %vm5727_vm3 = vcmp.ge.f32.partialorder %v4849_v33, 0.5  ;;  %2294 = vst.msk [vmem:[#allocation2 + $0x268] sm:$0xff] %vm6032_vm13, %v2165_v26  ;;  %vm6033_vm10 = vmmov %vm6029_vm11  ;;  %v2167_v22 = vsel %vm5735_vm15, 0.0, %v4846_v51  ;;  %v6035_v34 = vld [vmem:[#allocation22_spill] sm:$0xff]  ;;  %v1787_v26 = vmul.f32 0.3, %v1659_v1 }
 0x224   : > { %2295 = vst.msk [vmem:[#allocation2 + $0x270] sm:$0xff] %vm6033_vm10, %v2166_v6  ;;  %v2168_v44 = vsel %vm5727_vm3, 0.0, %v4849_v33  ;;  %v4877_v38 = vadd.f32 %v1786_v56, %v6035_v34  ;;  %vm6036_vm13 = vmmov %vm6033_vm10  ;;  %v1788_v6 = vmul.f32 0.3, %v1660_v49  ;;  %vm5734_vm11 = vcmp.ge.f32.partialorder %v4874_v18, 0.5  ;;  %v6038_v1 = vld [vmem:[#allocation24_spill] sm:$0xff] }
 0x225   : > { %2296 = vst.msk [vmem:[#allocation2 + $0x278] sm:$0xff] %vm6036_vm13, %v2167_v22  ;;  %v1791_v9 = vmul.f32 0.3, %v1663_v62  ;;  %v2169_v56 = vsel %vm5734_vm11, 0.0, %v4874_v18  ;;  %v6037_v22 = vld [vmem:[#allocation21_spill] sm:$0xff]  ;;  %vm6039_vm13 = vmmov %vm6033_vm10  ;;  %v6040_v3 = vld [vmem:[#allocation23_spill] sm:$0xff] }
 0x226   : > { %2297 = vst.msk [vmem:[#allocation2 + $0x280] sm:$0xff] %vm6033_vm10, %v2168_v44  ;;  %vm5733_vm3 = vcmp.ge.f32.partialorder %v4877_v38, 0.5  ;;  %v4890_v34 = vadd.f32 %v1787_v26, %v6037_v22  ;;  %v4893_v49 = vadd.f32 %v1788_v6, %v6038_v1  ;;  %v4898_v29 = vadd.f32 %v1789_v47, %v6040_v3  ;;  %v6042_v62 = vld [vmem:[#allocation26_spill] sm:$0xff]  ;;  %v1669_v47 = vld [vmem:[#allocation2 + $0x2e8] sm:$0xff]  ;;  %v6052_v22 = vld [vmem:[#allocation27_spill] sm:$0xff] }
 0x227   : > { %v2170_v61 = vsel %vm5733_vm3, 0.0, %v4877_v38  ;;  %2298 = vst.msk [vmem:[#allocation2 + $0x288] sm:$0xff] %vm6039_vm13, %v2169_v56  ;;  %v4901_v44 = vadd.f32 %v1790_v30, %v6042_v62  ;;  %v4904_v12 = vadd.f32 %v1791_v9, %v6044_v58  ;;  %v1793_v26 = vmul.f32 0.3, %v1665_v8  ;;  %v1668_v58 = vld [vmem:[#allocation2 + $0x2e0] sm:$0xff]  ;;  %v6054_v3 = vld [vmem:[#allocation30_spill] sm:$0xff] }
 0x228   : > { %2299 = vst.msk [vmem:[#allocation2 + $0x290] sm:$0xff] %vm6033_vm10, %v2170_v61  ;;  %6041 = vst [vmem:[#allocation69_spill] sm:$0xff] %v4898_v29  ;;  %vm5738_vm3 = vcmp.ge.f32.partialorder %v4890_v34, 0.5  ;;  %vm5737_vm11 = vcmp.ge.f32.partialorder %v4893_v49, 0.5  ;;  %v1794_v6 = vmul.f32 0.3, %v1666_v17  ;;  %v4926_v9 = vadd.f32 %v1792_v16, %v6048_v37 }
 0x229   : > { %6043 = vst [vmem:[#allocation75_spill] sm:$0xff] %v4901_v44  ;;  %6045 = vst [vmem:[#allocation73_spill] sm:$0xff] %v4904_v12  ;;  %v2171_v56 = vsel %vm5738_vm3, 0.0, %v4890_v34  ;;  %v2172_v30 = vsel %vm5737_vm11, 0.0, %v4893_v49  ;;  %vm5758_vm13 = vcmp.ge.f32.partialorder %v4898_v29, 0.5  ;;  %vm5748_vm10 = vcmp.ge.f32.partialorder %v4901_v44, 0.5 }
 0x22a   : > { %vm6046_vm15 = vcmask 261120   ;;  %v2173_v17 = vsel %vm5758_vm13, 0.0, %v4898_v29  ;;  %v2174_v8 = vsel %vm5748_vm10, 0.0, %v4901_v44  ;;  %vm5740_vm11 = vcmp.ge.f32.partialorder %v4904_v12, 0.5  ;;  %6049 = vst [vmem:[#allocation79_spill] sm:$0xff] %v4926_v9  ;;  %v1671_v37 = vld [vmem:[#allocation2 + $0x2f8] sm:$0xff] }
 0x22b   : > { %2300 = vst.msk [vmem:[#allocation2 + $0x298] sm:$0xff] %vm6046_vm15, %v2171_v56  ;;  %vm6047_vm7 = vmmov %vm6046_vm15  ;;  %v2175_v61 = vsel %vm5740_vm11, 0.0, %v4904_v12  ;;  %v4934_v1 = vadd.f32 %v1793_v26, %v6052_v22  ;;  %v4937_v62 = vadd.f32 %v1794_v6, %v6054_v3  ;;  %v1795_v56 = vmul.f32 0.3, %v1667_v27  ;;  %v6057_v26 = vld [vmem:[#allocation29_spill] sm:$0xff]  ;;  %v1672_v27 = vld [vmem:[#allocation2 + $0x300] sm:$0xff] }
 0x22c   : > { %2301 = vst.msk [vmem:[#allocation2 + $0x2a0] sm:$0xff] %vm6047_vm7, %v2172_v30  ;;  %vm6050_vm3 = vmmov %vm6047_vm7  ;;  %v1670_v30 = vld [vmem:[#allocation2 + $0x2f0] sm:$0xff]  ;;  %vm5743_vm7 = vcmp.ge.f32.partialorder %v4926_v9, 0.5  ;;  %v1796_v16 = vmul.f32 0.3, %v1668_v58  ;;  %v6062_v3 = vld [vmem:[#allocation31_spill] sm:$0xff] }
 0x22d   : > { %2302 = vst.msk [vmem:[#allocation2 + $0x2a8] sm:$0xff] %vm6050_vm3, %v2173_v17  ;;  %vm6051_vm4 = vmmov %vm6050_vm3  ;;  %v1797_v17 = vmul.f32 0.3, %v1669_v47  ;;  %v4947_v6 = vadd.f32 %v1795_v56, %v6057_v26  ;;  %v1673_v12 = vld [vmem:[#allocation2 + $0x308] sm:$0xff]  ;;  %v1674_v56 = vld [vmem:[#allocation2 + $0x310] sm:$0xff] }
 0x22e   : > { %2303 = vst.msk [vmem:[#allocation2 + $0x2b0] sm:$0xff] %vm6051_vm4, %v2174_v8  ;;  %6053 = vst [vmem:[#allocation77_spill] sm:$0xff] %v4934_v1  ;;  %v2176_v8 = vsel %vm5743_vm7, 0.0, %v4926_v9  ;;  %vm5746_vm4 = vcmp.ge.f32.partialorder %v4937_v62, 0.5  ;;  %v1675_v26 = vld [vmem:[#allocation2 + $0x318] sm:$0xff] }
 0x22f   : > { %6055 = vst [vmem:[#allocation83_spill] sm:$0xff] %v4937_v62  ;;  %vm6056_vm15 = vmmov %vm6050_vm3  ;;  %vm5747_vm3 = vcmp.ge.f32.partialorder %v4934_v1, 0.5  ;;  %v2178_v47 = vsel %vm5746_vm4, 0.0, %v4937_v62  ;;  %v4960_v9 = vadd.f32 %v1797_v17, %v6062_v3  ;;  %vm5757_vm7 = vcmp.ge.f32.partialorder %v4947_v6, 0.5  ;;  %v6067_v3 = vld [vmem:[#allocation33_spill] sm:$0xff]  ;;  %v1679_v44 = vld [vmem:[#allocation2 + $0x338] sm:$0xff] }
 0x230   : > { %2304 = vst.msk [vmem:[#allocation2 + $0x2b8] sm:$0xff] %vm6056_vm15, %v2175_v61  ;;  %6058 = vst [vmem:[#allocation81_spill] sm:$0xff] %v4947_v6  ;;  %v2177_v58 = vsel %vm5747_vm3, 0.0, %v4934_v1  ;;  %v6060_v61 = vld [vmem:[#allocation32_spill] sm:$0xff]  ;;  %v1799_v1 = vmul.f32 0.3, %v1671_v37 }
 0x231   : > { %vm6059_vm11 = vmmov %vm6056_vm15  ;;  %v4957_v22 = vadd.f32 %v1796_v16, %v6060_v61  ;;  %v2179_v16 = vsel %vm5757_vm7, 0.0, %v4947_v6  ;;  %vm5755_vm3 = vcmp.ge.f32.partialorder %v4960_v9, 0.5  ;;  %v1800_v17 = vmul.f32 0.3, %v1672_v27  ;;  %v1677_v61 = vld [vmem:[#allocation2 + $0x328] sm:$0xff]  ;;  %v6065_v37 = vld [vmem:[#allocation34_spill] sm:$0xff] }
 0x232   : > { %2305 = vst.msk [vmem:[#allocation2 + $0x2c0] sm:$0xff] %vm6059_vm11, %v2176_v8  ;;  %vm6063_vm15 = vmmov %vm6059_vm11  ;;  %v1798_v8 = vmul.f32 0.3, %v1670_v30  ;;  %v2181_v30 = vsel %vm5755_vm3, 0.0, %v4960_v9  ;;  %v4981_v6 = vadd.f32 %v1799_v1, %v6067_v3  ;;  %v1678_v62 = vld [vmem:[#allocation2 + $0x330] sm:$0xff]  ;;  %v6071_v27 = vld [vmem:[#allocation36_spill] sm:$0xff] }
 0x233   : > { %6061 = vst [vmem:[#allocation4_spill] sm:$0xff] %v4957_v22  ;;  %2306 = vst.msk [vmem:[#allocation2 + $0x2c8] sm:$0xff] %vm6063_vm15, %v2177_v58  ;;  %vm5756_vm4 = vcmp.ge.f32.partialorder %v4957_v22, 0.5  ;;  %v1801_v24 = vmul.f32 0.3, %v1673_v12  ;;  %vm6074_vm7 = vcmp.ge.f32.partialorder %v4718_v28, 0.5 }
 0x234   : > { %2307 = vst.msk [vmem:[#allocation2 + $0x2d0] sm:$0xff] %vm6059_vm11, %v2178_v47  ;;  %vm6064_vm10 = vmmov %vm6059_vm11  ;;  %v2180_v58 = vsel %vm5756_vm4, 0.0, %v4957_v22  ;;  %v4978_v47 = vadd.f32 %v1798_v8, %v6065_v37  ;;  %v1802_v22 = vmul.f32 0.3, %v1674_v56  ;;  %v1803_v29 = vmul.f32 0.3, %v1675_v26 }
 0x235   : > { %2308 = vst.msk [vmem:[#allocation2 + $0x2d8] sm:$0xff] %vm6064_vm10, %v2179_v16  ;;  %6068 = vst [vmem:[#allocation6_spill] sm:$0xff] %v4981_v6  ;;  %v1928_v16 = vadd.f32 %v1800_v17, %v6071_v27  ;;  %vm5761_vm3 = vcmp.ge.f32.partialorder %v4981_v6, 0.5  ;;  %v1804_v8 = vmul.f32 0.3, %v1676_v25  ;;  %v6077_v56 = vld [vmem:[#allocation38_spill] sm:$0xff] }
 0x236   : > { %6066 = vst [vmem:[#allocation3_spill] sm:$0xff] %v4978_v47  ;;  %vm6069_vm15 = vmmov %vm6064_vm10  ;;  %v1805_v37 = vmul.f32 0.3, %v1677_v61  ;;  %v1930_v26 = vadd.f32 %v1802_v22, %v6077_v56  ;;  %v6078_v61 = vld [vmem:[#allocation37_spill] sm:$0xff]  ;;  %v6079_v27 = vld [vmem:[#allocation40_spill] sm:$0xff] }
 0x237   : > { %2309 = vst.msk [vmem:[#allocation2 + $0x2e0] sm:$0xff] %vm6069_vm15, %v2180_v58  ;;  %vm6070_vm11 = vmmov %vm6064_vm10  ;;  %vm5762_vm10 = vcmp.ge.f32.partialorder %v4978_v47, 0.5  ;;  %v2183_v58 = vsel %vm5761_vm3, 0.0, %v4981_v6  ;;  %vm2056_vm15 = vcmp.ge.f32.partialorder %v1928_v16, 0.5  ;;  %v1931_v3 = vadd.f32 %v1803_v29, %v6078_v61  ;;  %v1681_v22 = vld [vmem:[#allocation2 + $0x348] sm:$0xff]  ;;  %v1682_v29 = vld [vmem:[#allocation2 + $0x350] sm:$0xff] }
 0x238   : > { %2310 = vst.msk [vmem:[#allocation2 + $0x2e8] sm:$0xff] %vm6070_vm11, %v2181_v30  ;;  %v2182_v1 = vsel %vm5762_vm10, 0.0, %v4978_v47  ;;  %v6072_v30 = vld [vmem:[#allocation35_spill] sm:$0xff]  ;;  %vm6073_vm4 = vmmov %vm6070_vm11  ;;  %v2184_v12 = vsel %vm2056_vm15, 0.0, %v1928_v16  ;;  %v5006_v6 = vadd.f32 %v1804_v8, %v6079_v27  ;;  %v1806_v16 = vmul.f32 0.3, %v1678_v62 }
 0x239   : > { %v1929_v17 = vadd.f32 %v1801_v24, %v6072_v30  ;;  %2311 = vst.msk [vmem:[#allocation2 + $0x2f0] sm:$0xff] %vm6070_vm11, %v2182_v1  ;;  %vm4999_vm13 = vmor %vm6074_vm7, %vm2056_vm15  ;;  %v1680_v47 = vld [vmem:[#allocation2 + $0x340] sm:$0xff]  ;;  %v1807_v1 = vmul.f32 0.3, %v1679_v44  ;;  %vm6082_vm7 = vcmp.ge.f32.partialorder %v4721_v41, 0.5  ;;  %vm2058_vm10 = vcmp.ge.f32.partialorder %v1930_v26, 0.5 }
 0x23a   : > { %2312 = vst.msk [vmem:[#allocation2 + $0x2f8] sm:$0xff] %vm6073_vm4, %v2183_v58  ;;  %vm6080_vm3 = vmmov %vm6073_vm4  ;;  %v6081_v24 = vld [vmem:[#allocation39_spill] sm:$0xff]  ;;  %vm5763_vm14 = vcmp.ge.f32.partialorder %v1931_v3, 0.5  ;;  %v1683_v8 = vld [vmem:[#allocation2 + $0x358] sm:$0xff]  ;;  %v1808_v56 = vmul.f32 0.3, %v1680_v47 }
 0x23b   : > { %2313 = vst.msk [vmem:[#allocation2 + $0x300] sm:$0xff] %vm6080_vm3, %v2184_v12  ;;  %vm2057_vm11 = vcmp.ge.f32.partialorder %v1929_v17, 0.5  ;;  %v5014_v28 = vadd.f32 %v1805_v37, %v6081_v24  ;;  %vm2060_vm3 = vcmp.ge.f32.partialorder %v5006_v6, 0.5  ;;  %vm6083_vm9 = vmmov %vm6073_vm4  ;;  %v2186_v37 = vsel %vm2058_vm10, 0.0, %v1930_v26  ;;  %v1684_v62 = vld [vmem:[#allocation2 + $0x360] sm:$0xff]  ;;  %v1685_v61 = vld [vmem:[#allocation2 + $0x368] sm:$0xff] }
 0x23c   : > { %v2185_v58 = vsel %vm2057_vm11, 0.0, %v1929_v17  ;;  %vm2378_vm15 = vmor %vm6082_vm7, %vm2057_vm11  ;;  %v2187_v44 = vsel %vm5763_vm14, 0.0, %v1931_v3  ;;  %v2188_v41 = vsel %vm2060_vm3, 0.0, %v5006_v6  ;;  %v6090_v17 = vld [vmem:[#allocation42_spill] sm:$0xff]  ;;  %v5047_v25 = vadd.f32 %v1807_v1, %v6091_v13  ;;  %v6096_v47 = vld [vmem:[#allocation44_spill] sm:$0xff] }
 0x23d   : > { %2314 = vst.msk [vmem:[#allocation2 + $0x308] sm:$0xff] %vm6083_vm9, %v2185_v58  ;;  %vm2410_vm4 = vmor %vm4484_vm0, %vm2378_vm15  ;;  %vm2061_vm11 = vcmp.ge.f32.partialorder %v5014_v28, 0.5  ;;  %vm6087_vm0 = vcmask 261120   ;;  %v5044_v12 = vadd.f32 %v1806_v16, %v6090_v17  ;;  %v1809_v24 = vmul.f32 0.3, %v1681_v22  ;;  %v1686_v16 = vld [vmem:[#allocation2 + $0x370] sm:$0xff] }
 0x23e   : > { %vm6084_vm7 = vmor %vm4476_vm1, %vm4999_vm13  ;;  %2315 = vst.msk [vmem:[#allocation2 + $0x310] sm:$0xff] %vm6087_vm0, %v2186_v37  ;;  %v2189_v45 = vsel %vm2061_vm11, 0.0, %v5014_v28  ;;  %vm6092_vm1 = vcmp.ge.f32.partialorder %v4754_v43, 0.5  ;;  %v1810_v58 = vmul.f32 0.3, %v1682_v29  ;;  %v5064_v43 = vadd.f32 %v1808_v56, %v6096_v47  ;;  %v6106_v17 = vld [vmem:[#allocation48_spill] sm:$0xff] }
 0x23f   : > { %vm5033_vm9 = vmpackc.low %vm2410_vm4, %vm6084_vm7  ;;  %v1811_v37 = vmul.f32 0.3, %v1683_v8  ;;  %vm5764_vm7 = vcmp.ge.f32.partialorder %v5044_v12, 0.5  ;;  %v1812_v26 = vmul.f32 0.3, %v1684_v62  ;;  %v6101_v8 = vld [vmem:[#allocation43_spill] sm:$0xff] }
 0x240   : > { %vm6088_vm15 = vmmov %vm6087_vm0  ;;  %v2190_v22 = vsel %vm5764_vm7, 0.0, %v5044_v12  ;;  %vm5769_vm7 = vcmp.ge.f32.partialorder %v5064_v43, 0.5  ;;  %v1813_v56 = vmul.f32 0.3, %v1685_v61  ;;  %v1814_v61 = vmul.f32 0.3, %v1686_v16 }
 0x241   : > { %2316 = vst.msk [vmem:[#allocation2 + $0x318] sm:$0xff] %vm6088_vm15, %v2187_v44  ;;  %vm6089_vm14 = vmmov %vm6087_vm0  ;;  %vm6098_vm15 = vcmp.ge.f32.partialorder %v4757_v14, 0.5  ;;  %v5080_v44 = vadd.f32 %v1809_v24, %v6101_v8  ;;  %v6105_v14 = vld [vmem:[#allocation45_spill] sm:$0xff]  ;;  %v5096_v13 = vadd.f32 %v1812_v26, %v6106_v17  ;;  %v1688_v24 = vld [vmem:[#allocation2 + $0x380] sm:$0xff] }
 0x242   : > { %2317 = vst.msk [vmem:[#allocation2 + $0x320] sm:$0xff] %vm6089_vm14, %v2188_v41  ;;  %vm5052_vm13 = vmor %vm6092_vm1, %vm2058_vm10  ;;  %vm6097_vm10 = vcmp.ge.f32.partialorder %v1931_v3, 0.5  ;;  %v6102_v41 = vld [vmem:[#allocation46_spill] sm:$0xff]  ;;  %v1690_v47 = vld [vmem:[#allocation2 + $0x390] sm:$0xff] }
 0x243   : > { %vm6095_vm14 = vmmov %vm6087_vm0  ;;  %vm5770_vm0 = vcmp.ge.f32.partialorder %v5047_v25, 0.5  ;;  %v5083_v62 = vadd.f32 %v1810_v58, %v6102_v41  ;;  %v1687_v3 = vld [vmem:[#allocation2 + $0x378] sm:$0xff]  ;;  %v1689_v58 = vld [vmem:[#allocation2 + $0x388] sm:$0xff] }
 0x244   : > { %2318 = vst.msk [vmem:[#allocation2 + $0x328] sm:$0xff] %vm6095_vm14, %v2189_v45  ;;  %vm2411_vm4 = vmor %vm4494_vm6, %vm5052_vm13  ;;  %v2191_v29 = vsel %vm5770_vm0, 0.0, %v5047_v25  ;;  %v5093_v45 = vadd.f32 %v1811_v37, %v6105_v14  ;;  %v2192_v37 = vsel %vm5769_vm7, 0.0, %v5064_v43  ;;  %v1691_v26 = vld [vmem:[#allocation2 + $0x398] sm:$0xff]  ;;  %v1692_v16 = vld [vmem:[#allocation2 + $0x3a0] sm:$0xff]  ;;  %vm6118_vm7 = vnez %v5880_v60 }
 0x245   : > { %vm5069_vm1 = vmor %vm6098_vm15, %vm6097_vm10  ;;  %vm6103_vm10 = vcmask 261120   ;;  %v6114_v8 = vld [vmem:[#allocation47_spill] sm:$0xff]  ;;  %v1693_v14 = vld [vmem:[#allocation2 + $0x3a8] sm:$0xff]  ;;  %v1820_v57 = vmul.f32 0.3, %v1692_v16 }
 0x246   : > { %vm2412_vm14 = vmor %vm4500_vm2, %vm5069_vm1  ;;  %2319 = vst.msk [vmem:[#allocation2 + $0x330] sm:$0xff] %vm6103_vm10, %v2190_v22  ;;  %vm5765_vm1 = vcmp.ge.f32.partialorder %v5080_v44, 0.5  ;;  %vm5767_vm13 = vcmp.ge.f32.partialorder %v5093_v45, 0.5  ;;  %v5142_v6 = vadd.f32 %v1813_v56, %v6114_v8  ;;  %v1694_v17 = vld [vmem:[#allocation2 + $0x3b0] sm:$0xff]  ;;  %v1818_v56 = vmul.f32 0.3, %v1690_v47 }
 0x247   : > { %vm6104_vm15 = vmmov %vm6103_vm10  ;;  %vm5768_vm10 = vcmp.ge.f32.partialorder %v5083_v62, 0.5  ;;  %v2193_v5 = vsel %vm5765_vm1, 0.0, %v5080_v44  ;;  %v2195_v22 = vsel %vm5767_vm13, 0.0, %v5093_v45  ;;  %v6125_v47 = vld [vmem:[#allocation54_spill] sm:$0xff]  ;;  %v1696_v16 = vld [vmem:[#allocation2 + $0x3c0] sm:$0xff] }
 0x248   : > { %2320 = vst.msk [vmem:[#allocation2 + $0x338] sm:$0xff] %vm6104_vm15, %v2191_v29  ;;  %vm5103_vm2 = vmpackc.low %vm2412_vm14, %vm2411_vm4  ;;  %v2194_v27 = vsel %vm5768_vm10, 0.0, %v5083_v62  ;;  %vm5766_vm4 = vcmp.ge.f32.partialorder %v5096_v13, 0.5  ;;  %vm6110_vm14 = vcmp.ge.f32.partialorder %v4762_v50, 0.5  ;;  %v6115_v50 = vld [vmem:[#allocation52_spill] sm:$0xff]  ;;  %vm5772_vm13 = vcmp.ge.f32.partialorder %v5142_v6, 0.5 }
 0x249   : > { %vm6109_vm6 = vmmov %vm6104_vm15  ;;  %v2196_v29 = vsel %vm5766_vm4, 0.0, %v5096_v13  ;;  %v5145_v41 = vadd.f32 %v1814_v61, %v6115_v50  ;;  %v1819_v61 = vmul.f32 0.3, %v1691_v26  ;;  %v6127_v50 = vld [vmem:[#allocation58_spill] sm:$0xff] }
 0x24a   : > { %2321 = vst.msk [vmem:[#allocation2 + $0x340] sm:$0xff] %vm6109_vm6, %v2192_v37  ;;  %vm5129_vm15 = vmor %vm6110_vm14, %vm2060_vm3  ;;  %v1815_v37 = vmul.f32 0.3, %v1687_v3  ;;  %v2197_v3 = vsel %vm5772_vm13, 0.0, %v5142_v6  ;;  %v1695_v1 = vld [vmem:[#allocation2 + $0x3b8] sm:$0xff]  ;;  %vm6137_vm13 = vcmask 261120  }
 0x24b   : > { %2322 = vst.msk [vmem:[#allocation2 + $0x348] sm:$0xff] %vm6109_vm6, %v2193_v5  ;;  %vm6113_vm1 = vmmov %vm6109_vm6  ;;  %v1816_v5 = vmul.f32 0.3, %v1688_v24  ;;  %vm6117_vm6 = vcmp.ge.f32.partialorder %v4774_v55, 0.5  ;;  %vm5771_vm10 = vcmp.ge.f32.partialorder %v5145_v41, 0.5  ;;  %v6119_v24 = vld [vmem:[#allocation50_spill] sm:$0xff] }
 0x24c   : > { %2323 = vst.msk [vmem:[#allocation2 + $0x350] sm:$0xff] %vm6113_vm1, %v2194_v27  ;;  %vm2413_vm3 = vmor %vm4507_vm8, %vm5129_vm15  ;;  %v1817_v27 = vmul.f32 0.3, %v1689_v58  ;;  %v2198_v28 = vsel %vm5771_vm10, 0.0, %v5145_v41  ;;  %v5168_v55 = vadd.f32 %v1815_v37, %v6119_v24  ;;  %v6120_v58 = vld [vmem:[#allocation56_spill] sm:$0xff]  ;;  %v5191_v37 = vadd.f32 %v1819_v61, %v6127_v50  ;;  %v6143_v24 = vld [vmem:[#allocation62_spill] sm:$0xff] }
 0x24d   : > { %2324 = vst.msk [vmem:[#allocation2 + $0x358] sm:$0xff] %vm6113_vm1, %v2195_v22  ;;  %vm6116_vm14 = vmmov %vm6113_vm1  ;;  %v5171_v22 = vadd.f32 %v1816_v5, %v6120_v58  ;;  %vm6128_vm8 = vcmp.ge.f32.partialorder %v5044_v12, 0.5  ;;  %v1823_v50 = vmul.f32 0.3, %v1695_v1  ;;  %v6148_v1 = vld [vmem:[#allocation66_spill] sm:$0xff] }
 0x24e   : > { %2325 = vst.msk [vmem:[#allocation2 + $0x360] sm:$0xff] %vm6116_vm14, %v2196_v29  ;;  %vm2382_vm4 = vmor %vm6117_vm6, %vm2061_vm11  ;;  %v5185_v26 = vadd.f32 %v1817_v27, %v6125_v47  ;;  %v6126_v29 = vld [vmem:[#allocation60_spill] sm:$0xff]  ;;  %v1821_v27 = vmul.f32 0.3, %v1693_v14  ;;  %vm6132_vm14 = vnez %v5882_v11 }
 0x24f   : > { %vm2414_vm0 = vmor %vm6118_vm7, %vm2382_vm4  ;;  %v5188_v8 = vadd.f32 %v1818_v56, %v6126_v29  ;;  %v1822_v56 = vmul.f32 0.3, %v1694_v17  ;;  %v1697_v14 = vld [vmem:[#allocation2 + $0x3c8] sm:$0xff]  ;;  %v5271_v5 = vadd.f32 %v1823_v50, %v6148_v1 }
 0x250   : > { %vm5178_vm11 = vmpackc.low %vm2414_vm0, %vm2413_vm3  ;;  %vm6129_vm0 = vcmp.ge.f32.partialorder %v4782_v21, 0.5  ;;  %vm5773_vm3 = vcmp.ge.f32.partialorder %v5168_v55, 0.5  ;;  %v5245_v58 = vadd.f32 %v1821_v27, %v6143_v24  ;;  %v6144_v47 = vld [vmem:[#allocation68_spill] sm:$0xff]  ;;  %v1824_v27 = vmul.f32 0.3, %v1696_v16  ;;  %v1703_v24 = vld [vmem:[#allocation2 + $0x3f8] sm:$0xff] }
 0x251   : > { %vm6123_vm7 = vmmov %vm6113_vm1  ;;  %v2199_v12 = vsel %vm5773_vm3, 0.0, %v5168_v55  ;;  %v5248_v29 = vadd.f32 %v1822_v56, %v6144_v47  ;;  %v1700_v56 = vld [vmem:[#allocation2 + $0x3e0] sm:$0xff]  ;;  %v1701_v16 = vld [vmem:[#allocation2 + $0x3e8] sm:$0xff] }
 0x252   : > { %2326 = vst.msk [vmem:[#allocation2 + $0x368] sm:$0xff] %vm6123_vm7, %v2197_v3  ;;  %vm6124_vm4 = vmmov %vm6113_vm1  ;;  %vm5774_vm1 = vcmp.ge.f32.partialorder %v5171_v22, 0.5  ;;  %vm5780_vm7 = vcmp.ge.f32.partialorder %v5185_v26, 0.5 }
 0x253   : > { %2327 = vst.msk [vmem:[#allocation2 + $0x370] sm:$0xff] %vm6124_vm4, %v2198_v28  ;;  %vm5197_vm15 = vmor %vm6129_vm0, %vm6128_vm8  ;;  %v2200_v21 = vsel %vm5774_vm1, 0.0, %v5171_v22  ;;  %vm5779_vm4 = vcmp.ge.f32.partialorder %v5188_v8, 0.5  ;;  %vm6133_vm8 = vcmp.ge.f32.partialorder %v5047_v25, 0.5  ;;  %vm6134_vm0 = vcmp.ge.f32.partialorder %v4785_v10, 0.5  ;;  %v6139_v25 = vld [vmem:[#allocation64_spill] sm:$0xff] }
 0x254   : > { %vm2415_vm6 = vmor %vm6132_vm14, %vm5197_vm15  ;;  %2328 = vst.msk [vmem:[#allocation2 + $0x378] sm:$0xff] %vm6137_vm13, %v2199_v12  ;;  %v2201_v61 = vsel %vm5780_vm7, 0.0, %v5185_v26  ;;  %v2202_v3 = vsel %vm5779_vm4, 0.0, %v5188_v8  ;;  %vm5775_vm1 = vcmp.ge.f32.partialorder %v5191_v37, 0.5  ;;  %v5233_v10 = vadd.f32 %v1820_v57, %v6139_v25  ;;  %v1698_v57 = vld [vmem:[#allocation2 + $0x3d0] sm:$0xff] }
 0x255   : > { %vm5219_vm10 = vmor %vm6134_vm0, %vm6133_vm8  ;;  %vm6140_vm8 = vnez %v5884_v63  ;;  %v2203_v28 = vsel %vm5775_vm1, 0.0, %v5191_v37  ;;  %v1825_v12 = vmul.f32 0.3, %v1697_v14  ;;  %vm5776_vm15 = vcmp.ge.f32.partialorder %v5245_v58, 0.5 }
 0x256   : > { %vm6138_vm3 = vmmov %vm6137_vm13  ;;  %vm5778_vm14 = vcmp.ge.f32.partialorder %v5248_v29, 0.5  ;;  %v2205_v17 = vsel %vm5776_vm15, 0.0, %v5245_v58  ;;  %v1826_v47 = vmul.f32 0.3, %v1698_v57  ;;  %vm6160_vm4 = vcmp.ge.f32.partialorder %v4793_v39, 0.5  ;;  %v6163_v57 = vld [vmem:[#allocation76_spill] sm:$0xff] }
 0x257   : > { %2329 = vst.msk [vmem:[#allocation2 + $0x380] sm:$0xff] %vm6138_vm3, %v2200_v21  ;;  %vm2416_vm13 = vmor %vm6140_vm8, %vm5219_vm10  ;;  %v1699_v21 = vld [vmem:[#allocation2 + $0x3d8] sm:$0xff]  ;;  %v3243_v14 = vmov 0  }
 0x258   : > { %vm6141_vm0 = vmmov %vm6138_vm3  ;;  %v1827_v50 = vmul.f32 0.3, %v1699_v21  ;;  %v5320_v21 = vadd.f32 %v1826_v47, %v6163_v57  ;;  %v6183_v47 = vld [vmem:[#allocation82_spill] sm:$0xff] }
 0x259   : > { %2330 = vst.msk [vmem:[#allocation2 + $0x388] sm:$0xff] %vm6141_vm0, %v2201_v61  ;;  %vm6142_vm3 = vmmov %vm6141_vm0  ;;  %v2206_v61 = vsel %vm5778_vm14, 0.0, %v5248_v29  ;;  %vm6159_vm14 = vcmp.ge.f32.partialorder %v5080_v44, 0.5 }
 0x25a   : > { %2331 = vst.msk [vmem:[#allocation2 + $0x390] sm:$0xff] %vm6142_vm3, %v2202_v3  ;;  %vm5255_vm10 = vmpackc.low %vm2416_vm13, %vm2415_vm6  ;;  %vm6149_vm6 = vcmp.ge.f32.partialorder %v5064_v43, 0.5  ;;  %vm6150_vm13 = vcmp.ge.f32.partialorder %v4788_v54, 0.5  ;;  %v6154_v3 = vld [vmem:[#allocation72_spill] sm:$0xff]  ;;  %v6155_v43 = vld [vmem:[#allocation70_spill] sm:$0xff] }
 0x25b   : > { %vm6147_vm8 = vmmov %vm6141_vm0  ;;  %vm5777_vm0 = vcmp.ge.f32.partialorder %v5233_v10, 0.5  ;;  %v5289_v25 = vadd.f32 %v1824_v27, %v6154_v3  ;;  %v1702_v54 = vld [vmem:[#allocation2 + $0x3f0] sm:$0xff] }
 0x25c   : > { %2332 = vst.msk [vmem:[#allocation2 + $0x398] sm:$0xff] %vm6147_vm8, %v2203_v28  ;;  %v2204_v11 = vsel %vm5777_vm0, 0.0, %v5233_v10  ;;  %vm5277_vm8 = vmor %vm6150_vm13, %vm6149_vm6  ;;  %v5292_v28 = vadd.f32 %v1825_v12, %v6155_v43  ;;  %vm2079_vm0 = vcmp.ge.f32.partialorder %v5271_v5, 0.5  ;;  %v1828_v12 = vmul.f32 0.3, %v1700_v56  ;;  %v6170_v56 = vld [vmem:[#allocation80_spill] sm:$0xff] }
 0x25d   : > { %vm6153_vm1 = vmmov %vm6142_vm3  ;;  %v2207_v27 = vsel %vm2079_vm0, 0.0, %v5271_v5  ;;  %v1830_v3 = vmul.f32 0.3, %v1702_v54  ;;  %v1831_v43 = vmul.f32 0.3, %v1703_v24  ;;  %v6182_v54 = vld [vmem:[#allocation84_spill] sm:$0xff] }
 0x25e   : > { %2333 = vst.msk [vmem:[#allocation2 + $0x3a0] sm:$0xff] %vm6153_vm1, %v2204_v11  ;;  %vm6156_vm1 = vnez %v5886_v20  ;;  %vm6157_vm13 = vmmov %vm6142_vm3  ;;  %vm5781_vm6 = vcmp.ge.f32.partialorder %v5292_v28, 0.5  ;;  %v6164_v11 = vld [vmem:[#allocation74_spill] sm:$0xff]  ;;  %v6242_v5 = vld [vmem:[#allocation79_spill] sm:$0xff] }
 0x25f   : > { %2334 = vst.msk [vmem:[#allocation2 + $0x3a8] sm:$0xff] %vm6157_vm13, %v2205_v17  ;;  %vm6158_vm15 = vmmov %vm6142_vm3  ;;  %vm5782_vm3 = vcmp.ge.f32.partialorder %v5289_v25, 0.5  ;;  %vm2569_vm13 = vcmask 254976   ;;  %v2209_v44 = vsel %vm5781_vm6, 0.0, %v5292_v28  ;;  %v5323_v1 = vadd.f32 %v1827_v50, %v6164_v11 }
 0x260   : > { %2335 = vst.msk [vmem:[#allocation2 + $0x3b0] sm:$0xff] %vm6158_vm15, %v2206_v61  ;;  %vm2386_vm7 = vmor %vm6160_vm4, %vm6159_vm14  ;;  %vm6161_vm15 = vnez %v5889_v4  ;;  %v2208_v39 = vsel %vm5782_vm3, 0.0, %v5289_v25  ;;  %vm6168_vm4 = vcmask 261120   ;;  %v5337_v17 = vadd.f32 %v1828_v12, %v6170_v56 }
 0x261   : > { %vm2418_vm5 = vmor %vm6161_vm15, %vm2386_vm7  ;;  %2336 = vst.msk [vmem:[#allocation2 + $0x3b8] sm:$0xff] %vm6162_vm12, %v2207_v27  ;;  %v1829_v61 = vmul.f32 0.3, %v1701_v16  ;;  %vm6171_vm15 = vcmp.ge.f32.partialorder %v5083_v62, 0.5  ;;  %vm6172_vm6 = vcmp.ge.f32.partialorder %v4819_v2, 0.5  ;;  %v5385_v24 = vadd.f32 %v1830_v3, %v6182_v54 }
 0x262   : > { %vm6165_vm7 = vmor %vm6156_vm1, %vm5277_vm8  ;;  %2337 = vst.msk [vmem:[#allocation2 + $0x3c0] sm:$0xff] %vm6168_vm4, %v2208_v39  ;;  %vm5783_vm8 = vcmp.ge.f32.partialorder %v5323_v1, 0.5  ;;  %v5388_v50 = vadd.f32 %v1831_v43, %v6183_v47 }
 0x263   : > { %vm5330_vm12 = vmpackc.low %vm2418_vm5, %vm6165_vm7  ;;  %vm2082_vm5 = vcmp.ge.f32.partialorder %v5320_v21, 0.5  ;;  %vm6177_vm7 = vnez %v5893_v59  ;;  %v2211_v30 = vsel %vm5783_vm8, 0.0, %v5323_v1  ;;  %v5373_v63 = vadd.f32 %v1829_v61, %v6178_v52 }
 0x264   : > { %vm6169_vm14 = vmmov %vm6168_vm4  ;;  %v2210_v62 = vsel %vm2082_vm5, 0.0, %v5320_v21  ;;  %v6260_v21 = vld [vmem:[#allocation63_spill] sm:$0xff] }
 0x265   : > { %2338 = vst.msk [vmem:[#allocation2 + $0x3c8] sm:$0xff] %vm6169_vm14, %v2209_v44  ;;  %vm5343_vm3 = vmor %vm6172_vm6, %vm6171_vm15 }
 0x266   : > { %vm6175_vm1 = vmpackc.even %vm5103_vm2, %vm5033_vm9  ;;  %vm2084_vm9 = vcmp.ge.f32.partialorder %v5337_v17, 0.5  ;;  %vm6179_vm2 = vcmp.ge.f32.partialorder %v5093_v45, 0.5  ;;  %2339 = vst.msk [vmem:[#allocation2 + $0x3d0] sm:$0xff] %vm6169_vm14, %v2210_v62 }
 0x267   : > { %v2465_v16 = vsel %vm6175_vm1, 16843009, %v3243_v14  ;;  %vm6176_vm6 = vmpackc.even %vm5255_vm10, %vm5178_vm11  ;;  %vm6180_vm11 = vcmp.ge.f32.partialorder %v4822_v31, 0.5  ;;  %v2212_v60 = vsel %vm2084_vm9, 0.0, %v5337_v17  ;;  %vm6184_vm1 = vnez %v5898_v7  ;;  %v6268_v17 = vld [vmem:[#allocation67_spill] sm:$0xff] }
 0x268   : > { %v2466_v2 = vsel %vm6176_vm6, 16843009, %v3243_v14  ;;  %vm2419_vm4 = vmor %vm6177_vm7, %vm5343_vm3  ;;  %v2473_v27 = vunpack.c.0.s8 %v2465_v16  ;;  %v2474_v31 = vunpack.c.1.s8 %v2465_v16  ;;  %v2475_v45 = vunpack.c.2.s8 %v2465_v16 }
 0x269   : > { %vm2388_vm10 = vmor %vm6180_vm11, %vm6179_vm2  ;;  %vm5786_vm2 = vcmp.ge.f32.partialorder %v5373_v63, 0.5  ;;  %v2476_v12 = vunpack.c.3.s8 %v2465_v16  ;;  %vm6188_vm3 = vcmp.ge.f32.partialorder %v5096_v13, 0.5  ;;  %vm6189_vm7 = vcmp.ge.f32.partialorder %v4828_v40, 0.5 }
 0x26a   : > { %vm6181_vm15 = vmmov %vm6169_vm14  ;;  %v2213_v7 = vsel %vm5786_vm2, 0.0, %v5373_v63  ;;  %v2505_v44 = vpack.c.b16 %v2473_v27, %v2473_v27  ;;  %v2507_v11 = vpack.c.b16 %v2474_v31, %v2474_v31  ;;  %v2509_v56 = vpack.c.b16 %v2475_v45, %v2475_v45 }
 0x26b   : > { %2340 = vst.msk [vmem:[#allocation2 + $0x3d8] sm:$0xff] %vm6181_vm15, %v2211_v30  ;;  %vm2420_vm6 = vmor %vm6184_vm1, %vm2388_vm10  ;;  %vm5784_vm10 = vcmp.ge.f32.partialorder %v5388_v50, 0.5  ;;  %v2511_v43 = vpack.c.b16 %v2476_v12, %v2476_v12  ;;  %v2477_v20 = vunpack.c.0.s8 %v2466_v2  ;;  %v2478_v16 = vunpack.c.1.s8 %v2466_v2 }
 0x26c   : > { %vm6185_vm8 = vmmov %vm6169_vm14  ;;  %2342 = vst.msk [vmem:[#allocation2 + $0x3e8] sm:$0xff] %vm6181_vm15, %v2213_v7  ;;  %v2215_v57 = vsel %vm5784_vm10, 0.0, %v5388_v50  ;;  %v2506_v3 = vpack.c.b8 %v2505_v44, %v2505_v44  ;;  %v2508_v40 = vpack.c.b8 %v2507_v11, %v2507_v11  ;;  %v2510_v13 = vpack.c.b8 %v2509_v56, %v2509_v56 }
 0x26d   : > { %2341 = vst.msk [vmem:[#allocation2 + $0x3e0] sm:$0xff] %vm6185_vm8, %v2212_v60  ;;  %vm5399_vm11 = vmpackc.low %vm2420_vm6, %vm2419_vm4  ;;  %vm5785_vm8 = vcmp.ge.f32.partialorder %v5385_v24, 0.5  ;;  %v2479_v62 = vunpack.c.2.s8 %v2466_v2  ;;  %v2480_v30 = vunpack.c.3.s8 %v2466_v2  ;;  %v2512_v52 = vpack.c.b8 %v2511_v43, %v2511_v43 }
 0x26e   : > { %vm2449_vm14 = vmpackc.even %vm5399_vm11, %vm5330_vm12  ;;  %v2214_v59 = vsel %vm5785_vm8, 0.0, %v5385_v24  ;;  %2570 = vst.msk [vmem:[%s3311_s7] sm:$0x3] %vm2569_vm13, %v2506_v3  ;;  %v2513_v60 = vpack.c.b16 %v2477_v20, %v2477_v20  ;;  %v2515_v54 = vpack.c.b16 %v2478_v16, %v2478_v16  ;;  %vm6200_vm11 = vcmp.ge.f32.partialorder %v5145_v41, 0.5 }
 0x26f   : > { %vm5423_vm4 = vmor %vm6189_vm7, %vm6188_vm3  ;;  %vm6195_vm3 = vcmp.ge.f32.partialorder %v5142_v6, 0.5  ;;  %vm6196_vm7 = vcmp.ge.f32.partialorder %v4837_v42, 0.5  ;;  %v2467_v47 = vsel %vm2449_vm14, 16843009, %v3243_v14  ;;  %2571 = vst.msk [vmem:[%s3311_s7 + $0x2] sm:$0x3] %vm2569_vm13, %v2508_v40  ;;  %v2517_v42 = vpack.c.b16 %v2479_v62, %v2479_v62 }
 0x270   : > { %vm6192_vm1 = vmmov %vm6181_vm15  ;;  %vm6194_vm15 = vnez %v5904_v53  ;;  %2572 = vst.msk [vmem:[%s3311_s7 + $0x4] sm:$0x3] %vm2569_vm13, %v2510_v13  ;;  %v2519_v6 = vpack.c.b16 %v2480_v30, %v2480_v30  ;;  %v2481_v2 = vunpack.c.0.s8 %v2467_v47  ;;  %v2482_v27 = vunpack.c.1.s8 %v2467_v47 }
 0x271   : > { %2343 = vst.msk [vmem:[#allocation2 + $0x3f0] sm:$0xff] %vm6192_vm1, %v2214_v59  ;;  %vm6193_vm6 = vmmov %vm6192_vm1  ;;  %v2516_v31 = vpack.c.b8 %v2515_v54, %v2515_v54  ;;  %v2483_v45 = vunpack.c.2.s8 %v2467_v47  ;;  %v2484_v12 = vunpack.c.3.s8 %v2467_v47  ;;  %vm6201_vm14 = vcmp.ge.f32.partialorder %v4840_v15, 0.5  ;;  %v6235_v47 = vld [vmem:[#allocation49_spill] sm:$0xff] }
 0x272   : > { %2344 = vst.msk [vmem:[#allocation2 + $0x3f8] sm:$0xff] %vm6193_vm6, %v2215_v57  ;;  %vm2421_vm10 = vmor %vm6194_vm15, %vm5423_vm4  ;;  %vm6197_vm6 = vnez %v5908_v36  ;;  %v2514_v36 = vpack.c.b8 %v2513_v60, %v2513_v60  ;;  %v2518_v39 = vpack.c.b8 %v2517_v42, %v2517_v42  ;;  %v2520_v7 = vpack.c.b8 %v2519_v6, %v2519_v6  ;;  %v6237_v42 = vld [vmem:[#allocation73_spill] sm:$0xff] }
 0x273   : > { %vm2390_vm1 = vmor %vm6196_vm7, %vm6195_vm3  ;;  %2573 = vst.msk [vmem:[%s3311_s7 + $0x6] sm:$0x3] %vm2569_vm13, %v2512_v52  ;;  %v2521_v44 = vpack.c.b16 %v2481_v2, %v2481_v2  ;;  %v2523_v59 = vpack.c.b16 %v2482_v27, %v2482_v27  ;;  %v2525_v15 = vpack.c.b16 %v2483_v45, %v2483_v45  ;;  %v2527_v41 = vpack.c.b16 %v2484_v12, %v2484_v12  ;;  %v6244_v2 = vld [vmem:[#allocation53_spill] sm:$0xff] }
 0x274   : > { %vm2422_vm8 = vmor %vm6197_vm6, %vm2390_vm1  ;;  %2574 = vst.msk [vmem:[%s3311_s7 + $0x8] sm:$0x3] %vm2569_vm13, %v2514_v36  ;;  %vm6205_vm4 = vcmp.ge.f32.partialorder %v5168_v55, 0.5  ;;  %vm6206_vm15 = vcmp.ge.f32.partialorder %v4846_v51, 0.5  ;;  %vm6207_vm1 = vnez %v5918_v35  ;;  %v6247_v45 = vld [vmem:[#allocation77_spill] sm:$0xff] }
 0x275   : > { %vm5456_vm12 = vmpackc.low %vm2422_vm8, %vm2421_vm10  ;;  %vm6204_vm8 = vnez %v5912_v46  ;;  %2575 = vst.msk [vmem:[%s3311_s7 + $0xa] sm:$0x3] %vm2569_vm13, %v2516_v31  ;;  %v2522_v46 = vpack.c.b8 %v2521_v44, %v2521_v44  ;;  %v2524_v57 = vpack.c.b8 %v2523_v59, %v2523_v59  ;;  %v2526_v11 = vpack.c.b8 %v2525_v15, %v2525_v15 }
 0x276   : > { %vm5466_vm3 = vmor %vm6201_vm14, %vm6200_vm11  ;;  %2576 = vst.msk [vmem:[%s3311_s7 + $0xc] sm:$0x3] %vm2569_vm13, %v2518_v39  ;;  %v2528_v56 = vpack.c.b8 %v2527_v41, %v2527_v41 }
 0x277   : > { %vm2423_vm10 = vmor %vm6204_vm8, %vm5466_vm3  ;;  %2577 = vst.msk [vmem:[%s3311_s7 + $0xe] sm:$0x3] %vm2569_vm13, %v2520_v7  ;;  %vm6208_vm3 = vcmp.ge.f32.partialorder %v5171_v22, 0.5  ;;  %vm6209_vm8 = vcmp.ge.f32.partialorder %v4849_v33, 0.5 }
 0x278   : > { %vm2392_vm7 = vmor %vm6206_vm15, %vm6205_vm4  ;;  %2578 = vst.msk [vmem:[%s3311_s7 + $0x10] sm:$0x3] %vm2569_vm13, %v2522_v46 }
 0x279   : > { %vm2424_vm6 = vmor %vm6207_vm1, %vm2392_vm7  ;;  %2579 = vst.msk [vmem:[%s3311_s7 + $0x12] sm:$0x3] %vm2569_vm13, %v2524_v57  ;;  %vm6212_vm7 = vcmp.ge.f32.partialorder %v4874_v18, 0.5  ;;  %v6255_v57 = vld [vmem:[#allocation57_spill] sm:$0xff] }
 0x27a   : > { %vm2451_vm11 = vmpackc.low %vm2424_vm6, %vm2423_vm10  ;;  %2580 = vst.msk [vmem:[%s3311_s7 + $0x14] sm:$0x3] %vm2569_vm13, %v2526_v11  ;;  %vm6210_vm10 = vnez %v5923_v19  ;;  %vm6213_vm6 = vnez %v5927_v32  ;;  %v6258_v11 = vld [vmem:[#allocation81_spill] sm:$0xff] }
 0x27b   : > { %vm2452_vm14 = vmpackc.even %vm2451_vm11, %vm5456_vm12  ;;  %2581 = vst.msk [vmem:[%s3311_s7 + $0x16] sm:$0x3] %vm2569_vm13, %v2528_v56  ;;  %vm6211_vm12 = vcmp.ge.f32.partialorder %v5185_v26, 0.5 }
 0x27c   : > { %vm2393_vm4 = vmor %vm6209_vm8, %vm6208_vm3  ;;  %v2468_v35 = vsel %vm2452_vm14, 16843009, %v3243_v14  ;;  %vm6216_vm3 = vcmp.ge.f32.partialorder %v5188_v8, 0.5  ;;  %vm6217_vm8 = vcmp.ge.f32.partialorder %v4877_v38, 0.5 }
 0x27d   : > { %vm2425_vm15 = vmor %vm6210_vm10, %vm2393_vm4  ;;  %v2485_v51 = vunpack.c.0.s8 %v2468_v35  ;;  %v2486_v55 = vunpack.c.1.s8 %v2468_v35  ;;  %v2487_v61 = vunpack.c.2.s8 %v2468_v35  ;;  %v2488_v3 = vunpack.c.3.s8 %v2468_v35  ;;  %v6264_v35 = vld [vmem:[#allocation61_spill] sm:$0xff] }
 0x27e   : > { %vm2394_vm1 = vmor %vm6212_vm7, %vm6211_vm12  ;;  %vm6218_vm10 = vnez %v5932_v0  ;;  %vm6219_vm7 = vcmp.ge.f32.partialorder %v5191_v37, 0.5  ;;  %v6226_v37 = vld [vmem:[#allocation69_spill] sm:$0xff] }
 0x27f   : > { %vm2426_vm11 = vmor %vm6213_vm6, %vm2394_vm1  ;;  %v2529_v33 = vpack.c.b16 %v2485_v51, %v2485_v51  ;;  %v2531_v22 = vpack.c.b16 %v2486_v55, %v2486_v55  ;;  %v2533_v19 = vpack.c.b16 %v2487_v61, %v2487_v61  ;;  %v2535_v43 = vpack.c.b16 %v2488_v3, %v2488_v3 }
 0x280   : > { %vm5511_vm14 = vmpackc.low %vm2426_vm11, %vm2425_vm15  ;;  %vm6220_vm1 = vcmp.ge.f32.partialorder %v4890_v34, 0.5  ;;  %vm6221_vm6 = vnez %v5938_v48 }
 0x281   : > { %vm2395_vm4 = vmor %vm6217_vm8, %vm6216_vm3  ;;  %v2530_v18 = vpack.c.b8 %v2529_v33, %v2529_v33  ;;  %v2532_v26 = vpack.c.b8 %v2531_v22, %v2531_v22  ;;  %v2534_v16 = vpack.c.b8 %v2533_v19, %v2533_v19  ;;  %v2536_v32 = vpack.c.b8 %v2535_v43, %v2535_v43 }
 0x282   : > { %vm2427_vm12 = vmor %vm6218_vm10, %vm2395_vm4  ;;  %vm6222_vm4 = vcmp.ge.f32.partialorder %v5233_v10, 0.5  ;;  %vm6223_vm10 = vcmp.ge.f32.partialorder %v4893_v49, 0.5  ;;  %v6228_v10 = vld [vmem:[#allocation51_spill] sm:$0xff] }
 0x283   : > { %vm2396_vm15 = vmor %vm6220_vm1, %vm6219_vm7  ;;  %2582 = vst.msk [vmem:[%s3311_s7 + $0x18] sm:$0x3] %vm2569_vm13, %v2530_v18  ;;  %vm6224_vm1 = vnez %v5942_v23 }
 0x284   : > { %2583 = vst.msk [vmem:[%s3311_s7 + $0x1a] sm:$0x3] %vm2569_vm13, %v2532_v26  ;;  %2584 = vst.msk [vmem:[%s3311_s7 + $0x1c] sm:$0x3] %vm2569_vm13, %v2534_v16 }
 0x285   : > { %2585 = vst.msk [vmem:[%s3311_s7 + $0x1e] sm:$0x3] %vm2569_vm13, %v2536_v32  ;;  %vm2428_vm11 = vmor %vm6221_vm6, %vm2396_vm15  ;;  %vm6227_vm15 = vcmp.ge.f32.partialorder %v6226_v37, 0.5  ;;  %vm6229_vm6 = vnez %v6228_v10  ;;  %v6275_v32 = vld [vmem:[#allocation65_spill] sm:$0xff] }
 0x286   : > { %vm2454_vm3 = vmpackc.low %vm2428_vm11, %vm2427_vm12  ;;  %vm6225_vm12 = vcmp.ge.f32.partialorder %v5245_v58, 0.5  ;;  %v6233_v58 = vld [vmem:[#allocation75_spill] sm:$0xff] }
 0x287   : > { %vm2455_vm8 = vmpackc.even %vm2454_vm3, %vm5511_vm14 }
 0x288   : > { %vm2397_vm7 = vmor %vm6223_vm10, %vm6222_vm4  ;;  %v2469_v0 = vsel %vm2455_vm8, 16843009, %v3243_v14  ;;  %vm6232_vm8 = vcmp.ge.f32.partialorder %v5248_v29, 0.5  ;;  %vm6234_vm4 = vcmp.ge.f32.partialorder %v6233_v58, 0.5  ;;  %v6239_v29 = vld [vmem:[#allocation55_spill] sm:$0xff] }
 0x289   : > { %vm2429_vm2 = vmor %vm6224_vm1, %vm2397_vm7  ;;  %v2489_v38 = vunpack.c.0.s8 %v2469_v0  ;;  %v2490_v34 = vunpack.c.1.s8 %v2469_v0  ;;  %v2491_v8 = vunpack.c.2.s8 %v2469_v0  ;;  %v2492_v48 = vunpack.c.3.s8 %v2469_v0  ;;  %v6278_v0 = vld [vmem:[#allocation6_spill] sm:$0xff] }
 0x28a   : > { %vm2398_vm14 = vmor %vm6227_vm15, %vm6225_vm12  ;;  %vm6236_vm7 = vnez %v6235_v47  ;;  %vm6238_vm12 = vcmp.ge.f32.partialorder %v6237_v42, 0.5  ;;  %vm6240_vm15 = vnez %v6239_v29 }
 0x28b   : > { %vm2430_vm11 = vmor %vm6229_vm6, %vm2398_vm14  ;;  %v2537_v49 = vpack.c.b16 %v2489_v38, %v2489_v38  ;;  %v2539_v40 = vpack.c.b16 %v2490_v34, %v2490_v34  ;;  %v2541_v23 = vpack.c.b16 %v2491_v8, %v2491_v8  ;;  %v2543_v13 = vpack.c.b16 %v2492_v48, %v2492_v48 }
 0x28c   : > { %vm5550_vm3 = vmpackc.low %vm2430_vm11, %vm2429_vm2 }
 0x28d   : > { %vm2399_vm10 = vmor %vm6234_vm4, %vm6232_vm8  ;;  %v2538_v30 = vpack.c.b8 %v2537_v49, %v2537_v49  ;;  %v2540_v52 = vpack.c.b8 %v2539_v40, %v2539_v40  ;;  %v2542_v60 = vpack.c.b8 %v2541_v23, %v2541_v23  ;;  %v2544_v54 = vpack.c.b8 %v2543_v13, %v2543_v13 }
 0x28e   : > { %vm2431_vm1 = vmor %vm6236_vm7, %vm2399_vm10  ;;  %vm6241_vm8 = vcmp.ge.f32.partialorder %v5289_v25, 0.5  ;;  %vm6243_vm4 = vcmp.ge.f32.partialorder %v6242_v5, 0.5  ;;  %vm6245_vm10 = vnez %v6244_v2  ;;  %v6249_v25 = vld [vmem:[#allocation59_spill] sm:$0xff] }
 0x28f   : > { %vm2400_vm2 = vmor %vm6238_vm12, %vm2079_vm0  ;;  %2586 = vst.msk [vmem:[%s3311_s7 + $0x20] sm:$0x3] %vm2569_vm13, %v2538_v30  ;;  %vm6248_vm12 = vcmp.ge.f32.partialorder %v6247_v45, 0.5 }
 0x290   : > { %2587 = vst.msk [vmem:[%s3311_s7 + $0x22] sm:$0x3] %vm2569_vm13, %v2540_v52  ;;  %2588 = vst.msk [vmem:[%s3311_s7 + $0x24] sm:$0x3] %vm2569_vm13, %v2542_v60 }
 0x291   : > { %2589 = vst.msk [vmem:[%s3311_s7 + $0x26] sm:$0x3] %vm2569_vm13, %v2544_v54  ;;  %vm2432_vm14 = vmor %vm6240_vm15, %vm2400_vm2  ;;  %vm6250_vm2 = vnez %v6249_v25 }
 0x292   : > { %vm2457_vm6 = vmpackc.low %vm2432_vm14, %vm2431_vm1  ;;  %vm6246_vm1 = vcmp.ge.f32.partialorder %v5292_v28, 0.5  ;;  %v6253_v28 = vld [vmem:[#allocation83_spill] sm:$0xff] }
 0x293   : > { %vm2458_vm11 = vmpackc.even %vm2457_vm6, %vm5550_vm3  ;;  %vm6254_vm6 = vcmp.ge.f32.partialorder %v6253_v28, 0.5 }
 0x294   : > { %vm2401_vm0 = vmor %vm6243_vm4, %vm6241_vm8  ;;  %v2470_v6 = vsel %vm2458_vm11, 16843009, %v3243_v14  ;;  %vm6256_vm8 = vnez %v6255_v57 }
 0x295   : > { %vm2433_vm7 = vmor %vm6245_vm10, %vm2401_vm0  ;;  %v2493_v27 = vunpack.c.0.s8 %v2470_v6  ;;  %v2494_v4 = vunpack.c.1.s8 %v2470_v6  ;;  %v2495_v36 = vunpack.c.2.s8 %v2470_v6  ;;  %v2496_v31 = vunpack.c.3.s8 %v2470_v6 }
 0x296   : > { %vm2402_vm3 = vmor %vm6248_vm12, %vm6246_vm1  ;;  %vm6257_vm0 = vcmp.ge.f32.partialorder %v5323_v1, 0.5  ;;  %vm6259_vm10 = vcmp.ge.f32.partialorder %v6258_v11, 0.5  ;;  %v6262_v1 = vld [vmem:[#allocation4_spill] sm:$0xff] }
 0x297   : > { %vm2434_vm15 = vmor %vm6250_vm2, %vm2402_vm3  ;;  %v2545_v12 = vpack.c.b16 %v2493_v27, %v2493_v27  ;;  %v2547_v53 = vpack.c.b16 %v2494_v4, %v2494_v4  ;;  %v2549_v39 = vpack.c.b16 %v2495_v36, %v2495_v36  ;;  %v2551_v7 = vpack.c.b16 %v2496_v31, %v2496_v31 }
 0x298   : > { %vm5589_vm14 = vmpackc.low %vm2434_vm15, %vm2433_vm7  ;;  %vm6263_vm2 = vcmp.ge.f32.partialorder %v6262_v1, 0.5 }
 0x299   : > { %vm2403_vm11 = vmor %vm6254_vm6, %vm2082_vm5  ;;  %v2546_v59 = vpack.c.b8 %v2545_v12, %v2545_v12  ;;  %v2548_v15 = vpack.c.b8 %v2547_v53, %v2547_v53  ;;  %v2550_v41 = vpack.c.b8 %v2549_v39, %v2549_v39  ;;  %v2552_v46 = vpack.c.b8 %v2551_v7, %v2551_v7 }
 0x29a   : > { %vm2435_vm4 = vmor %vm6256_vm8, %vm2403_vm11  ;;  %vm6261_vm5 = vnez %v6260_v21  ;;  %vm6265_vm6 = vnez %v6264_v35  ;;  %vm6266_vm8 = vcmp.ge.f32.partialorder %v5373_v63, 0.5  ;;  %v6273_v63 = vld [vmem:[#allocation3_spill] sm:$0xff] }
 0x29b   : > { %vm2404_vm7 = vmor %vm6259_vm10, %vm6257_vm0  ;;  %2590 = vst.msk [vmem:[%s3311_s7 + $0x28] sm:$0x3] %vm2569_vm13, %v2546_v59  ;;  %vm6269_vm0 = vnez %v6268_v17 }
 0x29c   : > { %2591 = vst.msk [vmem:[%s3311_s7 + $0x2a] sm:$0x3] %vm2569_vm13, %v2548_v15  ;;  %2592 = vst.msk [vmem:[%s3311_s7 + $0x2c] sm:$0x3] %vm2569_vm13, %v2550_v41 }
 0x29d   : > { %2593 = vst.msk [vmem:[%s3311_s7 + $0x2e] sm:$0x3] %vm2569_vm13, %v2552_v46  ;;  %vm2436_vm1 = vmor %vm6261_vm5, %vm2404_vm7  ;;  %vm6272_vm7 = vcmp.ge.f32.partialorder %v5385_v24, 0.5  ;;  %vm6274_vm5 = vcmp.ge.f32.partialorder %v6273_v63, 0.5  ;;  %v6280_v24 = vld [vmem:[#allocation71_spill] sm:$0xff] }
 0x29e   : > { %vm2460_vm12 = vmpackc.low %vm2436_vm1, %vm2435_vm4  ;;  %vm6267_vm4 = vcmp.ge.f32.partialorder %v4960_v9, 0.5 }
 0x29f   : > { %vm2461_vm3 = vmpackc.even %vm2460_vm12, %vm5589_vm14  ;;  %vm6276_vm12 = vnez %v6275_v32 }
 0x2a0   : > { %vm2405_vm15 = vmor %vm6263_vm2, %vm2084_vm9  ;;  %v2471_v56 = vsel %vm2461_vm3, 16843009, %v3243_v14  ;;  %vm6277_vm2 = vcmp.ge.f32.partialorder %v5388_v50, 0.5 }
 0x2a1   : > { %vm2437_vm11 = vmor %vm6265_vm6, %vm2405_vm15  ;;  %v2497_v51 = vunpack.c.0.s8 %v2471_v56  ;;  %v2498_v55 = vunpack.c.1.s8 %v2471_v56  ;;  %v2499_v61 = vunpack.c.2.s8 %v2471_v56  ;;  %v2500_v3 = vunpack.c.3.s8 %v2471_v56 }
 0x2a2   : > { %vm2406_vm14 = vmor %vm6267_vm4, %vm6266_vm8  ;;  %vm6279_vm15 = vcmp.ge.f32.partialorder %v6278_v0, 0.5 }
 0x2a3   : > { %vm2438_vm9 = vmor %vm6269_vm0, %vm2406_vm14  ;;  %v2553_v33 = vpack.c.b16 %v2497_v51, %v2497_v51  ;;  %v2555_v22 = vpack.c.b16 %v2498_v55, %v2498_v55  ;;  %v2557_v19 = vpack.c.b16 %v2499_v61, %v2499_v61  ;;  %v2559_v43 = vpack.c.b16 %v2500_v3, %v2500_v3 }
 0x2a4   : > { %vm5628_vm10 = vmpackc.low %vm2438_vm9, %vm2437_vm11  ;;  %vm6281_vm11 = vnez %v6280_v24 }
 0x2a5   : > { %vm2407_vm1 = vmor %vm6274_vm5, %vm6272_vm7  ;;  %v2554_v9 = vpack.c.b8 %v2553_v33, %v2553_v33  ;;  %v2556_v18 = vpack.c.b8 %v2555_v22, %v2555_v22  ;;  %v2558_v26 = vpack.c.b8 %v2557_v19, %v2557_v19  ;;  %v2560_v16 = vpack.c.b8 %v2559_v43, %v2559_v43 }
 0x2a6   : > { %vm2439_vm3 = vmor %vm6276_vm12, %vm2407_vm1 }
 0x2a7   : > { %vm2408_vm6 = vmor %vm6279_vm15, %vm6277_vm2  ;;  %2594 = vst.msk [vmem:[%s3311_s7 + $0x30] sm:$0x3] %vm2569_vm13, %v2554_v9 }
 0x2a8   : > { %2595 = vst.msk [vmem:[%s3311_s7 + $0x32] sm:$0x3] %vm2569_vm13, %v2556_v18  ;;  %2596 = vst.msk [vmem:[%s3311_s7 + $0x34] sm:$0x3] %vm2569_vm13, %v2558_v26 }
 0x2a9   : > { %2597 = vst.msk [vmem:[%s3311_s7 + $0x36] sm:$0x3] %vm2569_vm13, %v2560_v16  ;;  %vm2440_vm8 = vmor %vm6281_vm11, %vm2408_vm6 }
 0x2aa   : > { %vm2463_vm4 = vmpackc.low %vm2440_vm8, %vm2439_vm3 }
 0x2ab   : > { %vm2464_vm14 = vmpackc.even %vm2463_vm4, %vm5628_vm10 }
 0x2ac   : > { %v2472_v50 = vsel %vm2464_vm14, 16843009, %v3243_v14 }
 0x2ad   : > { %v2501_v38 = vunpack.c.0.s8 %v2472_v50  ;;  %v2502_v34 = vunpack.c.1.s8 %v2472_v50  ;;  %v2503_v8 = vunpack.c.2.s8 %v2472_v50  ;;  %v2504_v48 = vunpack.c.3.s8 %v2472_v50 }
 0x2af   : > { %v2561_v37 = vpack.c.b16 %v2501_v38, %v2501_v38  ;;  %v2563_v10 = vpack.c.b16 %v2502_v34, %v2502_v34  ;;  %v2565_v49 = vpack.c.b16 %v2503_v8, %v2503_v8  ;;  %v2567_v40 = vpack.c.b16 %v2504_v48, %v2504_v48 }
 0x2b1   : > { %v2562_v23 = vpack.c.b8 %v2561_v37, %v2561_v37  ;;  %v2564_v13 = vpack.c.b8 %v2563_v10, %v2563_v10  ;;  %v2566_v62 = vpack.c.b8 %v2565_v49, %v2565_v49  ;;  %v2568_v58 = vpack.c.b8 %v2567_v40, %v2567_v40 }
 0x2b3   : > { %2598 = vst.msk [vmem:[%s3311_s7 + $0x38] sm:$0x3] %vm2569_vm13, %v2562_v23  ;;  %2599 = vst.msk [vmem:[%s3311_s7 + $0x3a] sm:$0x3] %vm2569_vm13, %v2564_v13 }
 0x2b4   : > { %2600 = vst.msk [vmem:[%s3311_s7 + $0x3c] sm:$0x3] %vm2569_vm13, %v2566_v62  ;;  %2601 = vst.msk [vmem:[%s3311_s7 + $0x3e] sm:$0x3] %vm2569_vm13, %v2568_v58 }
 0x2b5 PF: > { %s13_s16 = sadd.s32 1, %s3239_s16   ;;  %s6282_s12 = smov %s3231_s14 }
 0x2b6   : > { %p10_p8 = scmp.ge.s32.totalorder %s13_s16, 10   ;;  %s6283_s13 = smov %s3235_s15 }
 0x2b7   : > { %s6284_s14 = smov %s6287_s17  ;;  %s6285_s15 = smov %s6291_s18 }
 0x2b8   :  { %12 = sbr.rel (!%p10_p8) target bundleno = 3 (0x3), region = 66 }

// kernel: forward.5
= control target key start
LH: loop header
LB: loop body
LE: loop exit
PB: predicated region body
PF: predicated region fallthrough
CT: control target
= control target key end

     0   :  { %s1537_s12 = smov 0   ;;  %s1539_s13 = smov 0   ;;  %s2212_s0 = inlined_call_operand.vmem [shape: s8[2048,288], index: 0, kind: input, shape index: {}]   ;;  %s2213_s1 = inlined_call_operand.vmem [shape: bf16[288,64], index: 1, kind: input, shape index: {}]   ;;  %s2214_s2 = inlined_call_operand.vmem [shape: f32[1,64], index: 2, kind: input, shape index: {}]   ;;  %s2215_s3 = inlined_call_operand.vmem [shape: s8[512,64], index: 3, kind: output, shape index: {}]  }
   0x1   :  { %s1541_s14 = smov 0   ;;  %s1543_s15 = smov 0  }
   0x2   :  { %s1545_s16 = smov 0  }
   0x3 LB: > { %s22_s17 = sadd.s32 1, %s1505_s14  ;;  %s25_s18 = sadd.s32 1, %s1509_s15  ;;  %s1513_s16 = sphi %s1545_s16, %s13_s16   ;;  %s1509_s15 = sphi %s1543_s15, %s2285_s15   ;;  %s1505_s14 = sphi %s1541_s14, %s2284_s14   ;;  %s1501_s13 = sphi %s1539_s13, %s2283_s13   ;;  %s1497_s12 = sphi %s1537_s12, %s2282_s12  }
   0x4   : > { %p23_p0 = scmp.ge.s32.totalorder %s22_s17, 4  ;;  %p1187_p1 = scmp.ge.s32.totalorder %s1513_s16, 1 }
   0x5   : > { %p163_p2 = scmp.lt.s32.totalorder %s1513_s16, 9 }
   0x6   : > { %s2287_s17 = smov (%p23_p0, %s22_s17), 0  ;;  %s2289_s18 = smov (!%p23_p0, %s25_s18), %s1509_s15 }
   0x7   : > { %p164_p3 = pnand %p1187_p1, %p163_p2  ;;  %p27_p4 = scmp.ge.s32.totalorder %s2289_s18, 2 }
   0x8   : > { %v1457_v0 = vld [vmem:[%s2213_s1 + $0x40] sm:$0xff] (!%p164_p3)   ;;  %s1188_s21 = sshll.u32 (!%p164_p3), %s1501_s13, 2  ;;  %v1459_v2 = vld [vmem:[%s2213_s1 + $0x48] sm:$0xff] (!%p164_p3)   ;;  %v1461_v4 = vld [vmem:[%s2213_s1 + $0x50] sm:$0xff] (!%p164_p3)   ;;  %vm439_vm0 = vcmask (!%p164_p3), 261120   ;;  %p1229_p6 = scmp.ne.s32.totalorder (!%p164_p3), %s1497_s12, 0 }
   0x9   : > { %s2291_s18 = smov (%p27_p4, %s2289_s18), 0  ;;  %167 = sbr.rel (%p164_p3) target bundleno = 421 (0x1a5), region = 32 }
   0xa   : > { %v1458_v1 = vld [vmem:[%s2213_s1] sm:$0xff] (!%p164_p3)   ;;  %s193_s24 = sadd.s32 (!%p164_p3), %s1497_s12, %s1188_s21  ;;  %1232 = vmatprep.subr.bf16.mxu0 (!%p164_p3), %v1457_v0  ;;  %1398 = vmatprep.subr.bf16.mxu1 (!%p164_p3), %v1457_v0  ;;  %v1460_v3 = vld [vmem:[%s2213_s1 + $0x8] sm:$0xff] (!%p164_p3)   ;;  %v1462_v5 = vld [vmem:[%s2213_s1 + $0x10] sm:$0xff] (!%p164_p3)  }
   0xb   : > { %s1189_s27 = sshll.u32 (!%p164_p3), %s193_s24, 3  ;;  %1233 = vmatpush3.bf16.msra.mxu0 (!%p164_p3), %v1458_v1  ;;  %1406 = vmatpush3.bf16.msra.mxu1 (!%p164_p3), %v1458_v1  ;;  %v1463_v6 = vld [vmem:[%s2213_s1 + $0x58] sm:$0xff] (!%p164_p3)   ;;  %v1465_v8 = vld [vmem:[%s2213_s1 + $0x60] sm:$0xff] (!%p164_p3)   ;;  %v1467_v10 = vld [vmem:[%s2213_s1 + $0x68] sm:$0xff] (!%p164_p3)  }
   0xc   : > { %p195_p5 = scmp.lt.s32.totalorder (!%p164_p3), %s1189_s27, 63  ;;  %1234 = vmatprep.subr.bf16.mxu0 (!%p164_p3), %v1459_v2  ;;  %1399 = vmatprep.subr.bf16.mxu1 (!%p164_p3), %v1459_v2  ;;  %v1464_v7 = vld [vmem:[%s2213_s1 + $0x18] sm:$0xff] (!%p164_p3)   ;;  %v1466_v9 = vld [vmem:[%s2213_s1 + $0x20] sm:$0xff] (!%p164_p3)   ;;  %v1468_v15 = vld [vmem:[%s2213_s1 + $0x28] sm:$0xff] (!%p164_p3)  }
   0xd   : > { %v1469_v16 = vld [vmem:[%s2213_s1 + $0x70] sm:$0xff] (!%p164_p3)   ;;  %v1471_v18 = vld [vmem:[%s2213_s1 + $0x78] sm:$0xff] (!%p164_p3)   ;;  %v1473_v22 = vld [vmem:[%s2213_s1 + $0x80] sm:$0xff] (!%p164_p3)  }
   0xe   : > { %v1470_v17 = vld [vmem:[%s2213_s1 + $0x30] sm:$0xff] (!%p164_p3)   ;;  %v1472_v19 = vld [vmem:[%s2213_s1 + $0x38] sm:$0xff] (!%p164_p3)   ;;  %v1474_v27 = vld [vmem:[%s2213_s1 + $0x88] sm:$0xff] (!%p164_p3)  }
   0xf   : > { %1235 = vmatpush3.bf16.msra.mxu0 (!%p164_p3), %v1460_v3  ;;  %1407 = vmatpush3.bf16.msra.mxu1 (!%p164_p3), %v1460_v3 }
  0x10   : > { %s2293_s27 = smov (!%p195_p5, %s1189_s27), 63  ;;  %1236 = vmatprep.subr.bf16.mxu0 %v1461_v4  ;;  %1400 = vmatprep.subr.bf16.mxu1 %v1461_v4  ;;  %vm814_vm1 = vcmask (!%p1229_p6), 523264  }
  0x11   : > { %s1193_s9 = sshll.u32 %s2293_s27, 1  ;;  %s1414_s10 = smul.u32 24, %s2293_s27 }
  0x12   : > { %s1594_s19 = scalar_lea.vmem %s2215_s3, %s1193_s9 }
  0x13   : > { %1237 = vmatpush3.bf16.msra.mxu0 %v1462_v5  ;;  %1408 = vmatpush3.bf16.msra.mxu1 %v1462_v5  ;;  %s1605_s26 = scalar_lea.vmem %s2212_s0, %s1414_s10 }
  0x14   : > { %1238 = vmatprep.subr.bf16.mxu0 %v1463_v6  ;;  %1401 = vmatprep.subr.bf16.mxu1 %v1463_v6  ;;  %v217_v11 = vld [vmem:[%s1605_s26 + $0x8] sm:$0xff]  ;;  %v235_v12 = vld [vmem:[%s1605_s26 + $0x98] sm:$0xff]  ;;  %v216_v20 = vld [vmem:[%s1605_s26] sm:$0xff] }
  0x15   : > { %v241_v13 = vunpack.c.l.s8.bf16 %v217_v11  ;;  %v277_v14 = vunpack.c.l.s8.bf16 %v235_v12  ;;  %v234_v21 = vld [vmem:[%s1605_s26 + $0x90] sm:$0xff]  ;;  %v240_v23 = vunpack.c.l.s8.bf16 %v216_v20  ;;  %v244_v25 = vunpack.c.h.s8.bf16 %v217_v11  ;;  %v220_v28 = vld [vmem:[%s1605_s26 + $0x20] sm:$0xff]  ;;  %v219_v34 = vld [vmem:[%s1605_s26 + $0x18] sm:$0xff] }
  0x16   : > { %v276_v24 = vunpack.c.l.s8.bf16 %v234_v21  ;;  %v280_v26 = vunpack.c.h.s8.bf16 %v235_v12  ;;  %v238_v29 = vld [vmem:[%s1605_s26 + $0xb0] sm:$0xff]  ;;  %v243_v30 = vunpack.c.h.s8.bf16 %v216_v20  ;;  %v279_v31 = vunpack.c.h.s8.bf16 %v234_v21  ;;  %v237_v35 = vld [vmem:[%s1605_s26 + $0xa8] sm:$0xff]  ;;  %v223_v40 = vld [vmem:[%s1605_s26 + $0x38] sm:$0xff] }
  0x17   : > { %1239 = vmatpush3.bf16.msra.mxu0 %v1464_v7  ;;  %1409 = vmatpush3.bf16.msra.mxu1 %v1464_v7  ;;  %v247_v32 = vunpack.c.l.s8.bf16 %v220_v28  ;;  %v283_v33 = vunpack.c.l.s8.bf16 %v238_v29  ;;  %v246_v36 = vunpack.c.l.s8.bf16 %v219_v34  ;;  %v282_v37 = vunpack.c.l.s8.bf16 %v237_v35  ;;  %v218_v41 = vld [vmem:[%s1605_s26 + $0x10] sm:$0xff]  ;;  %v221_v47 = vld [vmem:[%s1605_s26 + $0x28] sm:$0xff]  ;;  %v224_v53 = vld [vmem:[%s1605_s26 + $0x40] sm:$0xff] }
  0x18   : > { %1240 = vmatprep.subr.bf16.mxu0 %v1465_v8  ;;  %1402 = vmatprep.subr.bf16.mxu1 %v1465_v8  ;;  %v250_v38 = vunpack.c.h.s8.bf16 %v220_v28  ;;  %v286_v39 = vunpack.c.h.s8.bf16 %v238_v29  ;;  %v249_v42 = vunpack.c.h.s8.bf16 %v219_v34  ;;  %v285_v43 = vunpack.c.h.s8.bf16 %v237_v35  ;;  %v222_v46 = vld [vmem:[%s1605_s26 + $0x30] sm:$0xff]  ;;  %v225_v58 = vld [vmem:[%s1605_s26 + $0x48] sm:$0xff]  ;;  %v227_v59 = vld [vmem:[%s1605_s26 + $0x58] sm:$0xff] }
  0x19   : > { %520 = vmatprep.mubr.bf16.mxu0 %v241_v13  ;;  %616 = vmatprep.mubr.bf16.mxu1 %v277_v14  ;;  %v253_v44 = vunpack.c.l.s8.bf16 %v223_v40  ;;  %v242_v45 = vunpack.c.l.s8.bf16 %v218_v41  ;;  %v245_v48 = vunpack.c.h.s8.bf16 %v218_v41  ;;  %v252_v49 = vunpack.c.l.s8.bf16 %v222_v46  ;;  %v226_v52 = vld [vmem:[%s1605_s26 + $0x50] sm:$0xff]  ;;  %v229_v0 = vld [vmem:[%s1605_s26 + $0x68] sm:$0xff]  ;;  %v228_v6 = vld [vmem:[%s1605_s26 + $0x60] sm:$0xff] }
  0x1a   : > { %v256_v50 = vunpack.c.h.s8.bf16 %v223_v40  ;;  %v248_v51 = vunpack.c.l.s8.bf16 %v221_v47  ;;  %v255_v54 = vunpack.c.h.s8.bf16 %v222_v46  ;;  %v251_v55 = vunpack.c.h.s8.bf16 %v221_v47  ;;  %v230_v1 = vld [vmem:[%s1605_s26 + $0x70] sm:$0xff]  ;;  %v233_v7 = vld [vmem:[%s1605_s26 + $0x88] sm:$0xff]  ;;  %v232_v12 = vld [vmem:[%s1605_s26 + $0x80] sm:$0xff] }
  0x1b   : > { %1241 = vmatpush3.bf16.msra.mxu0 %v1466_v9  ;;  %1410 = vmatpush3.bf16.msra.mxu1 %v1466_v9  ;;  %v259_v56 = vunpack.c.l.s8.bf16 %v226_v52  ;;  %v254_v57 = vunpack.c.l.s8.bf16 %v224_v53  ;;  %v258_v60 = vunpack.c.l.s8.bf16 %v225_v58  ;;  %v257_v61 = vunpack.c.h.s8.bf16 %v224_v53  ;;  %v236_v13 = vld [vmem:[%s1605_s26 + $0xa0] sm:$0xff] }
  0x1c   : > { %1242 = vmatprep.subr.bf16.mxu0 %v1467_v10  ;;  %1403 = vmatprep.subr.bf16.mxu1 %v1467_v10  ;;  %v262_v62 = vunpack.c.h.s8.bf16 %v226_v52  ;;  %v260_v63 = vunpack.c.l.s8.bf16 %v227_v59  ;;  %v261_v2 = vunpack.c.h.s8.bf16 %v225_v58  ;;  %v263_v3 = vunpack.c.h.s8.bf16 %v227_v59 }
  0x1d   : > { %v265_v4 = vunpack.c.l.s8.bf16 %v229_v0  ;;  %v266_v5 = vunpack.c.l.s8.bf16 %v230_v1  ;;  %v264_v8 = vunpack.c.l.s8.bf16 %v228_v6  ;;  %v269_v9 = vunpack.c.h.s8.bf16 %v230_v1 }
  0x1e   : > { %v268_v10 = vunpack.c.h.s8.bf16 %v229_v0  ;;  %v272_v11 = vunpack.c.l.s8.bf16 %v233_v7  ;;  %v267_v14 = vunpack.c.h.s8.bf16 %v228_v6  ;;  %v281_v21 = vunpack.c.h.s8.bf16 %v236_v13 }
  0x1f   : > { %1243 = vmatpush3.bf16.msra.mxu0 %v1468_v15  ;;  %1411 = vmatpush3.bf16.msra.mxu1 %v1468_v15  ;;  %v275_v15 = vunpack.c.h.s8.bf16 %v233_v7 }
  0x20   : > { %1244 = vmatprep.subr.bf16.mxu0 %v1469_v16  ;;  %1404 = vmatprep.subr.bf16.mxu1 %v1469_v16  ;;  %v271_v16 = vunpack.c.l.s8.bf16 %v232_v12 }
  0x23   : > { %1245 = vmatpush3.bf16.msra.mxu0 %v1470_v17  ;;  %1412 = vmatpush3.bf16.msra.mxu1 %v1470_v17  ;;  %v278_v17 = vunpack.c.l.s8.bf16 %v236_v13 }
  0x24   : > { %1246 = vmatprep.subr.bf16.mxu0 %v1471_v18  ;;  %1405 = vmatprep.subr.bf16.mxu1 %v1471_v18  ;;  %v231_v18 = vld [vmem:[%s1605_s26 + $0x78] sm:$0xff] }
  0x25   : > { %v270_v20 = vunpack.c.l.s8.bf16 %v231_v18 }
  0x27   : > { %1247 = vmatpush3.bf16.msra.mxu0 %v1472_v19  ;;  %1413 = vmatpush3.bf16.msra.mxu1 %v1472_v19  ;;  %v239_v19 = vld [vmem:[%s1605_s26 + $0xb8] sm:$0xff] }
  0x28   : > { %1362 = vmatprep.subr.bf16.mxu1 %v1473_v22 }
  0x2a   : > { %521 = vmatmul.mubr.bf16.vlgmr.msra.gmra.mrb[0].mxu0 %v240_v23  ;;  %617 = vmatmul.mubr.bf16.vlgmr.msra.gmra.mrb[0].mxu1 %v276_v24  ;;  %v284_v23 = vunpack.c.l.s8.bf16 %v239_v19  ;;  %v273_v24 = vunpack.c.h.s8.bf16 %v231_v18 }
  0x2b   : > { %1363 = vmatpush3.bf16.msra.mxu1 %v1473_v22  ;;  %528 = vmatprep.mubr.bf16.mxu0 %v244_v25  ;;  %v274_v22 = vunpack.c.h.s8.bf16 %v232_v12  ;;  %v287_v25 = vunpack.c.h.s8.bf16 %v239_v19 }
  0x2c   : > { %624 = vmatprep.mubr.bf16.mxu1 %v280_v26  ;;  %1364 = vmatprep.subr.bf16.mxu1 %v1474_v27 }
  0x2f   : > { %1365 = vmatpush3.bf16.msra.mxu1 %v1474_v27 }
  0x32   : > { %529 = vmatmul.mubr.bf16.gmra.mrb[4].mxu0 %v243_v30  ;;  %625 = vmatmul.mubr.bf16.gmra.mrb[4].mxu1 %v279_v31 }
  0x33   : > { %536 = vmatprep.mubr.bf16.mxu0 %v247_v32  ;;  %632 = vmatprep.mubr.bf16.mxu1 %v283_v33 }
  0x3a   : > { %537 = vmatmul.mubr.bf16.gmra.mrb[8].mxu0 %v246_v36  ;;  %633 = vmatmul.mubr.bf16.gmra.mrb[8].mxu1 %v282_v37 }
  0x3b   : > { %544 = vmatprep.mubr.bf16.mxu0 %v250_v38  ;;  %640 = vmatprep.mubr.bf16.mxu1 %v286_v39 }
  0x42   : > { %545 = vmatmul.mubr.bf16.gmra.mrb[12].mxu0 %v249_v42  ;;  %641 = vmatmul.mubr.bf16.gmra.mrb[12].mxu1 %v285_v43 }
  0x43   : > { %552 = vmatprep.mubr.bf16.mxu0 %v253_v44  ;;  %1366 = vmatprep.mubr.msk.bf16.mxu1 %vm439_vm0, %v242_v45 }
  0x4a   : > { %553 = vmatmul.mubr.bf16.gmra.mrb[16].mxu0 %v252_v49  ;;  %1367 = vmatmul.mubr.msk.bf16.vlgmr.msra.gmra.mrb[16].mxu1 %vm439_vm0, %v245_v48 }
  0x4b   : > { %560 = vmatprep.mubr.bf16.mxu0 %v256_v50  ;;  %1370 = vmatprep.mubr.msk.bf16.mxu1 %vm439_vm0, %v248_v51 }
  0x52   : > { %561 = vmatmul.mubr.bf16.gmra.mrb[20].mxu0 %v255_v54  ;;  %1371 = vmatmul.mubr.msk.bf16.gmra.mrb[20].mxu1 %vm439_vm0, %v251_v55 }
  0x53   : > { %568 = vmatprep.mubr.bf16.mxu0 %v259_v56  ;;  %1374 = vmatprep.mubr.msk.bf16.mxu1 %vm439_vm0, %v254_v57 }
  0x5a   : > { %569 = vmatmul.mubr.bf16.gmra.mrb[24].mxu0 %v258_v60  ;;  %1375 = vmatmul.mubr.msk.bf16.gmra.mrb[24].mxu1 %vm439_vm0, %v257_v61 }
  0x5b   : > { %576 = vmatprep.mubr.bf16.mxu0 %v262_v62  ;;  %1378 = vmatprep.mubr.msk.bf16.mxu1 %vm439_vm0, %v260_v63 }
  0x62   : > { %577 = vmatmul.mubr.bf16.gmra.mrb[28].mxu0 %v261_v2  ;;  %1379 = vmatmul.mubr.msk.bf16.gmra.mrb[28].mxu1 %vm439_vm0, %v263_v3 }
  0x63   : > { %584 = vmatprep.mubr.bf16.mxu0 %v265_v4  ;;  %1382 = vmatprep.mubr.msk.bf16.mxu1 %vm439_vm0, %v266_v5 }
  0x6a   : > { %585 = vmatmul.mubr.bf16.gmra.mrb[32].mxu0 %v264_v8  ;;  %1383 = vmatmul.mubr.msk.bf16.gmra.mrb[32].mxu1 %vm439_vm0, %v269_v9 }
  0x6b   : > { %592 = vmatprep.mubr.bf16.mxu0 %v268_v10  ;;  %1386 = vmatprep.mubr.msk.bf16.mxu1 %vm439_vm0, %v272_v11  ;;  %v1693_v10 = vld [vmem:[%s2214_s2] ss:$0 sm:$0xff] }
  0x72   : > { %593 = vmatmul.mubr.bf16.gmra.mrb[36].mxu0 %v267_v14  ;;  %1387 = vmatmul.mubr.msk.bf16.gmra.mrb[36].mxu1 %vm439_vm0, %v275_v15 }
  0x73   : > { %600 = vmatprep.mubr.bf16.mxu0 %v271_v16  ;;  %1390 = vmatprep.mubr.msk.bf16.mxu1 %vm439_vm0, %v278_v17 }
  0x7a   : > { %601 = vmatmul.mubr.bf16.gmra.mrb[40].mxu0 %v270_v20  ;;  %1391 = vmatmul.mubr.msk.bf16.gmra.mrb[40].mxu1 %vm439_vm0, %v281_v21 }
  0x7b   : > { %608 = vmatprep.mubr.bf16.mxu0 %v274_v22  ;;  %1394 = vmatprep.mubr.msk.bf16.mxu1 %vm439_vm0, %v284_v23 }
  0x82   : > { %609 = vmatmul.mubr.bf16.gmra.mrb[44].mxu0 %v273_v24  ;;  %1395 = vmatmul.mubr.msk.bf16.gmra.mrb[44].mxu1 %vm439_vm0, %v287_v25 }
  0xfd   : > { %v1248_v26 = vpop.f32.mrb[0].mxu0  ;;  %v1320_v27 = vpop.f32.mrb[0].mxu1 }
  0xfe   : > { %v1249_v28 = vpop.f32.mrb[1].mxu0  ;;  %v1321_v29 = vpop.f32.mrb[1].mxu1 }
  0xff   : > { %v1250_v30 = vadd.f32 %v1249_v28, %v1248_v26  ;;  %v1251_v31 = vpop.f32.mrb[2].mxu0  ;;  %v1674_v32 = vadd.f32 %v1321_v29, %v1320_v27  ;;  %v1323_v33 = vpop.f32.mrb[2].mxu1 }
 0x100   : > { %v1252_v34 = vpop.f32.mrb[3].mxu0  ;;  %v1324_v35 = vpop.f32.mrb[3].mxu1 }
 0x101   : > { %v1253_v36 = vadd.f32 %v1252_v34, %v1251_v31  ;;  %v1676_v37 = vadd.f32 %v1324_v35, %v1323_v33  ;;  %v523_v14 = vadd.f32 %v1250_v30, %v1693_v10 }
 0x103   : > { %v526_v23 = vadd.f32 %v1253_v36, %v1693_v10 }
 0x105   : > { %v1254_v38 = vpop.f32.mrb[4].mxu0  ;;  %v1326_v39 = vpop.f32.mrb[4].mxu1 }
 0x106   : > { %v1255_v40 = vpop.f32.mrb[5].mxu0  ;;  %v1327_v41 = vpop.f32.mrb[5].mxu1 }
 0x107   : > { %v1256_v42 = vadd.f32 %v1255_v40, %v1254_v38  ;;  %v1257_v43 = vpop.f32.mrb[6].mxu0  ;;  %v1678_v44 = vadd.f32 %v1327_v41, %v1326_v39  ;;  %v1329_v45 = vpop.f32.mrb[6].mxu1 }
 0x108   : > { %v1258_v46 = vpop.f32.mrb[7].mxu0  ;;  %v1330_v47 = vpop.f32.mrb[7].mxu1 }
 0x109   : > { %v1259_v48 = vadd.f32 %v1258_v46, %v1257_v43  ;;  %v1680_v49 = vadd.f32 %v1330_v47, %v1329_v45  ;;  %v531_v11 = vadd.f32 %v1256_v42, %v1693_v10 }
 0x10b   : > { %v534_v18 = vadd.f32 %v1259_v48, %v1693_v10 }
 0x10d   : > { %v1260_v50 = vpop.f32.mrb[8].mxu0  ;;  %v1332_v51 = vpop.f32.mrb[8].mxu1 }
 0x10e   : > { %v1261_v52 = vpop.f32.mrb[9].mxu0  ;;  %v1333_v53 = vpop.f32.mrb[9].mxu1 }
 0x10f   : > { %v1262_v54 = vadd.f32 %v1261_v52, %v1260_v50  ;;  %v1263_v55 = vpop.f32.mrb[10].mxu0  ;;  %v1682_v56 = vadd.f32 %v1333_v53, %v1332_v51  ;;  %v1335_v57 = vpop.f32.mrb[10].mxu1 }
 0x110   : > { %v1264_v58 = vpop.f32.mrb[11].mxu0  ;;  %v1336_v59 = vpop.f32.mrb[11].mxu1 }
 0x111   : > { %v1265_v60 = vadd.f32 %v1264_v58, %v1263_v55  ;;  %v1684_v61 = vadd.f32 %v1336_v59, %v1335_v57  ;;  %v539_v33 = vadd.f32 %v1262_v54, %v1693_v10 }
 0x113   : > { %v542_v43 = vadd.f32 %v1265_v60, %v1693_v10 }
 0x115   : > { %v1266_v62 = vpop.f32.mrb[12].mxu0  ;;  %v1338_v63 = vpop.f32.mrb[12].mxu1 }
 0x116   : > { %v1267_v0 = vpop.f32.mrb[13].mxu0  ;;  %v1339_v1 = vpop.f32.mrb[13].mxu1 }
 0x117   : > { %v1268_v2 = vadd.f32 %v1267_v0, %v1266_v62  ;;  %v1269_v3 = vpop.f32.mrb[14].mxu0  ;;  %v1686_v4 = vadd.f32 %v1339_v1, %v1338_v63  ;;  %v1341_v5 = vpop.f32.mrb[14].mxu1 }
 0x118   : > { %v1270_v6 = vpop.f32.mrb[15].mxu0  ;;  %v1342_v7 = vpop.f32.mrb[15].mxu1 }
 0x119   : > { %v1271_v8 = vadd.f32 %v1270_v6, %v1269_v3  ;;  %v1688_v9 = vadd.f32 %v1342_v7, %v1341_v5  ;;  %v547_v29 = vadd.f32 %v1268_v2, %v1693_v10 }
 0x11b   : > { %v550_v39 = vadd.f32 %v1271_v8, %v1693_v10 }
 0x11d   : > { %v1272_v12 = vpop.f32.mrb[16].mxu0  ;;  %v1368_v13 = vpop.f32.mrb[16].mxu1 }
 0x11e   : > { %v1697_v15 = vadd.f32 %v1368_v13, %v531_v11  ;;  %v1273_v16 = vpop.f32.mrb[17].mxu0  ;;  %v683_v17 = vpop.f32.mrb[17].mxu1 }
 0x11f   : > { %v1274_v19 = vadd.f32 %v1273_v16, %v1272_v12  ;;  %v1700_v20 = vadd.f32 %v683_v17, %v523_v14  ;;  %v1275_v21 = vpop.f32.mrb[18].mxu0  ;;  %v1369_v22 = vpop.f32.mrb[18].mxu1 }
 0x120   : > { %v1703_v24 = vadd.f32 %v1369_v22, %v534_v18  ;;  %v1276_v25 = vpop.f32.mrb[19].mxu0  ;;  %v686_v26 = vpop.f32.mrb[19].mxu1 }
 0x121   : > { %v1277_v27 = vadd.f32 %v1276_v25, %v1275_v21  ;;  %v1705_v28 = vadd.f32 %v686_v26, %v526_v23  ;;  %v555_v54 = vadd.f32 %v1274_v19, %v1693_v10 }
 0x123   : > { %v558_v1 = vadd.f32 %v1277_v27, %v1693_v10 }
 0x125   : > { %v1278_v30 = vpop.f32.mrb[20].mxu0  ;;  %v1372_v31 = vpop.f32.mrb[20].mxu1 }
 0x126   : > { %v1709_v34 = vadd.f32 %v1372_v31, %v547_v29  ;;  %v1279_v35 = vpop.f32.mrb[21].mxu0  ;;  %v699_v38 = vpop.f32.mrb[21].mxu1 }
 0x127   : > { %v1280_v36 = vadd.f32 %v1279_v35, %v1278_v30  ;;  %v1712_v40 = vadd.f32 %v699_v38, %v539_v33  ;;  %v1281_v41 = vpop.f32.mrb[22].mxu0  ;;  %v1373_v42 = vpop.f32.mrb[22].mxu1 }
 0x128   : > { %v1715_v45 = vadd.f32 %v1373_v42, %v550_v39  ;;  %v1282_v46 = vpop.f32.mrb[23].mxu0  ;;  %v702_v47 = vpop.f32.mrb[23].mxu1 }
 0x129   : > { %v1283_v48 = vadd.f32 %v1282_v46, %v1281_v41  ;;  %v1717_v50 = vadd.f32 %v702_v47, %v542_v43  ;;  %v563_v51 = vadd.f32 %v1280_v36, %v1693_v10 }
 0x12b   : > { %v566_v59 = vadd.f32 %v1283_v48, %v1693_v10 }
 0x12d   : > { %v1284_v52 = vpop.f32.mrb[24].mxu0  ;;  %v1376_v53 = vpop.f32.mrb[24].mxu1 }
 0x12e   : > { %v1721_v55 = vadd.f32 %v1376_v53, %v563_v51  ;;  %v1285_v57 = vpop.f32.mrb[25].mxu0  ;;  %v715_v58 = vpop.f32.mrb[25].mxu1 }
 0x12f   : > { %v1286_v60 = vadd.f32 %v1285_v57, %v1284_v52  ;;  %v1724_v62 = vadd.f32 %v715_v58, %v555_v54  ;;  %v1287_v63 = vpop.f32.mrb[26].mxu0  ;;  %v1377_v0 = vpop.f32.mrb[26].mxu1 }
 0x130   : > { %v1727_v2 = vadd.f32 %v1377_v0, %v566_v59  ;;  %v1288_v3 = vpop.f32.mrb[27].mxu0  ;;  %v718_v5 = vpop.f32.mrb[27].mxu1 }
 0x131   : > { %v1289_v6 = vadd.f32 %v1288_v3, %v1287_v63  ;;  %v1729_v7 = vadd.f32 %v718_v5, %v558_v1  ;;  %v571_v12 = vadd.f32 %v1286_v60, %v1693_v10 }
 0x133   : > { %v574_v21 = vadd.f32 %v1289_v6, %v1693_v10 }
 0x135   : > { %v1290_v8 = vpop.f32.mrb[28].mxu0  ;;  %v1380_v11 = vpop.f32.mrb[28].mxu1 }
 0x136   : > { %v1291_v13 = vpop.f32.mrb[29].mxu0  ;;  %v731_v14 = vpop.f32.mrb[29].mxu1 }
 0x137   : > { %v1292_v16 = vadd.f32 %v1291_v13, %v1290_v8  ;;  %v1732_v17 = vadd.f32 %v731_v14, %v571_v12  ;;  %v1293_v18 = vpop.f32.mrb[30].mxu0  ;;  %v1381_v19 = vpop.f32.mrb[30].mxu1  ;;  %v627_v12 = vadd.f32 %v1678_v44, %v1693_v10  ;;  %v622_v44 = vadd.f32 %v1676_v37, %v1693_v10 }
 0x138   : > { %v1294_v22 = vpop.f32.mrb[31].mxu0  ;;  %v734_v23 = vpop.f32.mrb[31].mxu1 }
 0x139   : > { %v579_v25 = vadd.f32 %v1292_v16, %v1693_v10  ;;  %v1295_v26 = vadd.f32 %v1294_v22, %v1293_v18  ;;  %v1736_v27 = vadd.f32 %v734_v23, %v574_v21  ;;  %v619_v18 = vadd.f32 %v1674_v32, %v1693_v10 }
 0x13a   : > { %v630_v23 = vadd.f32 %v1680_v49, %v1693_v10 }
 0x13b   : > { %v1738_v29 = vadd.f32 %v1380_v11, %v579_v25  ;;  %v582_v30 = vadd.f32 %v1295_v26, %v1693_v10 }
 0x13d   : > { %v1741_v31 = vadd.f32 %v1381_v19, %v582_v30  ;;  %v1296_v33 = vpop.f32.mrb[32].mxu0  ;;  %v1384_v35 = vpop.f32.mrb[32].mxu1 }
 0x13e   : > { %v1297_v38 = vpop.f32.mrb[33].mxu0  ;;  %v747_v39 = vpop.f32.mrb[33].mxu1 }
 0x13f   : > { %v1298_v36 = vadd.f32 %v1297_v38, %v1296_v33  ;;  %v1299_v41 = vpop.f32.mrb[34].mxu0  ;;  %v1385_v42 = vpop.f32.mrb[34].mxu1 }
 0x140   : > { %v1300_v43 = vpop.f32.mrb[35].mxu0  ;;  %v750_v46 = vpop.f32.mrb[35].mxu1 }
 0x141   : > { %v587_v47 = vadd.f32 %v1298_v36, %v1693_v10  ;;  %v1301_v48 = vadd.f32 %v1300_v43, %v1299_v41  ;;  %v643_v43 = vadd.f32 %v1686_v4, %v1693_v10  ;;  %v638_v4 = vadd.f32 %v1684_v61, %v1693_v10 }
 0x142   : > { %v1515_v61 = vmov (!%p1229_p6), 0.0  }
 0x143   : > { %v1744_v51 = vadd.f32 %v747_v39, %v587_v47  ;;  %v590_v52 = vadd.f32 %v1301_v48, %v1693_v10  ;;  %v635_v48 = vadd.f32 %v1682_v56, %v1693_v10  ;;  %815 = vst.msk [vmem:[#allocation2] sm:$0xff] (!%p1229_p6), %vm814_vm1, %v1515_v61  ;;  %816 = vst.msk [vmem:[#allocation2 + $0x8] sm:$0xff] (!%p1229_p6), %vm814_vm1, %v1515_v61 }
 0x144   : > { %817 = vst.msk [vmem:[#allocation2 + $0x10] sm:$0xff] (!%p1229_p6), %vm814_vm1, %v1515_v61  ;;  %818 = vst.msk [vmem:[#allocation2 + $0x18] sm:$0xff] (!%p1229_p6), %vm814_vm1, %v1515_v61 }
 0x145   : > { %v1747_v53 = vadd.f32 %v750_v46, %v590_v52  ;;  %v1302_v54 = vpop.f32.mrb[36].mxu0  ;;  %v1388_v57 = vpop.f32.mrb[36].mxu1  ;;  %819 = vst.msk [vmem:[#allocation2 + $0x20] sm:$0xff] (!%p1229_p6), %vm814_vm1, %v1515_v61  ;;  %820 = vst.msk [vmem:[#allocation2 + $0x28] sm:$0xff] (!%p1229_p6), %vm814_vm1, %v1515_v61 }
 0x146   : > { %v1303_v58 = vpop.f32.mrb[37].mxu0  ;;  %v763_v59 = vpop.f32.mrb[37].mxu1  ;;  %821 = vst.msk [vmem:[#allocation2 + $0x30] sm:$0xff] (!%p1229_p6), %vm814_vm1, %v1515_v61  ;;  %822 = vst.msk [vmem:[#allocation2 + $0x38] sm:$0xff] (!%p1229_p6), %vm814_vm1, %v1515_v61 }
 0x147   : > { %v1304_v60 = vadd.f32 %v1303_v58, %v1302_v54  ;;  %v1305_v63 = vpop.f32.mrb[38].mxu0  ;;  %v1389_v0 = vpop.f32.mrb[38].mxu1  ;;  %823 = vst.msk [vmem:[#allocation2 + $0x40] sm:$0xff] (!%p1229_p6), %vm814_vm1, %v1515_v61  ;;  %824 = vst.msk [vmem:[#allocation2 + $0x48] sm:$0xff] (!%p1229_p6), %vm814_vm1, %v1515_v61 }
 0x148   : > { %v1306_v1 = vpop.f32.mrb[39].mxu0  ;;  %v766_v3 = vpop.f32.mrb[39].mxu1  ;;  %825 = vst.msk [vmem:[#allocation2 + $0x50] sm:$0xff] (!%p1229_p6), %vm814_vm1, %v1515_v61  ;;  %826 = vst.msk [vmem:[#allocation2 + $0x58] sm:$0xff] (!%p1229_p6), %vm814_vm1, %v1515_v61 }
 0x149   : > { %v595_v5 = vadd.f32 %v1304_v60, %v1693_v10  ;;  %v1307_v6 = vadd.f32 %v1306_v1, %v1305_v63  ;;  %827 = vst.msk [vmem:[#allocation2 + $0x60] sm:$0xff] (!%p1229_p6), %vm814_vm1, %v1515_v61  ;;  %828 = vst.msk [vmem:[#allocation2 + $0x68] sm:$0xff] (!%p1229_p6), %vm814_vm1, %v1515_v61 }
 0x14a   : > { %829 = vst.msk [vmem:[#allocation2 + $0x70] sm:$0xff] (!%p1229_p6), %vm814_vm1, %v1515_v61  ;;  %830 = vst.msk [vmem:[#allocation2 + $0x78] sm:$0xff] (!%p1229_p6), %vm814_vm1, %v1515_v61 }
 0x14b   : > { %v1750_v8 = vadd.f32 %v1384_v35, %v595_v5  ;;  %v598_v11 = vadd.f32 %v1307_v6, %v1693_v10  ;;  %831 = vst.msk [vmem:[#allocation2 + $0x80] sm:$0xff] (!%p1229_p6), %vm814_vm1, %v1515_v61  ;;  %832 = vst.msk [vmem:[#allocation2 + $0x88] sm:$0xff] (!%p1229_p6), %vm814_vm1, %v1515_v61 }
 0x14c   : > { %833 = vst.msk [vmem:[#allocation2 + $0x90] sm:$0xff] (!%p1229_p6), %vm814_vm1, %v1515_v61  ;;  %834 = vst.msk [vmem:[#allocation2 + $0x98] sm:$0xff] (!%p1229_p6), %vm814_vm1, %v1515_v61 }
 0x14d   : > { %v1755_v13 = vadd.f32 %v1385_v42, %v598_v11  ;;  %v1308_v14 = vpop.f32.mrb[40].mxu0  ;;  %v1392_v16 = vpop.f32.mrb[40].mxu1  ;;  %835 = vst.msk [vmem:[#allocation2 + $0xa0] sm:$0xff] (!%p1229_p6), %vm814_vm1, %v1515_v61  ;;  %836 = vst.msk [vmem:[#allocation2 + $0xa8] sm:$0xff] (!%p1229_p6), %vm814_vm1, %v1515_v61 }
 0x14e   : > { %v1759_v19 = vadd.f32 %v1392_v16, %v627_v12  ;;  %v1309_v21 = vpop.f32.mrb[41].mxu0  ;;  %v779_v22 = vpop.f32.mrb[41].mxu1  ;;  %837 = vst.msk [vmem:[#allocation2 + $0xb0] sm:$0xff] (!%p1229_p6), %vm814_vm1, %v1515_v61  ;;  %838 = vst.msk [vmem:[#allocation2 + $0xb8] sm:$0xff] (!%p1229_p6), %vm814_vm1, %v1515_v61 }
 0x14f   : > { %v1310_v25 = vadd.f32 %v1309_v21, %v1308_v14  ;;  %v1763_v26 = vadd.f32 %v779_v22, %v619_v18  ;;  %v1311_v30 = vpop.f32.mrb[42].mxu0  ;;  %v1393_v33 = vpop.f32.mrb[42].mxu1  ;;  %839 = vst.msk [vmem:[#allocation2 + $0xc0] sm:$0xff] (!%p1229_p6), %vm814_vm1, %v1515_v61  ;;  %840 = vst.msk [vmem:[#allocation2 + $0xc8] sm:$0xff] (!%p1229_p6), %vm814_vm1, %v1515_v61 }
 0x150   : > { %v1767_v35 = vadd.f32 %v1393_v33, %v630_v23  ;;  %v1312_v38 = vpop.f32.mrb[43].mxu0  ;;  %v782_v39 = vpop.f32.mrb[43].mxu1  ;;  %841 = vst.msk [vmem:[#allocation2 + $0xd0] sm:$0xff] (!%p1229_p6), %vm814_vm1, %v1515_v61  ;;  %842 = vst.msk [vmem:[#allocation2 + $0xd8] sm:$0xff] (!%p1229_p6), %vm814_vm1, %v1515_v61 }
 0x151   : > { %v603_v32 = vadd.f32 %v1310_v25, %v1693_v10  ;;  %v1313_v36 = vadd.f32 %v1312_v38, %v1311_v30  ;;  %v1770_v41 = vadd.f32 %v782_v39, %v622_v44  ;;  %843 = vst.msk [vmem:[#allocation2 + $0xe0] sm:$0xff] (!%p1229_p6), %vm814_vm1, %v1515_v61  ;;  %844 = vst.msk [vmem:[#allocation2 + $0xe8] sm:$0xff] (!%p1229_p6), %vm814_vm1, %v1515_v61 }
 0x152   : > { %845 = vst.msk [vmem:[#allocation2 + $0xf0] sm:$0xff] (!%p1229_p6), %vm814_vm1, %v1515_v61  ;;  %846 = vst.msk [vmem:[#allocation2 + $0xf8] sm:$0xff] (!%p1229_p6), %vm814_vm1, %v1515_v61 }
 0x153   : > { %v1772_v42 = vadd.f32 %v763_v59, %v603_v32  ;;  %v606_v49 = vadd.f32 %v1313_v36, %v1693_v10  ;;  %v646_v59 = vadd.f32 %v1688_v9, %v1693_v10 }
 0x155   : > { %v1777_v46 = vadd.f32 %v766_v3, %v606_v49  ;;  %v1314_v47 = vpop.f32.mrb[44].mxu0  ;;  %v1396_v37 = vpop.f32.mrb[44].mxu1 }
 0x156   : > { %v1781_v52 = vadd.f32 %v1396_v37, %v643_v43  ;;  %v1315_v54 = vpop.f32.mrb[45].mxu0  ;;  %v795_v58 = vpop.f32.mrb[45].mxu1 }
 0x157   : > { %v1316_v60 = vadd.f32 %v1315_v54, %v1314_v47  ;;  %v1785_v63 = vadd.f32 %v795_v58, %v635_v48  ;;  %v1317_v1 = vpop.f32.mrb[46].mxu0  ;;  %v1397_v5 = vpop.f32.mrb[46].mxu1  ;;  %813 = sbr.rel (%p1229_p6) target bundleno = 350 (0x15e), region = 36 }
 0x158   : > { %v1789_v3 = vadd.f32 %v1397_v5, %v646_v59  ;;  %v1318_v6 = vpop.f32.mrb[47].mxu0  ;;  %v798_v11 = vpop.f32.mrb[47].mxu1 }
 0x159   : > { %v611_v56 = vadd.f32 %v1316_v60, %v1693_v10  ;;  %v1319_v12 = vadd.f32 %v1318_v6, %v1317_v1  ;;  %v1792_v14 = vadd.f32 %v798_v11, %v638_v4 }
 0x15b   : > { %v1794_v16 = vadd.f32 %v1388_v57, %v611_v56  ;;  %v614_v9 = vadd.f32 %v1319_v12, %v1693_v10 }
 0x15d   : > { %v1797_v18 = vadd.f32 %v1389_v0, %v614_v9 }
 0x15e PF: > { %v847_v10 = vld [vmem:[#allocation2] sm:$0xff]  ;;  %v848_v57 = vld [vmem:[#allocation2 + $0x8] sm:$0xff]  ;;  %v849_v0 = vld [vmem:[#allocation2 + $0x10] sm:$0xff]  ;;  %vm2229_vm2 = vcmask 523264  }
 0x15f   : > { %v879_v21 = vmul.f32 0.3, %v847_v10  ;;  %v880_v22 = vmul.f32 0.3, %v848_v57  ;;  %v881_v23 = vmul.f32 0.3, %v849_v0 }
 0x160   : > { %v850_v25 = vld [vmem:[#allocation2 + $0x18] sm:$0xff]  ;;  %v851_v30 = vld [vmem:[#allocation2 + $0x20] sm:$0xff]  ;;  %v852_v33 = vld [vmem:[#allocation2 + $0x28] sm:$0xff] }
 0x161   : > { %v1833_v44 = vadd.f32 %v879_v21, %v1700_v20  ;;  %v1836_v38 = vadd.f32 %v880_v22, %v1705_v28  ;;  %v1839_v39 = vadd.f32 %v881_v23, %v1697_v15  ;;  %v882_v32 = vmul.f32 0.3, %v850_v25  ;;  %v853_v36 = vld [vmem:[#allocation2 + $0x30] sm:$0xff]  ;;  %v854_v49 = vld [vmem:[#allocation2 + $0x38] sm:$0xff]  ;;  %v855_v28 = vld [vmem:[#allocation2 + $0x40] sm:$0xff] }
 0x162   : > { %v883_v43 = vmul.f32 0.3, %v851_v30  ;;  %v884_v47 = vmul.f32 0.3, %v852_v33  ;;  %v885_v37 = vmul.f32 0.3, %v853_v36 }
 0x163   : > { %vm943_vm3 = vcmp.ge.f32.partialorder %v1833_v44, 0.5  ;;  %vm944_vm4 = vcmp.ge.f32.partialorder %v1836_v38, 0.5  ;;  %vm945_vm5 = vcmp.ge.f32.partialorder %v1839_v39, 0.5  ;;  %v1845_v20 = vadd.f32 %v882_v32, %v1703_v24  ;;  %v856_v48 = vld [vmem:[#allocation2 + $0x48] sm:$0xff]  ;;  %v857_v5 = vld [vmem:[#allocation2 + $0x50] sm:$0xff]  ;;  %v858_v4 = vld [vmem:[#allocation2 + $0x58] sm:$0xff] }
 0x164   : > { %v975_v15 = vsel %vm943_vm3, 0.0, %v1833_v44  ;;  %v976_v54 = vsel %vm944_vm4, 0.0, %v1836_v38  ;;  %v977_v58 = vsel %vm945_vm5, 0.0, %v1839_v39  ;;  %v1857_v59 = vadd.f32 %v883_v43, %v1712_v40  ;;  %v859_v56 = vld [vmem:[#allocation2 + $0x60] sm:$0xff]  ;;  %v860_v57 = vld [vmem:[#allocation2 + $0x68] sm:$0xff]  ;;  %v862_v0 = vld [vmem:[#allocation2 + $0x78] sm:$0xff] }
 0x165   : > { %1008 = vst.msk [vmem:[#allocation2] sm:$0xff] %vm2229_vm2, %v975_v15  ;;  %1009 = vst.msk [vmem:[#allocation2 + $0x8] sm:$0xff] %vm2229_vm2, %v976_v54  ;;  %vm946_vm6 = vcmp.ge.f32.partialorder %v1845_v20, 0.5  ;;  %v1864_v24 = vadd.f32 %v884_v47, %v1717_v50  ;;  %v1867_v60 = vadd.f32 %v885_v37, %v1709_v34  ;;  %v886_v1 = vmul.f32 0.3, %v854_v49  ;;  %v863_v23 = vld [vmem:[#allocation2 + $0x80] sm:$0xff] }
 0x166   : > { %1010 = vst.msk [vmem:[#allocation2 + $0x10] sm:$0xff] %vm2229_vm2, %v977_v58  ;;  %v978_v40 = vsel %vm946_vm6, 0.0, %v1845_v20  ;;  %vm947_vm7 = vcmp.ge.f32.partialorder %v1857_v59, 0.5  ;;  %v887_v6 = vmul.f32 0.3, %v855_v28  ;;  %v864_v25 = vld [vmem:[#allocation2 + $0x88] sm:$0xff] }
 0x167   : > { %v888_v11 = vmul.f32 0.3, %v856_v48  ;;  %1011 = vst.msk [vmem:[#allocation2 + $0x18] sm:$0xff] %vm2229_vm2, %v978_v40  ;;  %v979_v50 = vsel %vm947_vm7, 0.0, %v1857_v59  ;;  %vm2218_vm8 = vcmp.ge.f32.partialorder %v1864_v24, 0.5  ;;  %vm2217_vm9 = vcmp.ge.f32.partialorder %v1867_v60, 0.5 }
 0x168   : > { %v1880_v34 = vadd.f32 %v886_v1, %v1715_v45  ;;  %1012 = vst.msk [vmem:[#allocation2 + $0x20] sm:$0xff] %vm2229_vm2, %v979_v50  ;;  %v980_v12 = vsel %vm2218_vm8, 0.0, %v1864_v24  ;;  %v981_v9 = vsel %vm2217_vm9, 0.0, %v1867_v60  ;;  %v1890_v61 = vadd.f32 %v887_v6, %v1724_v62  ;;  %v861_v45 = vld [vmem:[#allocation2 + $0x70] sm:$0xff]  ;;  %v866_v43 = vld [vmem:[#allocation2 + $0x98] sm:$0xff]  ;;  %v867_v40 = vld [vmem:[#allocation2 + $0xa0] sm:$0xff] }
 0x169   : > { %v1893_v10 = vadd.f32 %v888_v11, %v1729_v7  ;;  %1013 = vst.msk [vmem:[#allocation2 + $0x28] sm:$0xff] %vm2229_vm2, %v980_v12  ;;  %1014 = vst.msk [vmem:[#allocation2 + $0x30] sm:$0xff] %vm2229_vm2, %v981_v9  ;;  %v889_v21 = vmul.f32 0.3, %v857_v5  ;;  %v890_v22 = vmul.f32 0.3, %v858_v4 }
 0x16a   : > { %vm2216_vm10 = vcmp.ge.f32.partialorder %v1880_v34, 0.5  ;;  %vm951_vm11 = vcmp.ge.f32.partialorder %v1890_v61, 0.5  ;;  %v891_v7 = vmul.f32 0.3, %v859_v56  ;;  %v865_v49 = vld [vmem:[#allocation2 + $0x90] sm:$0xff]  ;;  %v868_v50 = vld [vmem:[#allocation2 + $0xa8] sm:$0xff] }
 0x16b   : > { %v982_v62 = vsel %vm2216_vm10, 0.0, %v1880_v34  ;;  %vm952_vm12 = vcmp.ge.f32.partialorder %v1893_v10, 0.5  ;;  %v983_v30 = vsel %vm951_vm11, 0.0, %v1890_v61  ;;  %v1911_v32 = vadd.f32 %v889_v21, %v1721_v55  ;;  %v871_v9 = vld [vmem:[#allocation2 + $0xc0] sm:$0xff] }
 0x16c   : > { %1015 = vst.msk [vmem:[#allocation2 + $0x38] sm:$0xff] %vm2229_vm2, %v982_v62  ;;  %v984_v33 = vsel %vm952_vm12, 0.0, %v1893_v10  ;;  %v1914_v36 = vadd.f32 %v890_v22, %v1727_v2  ;;  %1016 = vst.msk [vmem:[#allocation2 + $0x40] sm:$0xff] %vm2229_vm2, %v983_v30  ;;  %v1919_v47 = vadd.f32 %v891_v7, %v1732_v17  ;;  %v892_v37 = vmul.f32 0.3, %v860_v57  ;;  %v872_v22 = vld [vmem:[#allocation2 + $0xc8] sm:$0xff] }
 0x16d   : > { %1017 = vst.msk [vmem:[#allocation2 + $0x48] sm:$0xff] %vm2229_vm2, %v984_v33  ;;  %v893_v28 = vmul.f32 0.3, %v861_v45  ;;  %v894_v48 = vmul.f32 0.3, %v862_v0  ;;  %vm953_vm13 = vcmp.ge.f32.partialorder %v1911_v32, 0.5 }
 0x16e   : > { %vm954_vm14 = vcmp.ge.f32.partialorder %v1914_v36, 0.5  ;;  %v895_v55 = vmul.f32 0.3, %v863_v23  ;;  %v896_v15 = vmul.f32 0.3, %v864_v25  ;;  %v985_v2 = vsel %vm953_vm13, 0.0, %v1911_v32 }
 0x16f   : > { %v986_v54 = vsel %vm954_vm14, 0.0, %v1914_v36  ;;  %vm955_vm15 = vcmp.ge.f32.partialorder %v1919_v47, 0.5  ;;  %v1931_v17 = vadd.f32 %v892_v37, %v1736_v27  ;;  %1018 = vst.msk [vmem:[#allocation2 + $0x50] sm:$0xff] %vm2229_vm2, %v985_v2  ;;  %v1939_v1 = vadd.f32 %v893_v28, %v1738_v29  ;;  %v874_v28 = vld [vmem:[#allocation2 + $0xd8] sm:$0xff]  ;;  %v875_v61 = vld [vmem:[#allocation2 + $0xe0] sm:$0xff]  ;;  %v877_v32 = vld [vmem:[#allocation2 + $0xf0] sm:$0xff] }
 0x170   : > { %1019 = vst.msk [vmem:[#allocation2 + $0x58] sm:$0xff] %vm2229_vm2, %v986_v54  ;;  %v987_v58 = vsel %vm955_vm15, 0.0, %v1919_v47  ;;  %v1942_v5 = vadd.f32 %v894_v48, %v1741_v31  ;;  %v1945_v4 = vadd.f32 %v895_v55, %v1744_v51  ;;  %v1950_v27 = vadd.f32 %v896_v15, %v1747_v53  ;;  %v869_v31 = vld [vmem:[#allocation2 + $0xb0] sm:$0xff]  ;;  %v870_v51 = vld [vmem:[#allocation2 + $0xb8] sm:$0xff] }
 0x171   : > { %1020 = vst.msk [vmem:[#allocation2 + $0x60] sm:$0xff] %vm2229_vm2, %v987_v58  ;;  %vm2221_vm0 = vcmp.ge.f32.partialorder %v1931_v17, 0.5  ;;  %v897_v6 = vmul.f32 0.3, %v865_v49  ;;  %v898_v11 = vmul.f32 0.3, %v866_v43 }
 0x172   : > { %v988_v29 = vsel %vm2221_vm0, 0.0, %v1931_v17  ;;  %vm2220_vm1 = vcmp.ge.f32.partialorder %v1939_v1, 0.5  ;;  %vm2219_vm10 = vcmp.ge.f32.partialorder %v1942_v5, 0.5  ;;  %vm959_vm9 = vcmp.ge.f32.partialorder %v1945_v4, 0.5  ;;  %vm2003_vm0 = vmor %vm943_vm3, %vm951_vm11  ;;  %v878_v15 = vld [vmem:[#allocation2 + $0xf8] sm:$0xff] }
 0x173   : > { %1021 = vst.msk [vmem:[#allocation2 + $0x68] sm:$0xff] %vm2229_vm2, %v988_v29  ;;  %v989_v53 = vsel %vm2220_vm1, 0.0, %v1939_v1  ;;  %v990_v56 = vsel %vm2219_vm10, 0.0, %v1942_v5  ;;  %v991_v12 = vsel %vm959_vm9, 0.0, %v1945_v4  ;;  %vm2224_vm8 = vcmp.ge.f32.partialorder %v1950_v27, 0.5  ;;  %vm2018_vm3 = vmor %vm944_vm4, %vm952_vm12 }
 0x174   : > { %1022 = vst.msk [vmem:[#allocation2 + $0x70] sm:$0xff] %vm2229_vm2, %v989_v53  ;;  %1023 = vst.msk [vmem:[#allocation2 + $0x78] sm:$0xff] %vm2229_vm2, %v990_v56  ;;  %v992_v57 = vsel %vm2224_vm8, 0.0, %v1950_v27  ;;  %v1976_v45 = vadd.f32 %v897_v6, %v1750_v8  ;;  %v1979_v0 = vadd.f32 %v898_v11, %v1755_v13  ;;  %v899_v21 = vmul.f32 0.3, %v867_v40  ;;  %v873_v8 = vld [vmem:[#allocation2 + $0xd0] sm:$0xff] }
 0x175   : > { %1024 = vst.msk [vmem:[#allocation2 + $0x80] sm:$0xff] %vm2229_vm2, %v991_v12  ;;  %1025 = vst.msk [vmem:[#allocation2 + $0x88] sm:$0xff] %vm2229_vm2, %v992_v57  ;;  %v900_v23 = vmul.f32 0.3, %v868_v50  ;;  %v901_v62 = vmul.f32 0.3, %v869_v31 }
 0x176   : > { %v902_v7 = vmul.f32 0.3, %v870_v51  ;;  %vm2223_vm10 = vcmp.ge.f32.partialorder %v1976_v45, 0.5  ;;  %vm2222_vm1 = vcmp.ge.f32.partialorder %v1979_v0, 0.5  ;;  %v1985_v25 = vadd.f32 %v899_v21, %v1772_v42  ;;  %vm2031_vm8 = vmor %vm945_vm5, %vm953_vm13 }
 0x177   : > { %v903_v30 = vmul.f32 0.3, %v871_v9  ;;  %v993_v13 = vsel %vm2223_vm10, 0.0, %v1976_v45  ;;  %v994_v33 = vsel %vm2222_vm1, 0.0, %v1979_v0  ;;  %v1994_v49 = vadd.f32 %v900_v23, %v1777_v46  ;;  %vm2060_vm13 = vmor %vm946_vm6, %vm954_vm14 }
 0x178   : > { %v1997_v43 = vadd.f32 %v901_v62, %v1794_v16  ;;  %1026 = vst.msk [vmem:[#allocation2 + $0x90] sm:$0xff] %vm2229_vm2, %v993_v13  ;;  %1027 = vst.msk [vmem:[#allocation2 + $0x98] sm:$0xff] %vm2229_vm2, %v994_v33  ;;  %vm2228_vm1 = vcmp.ge.f32.partialorder %v1985_v25, 0.5  ;;  %v2011_v46 = vadd.f32 %v902_v7, %v1797_v18  ;;  %v904_v37 = vmul.f32 0.3, %v872_v22  ;;  %v876_v18 = vld [vmem:[#allocation2 + $0xe8] sm:$0xff] }
 0x179   : > { %v935_v16 = vadd.f32 %v903_v30, %v1763_v26  ;;  %v995_v48 = vsel %vm2228_vm1, 0.0, %v1985_v25  ;;  %vm2227_vm11 = vcmp.ge.f32.partialorder %v1994_v49, 0.5  ;;  %v905_v26 = vmul.f32 0.3, %v873_v8 }
 0x17a   : > { %vm2226_vm10 = vcmp.ge.f32.partialorder %v1997_v43, 0.5  ;;  %1028 = vst.msk [vmem:[#allocation2 + $0xa0] sm:$0xff] %vm2229_vm2, %v995_v48  ;;  %v996_v10 = vsel %vm2227_vm11, 0.0, %v1994_v49  ;;  %vm2225_vm4 = vcmp.ge.f32.partialorder %v2011_v46, 0.5  ;;  %v936_v58 = vadd.f32 %v904_v37, %v1770_v41 }
 0x17b   : > { %v997_v55 = vsel %vm2226_vm10, 0.0, %v1997_v43  ;;  %vm967_vm12 = vcmp.ge.f32.partialorder %v935_v16, 0.5  ;;  %1029 = vst.msk [vmem:[#allocation2 + $0xa8] sm:$0xff] %vm2229_vm2, %v996_v10  ;;  %v998_v39 = vsel %vm2225_vm4, 0.0, %v2011_v46  ;;  %v937_v40 = vadd.f32 %v905_v26, %v1759_v19 }
 0x17c   : > { %1030 = vst.msk [vmem:[#allocation2 + $0xb0] sm:$0xff] %vm2229_vm2, %v997_v55  ;;  %v999_v2 = vsel %vm967_vm12, 0.0, %v935_v16  ;;  %vm2050_vm5 = vmor %vm959_vm9, %vm967_vm12  ;;  %v906_v4 = vmul.f32 0.3, %v874_v28  ;;  %v907_v11 = vmul.f32 0.3, %v875_v61 }
 0x17d   : > { %1031 = vst.msk [vmem:[#allocation2 + $0xb8] sm:$0xff] %vm2229_vm2, %v998_v39  ;;  %1032 = vst.msk [vmem:[#allocation2 + $0xc0] sm:$0xff] %vm2229_vm2, %v999_v2  ;;  %v908_v50 = vmul.f32 0.3, %v876_v18  ;;  %vm968_vm14 = vcmp.ge.f32.partialorder %v936_v58, 0.5  ;;  %vm969_vm12 = vcmp.ge.f32.partialorder %v937_v40, 0.5 }
 0x17e   : > { %vm2070_vm9 = vmor %vm947_vm7, %vm955_vm15  ;;  %v909_v41 = vmul.f32 0.3, %v877_v32  ;;  %v910_v20 = vmul.f32 0.3, %v878_v15  ;;  %v1000_v36 = vsel %vm968_vm14, 0.0, %v936_v58  ;;  %vm2245_vm4 = vcmp.ge.f32.partialorder %v1950_v27, 0.5 }
 0x17f   : > { %vm1056_vm6 = vmor %vm2003_vm0, %vm2050_vm5  ;;  %v1001_v47 = vsel %vm969_vm12, 0.0, %v937_v40  ;;  %v938_v59 = vadd.f32 %v906_v4, %v1767_v35  ;;  %v939_v29 = vadd.f32 %v907_v11, %v1785_v63  ;;  %vm2246_vm7 = vcmp.ge.f32.partialorder %v1931_v17, 0.5  ;;  %1033 = vst.msk [vmem:[#allocation2 + $0xc8] sm:$0xff] %vm2229_vm2, %v1000_v36 }
 0x180   : > { %vm1049_vm10 = vmor %vm2245_vm4, %vm968_vm14  ;;  %vm2247_vm15 = vcmp.ge.f32.partialorder %v1864_v24, 0.5  ;;  %v2248_v31 = vmov 0  ;;  %1034 = vst.msk [vmem:[#allocation2 + $0xd0] sm:$0xff] %vm2229_vm2, %v1001_v47  ;;  %v940_v27 = vadd.f32 %v908_v50, %v1792_v14  ;;  %v941_v35 = vadd.f32 %v909_v41, %v1781_v52 }
 0x181   : > { %vm2087_vm11 = vmor %vm2247_vm15, %vm2246_vm7  ;;  %v942_v63 = vadd.f32 %v910_v20, %v1789_v3  ;;  %vm970_vm14 = vcmp.ge.f32.partialorder %v938_v59, 0.5  ;;  %vm2230_vm7 = vcmp.ge.f32.partialorder %v939_v29, 0.5  ;;  %vm2255_vm0 = vcmp.ge.f32.partialorder %v1939_v1, 0.5 }
 0x182   : > { %v2249_v31 = vsel %vm2087_vm11, 4294967295, %v2248_v31  ;;  %vm1057_vm1 = vmor %vm2018_vm3, %vm1049_vm10  ;;  %vm2252_vm10 = vcmp.ge.f32.partialorder %v1976_v45, 0.5  ;;  %v1002_v52 = vsel %vm970_vm14, 0.0, %v938_v59  ;;  %v1003_v3 = vsel %vm2230_vm7, 0.0, %v939_v29 }
 0x183   : > { %vm2103_vm4 = vmpackc.low %vm1057_vm1, %vm1056_vm6  ;;  %vm972_vm15 = vcmp.ge.f32.partialorder %v940_v27, 0.5  ;;  %vm2231_vm2 = vcmp.ge.f32.partialorder %v941_v35, 0.5  ;;  %vm2256_vm1 = vcmp.ge.f32.partialorder %v1867_v60, 0.5  ;;  %v2257_v17 = vmov 0 }
 0x184   : > { %vm2110_vm3 = vmor %vm2252_vm10, %vm969_vm12  ;;  %vm2259_vm12 = vcmask 523264   ;;  %v1004_v51 = vsel %vm972_vm15, 0.0, %v940_v27  ;;  %v1005_v53 = vsel %vm2231_vm2, 0.0, %v941_v35  ;;  %vm2232_vm7 = vcmp.ge.f32.partialorder %v942_v63, 0.5 }
 0x185   : > { %vm2119_vm5 = vmor %vm2256_vm1, %vm2255_vm0  ;;  %1035 = vst.msk [vmem:[#allocation2 + $0xd8] sm:$0xff] %vm2259_vm12, %v1002_v52  ;;  %vm2261_vm11 = vcmp.ge.f32.partialorder %v1979_v0, 0.5  ;;  %v1006_v60 = vsel %vm2232_vm7, 0.0, %v942_v63 }
 0x186   : > { %v2258_v17 = vsel %vm2119_vm5, 4294967295, %v2257_v17  ;;  %vm1058_vm6 = vmor %vm2031_vm8, %vm2110_vm3  ;;  %vm2264_vm8 = vcmp.ge.f32.partialorder %v1942_v5, 0.5  ;;  %vm2265_vm3 = vcmp.ge.f32.partialorder %v1880_v34, 0.5  ;;  %v1516_v34 = vmov 0  }
 0x187   : > { %vm2260_vm10 = vmmov %vm2259_vm12 }
 0x188   : > { %1036 = vst.msk [vmem:[#allocation2 + $0xe0] sm:$0xff] %vm2260_vm10, %v1003_v3  ;;  %vm1051_vm0 = vmor %vm2261_vm11, %vm970_vm14 }
 0x189   : > { %vm2262_vm1 = vmmov %vm2260_vm10 }
 0x18a   : > { %1037 = vst.msk [vmem:[#allocation2 + $0xe8] sm:$0xff] %vm2262_vm1, %v1004_v51  ;;  %vm2263_vm5 = vmmov %vm2262_vm1 }
 0x18b   : > { %1038 = vst.msk [vmem:[#allocation2 + $0xf0] sm:$0xff] %vm2263_vm5, %v1005_v53  ;;  %vm2140_vm12 = vmor %vm2265_vm3, %vm2264_vm8  ;;  %vm2269_vm5 = vcmp.ge.f32.partialorder %v939_v29, 0.5  ;;  %vm2277_vm8 = vcmp.ge.f32.partialorder %v941_v35, 0.5  ;;  %vm2278_vm3 = vcmp.ge.f32.partialorder %v1997_v43, 0.5 }
 0x18c   : > { %vm1059_vm10 = vmor %vm2060_vm13, %vm1051_vm0 }
 0x18d   : > { %vm2268_vm2 = vmmov %vm2262_vm1  ;;  %vm2270_vm1 = vcmp.ge.f32.partialorder %v1985_v25, 0.5 }
 0x18e   : > { %1039 = vst.msk [vmem:[#allocation2 + $0xf8] sm:$0xff] %vm2268_vm2, %v1006_v60  ;;  %vm1065_vm11 = vmpackc.low %vm1059_vm10, %vm1058_vm6  ;;  %vm2273_vm2 = vcmp.ge.f32.partialorder %v1994_v49, 0.5  ;;  %vm2274_vm6 = vnez %v2249_v31 }
 0x18f   : > { %vm1066_vm14 = vmpackc.even %vm1065_vm11, %vm2103_vm4 }
 0x190   : > { %vm2152_vm7 = vmor %vm2270_vm1, %vm2269_vm5  ;;  %v1070_v56 = vsel %vm1066_vm14, 16843009, %v1516_v34  ;;  %vm2280_vm14 = vcmp.ge.f32.partialorder %v942_v63, 0.5  ;;  %vm2281_vm5 = vcmp.ge.f32.partialorder %v2011_v46, 0.5 }
 0x191   : > { %vm1060_vm13 = vmor %vm2070_vm9, %vm2152_vm7  ;;  %v1072_v12 = vunpack.c.0.s8 %v1070_v56  ;;  %v1073_v9 = vunpack.c.1.s8 %v1070_v56  ;;  %v1074_v57 = vunpack.c.2.s8 %v1070_v56  ;;  %v1075_v45 = vunpack.c.3.s8 %v1070_v56 }
 0x192   : > { %vm1053_vm4 = vmor %vm2273_vm2, %vm972_vm15  ;;  %vm1096_vm7 = vcmask 517120   ;;  %vm2279_vm15 = vnez %v2258_v17 }
 0x193   : > { %vm1061_vm0 = vmor %vm2274_vm6, %vm1053_vm4  ;;  %v1080_v0 = vpack.c.b16 %v1072_v12, %v1072_v12  ;;  %v1082_v21 = vpack.c.b16 %v1073_v9, %v1073_v9  ;;  %v1084_v22 = vpack.c.b16 %v1074_v57, %v1074_v57  ;;  %v1086_v23 = vpack.c.b16 %v1075_v45, %v1075_v45 }
 0x194   : > { %vm2165_vm9 = vmpackc.low %vm1061_vm0, %vm1060_vm13 }
 0x195   : > { %vm1054_vm10 = vmor %vm2278_vm3, %vm2277_vm8  ;;  %v1081_v7 = vpack.c.b8 %v1080_v0, %v1080_v0  ;;  %v1083_v25 = vpack.c.b8 %v1082_v21, %v1082_v21  ;;  %v1085_v30 = vpack.c.b8 %v1084_v22, %v1084_v22  ;;  %v1087_v8 = vpack.c.b8 %v1086_v23, %v1086_v23 }
 0x196   : > { %vm1062_vm11 = vmor %vm2279_vm15, %vm1054_vm10 }
 0x197   : > { %vm1055_vm1 = vmor %vm2281_vm5, %vm2280_vm14  ;;  %1097 = vst.msk [vmem:[%s1594_s19] sm:$0x3] %vm1096_vm7, %v1081_v7 }
 0x198   : > { %1098 = vst.msk [vmem:[%s1594_s19 + $0x2] sm:$0x3] %vm1096_vm7, %v1083_v25  ;;  %1099 = vst.msk [vmem:[%s1594_s19 + $0x4] sm:$0x3] %vm1096_vm7, %v1085_v30 }
 0x199   : > { %1100 = vst.msk [vmem:[%s1594_s19 + $0x6] sm:$0x3] %vm1096_vm7, %v1087_v8  ;;  %vm1063_vm13 = vmor %vm2140_vm12, %vm1055_vm1 }
 0x19a   : > { %vm1068_vm2 = vmpackc.low %vm1063_vm13, %vm1062_vm11 }
 0x19b   : > { %vm1069_vm4 = vmpackc.even %vm1068_vm2, %vm2165_vm9 }
 0x19c   : > { %v1071_v13 = vsel %vm1069_vm4, 16843009, %v1516_v34 }
 0x19d   : > { %v1076_v33 = vunpack.c.0.s8 %v1071_v13  ;;  %v1077_v49 = vunpack.c.1.s8 %v1071_v13  ;;  %v1078_v43 = vunpack.c.2.s8 %v1071_v13  ;;  %v1079_v42 = vunpack.c.3.s8 %v1071_v13 }
 0x19f   : > { %v1088_v46 = vpack.c.b16 %v1076_v33, %v1076_v33  ;;  %v1090_v16 = vpack.c.b16 %v1077_v49, %v1077_v49  ;;  %v1092_v37 = vpack.c.b16 %v1078_v43, %v1078_v43  ;;  %v1094_v28 = vpack.c.b16 %v1079_v42, %v1079_v42 }
 0x1a1   : > { %v1089_v61 = vpack.c.b8 %v1088_v46, %v1088_v46  ;;  %v1091_v44 = vpack.c.b8 %v1090_v16, %v1090_v16  ;;  %v1093_v48 = vpack.c.b8 %v1092_v37, %v1092_v37  ;;  %v1095_v26 = vpack.c.b8 %v1094_v28, %v1094_v28 }
 0x1a3   : > { %1101 = vst.msk [vmem:[%s1594_s19 + $0x8] sm:$0x3] %vm1096_vm7, %v1089_v61  ;;  %1102 = vst.msk [vmem:[%s1594_s19 + $0xa] sm:$0x3] %vm1096_vm7, %v1091_v44 }
 0x1a4   : > { %1103 = vst.msk [vmem:[%s1594_s19 + $0xc] sm:$0x3] %vm1096_vm7, %v1093_v48  ;;  %1104 = vst.msk [vmem:[%s1594_s19 + $0xe] sm:$0x3] %vm1096_vm7, %v1095_v26 }
 0x1a5 PF: > { %s13_s16 = sadd.s32 1, %s1513_s16   ;;  %s2282_s12 = smov %s1505_s14 }
 0x1a6   : > { %p10_p7 = scmp.ge.s32.totalorder %s13_s16, 10   ;;  %s2283_s13 = smov %s1509_s15 }
 0x1a7   : > { %s2284_s14 = smov %s2287_s17  ;;  %s2285_s15 = smov %s2291_s18 }
 0x1a8   :  { %12 = sbr.rel (!%p10_p7) target bundleno = 3 (0x3), region = 66 }

// kernel: forward.6
= control target key start
LH: loop header
LB: loop body
LE: loop exit
PB: predicated region body
PF: predicated region fallthrough
CT: control target
= control target key end

     0   :  { %s1222_s12 = smov 0   ;;  %s1224_s13 = smov 0   ;;  %s1423_s0 = inlined_call_operand.vmem [shape: s8[512,576], index: 0, kind: input, shape index: {}]   ;;  %s1424_s1 = inlined_call_operand.vmem [shape: bf16[576,128], index: 1, kind: input, shape index: {}]   ;;  %s1425_s2 = inlined_call_operand.vmem [shape: f32[1,128], index: 2, kind: input, shape index: {}]   ;;  %s1426_s3 = inlined_call_operand.vmem [shape: bf16[128,128], index: 3, kind: output, shape index: {}]  }
   0x1   :  { %s1226_s14 = smov 0   ;;  %s1228_s15 = smov 0  }
   0x2   :  { %s1230_s16 = smov 0  }
   0x3 LB: > { %s22_s17 = sadd.s32 1, %s1190_s14  ;;  %s25_s18 = sadd.s32 1, %s1194_s15  ;;  %s1198_s16 = sphi %s1230_s16, %s13_s16   ;;  %s1194_s15 = sphi %s1228_s15, %s1434_s15   ;;  %s1190_s14 = sphi %s1226_s14, %s1433_s14   ;;  %s1186_s13 = sphi %s1224_s13, %s1432_s13   ;;  %s1182_s12 = sphi %s1222_s12, %s1431_s12  }
   0x4   : > { %p23_p0 = scmp.ge.s32.totalorder %s22_s17, 4  ;;  %p909_p1 = scmp.ge.s32.totalorder %s1198_s16, 1 }
   0x5   : > { %p163_p2 = scmp.lt.s32.totalorder %s1198_s16, 9 }
   0x6   : > { %s1436_s17 = smov (%p23_p0, %s22_s17), 0  ;;  %s1438_s18 = smov (!%p23_p0, %s25_s18), %s1194_s15 }
   0x7   : > { %p164_p3 = pnand %p909_p1, %p163_p2  ;;  %p27_p4 = scmp.ge.s32.totalorder %s1438_s18, 2 }
   0x8   : > { %v1124_v0 = vld [vmem:[%s1424_s1 + $0x40] sm:$0xff] (!%p164_p3)   ;;  %s910_s21 = sshll.u32 (!%p164_p3), %s1186_s13, 2  ;;  %v1128_v4 = vld [vmem:[%s1424_s1 + $0x48] sm:$0xff] (!%p164_p3)   ;;  %v1132_v8 = vld [vmem:[%s1424_s1 + $0x50] sm:$0xff] (!%p164_p3)   ;;  %vm539_vm0 = vcmask (!%p164_p3), 523264   ;;  %p957_p6 = scmp.ne.s32.totalorder (!%p164_p3), %s1182_s12, 0 }
   0x9   : > { %s1440_s18 = smov (%p27_p4, %s1438_s18), 0  ;;  %167 = sbr.rel (%p164_p3) target bundleno = 311 (0x137), region = 32 }
   0xa   : > { %v1125_v1 = vld [vmem:[%s1424_s1 + $0xc0] sm:$0xff] (!%p164_p3)   ;;  %s193_s24 = sadd.s32 (!%p164_p3), %s1182_s12, %s910_s21  ;;  %969 = vmatprep.subr.bf16.mxu0 (!%p164_p3), %v1124_v0  ;;  %v1129_v5 = vld [vmem:[%s1424_s1 + $0xc8] sm:$0xff] (!%p164_p3)   ;;  %v1133_v9 = vld [vmem:[%s1424_s1 + $0xd0] sm:$0xff] (!%p164_p3)  }
   0xb   : > { %v1126_v2 = vld [vmem:[%s1424_s1] sm:$0xff] (!%p164_p3)   ;;  %s911_s27 = sshll.u32 (!%p164_p3), %s193_s24, 1  ;;  %1009 = vmatprep.subr.bf16.mxu1 (!%p164_p3), %v1125_v1  ;;  %v1130_v6 = vld [vmem:[%s1424_s1 + $0x8] sm:$0xff] (!%p164_p3)   ;;  %v1134_v10 = vld [vmem:[%s1424_s1 + $0x10] sm:$0xff] (!%p164_p3)  }
   0xc   : > { %v1127_v3 = vld [vmem:[%s1424_s1 + $0x80] sm:$0xff] (!%p164_p3)   ;;  %p195_p5 = scmp.lt.s32.totalorder (!%p164_p3), %s911_s27, 15  ;;  %970 = vmatpush3.bf16.msra.mxu0 (!%p164_p3), %v1126_v2  ;;  %v1131_v7 = vld [vmem:[%s1424_s1 + $0x88] sm:$0xff] (!%p164_p3)   ;;  %v1135_v11 = vld [vmem:[%s1424_s1 + $0x90] sm:$0xff] (!%p164_p3)  }
   0xd   : > { %1010 = vmatpush3.bf16.msra.mxu1 (!%p164_p3), %v1127_v3  ;;  %971 = vmatprep.subr.bf16.mxu0 (!%p164_p3), %v1128_v4  ;;  %v1136_v12 = vld [vmem:[%s1424_s1 + $0x58] sm:$0xff] (!%p164_p3)   ;;  %v1140_v16 = vld [vmem:[%s1424_s1 + $0x60] sm:$0xff] (!%p164_p3)   ;;  %v1144_v20 = vld [vmem:[%s1424_s1 + $0x68] sm:$0xff] (!%p164_p3)  }
   0xe   : > { %1011 = vmatprep.subr.bf16.mxu1 (!%p164_p3), %v1129_v5  ;;  %v1137_v13 = vld [vmem:[%s1424_s1 + $0xd8] sm:$0xff] (!%p164_p3)   ;;  %v1141_v17 = vld [vmem:[%s1424_s1 + $0xe0] sm:$0xff] (!%p164_p3)   ;;  %v1145_v21 = vld [vmem:[%s1424_s1 + $0xe8] sm:$0xff] (!%p164_p3)  }
   0xf   : > { %v1138_v14 = vld [vmem:[%s1424_s1 + $0x18] sm:$0xff] (!%p164_p3)   ;;  %v1142_v18 = vld [vmem:[%s1424_s1 + $0x20] sm:$0xff] (!%p164_p3)   ;;  %v1146_v22 = vld [vmem:[%s1424_s1 + $0x28] sm:$0xff] (!%p164_p3)  }
  0x10   : > { %s1442_s27 = smov (!%p195_p5, %s911_s27), 15  ;;  %972 = vmatpush3.bf16.msra.mxu0 %v1130_v6  ;;  %v1139_v15 = vld [vmem:[%s1424_s1 + $0x98] sm:$0xff]   ;;  %v1143_v19 = vld [vmem:[%s1424_s1 + $0xa0] sm:$0xff]   ;;  %v1147_v23 = vld [vmem:[%s1424_s1 + $0xa8] sm:$0xff]  }
  0x11   : > { %s915_s19 = sshll.u32 %s1442_s27, 2  ;;  %1012 = vmatpush3.bf16.msra.mxu1 %v1131_v7  ;;  %973 = vmatprep.subr.bf16.mxu0 %v1132_v8  ;;  %v1148_v24 = vld [vmem:[%s1424_s1 + $0x70] sm:$0xff]   ;;  %s1081_s13 = smul.u32 40, %s1442_s27  ;;  %v1152_v28 = vld [vmem:[%s1424_s1 + $0x78] sm:$0xff]   ;;  %v1156_v40 = vld [vmem:[%s1424_s1 + $0x100] sm:$0xff]  }
  0x12   : > { %s1291_s24 = scalar_lea.vmem %s1426_s3, %s915_s19  ;;  %1013 = vmatprep.subr.bf16.mxu1 %v1133_v9  ;;  %v1149_v25 = vld [vmem:[%s1424_s1 + $0xf0] sm:$0xff]   ;;  %v1153_v29 = vld [vmem:[%s1424_s1 + $0xf8] sm:$0xff]   ;;  %v1157_v43 = vld [vmem:[%s1424_s1 + $0x108] sm:$0xff]  }
  0x13   : > { %v1150_v26 = vld [vmem:[%s1424_s1 + $0x30] sm:$0xff]   ;;  %s1357_s30 = scalar_lea.vmem %s1423_s0, %s1081_s13  ;;  %v1154_v30 = vld [vmem:[%s1424_s1 + $0x38] sm:$0xff]   ;;  %v916_v4 = vld [vmem:[%s1425_s2] ss:$0 sm:$0xff] }
  0x14   : > { %974 = vmatpush3.bf16.msra.mxu0 %v1134_v10  ;;  %v1151_v27 = vld [vmem:[%s1424_s1 + $0xb0] sm:$0xff]   ;;  %v1155_v31 = vld [vmem:[%s1424_s1 + $0xb8] sm:$0xff]   ;;  %v215_v32 = vld [vmem:[%s1357_s30 + $0x8] sm:$0xff] }
  0x15   : > { %1014 = vmatpush3.bf16.msra.mxu1 %v1135_v11  ;;  %975 = vmatprep.subr.bf16.mxu0 %v1136_v12  ;;  %v217_v33 = vld [vmem:[%s1357_s30 + $0x18] sm:$0xff]  ;;  %v214_v34 = vld [vmem:[%s1357_s30] sm:$0xff]  ;;  %v225_v35 = vunpack.c.l.s8.bf16 %v215_v32  ;;  %v216_v37 = vld [vmem:[%s1357_s30 + $0x10] sm:$0xff]  ;;  %v230_v41 = vunpack.c.h.s8.bf16 %v215_v32 }
  0x16   : > { %1015 = vmatprep.subr.bf16.mxu1 %v1137_v13  ;;  %v227_v36 = vunpack.c.l.s8.bf16 %v217_v33  ;;  %v224_v38 = vunpack.c.l.s8.bf16 %v214_v34  ;;  %v226_v39 = vunpack.c.l.s8.bf16 %v216_v37  ;;  %v232_v42 = vunpack.c.h.s8.bf16 %v217_v33  ;;  %v220_v44 = vld [vmem:[%s1357_s30 + $0x30] sm:$0xff]  ;;  %v222_v45 = vld [vmem:[%s1357_s30 + $0x40] sm:$0xff]  ;;  %v1159_v51 = vld [vmem:[%s1424_s1 + $0x118] sm:$0xff]  }
  0x17   : > { %584 = vmatprep.mubr.bf16.mxu0 %v225_v35  ;;  %v1158_v46 = vld [vmem:[%s1424_s1 + $0x110] sm:$0xff]   ;;  %v229_v47 = vunpack.c.h.s8.bf16 %v214_v34  ;;  %v231_v48 = vunpack.c.h.s8.bf16 %v216_v37  ;;  %v235_v49 = vunpack.c.l.s8.bf16 %v220_v44  ;;  %v237_v50 = vunpack.c.l.s8.bf16 %v222_v45  ;;  %v219_v52 = vld [vmem:[%s1357_s30 + $0x28] sm:$0xff]  ;;  %v221_v53 = vld [vmem:[%s1357_s30 + $0x38] sm:$0xff] }
  0x18   : > { %976 = vmatpush3.bf16.msra.mxu0 %v1138_v14  ;;  %649 = vmatprep.mubr.bf16.mxu1 %v227_v36  ;;  %v234_v54 = vunpack.c.l.s8.bf16 %v219_v52  ;;  %v236_v55 = vunpack.c.l.s8.bf16 %v221_v53  ;;  %v240_v56 = vunpack.c.h.s8.bf16 %v220_v44  ;;  %v242_v57 = vunpack.c.h.s8.bf16 %v222_v45  ;;  %v218_v58 = vld [vmem:[%s1357_s30 + $0x20] sm:$0xff]  ;;  %v223_v59 = vld [vmem:[%s1357_s30 + $0x48] sm:$0xff] }
  0x19   : > { %1016 = vmatpush3.bf16.msra.mxu1 %v1139_v15  ;;  %977 = vmatprep.subr.bf16.mxu0 %v1140_v16  ;;  %v239_v60 = vunpack.c.h.s8.bf16 %v219_v52  ;;  %v241_v61 = vunpack.c.h.s8.bf16 %v221_v53  ;;  %v228_v62 = vunpack.c.l.s8.bf16 %v218_v58  ;;  %v238_v63 = vunpack.c.l.s8.bf16 %v223_v59 }
  0x1a   : > { %1017 = vmatprep.subr.bf16.mxu1 %v1141_v17  ;;  %v233_v0 = vunpack.c.h.s8.bf16 %v218_v58  ;;  %v243_v1 = vunpack.c.h.s8.bf16 %v223_v59 }
  0x1c   : > { %978 = vmatpush3.bf16.msra.mxu0 %v1142_v18 }
  0x1d   : > { %1018 = vmatpush3.bf16.msra.mxu1 %v1143_v19  ;;  %979 = vmatprep.subr.bf16.mxu0 %v1144_v20 }
  0x1e   : > { %1019 = vmatprep.subr.bf16.mxu1 %v1145_v21 }
  0x20   : > { %980 = vmatpush3.bf16.msra.mxu0 %v1146_v22 }
  0x21   : > { %1020 = vmatpush3.bf16.msra.mxu1 %v1147_v23  ;;  %981 = vmatprep.subr.bf16.mxu0 %v1148_v24 }
  0x22   : > { %1021 = vmatprep.subr.bf16.mxu1 %v1149_v25 }
  0x24   : > { %982 = vmatpush3.bf16.msra.mxu0 %v1150_v26 }
  0x25   : > { %1022 = vmatpush3.bf16.msra.mxu1 %v1151_v27  ;;  %983 = vmatprep.subr.bf16.mxu0 %v1152_v28 }
  0x26   : > { %1023 = vmatprep.subr.bf16.mxu1 %v1153_v29 }
  0x28   : > { %984 = vmatpush3.bf16.msra.mxu0 %v1154_v30 }
  0x29   : > { %1024 = vmatpush3.bf16.msra.mxu1 %v1155_v31  ;;  %1057 = vmatprep.subr.bf16.mxu0 %v1156_v40 }
  0x2a   : > { %1073 = vmatprep.subr.bf16.mxu1 %v1156_v40 }
  0x2b   : > { %585 = vmatmul.mubr.bf16.vlgmr.msra.gmra.mrb[0].mxu0 %v224_v38 }
  0x2c   : > { %650 = vmatmul.mubr.bf16.vlgmr.msra.gmra.mrb[0].mxu1 %v226_v39  ;;  %1058 = vmatpush3.bf16.msra.mxu0 %v1156_v40 }
  0x2d   : > { %1077 = vmatpush3.bf16.msra.mxu1 %v1156_v40  ;;  %592 = vmatprep.mubr.bf16.mxu0 %v230_v41 }
  0x2e   : > { %657 = vmatprep.mubr.bf16.mxu1 %v232_v42  ;;  %1059 = vmatprep.subr.bf16.mxu0 %v1157_v43 }
  0x2f   : > { %1074 = vmatprep.subr.bf16.mxu1 %v1157_v43 }
  0x30   : > { %1060 = vmatpush3.bf16.msra.mxu0 %v1157_v43 }
  0x31   : > { %1078 = vmatpush3.bf16.msra.mxu1 %v1157_v43  ;;  %1061 = vmatprep.subr.bf16.mxu0 %v1158_v46 }
  0x32   : > { %1075 = vmatprep.subr.bf16.mxu1 %v1158_v46 }
  0x33   : > { %593 = vmatmul.mubr.bf16.gmra.mrb[4].mxu0 %v229_v47 }
  0x34   : > { %658 = vmatmul.mubr.bf16.gmra.mrb[4].mxu1 %v231_v48  ;;  %600 = vmatprep.mubr.bf16.mxu0 %v235_v49 }
  0x35   : > { %665 = vmatprep.mubr.bf16.mxu1 %v237_v50  ;;  %1062 = vmatpush3.bf16.msra.mxu0 %v1158_v46 }
  0x36   : > { %1079 = vmatpush3.bf16.msra.mxu1 %v1158_v46  ;;  %1063 = vmatprep.subr.bf16.mxu0 %v1159_v51 }
  0x37   : > { %1076 = vmatprep.subr.bf16.mxu1 %v1159_v51 }
  0x39   : > { %1064 = vmatpush3.bf16.msra.mxu0 %v1159_v51 }
  0x3a   : > { %1080 = vmatpush3.bf16.msra.mxu1 %v1159_v51 }
  0x3b   : > { %601 = vmatmul.mubr.bf16.gmra.mrb[8].mxu0 %v234_v54 }
  0x3c   : > { %666 = vmatmul.mubr.bf16.gmra.mrb[8].mxu1 %v236_v55  ;;  %608 = vmatprep.mubr.bf16.mxu0 %v240_v56 }
  0x3d   : > { %673 = vmatprep.mubr.bf16.mxu1 %v242_v57 }
  0x43   : > { %609 = vmatmul.mubr.bf16.gmra.mrb[12].mxu0 %v239_v60 }
  0x44   : > { %674 = vmatmul.mubr.bf16.gmra.mrb[12].mxu1 %v241_v61  ;;  %1065 = vmatprep.mubr.msk.bf16.mxu0 %vm539_vm0, %v228_v62 }
  0x45   : > { %1069 = vmatprep.mubr.msk.bf16.mxu1 %vm539_vm0, %v238_v63 }
  0x4b   : > { %1066 = vmatmul.mubr.msk.bf16.vlgmr.msra.gmra.mrb[16].mxu0 %vm539_vm0, %v233_v0 }
  0x4c   : > { %1070 = vmatmul.mubr.msk.bf16.vlgmr.msra.gmra.mrb[16].mxu1 %vm539_vm0, %v243_v1 }
  0xfe   : > { %v985_v2 = vpop.f32.mrb[0].mxu0 }
  0xff   : > { %v1025_v3 = vpop.f32.mrb[0].mxu1  ;;  %v986_v5 = vpop.f32.mrb[1].mxu0 }
 0x100   : > { %v1026_v6 = vpop.f32.mrb[1].mxu1  ;;  %v987_v7 = vadd.f32 %v986_v5, %v985_v2  ;;  %v988_v9 = vpop.f32.mrb[2].mxu0 }
 0x101   : > { %v1027_v8 = vadd.f32 %v1026_v6, %v1025_v3  ;;  %v1028_v10 = vpop.f32.mrb[2].mxu1  ;;  %v989_v11 = vpop.f32.mrb[3].mxu0 }
 0x102   : > { %v1029_v12 = vpop.f32.mrb[3].mxu1  ;;  %v587_v13 = vadd.f32 %v987_v7, %v916_v4  ;;  %v990_v14 = vadd.f32 %v989_v11, %v988_v9 }
 0x103   : > { %v1030_v15 = vadd.f32 %v1029_v12, %v1028_v10 }
 0x104   : > { %v590_v16 = vadd.f32 %v990_v14, %v916_v4  ;;  %v652_v17 = vadd.f32 %v1027_v8, %v587_v13 }
 0x106   : > { %v991_v18 = vpop.f32.mrb[4].mxu0  ;;  %v655_v20 = vadd.f32 %v1030_v15, %v590_v16 }
 0x107   : > { %v1031_v19 = vpop.f32.mrb[4].mxu1  ;;  %v992_v21 = vpop.f32.mrb[5].mxu0 }
 0x108   : > { %v1032_v22 = vpop.f32.mrb[5].mxu1  ;;  %v993_v23 = vadd.f32 %v992_v21, %v991_v18  ;;  %v994_v25 = vpop.f32.mrb[6].mxu0 }
 0x109   : > { %v1033_v24 = vadd.f32 %v1032_v22, %v1031_v19  ;;  %v1034_v26 = vpop.f32.mrb[6].mxu1  ;;  %v995_v27 = vpop.f32.mrb[7].mxu0 }
 0x10a   : > { %v1035_v28 = vpop.f32.mrb[7].mxu1  ;;  %v595_v29 = vadd.f32 %v993_v23, %v916_v4  ;;  %v996_v30 = vadd.f32 %v995_v27, %v994_v25 }
 0x10b   : > { %v1036_v31 = vadd.f32 %v1035_v28, %v1034_v26 }
 0x10c   : > { %v598_v32 = vadd.f32 %v996_v30, %v916_v4  ;;  %v660_v33 = vadd.f32 %v1033_v24, %v595_v29 }
 0x10e   : > { %v997_v34 = vpop.f32.mrb[8].mxu0  ;;  %v663_v36 = vadd.f32 %v1036_v31, %v598_v32 }
 0x10f   : > { %v1037_v35 = vpop.f32.mrb[8].mxu1  ;;  %v998_v37 = vpop.f32.mrb[9].mxu0 }
 0x110   : > { %v1038_v38 = vpop.f32.mrb[9].mxu1  ;;  %v999_v39 = vadd.f32 %v998_v37, %v997_v34  ;;  %v1000_v41 = vpop.f32.mrb[10].mxu0 }
 0x111   : > { %v1039_v40 = vadd.f32 %v1038_v38, %v1037_v35  ;;  %v1040_v42 = vpop.f32.mrb[10].mxu1  ;;  %v1001_v43 = vpop.f32.mrb[11].mxu0 }
 0x112   : > { %v1041_v44 = vpop.f32.mrb[11].mxu1  ;;  %v603_v45 = vadd.f32 %v999_v39, %v916_v4  ;;  %v1002_v46 = vadd.f32 %v1001_v43, %v1000_v41 }
 0x113   : > { %v1042_v47 = vadd.f32 %v1041_v44, %v1040_v42 }
 0x114   : > { %v606_v48 = vadd.f32 %v1002_v46, %v916_v4  ;;  %v668_v49 = vadd.f32 %v1039_v40, %v603_v45 }
 0x116   : > { %v1003_v50 = vpop.f32.mrb[12].mxu0  ;;  %v671_v52 = vadd.f32 %v1042_v47, %v606_v48 }
 0x117   : > { %v1043_v51 = vpop.f32.mrb[12].mxu1  ;;  %v1004_v53 = vpop.f32.mrb[13].mxu0 }
 0x118   : > { %v1044_v54 = vpop.f32.mrb[13].mxu1  ;;  %v1005_v55 = vadd.f32 %v1004_v53, %v1003_v50  ;;  %v1006_v57 = vpop.f32.mrb[14].mxu0 }
 0x119   : > { %v1045_v56 = vadd.f32 %v1044_v54, %v1043_v51  ;;  %v1046_v58 = vpop.f32.mrb[14].mxu1  ;;  %v1007_v59 = vpop.f32.mrb[15].mxu0 }
 0x11a   : > { %v1047_v60 = vpop.f32.mrb[15].mxu1  ;;  %v611_v61 = vadd.f32 %v1005_v55, %v916_v4  ;;  %v1008_v62 = vadd.f32 %v1007_v59, %v1006_v57 }
 0x11b   : > { %v1048_v63 = vadd.f32 %v1047_v60, %v1046_v58 }
 0x11c   : > { %v614_v0 = vadd.f32 %v1008_v62, %v916_v4  ;;  %v676_v1 = vadd.f32 %v1045_v56, %v611_v61  ;;  %v1200_v4 = vmov (!%p957_p6), 0.0  }
 0x11d   : > { %750 = sbr.rel (%p957_p6) target bundleno = 292 (0x124), region = 36  ;;  %751 = vst [vmem:[#allocation2] sm:$0xff] (!%p957_p6), %v1200_v4  ;;  %752 = vst [vmem:[#allocation2 + $0x8] sm:$0xff] (!%p957_p6), %v1200_v4 }
 0x11e   : > { %v1067_v2 = vpop.f32.mrb[16].mxu0  ;;  %v679_v5 = vadd.f32 %v1048_v63, %v614_v0  ;;  %753 = vst [vmem:[#allocation2 + $0x10] sm:$0xff] (!%p957_p6), %v1200_v4  ;;  %754 = vst [vmem:[#allocation2 + $0x18] sm:$0xff] (!%p957_p6), %v1200_v4 }
 0x11f   : > { %v1071_v3 = vpop.f32.mrb[16].mxu1  ;;  %v725_v6 = vadd.f32 %v1067_v2, %v660_v33  ;;  %v716_v8 = vpop.f32.mrb[17].mxu0  ;;  %755 = vst [vmem:[#allocation2 + $0x20] sm:$0xff] (!%p957_p6), %v1200_v4  ;;  %756 = vst [vmem:[#allocation2 + $0x28] sm:$0xff] (!%p957_p6), %v1200_v4 }
 0x120   : > { %v741_v7 = vadd.f32 %v1071_v3, %v676_v1  ;;  %v732_v9 = vpop.f32.mrb[17].mxu1  ;;  %v717_v10 = vadd.f32 %v716_v8, %v652_v17  ;;  %v1068_v12 = vpop.f32.mrb[18].mxu0  ;;  %757 = vst [vmem:[#allocation2 + $0x30] sm:$0xff] (!%p957_p6), %v1200_v4  ;;  %758 = vst [vmem:[#allocation2 + $0x38] sm:$0xff] (!%p957_p6), %v1200_v4 }
 0x121   : > { %v733_v11 = vadd.f32 %v732_v9, %v668_v49  ;;  %v1072_v13 = vpop.f32.mrb[18].mxu1  ;;  %v728_v14 = vadd.f32 %v1068_v12, %v663_v36  ;;  %v719_v16 = vpop.f32.mrb[19].mxu0 }
 0x122   : > { %v744_v15 = vadd.f32 %v1072_v13, %v679_v5  ;;  %v735_v18 = vpop.f32.mrb[19].mxu1  ;;  %v720_v19 = vadd.f32 %v719_v16, %v655_v20 }
 0x123   : > { %v736_v21 = vadd.f32 %v735_v18, %v671_v52 }
 0x124 PF: > { %v759_v17 = vld [vmem:[#allocation2] sm:$0xff]  ;;  %v760_v22 = vld [vmem:[#allocation2 + $0x8] sm:$0xff]  ;;  %v1201_v54 = vmov 0.0  }
 0x125   : > { %v761_v23 = vld [vmem:[#allocation2 + $0x10] sm:$0xff]  ;;  %v767_v24 = vmul.f32 0.3, %v759_v17  ;;  %v768_v25 = vmul.f32 0.3, %v760_v22  ;;  %v762_v26 = vld [vmem:[#allocation2 + $0x18] sm:$0xff] }
 0x126   : > { %v769_v20 = vmul.f32 0.3, %v761_v23  ;;  %v763_v27 = vld [vmem:[#allocation2 + $0x20] sm:$0xff]  ;;  %v764_v28 = vld [vmem:[#allocation2 + $0x28] sm:$0xff]  ;;  %v770_v32 = vmul.f32 0.3, %v762_v26 }
 0x127   : > { %v775_v29 = vadd.f32 %v767_v24, %v717_v10  ;;  %v776_v30 = vadd.f32 %v768_v25, %v720_v19  ;;  %v765_v33 = vld [vmem:[#allocation2 + $0x30] sm:$0xff]  ;;  %v766_v34 = vld [vmem:[#allocation2 + $0x38] sm:$0xff]  ;;  %v771_v35 = vmul.f32 0.3, %v763_v27  ;;  %v772_v36 = vmul.f32 0.3, %v764_v28 }
 0x128   : > { %v777_v31 = vadd.f32 %v769_v20, %v725_v6  ;;  %v773_v37 = vmul.f32 0.3, %v765_v33  ;;  %v778_v38 = vadd.f32 %v770_v32, %v728_v14  ;;  %v774_v45 = vmul.f32 0.3, %v766_v34 }
 0x129   : > { %vm783_vm1 = vcmp.ge.f32.partialorder %v775_v29, 0.5  ;;  %vm784_vm2 = vcmp.ge.f32.partialorder %v776_v30, 0.5  ;;  %v779_v42 = vadd.f32 %v771_v35, %v733_v11  ;;  %v780_v43 = vadd.f32 %v772_v36, %v736_v21 }
 0x12a   : > { %vm785_vm3 = vcmp.ge.f32.partialorder %v777_v31, 0.5  ;;  %v791_v39 = vsel %vm783_vm1, 0.0, %v775_v29  ;;  %v792_v40 = vsel %vm784_vm2, 0.0, %v776_v30  ;;  %vm786_vm4 = vcmp.ge.f32.partialorder %v778_v38, 0.5 }
 0x12b   : > { %v793_v41 = vsel %vm785_vm3, 0.0, %v777_v31  ;;  %799 = vst [vmem:[#allocation2] sm:$0xff] %v791_v39  ;;  %800 = vst [vmem:[#allocation2 + $0x8] sm:$0xff] %v792_v40  ;;  %v781_v44 = vadd.f32 %v773_v37, %v741_v7  ;;  %v794_v47 = vsel %vm786_vm4, 0.0, %v778_v38  ;;  %vm787_vm6 = vcmp.ge.f32.partialorder %v779_v42, 0.5 }
 0x12c   : > { %801 = vst [vmem:[#allocation2 + $0x10] sm:$0xff] %v793_v41  ;;  %vm1394_vm5 = vmor %vm783_vm1, %vm785_vm3  ;;  %v795_v49 = vsel %vm787_vm6, 0.0, %v779_v42  ;;  %vm788_vm8 = vcmp.ge.f32.partialorder %v780_v43, 0.5  ;;  %v782_v50 = vadd.f32 %v774_v45, %v744_v15 }
 0x12d   : > { %802 = vst [vmem:[#allocation2 + $0x18] sm:$0xff] %v794_v47  ;;  %vm1399_vm7 = vmor %vm784_vm2, %vm786_vm4  ;;  %vm789_vm9 = vcmp.ge.f32.partialorder %v781_v44, 0.5  ;;  %v796_v51 = vsel %vm788_vm8, 0.0, %v780_v43 }
 0x12e   : > { %803 = vst [vmem:[#allocation2 + $0x20] sm:$0xff] %v795_v49  ;;  %v797_v52 = vsel %vm789_vm9, 0.0, %v781_v44  ;;  %vm809_vm10 = vmor %vm787_vm6, %vm789_vm9  ;;  %vm790_vm11 = vcmp.ge.f32.partialorder %v782_v50, 0.5 }
 0x12f   : > { %804 = vst [vmem:[#allocation2 + $0x28] sm:$0xff] %v796_v51  ;;  %805 = vst [vmem:[#allocation2 + $0x30] sm:$0xff] %v797_v52  ;;  %v798_v53 = vsel %vm790_vm11, 0.0, %v782_v50 }
 0x130   : > { %vm811_vm12 = vmor %vm1394_vm5, %vm809_vm10  ;;  %806 = vst [vmem:[#allocation2 + $0x38] sm:$0xff] %v798_v53 }
 0x131   : > { %vm810_vm13 = vmor %vm788_vm8, %vm790_vm11  ;;  %v958_v55 = vsel %vm811_vm12, 1.0, %v1201_v54 }
 0x132   : > { %vm812_vm14 = vmor %vm1399_vm7, %vm810_vm13 }
 0x133   : > { %v959_v56 = vsel %vm812_vm14, 1.0, %v1201_v54 }
 0x134   : > { %v967_v57 = vpack.c.bf16 %v959_v56, %v958_v55 }
 0x136   : > { %968 = vst [vmem:[%s1291_s24] sm:$0xff] %v967_v57  }
 0x137 PF: > { %s13_s16 = sadd.s32 1, %s1198_s16   ;;  %s1431_s12 = smov %s1190_s14 }
 0x138   : > { %p10_p7 = scmp.ge.s32.totalorder %s13_s16, 10   ;;  %s1432_s13 = smov %s1194_s15 }
 0x139   : > { %s1433_s14 = smov %s1436_s17  ;;  %s1434_s15 = smov %s1440_s18 }
 0x13a   :  { %12 = sbr.rel (!%p10_p7) target bundleno = 3 (0x3), region = 66 }

// kernel: forward.7
= control target key start
LH: loop header
LB: loop body
LE: loop exit
PB: predicated region body
PF: predicated region fallthrough
CT: control target
= control target key end

     0   :  { %s2729_s1 = inlined_call_operand.vmem [shape: bf16[512,512], index: 1, kind: input, shape index: {}]   ;;  %s2730_s0 = inlined_call_operand.vmem [shape: bf16[32,512], index: 0, kind: input, shape index: {}]   ;;  %s2731_s3 = inlined_call_operand.vmem [shape: bf16[512,128], index: 3, kind: input, shape index: {}]   ;;  %s2732_s5 = inlined_call_operand.vmem [shape: bf16[128,128], index: 5, kind: input, shape index: {}]   ;;  %s2733_s2 = inlined_call_operand.vmem [shape: f32[1,512], index: 2, kind: input, shape index: {}]   ;;  %s2734_s4 = inlined_call_operand.vmem [shape: f32[1,128], index: 4, kind: input, shape index: {}]   ;;  %s2735_s6 = inlined_call_operand.vmem [shape: f32[1,128], index: 6, kind: input, shape index: {}]   ;;  %s2736_s7 = inlined_call_operand.vmem [shape: f32[32,128], index: 7, kind: output, shape index: {}]  }
   0x1   :  { %v1892_v0 = vld [vmem:[%s2729_s1 + $0x4] ss:$16 sps:$4 sm:$0xff]   ;;  %v1894_v1 = vld [vmem:[%s2729_s1 + $0xc] ss:$16 sps:$4 sm:$0xff]   ;;  %v1896_v2 = vld [vmem:[%s2729_s1] ss:$16 sps:$4 sm:$0xff]  }
   0x2   :  { %865 = vmatprep.subr.bf16.mxu0 %v1892_v0  ;;  %v1897_v3 = vld [vmem:[%s2729_s1 + $0x8] ss:$16 sps:$4 sm:$0xff]   ;;  %971 = vmatprep.subr.bf16.mxu1 %v1894_v1  ;;  %v1898_v4 = vld [vmem:[%s2729_s1 + $0x24] ss:$16 sps:$4 sm:$0xff]   ;;  %v1900_v5 = vld [vmem:[%s2729_s1 + $0x2c] ss:$16 sps:$4 sm:$0xff]  }
   0x3   :  { %866 = vmatpush1.bf16.msra.mxu0 %v1896_v2  ;;  %972 = vmatpush1.bf16.msra.mxu1 %v1897_v3  ;;  %v1902_v6 = vld [vmem:[%s2729_s1 + $0x20] ss:$16 sps:$4 sm:$0xff]   ;;  %v1903_v7 = vld [vmem:[%s2729_s1 + $0x28] ss:$16 sps:$4 sm:$0xff]   ;;  %v1904_v8 = vld [vmem:[%s2729_s1 + $0x44] ss:$16 sps:$4 sm:$0xff]  }
   0x4   :  { %867 = vmatprep.subr.bf16.mxu0 %v1898_v4  ;;  %973 = vmatprep.subr.bf16.mxu1 %v1900_v5  ;;  %v1906_v9 = vld [vmem:[%s2729_s1 + $0x4c] ss:$16 sps:$4 sm:$0xff]   ;;  %v1908_v10 = vld [vmem:[%s2729_s1 + $0x40] ss:$16 sps:$4 sm:$0xff]   ;;  %v1909_v11 = vld [vmem:[%s2729_s1 + $0x48] ss:$16 sps:$4 sm:$0xff]  }
   0x5   :  { %v1910_v12 = vld [vmem:[%s2729_s1 + $0x64] ss:$16 sps:$4 sm:$0xff]   ;;  %v1912_v13 = vld [vmem:[%s2729_s1 + $0x6c] ss:$16 sps:$4 sm:$0xff]   ;;  %v1914_v14 = vld [vmem:[%s2729_s1 + $0x60] ss:$16 sps:$4 sm:$0xff]  }
   0x6   :  { %v1915_v15 = vld [vmem:[%s2729_s1 + $0x68] ss:$16 sps:$4 sm:$0xff]   ;;  %v1916_v16 = vld [vmem:[%s2729_s1 + $0x84] ss:$16 sps:$4 sm:$0xff]   ;;  %v1918_v17 = vld [vmem:[%s2729_s1 + $0x8c] ss:$16 sps:$4 sm:$0xff]  }
   0x7   :  { %868 = vmatpush1.bf16.msra.mxu0 %v1902_v6  ;;  %974 = vmatpush1.bf16.msra.mxu1 %v1903_v7  ;;  %v1920_v18 = vld [vmem:[%s2729_s1 + $0x80] ss:$16 sps:$4 sm:$0xff]   ;;  %v1921_v19 = vld [vmem:[%s2729_s1 + $0x88] ss:$16 sps:$4 sm:$0xff]   ;;  %v1922_v20 = vld [vmem:[%s2729_s1 + $0xa4] ss:$16 sps:$4 sm:$0xff]  }
   0x8   :  { %869 = vmatprep.subr.bf16.mxu0 %v1904_v8  ;;  %975 = vmatprep.subr.bf16.mxu1 %v1906_v9  ;;  %v1924_v21 = vld [vmem:[%s2729_s1 + $0xac] ss:$16 sps:$4 sm:$0xff]   ;;  %v1926_v22 = vld [vmem:[%s2729_s1 + $0xa0] ss:$16 sps:$4 sm:$0xff]   ;;  %v1927_v23 = vld [vmem:[%s2729_s1 + $0xa8] ss:$16 sps:$4 sm:$0xff]  }
   0x9   :  { %v1928_v24 = vld [vmem:[%s2729_s1 + $0xc4] ss:$16 sps:$4 sm:$0xff]   ;;  %v1930_v25 = vld [vmem:[%s2729_s1 + $0xcc] ss:$16 sps:$4 sm:$0xff]   ;;  %v1932_v26 = vld [vmem:[%s2729_s1 + $0xc0] ss:$16 sps:$4 sm:$0xff]  }
   0xa   :  { %v1933_v27 = vld [vmem:[%s2729_s1 + $0xc8] ss:$16 sps:$4 sm:$0xff]   ;;  %v1934_v28 = vld [vmem:[%s2729_s1 + $0xe4] ss:$16 sps:$4 sm:$0xff]   ;;  %v1936_v29 = vld [vmem:[%s2729_s1 + $0xec] ss:$16 sps:$4 sm:$0xff]  }
   0xb   :  { %870 = vmatpush1.bf16.msra.mxu0 %v1908_v10  ;;  %976 = vmatpush1.bf16.msra.mxu1 %v1909_v11  ;;  %v1938_v30 = vld [vmem:[%s2729_s1 + $0xe0] ss:$16 sps:$4 sm:$0xff]   ;;  %v1939_v31 = vld [vmem:[%s2729_s1 + $0xe8] ss:$16 sps:$4 sm:$0xff]   ;;  %v1940_v32 = vld [vmem:[%s2729_s1 + $0x104] ss:$16 sps:$4 sm:$0xff]  }
   0xc   :  { %871 = vmatprep.subr.bf16.mxu0 %v1910_v12  ;;  %977 = vmatprep.subr.bf16.mxu1 %v1912_v13  ;;  %v1942_v33 = vld [vmem:[%s2729_s1 + $0x10c] ss:$16 sps:$4 sm:$0xff]   ;;  %v1944_v34 = vld [vmem:[%s2729_s1 + $0x100] ss:$16 sps:$4 sm:$0xff]   ;;  %v1945_v35 = vld [vmem:[%s2729_s1 + $0x108] ss:$16 sps:$4 sm:$0xff]  }
   0xd   :  { %v1946_v36 = vld [vmem:[%s2729_s1 + $0x124] ss:$16 sps:$4 sm:$0xff]   ;;  %v1948_v37 = vld [vmem:[%s2729_s1 + $0x12c] ss:$16 sps:$4 sm:$0xff]   ;;  %v1950_v38 = vld [vmem:[%s2729_s1 + $0x120] ss:$16 sps:$4 sm:$0xff]  }
   0xe   :  { %v1951_v39 = vld [vmem:[%s2729_s1 + $0x128] ss:$16 sps:$4 sm:$0xff]   ;;  %v1952_v40 = vld [vmem:[%s2729_s1 + $0x144] ss:$16 sps:$4 sm:$0xff]   ;;  %v1954_v41 = vld [vmem:[%s2729_s1 + $0x14c] ss:$16 sps:$4 sm:$0xff]  }
   0xf   :  { %872 = vmatpush1.bf16.msra.mxu0 %v1914_v14  ;;  %978 = vmatpush1.bf16.msra.mxu1 %v1915_v15  ;;  %v1956_v42 = vld [vmem:[%s2729_s1 + $0x140] ss:$16 sps:$4 sm:$0xff]   ;;  %v1957_v43 = vld [vmem:[%s2729_s1 + $0x148] ss:$16 sps:$4 sm:$0xff]   ;;  %v1958_v44 = vld [vmem:[%s2729_s1 + $0x164] ss:$16 sps:$4 sm:$0xff]  }
  0x10   :  { %873 = vmatprep.subr.bf16.mxu0 %v1916_v16  ;;  %979 = vmatprep.subr.bf16.mxu1 %v1918_v17  ;;  %v1960_v45 = vld [vmem:[%s2729_s1 + $0x16c] ss:$16 sps:$4 sm:$0xff]   ;;  %v1962_v46 = vld [vmem:[%s2729_s1 + $0x160] ss:$16 sps:$4 sm:$0xff]   ;;  %v1963_v47 = vld [vmem:[%s2729_s1 + $0x168] ss:$16 sps:$4 sm:$0xff]  }
  0x11   :  { %v1990_v48 = vld [vmem:[%s2730_s0 + $0x4] ss:$16 sps:$4 sm:$0xff]   ;;  %v1966_v50 = vld [vmem:[%s2729_s1 + $0x18c] ss:$16 sps:$4 sm:$0xff]   ;;  %v1968_v51 = vld [vmem:[%s2729_s1 + $0x180] ss:$16 sps:$4 sm:$0xff]  }
  0x12   :  { %v1964_v49 = vld [vmem:[%s2729_s1 + $0x184] ss:$16 sps:$4 sm:$0xff]   ;;  %897 = vmatprep.mubr.bf16.mxu0 %v1990_v48  ;;  %1003 = vmatprep.mubr.bf16.mxu1 %v1990_v48  ;;  %v1969_v52 = vld [vmem:[%s2729_s1 + $0x188] ss:$16 sps:$4 sm:$0xff]   ;;  %v1972_v54 = vld [vmem:[%s2729_s1 + $0x1ac] ss:$16 sps:$4 sm:$0xff]  }
  0x13   :  { %874 = vmatpush1.bf16.msra.mxu0 %v1920_v18  ;;  %980 = vmatpush1.bf16.msra.mxu1 %v1921_v19  ;;  %v1970_v53 = vld [vmem:[%s2729_s1 + $0x1a4] ss:$16 sps:$4 sm:$0xff]   ;;  %v1974_v55 = vld [vmem:[%s2729_s1 + $0x1a0] ss:$16 sps:$4 sm:$0xff]   ;;  %v1975_v56 = vld [vmem:[%s2729_s1 + $0x1a8] ss:$16 sps:$4 sm:$0xff]  }
  0x14   :  { %875 = vmatprep.subr.bf16.mxu0 %v1922_v20  ;;  %981 = vmatprep.subr.bf16.mxu1 %v1924_v21  ;;  %v1976_v57 = vld [vmem:[%s2729_s1 + $0x1c4] ss:$16 sps:$4 sm:$0xff]   ;;  %v1978_v58 = vld [vmem:[%s2729_s1 + $0x1cc] ss:$16 sps:$4 sm:$0xff]   ;;  %v1980_v59 = vld [vmem:[%s2729_s1 + $0x1c0] ss:$16 sps:$4 sm:$0xff]  }
  0x15   :  { %v1981_v60 = vld [vmem:[%s2729_s1 + $0x1c8] ss:$16 sps:$4 sm:$0xff]   ;;  %v1982_v61 = vld [vmem:[%s2729_s1 + $0x1e4] ss:$16 sps:$4 sm:$0xff]   ;;  %v1984_v62 = vld [vmem:[%s2729_s1 + $0x1ec] ss:$16 sps:$4 sm:$0xff]  }
  0x16   :  { %v1986_v63 = vld [vmem:[%s2729_s1 + $0x1e0] ss:$16 sps:$4 sm:$0xff]   ;;  %v1987_v0 = vld [vmem:[%s2729_s1 + $0x1e8] ss:$16 sps:$4 sm:$0xff]   ;;  %v1993_v1 = vld [vmem:[%s2729_s1 + $0x204] ss:$16 sps:$4 sm:$0xff]  }
  0x17   :  { %876 = vmatpush1.bf16.msra.mxu0 %v1926_v22  ;;  %982 = vmatpush1.bf16.msra.mxu1 %v1927_v23  ;;  %v1996_v2 = vld [vmem:[%s2729_s1 + $0x20c] ss:$16 sps:$4 sm:$0xff]   ;;  %v1988_v3 = vld [vmem:[%s2730_s0] ss:$16 sps:$4 sm:$0xff]   ;;  %v1994_v5 = vld [vmem:[%s2729_s1 + $0x208] ss:$16 sps:$4 sm:$0xff]  }
  0x18   :  { %877 = vmatprep.subr.bf16.mxu0 %v1928_v24  ;;  %983 = vmatprep.subr.bf16.mxu1 %v1930_v25  ;;  %v1991_v4 = vld [vmem:[%s2729_s1 + $0x200] ss:$16 sps:$4 sm:$0xff]   ;;  %v1999_v6 = vld [vmem:[%s2729_s1 + $0x224] ss:$16 sps:$4 sm:$0xff]   ;;  %v2002_v7 = vld [vmem:[%s2729_s1 + $0x22c] ss:$16 sps:$4 sm:$0xff]  }
  0x19   :  { %v1997_v8 = vld [vmem:[%s2729_s1 + $0x220] ss:$16 sps:$4 sm:$0xff]   ;;  %v2000_v9 = vld [vmem:[%s2729_s1 + $0x228] ss:$16 sps:$4 sm:$0xff]   ;;  %v2005_v10 = vld [vmem:[%s2729_s1 + $0x244] ss:$16 sps:$4 sm:$0xff]  }
  0x1a   :  { %v2008_v11 = vld [vmem:[%s2729_s1 + $0x24c] ss:$16 sps:$4 sm:$0xff]   ;;  %v2003_v12 = vld [vmem:[%s2729_s1 + $0x240] ss:$16 sps:$4 sm:$0xff]   ;;  %v2006_v13 = vld [vmem:[%s2729_s1 + $0x248] ss:$16 sps:$4 sm:$0xff]  }
  0x1b   :  { %878 = vmatpush1.bf16.msra.mxu0 %v1932_v26  ;;  %984 = vmatpush1.bf16.msra.mxu1 %v1933_v27  ;;  %v2011_v14 = vld [vmem:[%s2729_s1 + $0x264] ss:$16 sps:$4 sm:$0xff]   ;;  %v2014_v15 = vld [vmem:[%s2729_s1 + $0x26c] ss:$16 sps:$4 sm:$0xff]   ;;  %v2009_v16 = vld [vmem:[%s2729_s1 + $0x260] ss:$16 sps:$4 sm:$0xff]  }
  0x1c   :  { %879 = vmatprep.subr.bf16.mxu0 %v1934_v28  ;;  %985 = vmatprep.subr.bf16.mxu1 %v1936_v29  ;;  %v2012_v17 = vld [vmem:[%s2729_s1 + $0x268] ss:$16 sps:$4 sm:$0xff]   ;;  %v2017_v18 = vld [vmem:[%s2729_s1 + $0x284] ss:$16 sps:$4 sm:$0xff]   ;;  %v2020_v19 = vld [vmem:[%s2729_s1 + $0x28c] ss:$16 sps:$4 sm:$0xff]  }
  0x1d   :  { %v2015_v20 = vld [vmem:[%s2729_s1 + $0x280] ss:$16 sps:$4 sm:$0xff]   ;;  %v2018_v21 = vld [vmem:[%s2729_s1 + $0x288] ss:$16 sps:$4 sm:$0xff]   ;;  %v2023_v22 = vld [vmem:[%s2729_s1 + $0x2a4] ss:$16 sps:$4 sm:$0xff]  }
  0x1e   :  { %v2026_v23 = vld [vmem:[%s2729_s1 + $0x2ac] ss:$16 sps:$4 sm:$0xff]   ;;  %v2021_v24 = vld [vmem:[%s2729_s1 + $0x2a0] ss:$16 sps:$4 sm:$0xff]   ;;  %v2075_v25 = vld [vmem:[%s2730_s0 + $0x24] ss:$16 sps:$4 sm:$0xff]  }
  0x1f   :  { %880 = vmatpush1.bf16.msra.mxu0 %v1938_v30  ;;  %986 = vmatpush1.bf16.msra.mxu1 %v1939_v31  ;;  %v2024_v26 = vld [vmem:[%s2729_s1 + $0x2a8] ss:$16 sps:$4 sm:$0xff]   ;;  %v2077_v27 = vld [vmem:[%s2730_s0 + $0x20] ss:$16 sps:$4 sm:$0xff]   ;;  %v2029_v28 = vld [vmem:[%s2729_s1 + $0x2c4] ss:$16 sps:$4 sm:$0xff]  }
  0x20   :  { %881 = vmatprep.subr.bf16.mxu0 %v1940_v32  ;;  %987 = vmatprep.subr.bf16.mxu1 %v1942_v33  ;;  %v2032_v29 = vld [vmem:[%s2729_s1 + $0x2cc] ss:$16 sps:$4 sm:$0xff]   ;;  %v2027_v30 = vld [vmem:[%s2729_s1 + $0x2c0] ss:$16 sps:$4 sm:$0xff]   ;;  %v2030_v31 = vld [vmem:[%s2729_s1 + $0x2c8] ss:$16 sps:$4 sm:$0xff]  }
  0x21   :  { %v2035_v32 = vld [vmem:[%s2729_s1 + $0x2e4] ss:$16 sps:$4 sm:$0xff]   ;;  %v2038_v33 = vld [vmem:[%s2729_s1 + $0x2ec] ss:$16 sps:$4 sm:$0xff]   ;;  %v2054_v48 = vld [vmem:[%s2729_s1 + $0x348] ss:$16 sps:$4 sm:$0xff]  }
  0x23   :  { %882 = vmatpush1.bf16.msra.mxu0 %v1944_v34  ;;  %988 = vmatpush1.bf16.msra.mxu1 %v1945_v35  ;;  %v2092_v34 = vld [vmem:[%s2730_s0 + $0xc] ss:$16 sps:$4 sm:$0xff]   ;;  %v2033_v35 = vld [vmem:[%s2729_s1 + $0x2e0] ss:$16 sps:$4 sm:$0xff]  }
  0x24   :  { %883 = vmatprep.subr.bf16.mxu0 %v1946_v36  ;;  %989 = vmatprep.subr.bf16.mxu1 %v1948_v37  ;;  %v2036_v36 = vld [vmem:[%s2729_s1 + $0x2e8] ss:$16 sps:$4 sm:$0xff]   ;;  %v2041_v37 = vld [vmem:[%s2729_s1 + $0x304] ss:$16 sps:$4 sm:$0xff]  }
  0x27   :  { %884 = vmatpush1.bf16.msra.mxu0 %v1950_v38  ;;  %990 = vmatpush1.bf16.msra.mxu1 %v1951_v39  ;;  %v2044_v38 = vld [vmem:[%s2729_s1 + $0x30c] ss:$16 sps:$4 sm:$0xff]   ;;  %v2039_v39 = vld [vmem:[%s2729_s1 + $0x300] ss:$16 sps:$4 sm:$0xff]  }
  0x28   :  { %885 = vmatprep.subr.bf16.mxu0 %v1952_v40  ;;  %991 = vmatprep.subr.bf16.mxu1 %v1954_v41  ;;  %v2042_v40 = vld [vmem:[%s2729_s1 + $0x308] ss:$16 sps:$4 sm:$0xff]   ;;  %v2047_v41 = vld [vmem:[%s2729_s1 + $0x324] ss:$16 sps:$4 sm:$0xff]  }
  0x2b   :  { %886 = vmatpush1.bf16.msra.mxu0 %v1956_v42  ;;  %992 = vmatpush1.bf16.msra.mxu1 %v1957_v43  ;;  %v2050_v42 = vld [vmem:[%s2729_s1 + $0x32c] ss:$16 sps:$4 sm:$0xff]   ;;  %v2045_v43 = vld [vmem:[%s2729_s1 + $0x320] ss:$16 sps:$4 sm:$0xff]  }
  0x2c   :  { %887 = vmatprep.subr.bf16.mxu0 %v1958_v44  ;;  %993 = vmatprep.subr.bf16.mxu1 %v1960_v45  ;;  %v2048_v44 = vld [vmem:[%s2729_s1 + $0x328] ss:$16 sps:$4 sm:$0xff]   ;;  %v2053_v45 = vld [vmem:[%s2729_s1 + $0x344] ss:$16 sps:$4 sm:$0xff]  }
  0x2f   :  { %888 = vmatpush1.bf16.msra.mxu0 %v1962_v46  ;;  %994 = vmatpush1.bf16.msra.mxu1 %v1963_v47  ;;  %v2056_v46 = vld [vmem:[%s2729_s1 + $0x34c] ss:$16 sps:$4 sm:$0xff]   ;;  %v2051_v47 = vld [vmem:[%s2729_s1 + $0x340] ss:$16 sps:$4 sm:$0xff]  }
  0x30   :  { %889 = vmatprep.subr.bf16.mxu0 %v1964_v49  ;;  %995 = vmatprep.subr.bf16.mxu1 %v1966_v50  ;;  %v2059_v49 = vld [vmem:[%s2729_s1 + $0x364] ss:$16 sps:$4 sm:$0xff]   ;;  %v2062_v50 = vld [vmem:[%s2729_s1 + $0x36c] ss:$16 sps:$4 sm:$0xff]  }
  0x33   :  { %890 = vmatpush1.bf16.msra.mxu0 %v1968_v51  ;;  %996 = vmatpush1.bf16.msra.mxu1 %v1969_v52  ;;  %v2057_v51 = vld [vmem:[%s2729_s1 + $0x360] ss:$16 sps:$4 sm:$0xff]   ;;  %v2060_v52 = vld [vmem:[%s2729_s1 + $0x368] ss:$16 sps:$4 sm:$0xff]  }
  0x34   :  { %891 = vmatprep.subr.bf16.mxu0 %v1970_v53  ;;  %997 = vmatprep.subr.bf16.mxu1 %v1972_v54  ;;  %v2065_v53 = vld [vmem:[%s2729_s1 + $0x384] ss:$16 sps:$4 sm:$0xff]   ;;  %v2068_v54 = vld [vmem:[%s2729_s1 + $0x38c] ss:$16 sps:$4 sm:$0xff]  }
  0x37   :  { %892 = vmatpush1.bf16.msra.mxu0 %v1974_v55  ;;  %998 = vmatpush1.bf16.msra.mxu1 %v1975_v56  ;;  %v2063_v55 = vld [vmem:[%s2729_s1 + $0x380] ss:$16 sps:$4 sm:$0xff]   ;;  %v2066_v56 = vld [vmem:[%s2729_s1 + $0x388] ss:$16 sps:$4 sm:$0xff]  }
  0x38   :  { %893 = vmatprep.subr.bf16.mxu0 %v1976_v57  ;;  %999 = vmatprep.subr.bf16.mxu1 %v1978_v58  ;;  %v2071_v57 = vld [vmem:[%s2729_s1 + $0x3a4] ss:$16 sps:$4 sm:$0xff]   ;;  %v2074_v58 = vld [vmem:[%s2729_s1 + $0x3ac] ss:$16 sps:$4 sm:$0xff]  }
  0x3b   :  { %894 = vmatpush1.bf16.msra.mxu0 %v1980_v59  ;;  %1000 = vmatpush1.bf16.msra.mxu1 %v1981_v60  ;;  %v2069_v59 = vld [vmem:[%s2729_s1 + $0x3a0] ss:$16 sps:$4 sm:$0xff]   ;;  %v2072_v60 = vld [vmem:[%s2729_s1 + $0x3a8] ss:$16 sps:$4 sm:$0xff]  }
  0x3c   :  { %895 = vmatprep.subr.bf16.mxu0 %v1982_v61  ;;  %1001 = vmatprep.subr.bf16.mxu1 %v1984_v62  ;;  %v2080_v61 = vld [vmem:[%s2729_s1 + $0x3c4] ss:$16 sps:$4 sm:$0xff]   ;;  %v2083_v62 = vld [vmem:[%s2729_s1 + $0x3cc] ss:$16 sps:$4 sm:$0xff]  }
  0x3f   :  { %896 = vmatpush1.bf16.msra.mxu0 %v1986_v63  ;;  %1002 = vmatpush1.bf16.msra.mxu1 %v1987_v0  ;;  %v2078_v63 = vld [vmem:[%s2729_s1 + $0x3c0] ss:$16 sps:$4 sm:$0xff]   ;;  %v2081_v0 = vld [vmem:[%s2729_s1 + $0x3c8] ss:$16 sps:$4 sm:$0xff]  }
  0x40   :  { %918 = vmatprep.subr.bf16.mxu0 %v1993_v1  ;;  %1024 = vmatprep.subr.bf16.mxu1 %v1996_v2  ;;  %v2086_v1 = vld [vmem:[%s2729_s1 + $0x3e4] ss:$16 sps:$4 sm:$0xff]   ;;  %v2089_v2 = vld [vmem:[%s2729_s1 + $0x3ec] ss:$16 sps:$4 sm:$0xff]  }
  0x42   :  { %898 = vmatmul.mubr.bf16.vlgmr.msra.gmra.mrb[0].mxu0 %v1988_v3  ;;  %1004 = vmatmul.mubr.bf16.vlgmr.msra.gmra.mrb[0].mxu1 %v1988_v3  ;;  %v2084_v3 = vld [vmem:[%s2729_s1 + $0x3e0] ss:$16 sps:$4 sm:$0xff]  }
  0x43   :  { %919 = vmatpush1.bf16.msra.mxu0 %v1991_v4  ;;  %1025 = vmatpush1.bf16.msra.mxu1 %v1994_v5  ;;  %v2087_v4 = vld [vmem:[%s2729_s1 + $0x3e8] ss:$16 sps:$4 sm:$0xff]   ;;  %v2096_v5 = vld [vmem:[%s2731_s3 + $0x40] sm:$0xff]  }
  0x44   :  { %920 = vmatprep.subr.bf16.mxu0 %v1999_v6  ;;  %1026 = vmatprep.subr.bf16.mxu1 %v2002_v7  ;;  %v2097_v6 = vld [vmem:[%s2731_s3 + $0xc0] sm:$0xff]   ;;  %v2090_v7 = vld [vmem:[%s2730_s0 + $0x8] ss:$16 sps:$4 sm:$0xff]  }
  0x45   :  { %907 = vmatprep.mubr.bf16.mxu0 %v2075_v25  ;;  %1013 = vmatprep.mubr.bf16.mxu1 %v2075_v25  ;;  %v2113_v25 = vld [vmem:[%s2731_s3 + $0xe0] sm:$0xff]  }
  0x47   :  { %921 = vmatpush1.bf16.msra.mxu0 %v1997_v8  ;;  %1027 = vmatpush1.bf16.msra.mxu1 %v2000_v9  ;;  %v2093_v8 = vld [vmem:[%s2730_s0 + $0x2c] ss:$16 sps:$4 sm:$0xff]   ;;  %v2098_v9 = vld [vmem:[%s2731_s3] sm:$0xff]  }
  0x48   :  { %922 = vmatprep.subr.bf16.mxu0 %v2005_v10  ;;  %1028 = vmatprep.subr.bf16.mxu1 %v2008_v11  ;;  %v2099_v10 = vld [vmem:[%s2731_s3 + $0x80] sm:$0xff]   ;;  %v2100_v11 = vld [vmem:[%s2731_s3 + $0x48] sm:$0xff]  }
  0x4a   :  { %908 = vmatmul.mubr.bf16.gmra.mrb[4].mxu0 %v2077_v27  ;;  %1014 = vmatmul.mubr.bf16.gmra.mrb[4].mxu1 %v2077_v27  ;;  %v2115_v27 = vld [vmem:[%s2731_s3 + $0xa0] sm:$0xff]  }
  0x4b   :  { %923 = vmatpush1.bf16.msra.mxu0 %v2003_v12  ;;  %1029 = vmatpush1.bf16.msra.mxu1 %v2006_v13  ;;  %v2101_v12 = vld [vmem:[%s2731_s3 + $0xc8] sm:$0xff]  }
  0x4c   :  { %924 = vmatprep.subr.bf16.mxu0 %v2011_v14  ;;  %1030 = vmatprep.subr.bf16.mxu1 %v2014_v15  ;;  %v2102_v13 = vld [vmem:[%s2731_s3 + $0x8] sm:$0xff]   ;;  %v2104_v15 = vld [vmem:[%s2731_s3 + $0x50] sm:$0xff]  }
  0x4d   :  { %950 = vmatprep.mubr.bf16.mxu0 %v2092_v34  ;;  %1056 = vmatprep.mubr.bf16.mxu1 %v2092_v34  ;;  %v2103_v14 = vld [vmem:[%s2731_s3 + $0x88] sm:$0xff]   ;;  %v2122_v34 = vld [vmem:[%s2731_s3 + $0x30] sm:$0xff]  }
  0x4f   :  { %925 = vmatpush1.bf16.msra.mxu0 %v2009_v16  ;;  %1031 = vmatpush1.bf16.msra.mxu1 %v2012_v17  ;;  %v2105_v16 = vld [vmem:[%s2731_s3 + $0xd0] sm:$0xff]   ;;  %v2095_v17 = vld [vmem:[%s2730_s0 + $0x28] ss:$16 sps:$4 sm:$0xff]  }
  0x50   :  { %926 = vmatprep.subr.bf16.mxu0 %v2017_v18  ;;  %1032 = vmatprep.subr.bf16.mxu1 %v2020_v19  ;;  %v2106_v18 = vld [vmem:[%s2731_s3 + $0x10] sm:$0xff]  }
  0x51   :  { %v2107_v19 = vld [vmem:[%s2731_s3 + $0x90] sm:$0xff]  }
  0x53   :  { %927 = vmatpush1.bf16.msra.mxu0 %v2015_v20  ;;  %1033 = vmatpush1.bf16.msra.mxu1 %v2018_v21  ;;  %v2108_v20 = vld [vmem:[%s2731_s3 + $0x58] sm:$0xff]  }
  0x54   :  { %928 = vmatprep.subr.bf16.mxu0 %v2023_v22  ;;  %1034 = vmatprep.subr.bf16.mxu1 %v2026_v23  ;;  %v2109_v21 = vld [vmem:[%s2731_s3 + $0xd8] sm:$0xff]  }
  0x55   :  { %v2110_v22 = vld [vmem:[%s2731_s3 + $0x18] sm:$0xff]  }
  0x56   :  { %v2111_v23 = vld [vmem:[%s2731_s3 + $0x98] sm:$0xff]  }
  0x57   :  { %929 = vmatpush1.bf16.msra.mxu0 %v2021_v24  ;;  %1035 = vmatpush1.bf16.msra.mxu1 %v2024_v26  ;;  %v2112_v24 = vld [vmem:[%s2731_s3 + $0x60] sm:$0xff]  }
  0x58   :  { %930 = vmatprep.subr.bf16.mxu0 %v2029_v28  ;;  %1036 = vmatprep.subr.bf16.mxu1 %v2032_v29  ;;  %v2114_v26 = vld [vmem:[%s2731_s3 + $0x20] sm:$0xff]   ;;  %v2116_v28 = vld [vmem:[%s2731_s3 + $0x68] sm:$0xff]  }
  0x59   :  { %v2117_v29 = vld [vmem:[%s2731_s3 + $0xe8] sm:$0xff]  }
  0x5b   :  { %931 = vmatpush1.bf16.msra.mxu0 %v2027_v30  ;;  %1037 = vmatpush1.bf16.msra.mxu1 %v2030_v31  ;;  %v2118_v30 = vld [vmem:[%s2731_s3 + $0x28] sm:$0xff]  }
  0x5c   :  { %932 = vmatprep.subr.bf16.mxu0 %v2035_v32  ;;  %1038 = vmatprep.subr.bf16.mxu1 %v2038_v33  ;;  %v2119_v31 = vld [vmem:[%s2731_s3 + $0xa8] sm:$0xff]   ;;  %v2120_v32 = vld [vmem:[%s2731_s3 + $0x70] sm:$0xff]  }
  0x5d   :  { %v2121_v33 = vld [vmem:[%s2731_s3 + $0xf0] sm:$0xff]  }
  0x5f   :  { %933 = vmatpush1.bf16.msra.mxu0 %v2033_v35  ;;  %1039 = vmatpush1.bf16.msra.mxu1 %v2036_v36  ;;  %v2123_v35 = vld [vmem:[%s2731_s3 + $0xb0] sm:$0xff]   ;;  %v2124_v36 = vld [vmem:[%s2731_s3 + $0x78] sm:$0xff]  }
  0x60   :  { %934 = vmatprep.subr.bf16.mxu0 %v2041_v37  ;;  %1040 = vmatprep.subr.bf16.mxu1 %v2044_v38  ;;  %v2125_v37 = vld [vmem:[%s2731_s3 + $0xf8] sm:$0xff]  }
  0x61   :  { %v2126_v38 = vld [vmem:[%s2731_s3 + $0x38] sm:$0xff]  }
  0x63   :  { %935 = vmatpush1.bf16.msra.mxu0 %v2039_v39  ;;  %1041 = vmatpush1.bf16.msra.mxu1 %v2042_v40  ;;  %v2127_v39 = vld [vmem:[%s2731_s3 + $0xb8] sm:$0xff]   ;;  %v2683_v40 = vld [vmem:[%s2732_s5] sm:$0xff]  }
  0x64   :  { %936 = vmatprep.subr.bf16.mxu0 %v2047_v41  ;;  %1042 = vmatprep.subr.bf16.mxu1 %v2050_v42  ;;  %v165_v41 = vlaneseq }
  0x66   :  { %v166_v42 = vshrl.u32 %v165_v41, 7 }
  0x67   :  { %937 = vmatpush1.bf16.msra.mxu0 %v2045_v43  ;;  %1043 = vmatpush1.bf16.msra.mxu1 %v2048_v44 }
  0x68   :  { %938 = vmatprep.subr.bf16.mxu0 %v2053_v45  ;;  %1044 = vmatprep.subr.bf16.mxu1 %v2056_v46  ;;  %v167_v43 = vsub.s32 0, %v166_v42  ;;  %v175_v44 = vsub.s32 2, %v166_v42  ;;  %v163_v45 = vld [vmem:[%s2733_s2] sm:$0xf]  ;;  %v171_v46 = vsub.s32 1, %v166_v42 }
  0x6b   :  { %939 = vmatpush1.bf16.msra.mxu0 %v2051_v47  ;;  %1045 = vmatpush1.bf16.msra.mxu1 %v2054_v48  ;;  %v179_v47 = vsub.s32 3, %v166_v42  ;;  %v168_v48 = vrot.slane %v163_v45, %v167_v43 }
  0x6c   :  { %940 = vmatprep.subr.bf16.mxu0 %v2059_v49  ;;  %1046 = vmatprep.subr.bf16.mxu1 %v2062_v50  ;;  %v176_v49 = vrot.slane %v163_v45, %v175_v44  ;;  %v172_v50 = vrot.slane %v163_v45, %v171_v46 }
  0x6f   :  { %941 = vmatpush1.bf16.msra.mxu0 %v2057_v51  ;;  %1047 = vmatpush1.bf16.msra.mxu1 %v2060_v52  ;;  %v180_v51 = vrot.slane %v163_v45, %v179_v47  ;;  %v2132_v47 = vld [vmem:[%s2732_s5 + $0x20] sm:$0xff]  }
  0x70   :  { %942 = vmatprep.subr.bf16.mxu0 %v2065_v53  ;;  %1048 = vmatprep.subr.bf16.mxu1 %v2068_v54 }
  0x73   :  { %943 = vmatpush1.bf16.msra.mxu0 %v2063_v55  ;;  %1049 = vmatpush1.bf16.msra.mxu1 %v2066_v56 }
  0x74   :  { %944 = vmatprep.subr.bf16.mxu0 %v2071_v57  ;;  %1050 = vmatprep.subr.bf16.mxu1 %v2074_v58 }
  0x77   :  { %945 = vmatpush1.bf16.msra.mxu0 %v2069_v59  ;;  %1051 = vmatpush1.bf16.msra.mxu1 %v2072_v60 }
  0x78   :  { %946 = vmatprep.subr.bf16.mxu0 %v2080_v61  ;;  %1052 = vmatprep.subr.bf16.mxu1 %v2083_v62 }
  0x7b   :  { %947 = vmatpush1.bf16.msra.mxu0 %v2078_v63  ;;  %1053 = vmatpush1.bf16.msra.mxu1 %v2081_v0 }
  0x7c   :  { %948 = vmatprep.subr.bf16.mxu0 %v2086_v1  ;;  %1054 = vmatprep.subr.bf16.mxu1 %v2089_v2 }
  0x7f   :  { %949 = vmatpush1.bf16.msra.mxu0 %v2084_v3  ;;  %1055 = vmatpush1.bf16.msra.mxu1 %v2087_v4 }
  0x80   :  { %1774 = vmatprep.subr.bf16.mxu0 %v2096_v5  ;;  %1802 = vmatprep.subr.bf16.mxu1 %v2097_v6 }
  0x82   :  { %951 = vmatmul.mubr.bf16.vlgmr.msra.gmra.mrb[0].mxu0 %v2090_v7  ;;  %1057 = vmatmul.mubr.bf16.vlgmr.msra.gmra.mrb[0].mxu1 %v2090_v7 }
  0x83   :  { %960 = vmatprep.mubr.bf16.mxu0 %v2093_v8  ;;  %1066 = vmatprep.mubr.bf16.mxu1 %v2093_v8 }
  0x84   :  { %1775 = vmatpush3.bf16.msra.mxu0 %v2098_v9  ;;  %1803 = vmatpush3.bf16.msra.mxu1 %v2099_v10 }
  0x85   :  { %1776 = vmatprep.subr.bf16.mxu0 %v2100_v11  ;;  %1804 = vmatprep.subr.bf16.mxu1 %v2101_v12 }
  0x88   :  { %1777 = vmatpush3.bf16.msra.mxu0 %v2102_v13  ;;  %1805 = vmatpush3.bf16.msra.mxu1 %v2103_v14 }
  0x89   :  { %1778 = vmatprep.subr.bf16.mxu0 %v2104_v15  ;;  %1806 = vmatprep.subr.bf16.mxu1 %v2105_v16 }
  0x8a   :  { %961 = vmatmul.mubr.bf16.gmra.mrb[4].mxu0 %v2095_v17  ;;  %1067 = vmatmul.mubr.bf16.gmra.mrb[4].mxu1 %v2095_v17 }
  0x8c   :  { %1779 = vmatpush3.bf16.msra.mxu0 %v2106_v18  ;;  %1807 = vmatpush3.bf16.msra.mxu1 %v2107_v19 }
  0x8d   :  { %1780 = vmatprep.subr.bf16.mxu0 %v2108_v20  ;;  %1808 = vmatprep.subr.bf16.mxu1 %v2109_v21 }
  0x90   :  { %1781 = vmatpush3.bf16.msra.mxu0 %v2110_v22  ;;  %1809 = vmatpush3.bf16.msra.mxu1 %v2111_v23  ;;  %v2129_v22 = vld [vmem:[%s2732_s5 + $0x8] sm:$0xff]  }
  0x91   :  { %1782 = vmatprep.subr.bf16.mxu0 %v2112_v24  ;;  %1810 = vmatprep.subr.bf16.mxu1 %v2113_v25 }
  0x94   :  { %1783 = vmatpush3.bf16.msra.mxu0 %v2114_v26  ;;  %1811 = vmatpush3.bf16.msra.mxu1 %v2115_v27 }
  0x95   :  { %1784 = vmatprep.subr.bf16.mxu0 %v2116_v28  ;;  %1812 = vmatprep.subr.bf16.mxu1 %v2117_v29 }
  0x98   :  { %1785 = vmatpush3.bf16.msra.mxu0 %v2118_v30  ;;  %1813 = vmatpush3.bf16.msra.mxu1 %v2119_v31 }
  0x99   :  { %1786 = vmatprep.subr.bf16.mxu0 %v2120_v32  ;;  %1814 = vmatprep.subr.bf16.mxu1 %v2121_v33 }
  0x9c   :  { %1787 = vmatpush3.bf16.msra.mxu0 %v2122_v34  ;;  %1815 = vmatpush3.bf16.msra.mxu1 %v2123_v35 }
  0x9d   :  { %1788 = vmatprep.subr.bf16.mxu0 %v2124_v36  ;;  %1816 = vmatprep.subr.bf16.mxu1 %v2125_v37  ;;  %v2130_v37 = vld [vmem:[%s2732_s5 + $0x10] sm:$0xff]  }
  0xa0   :  { %1789 = vmatpush3.bf16.msra.mxu0 %v2126_v38  ;;  %1817 = vmatpush3.bf16.msra.mxu1 %v2127_v39 }
  0xa1   :  { %1840 = vmatprep.subr.bf16.mxu0 %v2683_v40 }
 0x155   :  { %v952_v52 = vpop.f32.mrb[0].mxu0  ;;  %v1058_v53 = vpop.f32.mrb[0].mxu1 }
 0x156   :  { %v1860_v54 = vadd.f32 %v952_v52, %v168_v48  ;;  %v1868_v55 = vadd.f32 %v1058_v53, %v176_v49  ;;  %v954_v56 = vpop.f32.mrb[1].mxu0  ;;  %v1060_v57 = vpop.f32.mrb[1].mxu1  ;;  %v1732_v53 = vld [vmem:[%s2734_s4] ss:$0 sm:$0xff] }
 0x157   :  { %v1861_v58 = vadd.f32 %v954_v56, %v172_v50  ;;  %v1869_v59 = vadd.f32 %v1060_v57, %v180_v51  ;;  %v956_v60 = vpop.f32.mrb[2].mxu0  ;;  %v1062_v61 = vpop.f32.mrb[2].mxu1 }
 0x158   :  { %v1862_v62 = vadd.f32 %v956_v60, %v168_v48  ;;  %v1870_v63 = vadd.f32 %v1062_v61, %v176_v49  ;;  %v958_v0 = vpop.f32.mrb[3].mxu0  ;;  %v1064_v1 = vpop.f32.mrb[3].mxu1  ;;  %v1077_v4 = vmax.f32 %v1860_v54, 0.0  ;;  %v1079_v5 = vmax.f32 %v1868_v55, 0.0 }
 0x159   :  { %v1863_v2 = vadd.f32 %v958_v0, %v172_v50  ;;  %v1871_v3 = vadd.f32 %v1064_v1, %v180_v51  ;;  %v1078_v8 = vmax.f32 %v1861_v58, 0.0  ;;  %v1080_v9 = vmax.f32 %v1869_v59, 0.0 }
 0x15a   :  { %v1081_v6 = vmax.f32 %v1862_v62, 0.0  ;;  %v1083_v7 = vmax.f32 %v1870_v63, 0.0 }
 0x15b   :  { %v1082_v10 = vmax.f32 %v1863_v2, 0.0  ;;  %v1084_v11 = vmax.f32 %v1871_v3, 0.0 }
 0x15c   :  { %v1093_v12 = vpack.c.bf16 %v1081_v6, %v1077_v4  ;;  %v1095_v13 = vpack.c.bf16 %v1083_v7, %v1079_v5 }
 0x15d   :  { %v1094_v14 = vpack.c.bf16 %v1082_v10, %v1078_v8  ;;  %v1096_v15 = vpack.c.bf16 %v1084_v11, %v1080_v9  ;;  %v962_v16 = vpop.f32.mrb[4].mxu0  ;;  %v1068_v17 = vpop.f32.mrb[4].mxu1 }
 0x15e   :  { %v1864_v18 = vadd.f32 %v962_v16, %v168_v48  ;;  %v1872_v19 = vadd.f32 %v1068_v17, %v176_v49  ;;  %v964_v20 = vpop.f32.mrb[5].mxu0  ;;  %v1070_v21 = vpop.f32.mrb[5].mxu1 }
 0x15f   :  { %v1865_v23 = vadd.f32 %v964_v20, %v172_v50  ;;  %v1873_v24 = vadd.f32 %v1070_v21, %v180_v51  ;;  %v966_v25 = vpop.f32.mrb[6].mxu0  ;;  %v1072_v26 = vpop.f32.mrb[6].mxu1  ;;  %1396 = vmatprep.mubr.bf16.mxu0 %v1094_v14  ;;  %1445 = vmatprep.mubr.bf16.mxu1 %v1096_v15 }
 0x160   :  { %v1866_v27 = vadd.f32 %v966_v25, %v168_v48  ;;  %v1874_v28 = vadd.f32 %v1072_v26, %v176_v49  ;;  %v968_v29 = vpop.f32.mrb[7].mxu0  ;;  %v1074_v30 = vpop.f32.mrb[7].mxu1  ;;  %1397 = vmatmul.mubr.bf16.vlgmr.msra.gmra.mrb[8].mxu0 %v1093_v12  ;;  %1446 = vmatmul.mubr.bf16.vlgmr.msra.gmra.mrb[8].mxu1 %v1095_v13  ;;  %v1085_v33 = vmax.f32 %v1864_v18, 0.0  ;;  %v1087_v34 = vmax.f32 %v1872_v19, 0.0  ;;  %v2133_v48 = vld [vmem:[%s2732_s5 + $0x28] sm:$0xff]   ;;  %v2134_v49 = vld [vmem:[%s2732_s5 + $0x30] sm:$0xff]  }
 0x161   :  { %v1867_v31 = vadd.f32 %v968_v29, %v172_v50  ;;  %v1875_v32 = vadd.f32 %v1074_v30, %v180_v51  ;;  %1841 = vmatpush3.bf16.msra.mxu0 %v2683_v40  ;;  %v1086_v38 = vmax.f32 %v1865_v23, 0.0  ;;  %v1088_v39 = vmax.f32 %v1873_v24, 0.0  ;;  %v2131_v40 = vld [vmem:[%s2732_s5 + $0x18] sm:$0xff]   ;;  %v1765_v26 = vld [vmem:[%s2735_s6] ss:$0 sm:$0xff] }
 0x162   :  { %v1089_v35 = vmax.f32 %v1866_v27, 0.0  ;;  %v1091_v36 = vmax.f32 %v1874_v28, 0.0  ;;  %1842 = vmatprep.subr.bf16.mxu0 %v2129_v22  ;;  %v2135_v50 = vld [vmem:[%s2732_s5 + $0x38] sm:$0xff]  }
 0x163   :  { %v1090_v41 = vmax.f32 %v1867_v31, 0.0  ;;  %v1092_v42 = vmax.f32 %v1875_v32, 0.0 }
 0x164   :  { %v1097_v43 = vpack.c.bf16 %v1089_v35, %v1085_v33  ;;  %v1099_v44 = vpack.c.bf16 %v1091_v36, %v1087_v34 }
 0x165   :  { %v1098_v45 = vpack.c.bf16 %v1090_v41, %v1086_v38  ;;  %v1100_v46 = vpack.c.bf16 %v1092_v42, %v1088_v39  ;;  %1843 = vmatpush3.bf16.msra.mxu0 %v2129_v22 }
 0x166   :  { %1844 = vmatprep.subr.bf16.mxu0 %v2130_v37 }
 0x167   :  { %1404 = vmatprep.mubr.bf16.mxu0 %v1098_v45  ;;  %1453 = vmatprep.mubr.bf16.mxu1 %v1100_v46 }
 0x168   :  { %1405 = vmatmul.mubr.bf16.gmra.mrb[12].mxu0 %v1097_v43  ;;  %1454 = vmatmul.mubr.bf16.gmra.mrb[12].mxu1 %v1099_v44 }
 0x169   :  { %1845 = vmatpush3.bf16.msra.mxu0 %v2130_v37 }
 0x16a   :  { %1846 = vmatprep.subr.bf16.mxu0 %v2131_v40 }
 0x16d   :  { %1847 = vmatpush3.bf16.msra.mxu0 %v2131_v40 }
 0x16e   :  { %1848 = vmatprep.subr.bf16.mxu0 %v2132_v47 }
 0x171   :  { %1849 = vmatpush3.bf16.msra.mxu0 %v2132_v47 }
 0x172   :  { %1850 = vmatprep.subr.bf16.mxu0 %v2133_v48 }
 0x175   :  { %1851 = vmatpush3.bf16.msra.mxu0 %v2133_v48 }
 0x176   :  { %1852 = vmatprep.subr.bf16.mxu0 %v2134_v49 }
 0x179   :  { %1853 = vmatpush3.bf16.msra.mxu0 %v2134_v49 }
 0x17a   :  { %1854 = vmatprep.subr.bf16.mxu0 %v2135_v50 }
 0x17d   :  { %1855 = vmatpush3.bf16.msra.mxu0 %v2135_v50 }
 0x233   :  { %v1790_v51 = vpop.f32.mrb[8].mxu0  ;;  %v1818_v52 = vpop.f32.mrb[8].mxu1 }
 0x234   :  { %v1791_v54 = vpop.f32.mrb[9].mxu0  ;;  %v1819_v55 = vpop.f32.mrb[9].mxu1 }
 0x235   :  { %v1792_v56 = vadd.f32 %v1791_v54, %v1790_v51  ;;  %v1820_v57 = vadd.f32 %v1819_v55, %v1818_v52  ;;  %v1793_v58 = vpop.f32.mrb[10].mxu0  ;;  %v1821_v59 = vpop.f32.mrb[10].mxu1 }
 0x236   :  { %v1794_v60 = vpop.f32.mrb[11].mxu0  ;;  %v1822_v61 = vpop.f32.mrb[11].mxu1 }
 0x237   :  { %v1399_v62 = vadd.f32 %v1792_v56, %v1732_v53  ;;  %v1795_v63 = vadd.f32 %v1794_v60, %v1793_v58  ;;  %v1823_v0 = vadd.f32 %v1822_v61, %v1821_v59 }
 0x239   :  { %v1448_v1 = vadd.f32 %v1820_v57, %v1399_v62  ;;  %v1402_v2 = vadd.f32 %v1795_v63, %v1732_v53 }
 0x23b   :  { %v1451_v3 = vadd.f32 %v1823_v0, %v1402_v2  ;;  %v1796_v4 = vpop.f32.mrb[12].mxu0  ;;  %v1824_v5 = vpop.f32.mrb[12].mxu1  ;;  %v1462_v8 = vmax.f32 %v1448_v1, 0.0 }
 0x23c   :  { %v1797_v6 = vpop.f32.mrb[13].mxu0  ;;  %v1825_v7 = vpop.f32.mrb[13].mxu1 }
 0x23d   :  { %v1463_v9 = vmax.f32 %v1451_v3, 0.0  ;;  %v1798_v10 = vadd.f32 %v1797_v6, %v1796_v4  ;;  %v1826_v11 = vadd.f32 %v1825_v7, %v1824_v5  ;;  %v1799_v12 = vpop.f32.mrb[14].mxu0  ;;  %v1827_v13 = vpop.f32.mrb[14].mxu1 }
 0x23e   :  { %v1800_v14 = vpop.f32.mrb[15].mxu0  ;;  %v1828_v15 = vpop.f32.mrb[15].mxu1 }
 0x23f   :  { %v1407_v16 = vadd.f32 %v1798_v10, %v1732_v53  ;;  %v1801_v17 = vadd.f32 %v1800_v14, %v1799_v12  ;;  %v1829_v18 = vadd.f32 %v1828_v15, %v1827_v13  ;;  %v1466_v19 = vpack.c.bf16 %v1463_v9, %v1462_v8 }
 0x241   :  { %v1456_v20 = vadd.f32 %v1826_v11, %v1407_v16  ;;  %v1410_v21 = vadd.f32 %v1801_v17, %v1732_v53  ;;  %1856 = vmatprep.mubr.bf16.mxu0 %v1466_v19 }
 0x243   :  { %v1459_v22 = vadd.f32 %v1829_v18, %v1410_v21  ;;  %v1464_v23 = vmax.f32 %v1456_v20, 0.0 }
 0x245   :  { %v1465_v24 = vmax.f32 %v1459_v22, 0.0 }
 0x247   :  { %v1467_v25 = vpack.c.bf16 %v1465_v24, %v1464_v23 }
 0x249   :  { %1857 = vmatmul.mubr.bf16.vlgmr.msra.gmra.mrb[16].mxu0 %v1467_v25 }
 0x31c   :  { %v1858_v27 = vpop.f32.mrb[16].mxu0 }
 0x31d   :  { %v1582_v28 = vadd.f32 %v1858_v27, %v1765_v26  ;;  %v1573_v29 = vpop.f32.mrb[17].mxu0 }
 0x31e   :  { %v1574_v30 = vadd.f32 %v1765_v26, %v1573_v29  ;;  %v1859_v31 = vpop.f32.mrb[18].mxu0 }
 0x31f   :  { %1590 = vst [vmem:[%s2736_s7 + $0x10] sm:$0xff] %v1582_v28  ;;  %v1585_v32 = vadd.f32 %v1859_v31, %v1765_v26  ;;  %v1576_v33 = vpop.f32.mrb[19].mxu0 }
 0x320   :  { %1588 = vst [vmem:[%s2736_s7] sm:$0xff] %v1574_v30  ;;  %v1577_v34 = vadd.f32 %v1765_v26, %v1576_v33 }
 0x321   :  { %1591 = vst [vmem:[%s2736_s7 + $0x18] sm:$0xff] %v1585_v32 }
 0x322   :  { %1589 = vst [vmem:[%s2736_s7 + $0x8] sm:$0xff] %v1577_v34 }

</bundles_post_ra>
